<compile_context>
chip_gen: v7x
topology: tpu7x:2x2x1
jax: 0.10.0
libtpu: 0.0.40
codegen_flags: <defaults>
</compile_context>

<pallas_src>
import math

import jax
import jax.numpy as jnp
from jax.experimental import pallas as pl
from jax.experimental.pallas import tpu as pltpu


# ---------------------------------------------------------------------------
# In-kernel building blocks.
# Batched activations: Python lists of per-feature-channel arrays [n, tb]
#   (n = set elements on sublanes, tb = batch tile on lanes).
# Weights / biases: nested Python lists of SMEM-resident scalars.
# ---------------------------------------------------------------------------

def _linear_ch(x_ch, W, b):
    """list[din] of [n, tb] -> list[dout] of [n, tb]; unrolled VPU FMAs."""
    din, dout = len(W), len(W[0])
    out = []
    for o in range(dout):
        acc = x_ch[0] * W[0][o]
        for i in range(1, din):
            acc = acc + x_ch[i] * W[i][o]
        out.append(acc + b[o])
    return out


def _proj_rows(rows, W, b):
    """Batch-invariant rows (I / S) @ W + b, pure scalar-unit math.

    rows: [nq][din] scalars -> [nq][dout] scalars."""
    din, dout = len(W), len(W[0])
    out = []
    for q in range(len(rows)):
        r = []
        for o in range(dout):
            acc = rows[q][0] * W[0][o]
            for i in range(1, din):
                acc = acc + rows[q][i] * W[i][o]
            r.append(acc + b[o])
        out.append(r)
    return out


def _mab_hoisted_q(qp, k_in, mab_w, num_heads, dim_v, scale):
    """MAB whose query set is batch-invariant (already projected to scalars).

    qp:   [nq][dim_v] scalars (hoisted Q0 @ Wq + bq)
    k_in: list[dk] of [nk, tb] arrays
    Returns list[dim_v] of [nq, tb] arrays.
    """
    _, _, Wk, bk, Wv, bv, Wo, bo = mab_w
    nq = len(qp)
    dh = dim_v // num_heads
    k_ch = _linear_ch(k_in, Wk, bk)          # dim_v x [nk, tb]
    v_ch = _linear_ch(k_in, Wv, bv)          # dim_v x [nk, tb]

    o_rows = [[None] * dim_v for _ in range(nq)]
    for q in range(nq):
        for h in range(num_heads):
            base = h * dh
            # scores over k live on the sublane axis: [nk, tb]
            s = k_ch[base] * (qp[q][base] * scale)
            for d in range(1, dh):
                s = s + k_ch[base + d] * (qp[q][base + d] * scale)
            m = jnp.max(s, axis=0, keepdims=True)           # [1, tb]
            e = jnp.exp(s - m)
            l = jnp.sum(e, axis=0, keepdims=True)           # [1, tb]
            a = e * pl.reciprocal(l, approx=True)           # [nk, tb]
            for d in range(dh):
                av = jnp.sum(a * v_ch[base + d], axis=0, keepdims=True)
                o_rows[q][base + d] = av + qp[q][base + d]  # residual on Q head
    if nq == 1:
        O = [o_rows[0][v] for v in range(dim_v)]
    else:
        O = [jnp.concatenate([o_rows[q][v] for q in range(nq)], axis=0)
             for v in range(dim_v)]                          # [nq, tb] each
    f = _linear_ch(O, Wo, bo)
    return [O[v] + jnp.maximum(f[v], 0.0) for v in range(dim_v)]


def _mab_batched_q(q_in, k_in, mab_w, num_heads, dim_v, scale):
    """MAB with a batch-dependent query set.

    q_in: list[dq] of [nq, tb]; k_in: list[dk] of [nk, tb].
    Scores are laid out [nk, nq, tb] so softmax reduces over the leading axis
    (pure VPU).  Returns list[dim_v] of [nq, tb].
    """
    Wq, bq, Wk, bk, Wv, bv, Wo, bo = mab_w
    q_ch = _linear_ch(q_in, Wq, bq)
    k_ch = _linear_ch(k_in, Wk, bk)
    v_ch = _linear_ch(k_in, Wv, bv)
    dh = dim_v // num_heads

    O = [None] * dim_v
    for h in range(num_heads):
        base = h * dh
        s3 = k_ch[base][:, None, :] * q_ch[base][None, :, :]       # [nk, nq, tb]
        for d in range(1, dh):
            s3 = s3 + k_ch[base + d][:, None, :] * q_ch[base + d][None, :, :]
        s3 = s3 * scale
        m = jnp.max(s3, axis=0, keepdims=True)                     # [1, nq, tb]
        e = jnp.exp(s3 - m)
        l = jnp.sum(e, axis=0, keepdims=True)
        a = e * pl.reciprocal(l, approx=True)                      # [nk, nq, tb]
        for d in range(dh):
            av = jnp.sum(a * v_ch[base + d][:, None, :], axis=0)   # [nq, tb]
            O[base + d] = q_ch[base + d] + av
    f = _linear_ch(O, Wo, bo)
    return [O[v] + jnp.maximum(f[v], 0.0) for v in range(dim_v)]


def _isab_ch(x_ch, I_rows, m0, m1, num_heads, dim_v, scale):
    """ISAB: H = MAB(I, X); return MAB(X, H).  I projection is hoisted."""
    qI = _proj_rows(I_rows, m0[0], m0[1])                 # batch-invariant
    H = _mab_hoisted_q(qI, x_ch, m0, num_heads, dim_v, scale)
    return _mab_batched_q(x_ch, H, m1, num_heads, dim_v, scale)


# ---------------------------------------------------------------------------
# Kernel builder
# ---------------------------------------------------------------------------

def _make_kernel(meta, d_in, num_heads, dim_hidden, num_seeds, dim_output):
    scale = 1.0 / math.sqrt(dim_hidden)   # original ST scales by sqrt(dim_V)

    def kernel(x_ref, theta_ref, out_ref):
        # ---- read all (tiny) weights from SMEM as nested scalar lists ------
        def read(m):
            off, shape = m
            if len(shape) == 1:
                return [theta_ref[off + i] for i in range(shape[0])]
            r, c = shape
            return [[theta_ref[off + i * c + j] for j in range(c)]
                    for i in range(r)]

        vals = iter([read(m) for m in meta])
        nxt = lambda: next(vals)
        I1 = nxt()
        m10 = tuple(nxt() for _ in range(8))
        m11 = tuple(nxt() for _ in range(8))
        I2 = nxt()
        m20 = tuple(nxt() for _ in range(8))
        m21 = tuple(nxt() for _ in range(8))
        S = nxt()
        mp = tuple(nxt() for _ in range(8))
        Wd = nxt()
        bd = nxt()

        # ---- activations: batch tile on the lane axis ----------------------
        x = x_ref[...].astype(jnp.float32)            # [d_in, N, tb]
        x_ch = [x[c] for c in range(d_in)]            # d_in x [N, tb]

        h = _isab_ch(x_ch, I1, m10, m11, num_heads, dim_hidden, scale)
        h = _isab_ch(h, I2, m20, m21, num_heads, dim_hidden, scale)

        # PMA: MAB(S, h) with the (batch-invariant) seed projection hoisted.
        qS = _proj_rows(S, mp[0], mp[1])
        p = _mab_hoisted_q(qS, h, mp, num_heads, dim_hidden, scale)

        # Decoder Linear(dim_hidden -> dim_output), emitted lane-dense.
        rows = []
        for s_i in range(num_seeds):
            for c in range(dim_output):
                acc = p[0][s_i:s_i + 1, :] * Wd[0][c]
                for v in range(1, dim_hidden):
                    acc = acc + p[v][s_i:s_i + 1, :] * Wd[v][c]
                rows.append(acc + bd[c])
        out = rows[0] if len(rows) == 1 else jnp.concatenate(rows, axis=0)
        out_ref[...] = out.astype(out_ref.dtype)      # [num_seeds*dim_output, tb]

    return kernel


# ---------------------------------------------------------------------------
# Wrapper
# ---------------------------------------------------------------------------

def _normalize_params(params):
    (I1, m10, m11, I2, m20, m21, S, mp, w_dec, b_dec) = params
    f32 = lambda a: jnp.asarray(a, jnp.float32)
    tmap = lambda t: tuple(f32(a) for a in t)
    return (f32(I1), tmap(m10), tmap(m11), f32(I2), tmap(m20), tmap(m21),
            f32(S), tmap(mp), f32(w_dec), f32(b_dec))


def _flatten_param_leaves(nparams):
    (I1, m10, m11, I2, m20, m21, S, mp, w_dec, b_dec) = nparams
    return [I1, *m10, *m11, I2, *m20, *m21, S, *mp, w_dec, b_dec]


def st_forward(x, params, *, num_heads=2, dim_hidden=4, batch_tile=None):
    """Pallas forward for ST.  x: [B, N, dim_input] -> squeezed logits.

    Linear weights are stored pre-transposed as [in, out]; biases as [out].
    Mirrors torch `.squeeze()` (so B == 1 would also drop the batch dim).
    """
    x = jnp.asarray(x, jnp.float32)
    B, N, d_in = (int(s) for s in x.shape)
    nparams = _normalize_params(params)
    leaves = _flatten_param_leaves(nparams)

    meta, off = [], 0
    for leaf in leaves:
        meta.append((off, tuple(int(s) for s in leaf.shape)))
        off += int(leaf.size)
    theta = jnp.concatenate([leaf.ravel() for leaf in leaves])   # packed weights

    num_seeds = int(nparams[6].shape[0])     # S: [num_seeds, dim_hidden]
    dim_output = int(nparams[8].shape[1])    # w_dec: [dim_hidden, dim_output]
    out_rows = num_seeds * dim_output

    # ---- batch tiling: batch lives on the 128-lane axis --------------------
    LANE = 128
    b_pad = pl.cdiv(B, LANE) * LANE
    if batch_tile is None:
        if b_pad <= LANE:
            tb = b_pad                        # tiny B: single latency-bound step
        else:                                 # >=2 steps (v7x megacore), cap 512
            tb = min(512, max(LANE, ((b_pad // 2) // LANE) * LANE))
    else:
        tb = max(LANE, pl.cdiv(int(batch_tile), LANE) * LANE)
    b_pad = pl.cdiv(b_pad, tb) * tb

    # Lane-dense layout: [d_in, N, B_pad] (wrapper-side layout plumbing only).
    xt = jnp.transpose(x, (2, 1, 0))
    if b_pad != B:
        xt = jnp.pad(xt, ((0, 0), (0, 0), (0, b_pad - B)))

    kernel = _make_kernel(meta, d_in, num_heads, dim_hidden, num_seeds,
                          dim_output)

    out = pl.pallas_call(
        kernel,
        out_shape=jax.ShapeDtypeStruct((out_rows, b_pad), jnp.float32),
        grid=(b_pad // tb,),
        in_specs=[
            pl.BlockSpec((d_in, N, tb), lambda i: (0, 0, i)),
            pl.BlockSpec(memory_space=pltpu.MemorySpace.SMEM),   # packed weights
        ],
        out_specs=pl.BlockSpec((out_rows, tb), lambda i: (0, i)),
        compiler_params=pltpu.CompilerParams(
            dimension_semantics=("parallel",)),   # batch steps are independent
    )(xt, theta)

    out = out[:, :B].T.reshape(B, num_seeds, dim_output)
    return jnp.squeeze(out)                       # torch `.squeeze()` semantics


# ---------------------------------------------------------------------------
# Pure-JAX reference (standard layout) for correctness checking.
# ---------------------------------------------------------------------------

def _linear3_ref(x, w, b):
    tb, n, din = x.shape
    y = jnp.dot(x.reshape(tb * n, din), w, preferred_element_type=jnp.float32)
    return y.reshape(tb, n, w.shape[1]) + b


def _mab_ref(Q, K, params, num_heads, dim_v):
    wq, bq, wk, bk, wv, bv, wo, bo = params
    q = _linear3_ref(Q, wq, bq)
    k = _linear3_ref(K, wk, bk)
    v = _linear3_ref(K, wv, bv)
    dh = dim_v // num_heads
    scale = 1.0 / math.sqrt(dim_v)
    heads = []
    for h in range(num_heads):
        sl = slice(h * dh, (h + 1) * dh)
        qh, kh, vh = q[..., sl], k[..., sl], v[..., sl]
        s = jnp.einsum('bqd,bkd->bqk', qh, kh) * scale
        a = jax.nn.softmax(s, axis=-1)
        heads.append(qh + jnp.einsum('bqk,bkd->bqd', a, vh))
    o = jnp.concatenate(heads, axis=-1)
    return o + jnp.maximum(_linear3_ref(o, wo, bo), 0.0)


def _isab_ref(X, I, m0, m1, num_heads, dim_v):
    b = X.shape[0]
    Ib = jnp.broadcast_to(I[None], (b,) + I.shape)
    H = _mab_ref(Ib, X, m0, num_heads, dim_v)
    return _mab_ref(X, H, m1, num_heads, dim_v)


def st_reference(x, params, *, num_heads=2, dim_hidden=4):
    x = jnp.asarray(x, jnp.float32)
    (I1, m10, m11, I2, m20, m21, S, mp, w_dec, b_dec) = _normalize_params(params)
    h = _isab_ref(x, I1, m10, m11, num_heads, dim_hidden)
    h = _isab_ref(h, I2, m20, m21, num_heads, dim_hidden)
    b = x.shape[0]
    Sb = jnp.broadcast_to(S[None], (b,) + S.shape)
    p = _mab_ref(Sb, h, mp, num_heads, dim_hidden)
    logits = jnp.einsum('bsd,dc->bsc', p, w_dec) + b_dec
    return jnp.squeeze(logits)


# ---------------------------------------------------------------------------
# Demo / self-test
# ---------------------------------------------------------------------------

if __name__ == "__main__":
    # ST defaults: dim_input=2, num_outputs=1, dim_output=10, num_inds=4,
    # dim_hidden=4, num_heads=2, ln=False.  Point cloud: B=2 sets of N=16 pts.
    B, N = 2, 16
    dim_input, dim_hidden, num_heads = 2, 4, 2
    num_inds, num_outputs, dim_output = 4, 1, 10

    key = jax.random.PRNGKey(0)
    kx, kp = jax.random.split(key)
    x = jax.random.normal(kx, (B, N, dim_input), jnp.float32)

    def mab_params(key, dim_q, dim_k, dim_v):
        ks = jax.random.split(key, 8)

        def lin(kw, kb, din, dout):
            w = (1.0 / math.sqrt(din)) * jax.random.normal(kw, (din, dout),
                                                           jnp.float32)
            b = 0.1 * jax.random.normal(kb, (dout,), jnp.float32)
            return w, b

        wq, bq = lin(ks[0], ks[1], dim_q, dim_v)
        wk, bk = lin(ks[2], ks[3], dim_k, dim_v)
        wv, bv = lin(ks[4], ks[5], dim_k, dim_v)
        wo, bo = lin(ks[6], ks[7], dim_v, dim_v)
        return (wq, bq, wk, bk, wv, bv, wo, bo)

    ks = jax.random.split(kp, 10)
    I1 = jax.random.normal(ks[0], (num_inds, dim_hidden), jnp.float32)
    isab1_m0 = mab_params(ks[1], dim_hidden, dim_input, dim_hidden)
    isab1_m1 = mab_params(ks[2], dim_input, dim_hidden, dim_hidden)
    I2 = jax.random.normal(ks[3], (num_inds, dim_hidden), jnp.float32)
    isab2_m0 = mab_params(ks[4], dim_hidden, dim_hidden, dim_hidden)
    isab2_m1 = mab_params(ks[5], dim_hidden, dim_hidden, dim_hidden)
    S = jax.random.normal(ks[6], (num_outputs, dim_hidden), jnp.float32)
    pma_m = mab_params(ks[7], dim_hidden, dim_hidden, dim_hidden)
    w_dec = (1.0 / math.sqrt(dim_hidden)) * jax.random.normal(
        ks[8], (dim_hidden, dim_output), jnp.float32)
    b_dec = 0.1 * jax.random.normal(ks[9], (dim_output,), jnp.float32)

    params = (I1, isab1_m0, isab1_m1, I2, isab2_m0, isab2_m1,
              S, pma_m, w_dec, b_dec)

    y = jax.block_until_ready(
        st_forward(x, params, num_heads=num_heads, dim_hidden=dim_hidden))

    assert y.shape == (B, dim_output), y.shape
    assert bool(jnp.all(jnp.isfinite(y)))

    y_ref = jax.block_until_ready(
        st_reference(x, params, num_heads=num_heads, dim_hidden=dim_hidden))
    assert jnp.allclose(y, y_ref, rtol=1e-2, atol=1e-2), (
        float(jnp.max(jnp.abs(y - y_ref))))

    print("KERNEL_OK")
</pallas_src>

<mosaic_0001>
module attributes {stable_mosaic.version = 11 : i64} {
  func.func @kernel(%arg0: i32, %arg1: memref<2x16x128xf32, #tpu.memory_space<vmem>>, %arg2: memref<462xf32, #tpu.memory_space<smem>>, %arg3: memref<10x128xf32, #tpu.memory_space<vmem>>) attributes {dimension_semantics = [#tpu.dimension_semantics<parallel>], iteration_bounds = array<i64: 1>, scalar_prefetch = 0 : i64, scratch_operands = 0 : i64, tpu.core_type = #tpu.core_type<tc>, window_params = [{transform_indices = @transform_0, window_bounds = array<i64: 2, 16, 128>}, {transform_indices = @transform_1, window_bounds = array<i64: 462>}, {transform_indices = @transform_2, window_bounds = array<i64: 10, 128>}]} {
    %c0 = arith.constant 0 : index
    %0 = memref.load %arg2[%c0] : memref<462xf32, #tpu.memory_space<smem>>
    %c1 = arith.constant 1 : index
    %1 = memref.load %arg2[%c1] : memref<462xf32, #tpu.memory_space<smem>>
    %c2 = arith.constant 2 : index
    %2 = memref.load %arg2[%c2] : memref<462xf32, #tpu.memory_space<smem>>
    %c3 = arith.constant 3 : index
    %3 = memref.load %arg2[%c3] : memref<462xf32, #tpu.memory_space<smem>>
    %c4 = arith.constant 4 : index
    %4 = memref.load %arg2[%c4] : memref<462xf32, #tpu.memory_space<smem>>
    %c5 = arith.constant 5 : index
    %5 = memref.load %arg2[%c5] : memref<462xf32, #tpu.memory_space<smem>>
    %c6 = arith.constant 6 : index
    %6 = memref.load %arg2[%c6] : memref<462xf32, #tpu.memory_space<smem>>
    %c7 = arith.constant 7 : index
    %7 = memref.load %arg2[%c7] : memref<462xf32, #tpu.memory_space<smem>>
    %c8 = arith.constant 8 : index
    %8 = memref.load %arg2[%c8] : memref<462xf32, #tpu.memory_space<smem>>
    %c9 = arith.constant 9 : index
    %9 = memref.load %arg2[%c9] : memref<462xf32, #tpu.memory_space<smem>>
    %c10 = arith.constant 10 : index
    %10 = memref.load %arg2[%c10] : memref<462xf32, #tpu.memory_space<smem>>
    %c11 = arith.constant 11 : index
    %11 = memref.load %arg2[%c11] : memref<462xf32, #tpu.memory_space<smem>>
    %c12 = arith.constant 12 : index
    %12 = memref.load %arg2[%c12] : memref<462xf32, #tpu.memory_space<smem>>
    %c13 = arith.constant 13 : index
    %13 = memref.load %arg2[%c13] : memref<462xf32, #tpu.memory_space<smem>>
    %c14 = arith.constant 14 : index
    %14 = memref.load %arg2[%c14] : memref<462xf32, #tpu.memory_space<smem>>
    %c15 = arith.constant 15 : index
    %15 = memref.load %arg2[%c15] : memref<462xf32, #tpu.memory_space<smem>>
    %c16 = arith.constant 16 : index
    %16 = memref.load %arg2[%c16] : memref<462xf32, #tpu.memory_space<smem>>
    %c17 = arith.constant 17 : index
    %17 = memref.load %arg2[%c17] : memref<462xf32, #tpu.memory_space<smem>>
    %c18 = arith.constant 18 : index
    %18 = memref.load %arg2[%c18] : memref<462xf32, #tpu.memory_space<smem>>
    %c19 = arith.constant 19 : index
    %19 = memref.load %arg2[%c19] : memref<462xf32, #tpu.memory_space<smem>>
    %c20 = arith.constant 20 : index
    %20 = memref.load %arg2[%c20] : memref<462xf32, #tpu.memory_space<smem>>
    %c21 = arith.constant 21 : index
    %21 = memref.load %arg2[%c21] : memref<462xf32, #tpu.memory_space<smem>>
    %c22 = arith.constant 22 : index
    %22 = memref.load %arg2[%c22] : memref<462xf32, #tpu.memory_space<smem>>
    %c23 = arith.constant 23 : index
    %23 = memref.load %arg2[%c23] : memref<462xf32, #tpu.memory_space<smem>>
    %c24 = arith.constant 24 : index
    %24 = memref.load %arg2[%c24] : memref<462xf32, #tpu.memory_space<smem>>
    %c25 = arith.constant 25 : index
    %25 = memref.load %arg2[%c25] : memref<462xf32, #tpu.memory_space<smem>>
    %c26 = arith.constant 26 : index
    %26 = memref.load %arg2[%c26] : memref<462xf32, #tpu.memory_space<smem>>
    %c27 = arith.constant 27 : index
    %27 = memref.load %arg2[%c27] : memref<462xf32, #tpu.memory_space<smem>>
    %c28 = arith.constant 28 : index
    %28 = memref.load %arg2[%c28] : memref<462xf32, #tpu.memory_space<smem>>
    %c29 = arith.constant 29 : index
    %29 = memref.load %arg2[%c29] : memref<462xf32, #tpu.memory_space<smem>>
    %c30 = arith.constant 30 : index
    %30 = memref.load %arg2[%c30] : memref<462xf32, #tpu.memory_space<smem>>
    %c31 = arith.constant 31 : index
    %31 = memref.load %arg2[%c31] : memref<462xf32, #tpu.memory_space<smem>>
    %c32 = arith.constant 32 : index
    %32 = memref.load %arg2[%c32] : memref<462xf32, #tpu.memory_space<smem>>
    %c33 = arith.constant 33 : index
    %33 = memref.load %arg2[%c33] : memref<462xf32, #tpu.memory_space<smem>>
    %c34 = arith.constant 34 : index
    %34 = memref.load %arg2[%c34] : memref<462xf32, #tpu.memory_space<smem>>
    %c35 = arith.constant 35 : index
    %35 = memref.load %arg2[%c35] : memref<462xf32, #tpu.memory_space<smem>>
    %c36 = arith.constant 36 : index
    %36 = memref.load %arg2[%c36] : memref<462xf32, #tpu.memory_space<smem>>
    %c37 = arith.constant 37 : index
    %37 = memref.load %arg2[%c37] : memref<462xf32, #tpu.memory_space<smem>>
    %c38 = arith.constant 38 : index
    %38 = memref.load %arg2[%c38] : memref<462xf32, #tpu.memory_space<smem>>
    %c39 = arith.constant 39 : index
    %39 = memref.load %arg2[%c39] : memref<462xf32, #tpu.memory_space<smem>>
    %c40 = arith.constant 40 : index
    %40 = memref.load %arg2[%c40] : memref<462xf32, #tpu.memory_space<smem>>
    %c41 = arith.constant 41 : index
    %41 = memref.load %arg2[%c41] : memref<462xf32, #tpu.memory_space<smem>>
    %c42 = arith.constant 42 : index
    %42 = memref.load %arg2[%c42] : memref<462xf32, #tpu.memory_space<smem>>
    %c43 = arith.constant 43 : index
    %43 = memref.load %arg2[%c43] : memref<462xf32, #tpu.memory_space<smem>>
    %c44 = arith.constant 44 : index
    %44 = memref.load %arg2[%c44] : memref<462xf32, #tpu.memory_space<smem>>
    %c45 = arith.constant 45 : index
    %45 = memref.load %arg2[%c45] : memref<462xf32, #tpu.memory_space<smem>>
    %c46 = arith.constant 46 : index
    %46 = memref.load %arg2[%c46] : memref<462xf32, #tpu.memory_space<smem>>
    %c47 = arith.constant 47 : index
    %47 = memref.load %arg2[%c47] : memref<462xf32, #tpu.memory_space<smem>>
    %c48 = arith.constant 48 : index
    %48 = memref.load %arg2[%c48] : memref<462xf32, #tpu.memory_space<smem>>
    %c49 = arith.constant 49 : index
    %49 = memref.load %arg2[%c49] : memref<462xf32, #tpu.memory_space<smem>>
    %c50 = arith.constant 50 : index
    %50 = memref.load %arg2[%c50] : memref<462xf32, #tpu.memory_space<smem>>
    %c51 = arith.constant 51 : index
    %51 = memref.load %arg2[%c51] : memref<462xf32, #tpu.memory_space<smem>>
    %c52 = arith.constant 52 : index
    %52 = memref.load %arg2[%c52] : memref<462xf32, #tpu.memory_space<smem>>
    %c53 = arith.constant 53 : index
    %53 = memref.load %arg2[%c53] : memref<462xf32, #tpu.memory_space<smem>>
    %c54 = arith.constant 54 : index
    %54 = memref.load %arg2[%c54] : memref<462xf32, #tpu.memory_space<smem>>
    %c55 = arith.constant 55 : index
    %55 = memref.load %arg2[%c55] : memref<462xf32, #tpu.memory_space<smem>>
    %c56 = arith.constant 56 : index
    %56 = memref.load %arg2[%c56] : memref<462xf32, #tpu.memory_space<smem>>
    %c57 = arith.constant 57 : index
    %57 = memref.load %arg2[%c57] : memref<462xf32, #tpu.memory_space<smem>>
    %c58 = arith.constant 58 : index
    %58 = memref.load %arg2[%c58] : memref<462xf32, #tpu.memory_space<smem>>
    %c59 = arith.constant 59 : index
    %59 = memref.load %arg2[%c59] : memref<462xf32, #tpu.memory_space<smem>>
    %c60 = arith.constant 60 : index
    %60 = memref.load %arg2[%c60] : memref<462xf32, #tpu.memory_space<smem>>
    %c61 = arith.constant 61 : index
    %61 = memref.load %arg2[%c61] : memref<462xf32, #tpu.memory_space<smem>>
    %c62 = arith.constant 62 : index
    %62 = memref.load %arg2[%c62] : memref<462xf32, #tpu.memory_space<smem>>
    %c63 = arith.constant 63 : index
    %63 = memref.load %arg2[%c63] : memref<462xf32, #tpu.memory_space<smem>>
    %c64 = arith.constant 64 : index
    %64 = memref.load %arg2[%c64] : memref<462xf32, #tpu.memory_space<smem>>
    %c65 = arith.constant 65 : index
    %65 = memref.load %arg2[%c65] : memref<462xf32, #tpu.memory_space<smem>>
    %c66 = arith.constant 66 : index
    %66 = memref.load %arg2[%c66] : memref<462xf32, #tpu.memory_space<smem>>
    %c67 = arith.constant 67 : index
    %67 = memref.load %arg2[%c67] : memref<462xf32, #tpu.memory_space<smem>>
    %c68 = arith.constant 68 : index
    %68 = memref.load %arg2[%c68] : memref<462xf32, #tpu.memory_space<smem>>
    %c69 = arith.constant 69 : index
    %69 = memref.load %arg2[%c69] : memref<462xf32, #tpu.memory_space<smem>>
    %c70 = arith.constant 70 : index
    %70 = memref.load %arg2[%c70] : memref<462xf32, #tpu.memory_space<smem>>
    %c71 = arith.constant 71 : index
    %71 = memref.load %arg2[%c71] : memref<462xf32, #tpu.memory_space<smem>>
    %c72 = arith.constant 72 : index
    %72 = memref.load %arg2[%c72] : memref<462xf32, #tpu.memory_space<smem>>
    %c73 = arith.constant 73 : index
    %73 = memref.load %arg2[%c73] : memref<462xf32, #tpu.memory_space<smem>>
    %c74 = arith.constant 74 : index
    %74 = memref.load %arg2[%c74] : memref<462xf32, #tpu.memory_space<smem>>
    %c75 = arith.constant 75 : index
    %75 = memref.load %arg2[%c75] : memref<462xf32, #tpu.memory_space<smem>>
    %c76 = arith.constant 76 : index
    %76 = memref.load %arg2[%c76] : memref<462xf32, #tpu.memory_space<smem>>
    %c77 = arith.constant 77 : index
    %77 = memref.load %arg2[%c77] : memref<462xf32, #tpu.memory_space<smem>>
    %c78 = arith.constant 78 : index
    %78 = memref.load %arg2[%c78] : memref<462xf32, #tpu.memory_space<smem>>
    %c79 = arith.constant 79 : index
    %79 = memref.load %arg2[%c79] : memref<462xf32, #tpu.memory_space<smem>>
    %c80 = arith.constant 80 : index
    %80 = memref.load %arg2[%c80] : memref<462xf32, #tpu.memory_space<smem>>
    %c81 = arith.constant 81 : index
    %81 = memref.load %arg2[%c81] : memref<462xf32, #tpu.memory_space<smem>>
    %c82 = arith.constant 82 : index
    %82 = memref.load %arg2[%c82] : memref<462xf32, #tpu.memory_space<smem>>
    %c83 = arith.constant 83 : index
    %83 = memref.load %arg2[%c83] : memref<462xf32, #tpu.memory_space<smem>>
    %c84 = arith.constant 84 : index
    %84 = memref.load %arg2[%c84] : memref<462xf32, #tpu.memory_space<smem>>
    %c85 = arith.constant 85 : index
    %85 = memref.load %arg2[%c85] : memref<462xf32, #tpu.memory_space<smem>>
    %c86 = arith.constant 86 : index
    %86 = memref.load %arg2[%c86] : memref<462xf32, #tpu.memory_space<smem>>
    %c87 = arith.constant 87 : index
    %87 = memref.load %arg2[%c87] : memref<462xf32, #tpu.memory_space<smem>>
    %c88 = arith.constant 88 : index
    %88 = memref.load %arg2[%c88] : memref<462xf32, #tpu.memory_space<smem>>
    %c89 = arith.constant 89 : index
    %89 = memref.load %arg2[%c89] : memref<462xf32, #tpu.memory_space<smem>>
    %c90 = arith.constant 90 : index
    %90 = memref.load %arg2[%c90] : memref<462xf32, #tpu.memory_space<smem>>
    %c91 = arith.constant 91 : index
    %91 = memref.load %arg2[%c91] : memref<462xf32, #tpu.memory_space<smem>>
    %c92 = arith.constant 92 : index
    %92 = memref.load %arg2[%c92] : memref<462xf32, #tpu.memory_space<smem>>
    %c93 = arith.constant 93 : index
    %93 = memref.load %arg2[%c93] : memref<462xf32, #tpu.memory_space<smem>>
    %c94 = arith.constant 94 : index
    %94 = memref.load %arg2[%c94] : memref<462xf32, #tpu.memory_space<smem>>
    %c95 = arith.constant 95 : index
    %95 = memref.load %arg2[%c95] : memref<462xf32, #tpu.memory_space<smem>>
    %c96 = arith.constant 96 : index
    %96 = memref.load %arg2[%c96] : memref<462xf32, #tpu.memory_space<smem>>
    %c97 = arith.constant 97 : index
    %97 = memref.load %arg2[%c97] : memref<462xf32, #tpu.memory_space<smem>>
    %c98 = arith.constant 98 : index
    %98 = memref.load %arg2[%c98] : memref<462xf32, #tpu.memory_space<smem>>
    %c99 = arith.constant 99 : index
    %99 = memref.load %arg2[%c99] : memref<462xf32, #tpu.memory_space<smem>>
    %c100 = arith.constant 100 : index
    %100 = memref.load %arg2[%c100] : memref<462xf32, #tpu.memory_space<smem>>
    %c101 = arith.constant 101 : index
    %101 = memref.load %arg2[%c101] : memref<462xf32, #tpu.memory_space<smem>>
    %c102 = arith.constant 102 : index
    %102 = memref.load %arg2[%c102] : memref<462xf32, #tpu.memory_space<smem>>
    %c103 = arith.constant 103 : index
    %103 = memref.load %arg2[%c103] : memref<462xf32, #tpu.memory_space<smem>>
    %c104 = arith.constant 104 : index
    %104 = memref.load %arg2[%c104] : memref<462xf32, #tpu.memory_space<smem>>
    %c105 = arith.constant 105 : index
    %105 = memref.load %arg2[%c105] : memref<462xf32, #tpu.memory_space<smem>>
    %c106 = arith.constant 106 : index
    %106 = memref.load %arg2[%c106] : memref<462xf32, #tpu.memory_space<smem>>
    %c107 = arith.constant 107 : index
    %107 = memref.load %arg2[%c107] : memref<462xf32, #tpu.memory_space<smem>>
    %c108 = arith.constant 108 : index
    %108 = memref.load %arg2[%c108] : memref<462xf32, #tpu.memory_space<smem>>
    %c109 = arith.constant 109 : index
    %109 = memref.load %arg2[%c109] : memref<462xf32, #tpu.memory_space<smem>>
    %c110 = arith.constant 110 : index
    %110 = memref.load %arg2[%c110] : memref<462xf32, #tpu.memory_space<smem>>
    %c111 = arith.constant 111 : index
    %111 = memref.load %arg2[%c111] : memref<462xf32, #tpu.memory_space<smem>>
    %c112 = arith.constant 112 : index
    %112 = memref.load %arg2[%c112] : memref<462xf32, #tpu.memory_space<smem>>
    %c113 = arith.constant 113 : index
    %113 = memref.load %arg2[%c113] : memref<462xf32, #tpu.memory_space<smem>>
    %c114 = arith.constant 114 : index
    %114 = memref.load %arg2[%c114] : memref<462xf32, #tpu.memory_space<smem>>
    %c115 = arith.constant 115 : index
    %115 = memref.load %arg2[%c115] : memref<462xf32, #tpu.memory_space<smem>>
    %c116 = arith.constant 116 : index
    %116 = memref.load %arg2[%c116] : memref<462xf32, #tpu.memory_space<smem>>
    %c117 = arith.constant 117 : index
    %117 = memref.load %arg2[%c117] : memref<462xf32, #tpu.memory_space<smem>>
    %c118 = arith.constant 118 : index
    %118 = memref.load %arg2[%c118] : memref<462xf32, #tpu.memory_space<smem>>
    %c119 = arith.constant 119 : index
    %119 = memref.load %arg2[%c119] : memref<462xf32, #tpu.memory_space<smem>>
    %c120 = arith.constant 120 : index
    %120 = memref.load %arg2[%c120] : memref<462xf32, #tpu.memory_space<smem>>
    %c121 = arith.constant 121 : index
    %121 = memref.load %arg2[%c121] : memref<462xf32, #tpu.memory_space<smem>>
    %c122 = arith.constant 122 : index
    %122 = memref.load %arg2[%c122] : memref<462xf32, #tpu.memory_space<smem>>
    %c123 = arith.constant 123 : index
    %123 = memref.load %arg2[%c123] : memref<462xf32, #tpu.memory_space<smem>>
    %c124 = arith.constant 124 : index
    %124 = memref.load %arg2[%c124] : memref<462xf32, #tpu.memory_space<smem>>
    %c125 = arith.constant 125 : index
    %125 = memref.load %arg2[%c125] : memref<462xf32, #tpu.memory_space<smem>>
    %c126 = arith.constant 126 : index
    %126 = memref.load %arg2[%c126] : memref<462xf32, #tpu.memory_space<smem>>
    %c127 = arith.constant 127 : index
    %127 = memref.load %arg2[%c127] : memref<462xf32, #tpu.memory_space<smem>>
    %c128 = arith.constant 128 : index
    %128 = memref.load %arg2[%c128] : memref<462xf32, #tpu.memory_space<smem>>
    %c129 = arith.constant 129 : index
    %129 = memref.load %arg2[%c129] : memref<462xf32, #tpu.memory_space<smem>>
    %c130 = arith.constant 130 : index
    %130 = memref.load %arg2[%c130] : memref<462xf32, #tpu.memory_space<smem>>
    %c131 = arith.constant 131 : index
    %131 = memref.load %arg2[%c131] : memref<462xf32, #tpu.memory_space<smem>>
    %c132 = arith.constant 132 : index
    %132 = memref.load %arg2[%c132] : memref<462xf32, #tpu.memory_space<smem>>
    %c133 = arith.constant 133 : index
    %133 = memref.load %arg2[%c133] : memref<462xf32, #tpu.memory_space<smem>>
    %c134 = arith.constant 134 : index
    %134 = memref.load %arg2[%c134] : memref<462xf32, #tpu.memory_space<smem>>
    %c135 = arith.constant 135 : index
    %135 = memref.load %arg2[%c135] : memref<462xf32, #tpu.memory_space<smem>>
    %c136 = arith.constant 136 : index
    %136 = memref.load %arg2[%c136] : memref<462xf32, #tpu.memory_space<smem>>
    %c137 = arith.constant 137 : index
    %137 = memref.load %arg2[%c137] : memref<462xf32, #tpu.memory_space<smem>>
    %c138 = arith.constant 138 : index
    %138 = memref.load %arg2[%c138] : memref<462xf32, #tpu.memory_space<smem>>
    %c139 = arith.constant 139 : index
    %139 = memref.load %arg2[%c139] : memref<462xf32, #tpu.memory_space<smem>>
    %c140 = arith.constant 140 : index
    %140 = memref.load %arg2[%c140] : memref<462xf32, #tpu.memory_space<smem>>
    %c141 = arith.constant 141 : index
    %141 = memref.load %arg2[%c141] : memref<462xf32, #tpu.memory_space<smem>>
    %c142 = arith.constant 142 : index
    %142 = memref.load %arg2[%c142] : memref<462xf32, #tpu.memory_space<smem>>
    %c143 = arith.constant 143 : index
    %143 = memref.load %arg2[%c143] : memref<462xf32, #tpu.memory_space<smem>>
    %c144 = arith.constant 144 : index
    %144 = memref.load %arg2[%c144] : memref<462xf32, #tpu.memory_space<smem>>
    %c145 = arith.constant 145 : index
    %145 = memref.load %arg2[%c145] : memref<462xf32, #tpu.memory_space<smem>>
    %c146 = arith.constant 146 : index
    %146 = memref.load %arg2[%c146] : memref<462xf32, #tpu.memory_space<smem>>
    %c147 = arith.constant 147 : index
    %147 = memref.load %arg2[%c147] : memref<462xf32, #tpu.memory_space<smem>>
    %c148 = arith.constant 148 : index
    %148 = memref.load %arg2[%c148] : memref<462xf32, #tpu.memory_space<smem>>
    %c149 = arith.constant 149 : index
    %149 = memref.load %arg2[%c149] : memref<462xf32, #tpu.memory_space<smem>>
    %c150 = arith.constant 150 : index
    %150 = memref.load %arg2[%c150] : memref<462xf32, #tpu.memory_space<smem>>
    %c151 = arith.constant 151 : index
    %151 = memref.load %arg2[%c151] : memref<462xf32, #tpu.memory_space<smem>>
    %c152 = arith.constant 152 : index
    %152 = memref.load %arg2[%c152] : memref<462xf32, #tpu.memory_space<smem>>
    %c153 = arith.constant 153 : index
    %153 = memref.load %arg2[%c153] : memref<462xf32, #tpu.memory_space<smem>>
    %c154 = arith.constant 154 : index
    %154 = memref.load %arg2[%c154] : memref<462xf32, #tpu.memory_space<smem>>
    %c155 = arith.constant 155 : index
    %155 = memref.load %arg2[%c155] : memref<462xf32, #tpu.memory_space<smem>>
    %c156 = arith.constant 156 : index
    %156 = memref.load %arg2[%c156] : memref<462xf32, #tpu.memory_space<smem>>
    %c157 = arith.constant 157 : index
    %157 = memref.load %arg2[%c157] : memref<462xf32, #tpu.memory_space<smem>>
    %c158 = arith.constant 158 : index
    %158 = memref.load %arg2[%c158] : memref<462xf32, #tpu.memory_space<smem>>
    %c159 = arith.constant 159 : index
    %159 = memref.load %arg2[%c159] : memref<462xf32, #tpu.memory_space<smem>>
    %c160 = arith.constant 160 : index
    %160 = memref.load %arg2[%c160] : memref<462xf32, #tpu.memory_space<smem>>
    %c161 = arith.constant 161 : index
    %161 = memref.load %arg2[%c161] : memref<462xf32, #tpu.memory_space<smem>>
    %c162 = arith.constant 162 : index
    %162 = memref.load %arg2[%c162] : memref<462xf32, #tpu.memory_space<smem>>
    %c163 = arith.constant 163 : index
    %163 = memref.load %arg2[%c163] : memref<462xf32, #tpu.memory_space<smem>>
    %c164 = arith.constant 164 : index
    %164 = memref.load %arg2[%c164] : memref<462xf32, #tpu.memory_space<smem>>
    %c165 = arith.constant 165 : index
    %165 = memref.load %arg2[%c165] : memref<462xf32, #tpu.memory_space<smem>>
    %c166 = arith.constant 166 : index
    %166 = memref.load %arg2[%c166] : memref<462xf32, #tpu.memory_space<smem>>
    %c167 = arith.constant 167 : index
    %167 = memref.load %arg2[%c167] : memref<462xf32, #tpu.memory_space<smem>>
    %c168 = arith.constant 168 : index
    %168 = memref.load %arg2[%c168] : memref<462xf32, #tpu.memory_space<smem>>
    %c169 = arith.constant 169 : index
    %169 = memref.load %arg2[%c169] : memref<462xf32, #tpu.memory_space<smem>>
    %c170 = arith.constant 170 : index
    %170 = memref.load %arg2[%c170] : memref<462xf32, #tpu.memory_space<smem>>
    %c171 = arith.constant 171 : index
    %171 = memref.load %arg2[%c171] : memref<462xf32, #tpu.memory_space<smem>>
    %c172 = arith.constant 172 : index
    %172 = memref.load %arg2[%c172] : memref<462xf32, #tpu.memory_space<smem>>
    %c173 = arith.constant 173 : index
    %173 = memref.load %arg2[%c173] : memref<462xf32, #tpu.memory_space<smem>>
    %c174 = arith.constant 174 : index
    %174 = memref.load %arg2[%c174] : memref<462xf32, #tpu.memory_space<smem>>
    %c175 = arith.constant 175 : index
    %175 = memref.load %arg2[%c175] : memref<462xf32, #tpu.memory_space<smem>>
    %c176 = arith.constant 176 : index
    %176 = memref.load %arg2[%c176] : memref<462xf32, #tpu.memory_space<smem>>
    %c177 = arith.constant 177 : index
    %177 = memref.load %arg2[%c177] : memref<462xf32, #tpu.memory_space<smem>>
    %c178 = arith.constant 178 : index
    %178 = memref.load %arg2[%c178] : memref<462xf32, #tpu.memory_space<smem>>
    %c179 = arith.constant 179 : index
    %179 = memref.load %arg2[%c179] : memref<462xf32, #tpu.memory_space<smem>>
    %c180 = arith.constant 180 : index
    %180 = memref.load %arg2[%c180] : memref<462xf32, #tpu.memory_space<smem>>
    %c181 = arith.constant 181 : index
    %181 = memref.load %arg2[%c181] : memref<462xf32, #tpu.memory_space<smem>>
    %c182 = arith.constant 182 : index
    %182 = memref.load %arg2[%c182] : memref<462xf32, #tpu.memory_space<smem>>
    %c183 = arith.constant 183 : index
    %183 = memref.load %arg2[%c183] : memref<462xf32, #tpu.memory_space<smem>>
    %c184 = arith.constant 184 : index
    %184 = memref.load %arg2[%c184] : memref<462xf32, #tpu.memory_space<smem>>
    %c185 = arith.constant 185 : index
    %185 = memref.load %arg2[%c185] : memref<462xf32, #tpu.memory_space<smem>>
    %c186 = arith.constant 186 : index
    %186 = memref.load %arg2[%c186] : memref<462xf32, #tpu.memory_space<smem>>
    %c187 = arith.constant 187 : index
    %187 = memref.load %arg2[%c187] : memref<462xf32, #tpu.memory_space<smem>>
    %c188 = arith.constant 188 : index
    %188 = memref.load %arg2[%c188] : memref<462xf32, #tpu.memory_space<smem>>
    %c189 = arith.constant 189 : index
    %189 = memref.load %arg2[%c189] : memref<462xf32, #tpu.memory_space<smem>>
    %c190 = arith.constant 190 : index
    %190 = memref.load %arg2[%c190] : memref<462xf32, #tpu.memory_space<smem>>
    %c191 = arith.constant 191 : index
    %191 = memref.load %arg2[%c191] : memref<462xf32, #tpu.memory_space<smem>>
    %c192 = arith.constant 192 : index
    %192 = memref.load %arg2[%c192] : memref<462xf32, #tpu.memory_space<smem>>
    %c193 = arith.constant 193 : index
    %193 = memref.load %arg2[%c193] : memref<462xf32, #tpu.memory_space<smem>>
    %c194 = arith.constant 194 : index
    %194 = memref.load %arg2[%c194] : memref<462xf32, #tpu.memory_space<smem>>
    %c195 = arith.constant 195 : index
    %195 = memref.load %arg2[%c195] : memref<462xf32, #tpu.memory_space<smem>>
    %c196 = arith.constant 196 : index
    %196 = memref.load %arg2[%c196] : memref<462xf32, #tpu.memory_space<smem>>
    %c197 = arith.constant 197 : index
    %197 = memref.load %arg2[%c197] : memref<462xf32, #tpu.memory_space<smem>>
    %c198 = arith.constant 198 : index
    %198 = memref.load %arg2[%c198] : memref<462xf32, #tpu.memory_space<smem>>
    %c199 = arith.constant 199 : index
    %199 = memref.load %arg2[%c199] : memref<462xf32, #tpu.memory_space<smem>>
    %c200 = arith.constant 200 : index
    %200 = memref.load %arg2[%c200] : memref<462xf32, #tpu.memory_space<smem>>
    %c201 = arith.constant 201 : index
    %201 = memref.load %arg2[%c201] : memref<462xf32, #tpu.memory_space<smem>>
    %c202 = arith.constant 202 : index
    %202 = memref.load %arg2[%c202] : memref<462xf32, #tpu.memory_space<smem>>
    %c203 = arith.constant 203 : index
    %203 = memref.load %arg2[%c203] : memref<462xf32, #tpu.memory_space<smem>>
    %c204 = arith.constant 204 : index
    %204 = memref.load %arg2[%c204] : memref<462xf32, #tpu.memory_space<smem>>
    %c205 = arith.constant 205 : index
    %205 = memref.load %arg2[%c205] : memref<462xf32, #tpu.memory_space<smem>>
    %c206 = arith.constant 206 : index
    %206 = memref.load %arg2[%c206] : memref<462xf32, #tpu.memory_space<smem>>
    %c207 = arith.constant 207 : index
    %207 = memref.load %arg2[%c207] : memref<462xf32, #tpu.memory_space<smem>>
    %c208 = arith.constant 208 : index
    %208 = memref.load %arg2[%c208] : memref<462xf32, #tpu.memory_space<smem>>
    %c209 = arith.constant 209 : index
    %209 = memref.load %arg2[%c209] : memref<462xf32, #tpu.memory_space<smem>>
    %c210 = arith.constant 210 : index
    %210 = memref.load %arg2[%c210] : memref<462xf32, #tpu.memory_space<smem>>
    %c211 = arith.constant 211 : index
    %211 = memref.load %arg2[%c211] : memref<462xf32, #tpu.memory_space<smem>>
    %c212 = arith.constant 212 : index
    %212 = memref.load %arg2[%c212] : memref<462xf32, #tpu.memory_space<smem>>
    %c213 = arith.constant 213 : index
    %213 = memref.load %arg2[%c213] : memref<462xf32, #tpu.memory_space<smem>>
    %c214 = arith.constant 214 : index
    %214 = memref.load %arg2[%c214] : memref<462xf32, #tpu.memory_space<smem>>
    %c215 = arith.constant 215 : index
    %215 = memref.load %arg2[%c215] : memref<462xf32, #tpu.memory_space<smem>>
    %c216 = arith.constant 216 : index
    %216 = memref.load %arg2[%c216] : memref<462xf32, #tpu.memory_space<smem>>
    %c217 = arith.constant 217 : index
    %217 = memref.load %arg2[%c217] : memref<462xf32, #tpu.memory_space<smem>>
    %c218 = arith.constant 218 : index
    %218 = memref.load %arg2[%c218] : memref<462xf32, #tpu.memory_space<smem>>
    %c219 = arith.constant 219 : index
    %219 = memref.load %arg2[%c219] : memref<462xf32, #tpu.memory_space<smem>>
    %c220 = arith.constant 220 : index
    %220 = memref.load %arg2[%c220] : memref<462xf32, #tpu.memory_space<smem>>
    %c221 = arith.constant 221 : index
    %221 = memref.load %arg2[%c221] : memref<462xf32, #tpu.memory_space<smem>>
    %c222 = arith.constant 222 : index
    %222 = memref.load %arg2[%c222] : memref<462xf32, #tpu.memory_space<smem>>
    %c223 = arith.constant 223 : index
    %223 = memref.load %arg2[%c223] : memref<462xf32, #tpu.memory_space<smem>>
    %c224 = arith.constant 224 : index
    %224 = memref.load %arg2[%c224] : memref<462xf32, #tpu.memory_space<smem>>
    %c225 = arith.constant 225 : index
    %225 = memref.load %arg2[%c225] : memref<462xf32, #tpu.memory_space<smem>>
    %c226 = arith.constant 226 : index
    %226 = memref.load %arg2[%c226] : memref<462xf32, #tpu.memory_space<smem>>
    %c227 = arith.constant 227 : index
    %227 = memref.load %arg2[%c227] : memref<462xf32, #tpu.memory_space<smem>>
    %c228 = arith.constant 228 : index
    %228 = memref.load %arg2[%c228] : memref<462xf32, #tpu.memory_space<smem>>
    %c229 = arith.constant 229 : index
    %229 = memref.load %arg2[%c229] : memref<462xf32, #tpu.memory_space<smem>>
    %c230 = arith.constant 230 : index
    %230 = memref.load %arg2[%c230] : memref<462xf32, #tpu.memory_space<smem>>
    %c231 = arith.constant 231 : index
    %231 = memref.load %arg2[%c231] : memref<462xf32, #tpu.memory_space<smem>>
    %c232 = arith.constant 232 : index
    %232 = memref.load %arg2[%c232] : memref<462xf32, #tpu.memory_space<smem>>
    %c233 = arith.constant 233 : index
    %233 = memref.load %arg2[%c233] : memref<462xf32, #tpu.memory_space<smem>>
    %c234 = arith.constant 234 : index
    %234 = memref.load %arg2[%c234] : memref<462xf32, #tpu.memory_space<smem>>
    %c235 = arith.constant 235 : index
    %235 = memref.load %arg2[%c235] : memref<462xf32, #tpu.memory_space<smem>>
    %c236 = arith.constant 236 : index
    %236 = memref.load %arg2[%c236] : memref<462xf32, #tpu.memory_space<smem>>
    %c237 = arith.constant 237 : index
    %237 = memref.load %arg2[%c237] : memref<462xf32, #tpu.memory_space<smem>>
    %c238 = arith.constant 238 : index
    %238 = memref.load %arg2[%c238] : memref<462xf32, #tpu.memory_space<smem>>
    %c239 = arith.constant 239 : index
    %239 = memref.load %arg2[%c239] : memref<462xf32, #tpu.memory_space<smem>>
    %c240 = arith.constant 240 : index
    %240 = memref.load %arg2[%c240] : memref<462xf32, #tpu.memory_space<smem>>
    %c241 = arith.constant 241 : index
    %241 = memref.load %arg2[%c241] : memref<462xf32, #tpu.memory_space<smem>>
    %c242 = arith.constant 242 : index
    %242 = memref.load %arg2[%c242] : memref<462xf32, #tpu.memory_space<smem>>
    %c243 = arith.constant 243 : index
    %243 = memref.load %arg2[%c243] : memref<462xf32, #tpu.memory_space<smem>>
    %c244 = arith.constant 244 : index
    %244 = memref.load %arg2[%c244] : memref<462xf32, #tpu.memory_space<smem>>
    %c245 = arith.constant 245 : index
    %245 = memref.load %arg2[%c245] : memref<462xf32, #tpu.memory_space<smem>>
    %c246 = arith.constant 246 : index
    %246 = memref.load %arg2[%c246] : memref<462xf32, #tpu.memory_space<smem>>
    %c247 = arith.constant 247 : index
    %247 = memref.load %arg2[%c247] : memref<462xf32, #tpu.memory_space<smem>>
    %c248 = arith.constant 248 : index
    %248 = memref.load %arg2[%c248] : memref<462xf32, #tpu.memory_space<smem>>
    %c249 = arith.constant 249 : index
    %249 = memref.load %arg2[%c249] : memref<462xf32, #tpu.memory_space<smem>>
    %c250 = arith.constant 250 : index
    %250 = memref.load %arg2[%c250] : memref<462xf32, #tpu.memory_space<smem>>
    %c251 = arith.constant 251 : index
    %251 = memref.load %arg2[%c251] : memref<462xf32, #tpu.memory_space<smem>>
    %c252 = arith.constant 252 : index
    %252 = memref.load %arg2[%c252] : memref<462xf32, #tpu.memory_space<smem>>
    %c253 = arith.constant 253 : index
    %253 = memref.load %arg2[%c253] : memref<462xf32, #tpu.memory_space<smem>>
    %c254 = arith.constant 254 : index
    %254 = memref.load %arg2[%c254] : memref<462xf32, #tpu.memory_space<smem>>
    %c255 = arith.constant 255 : index
    %255 = memref.load %arg2[%c255] : memref<462xf32, #tpu.memory_space<smem>>
    %c256 = arith.constant 256 : index
    %256 = memref.load %arg2[%c256] : memref<462xf32, #tpu.memory_space<smem>>
    %c257 = arith.constant 257 : index
    %257 = memref.load %arg2[%c257] : memref<462xf32, #tpu.memory_space<smem>>
    %c258 = arith.constant 258 : index
    %258 = memref.load %arg2[%c258] : memref<462xf32, #tpu.memory_space<smem>>
    %c259 = arith.constant 259 : index
    %259 = memref.load %arg2[%c259] : memref<462xf32, #tpu.memory_space<smem>>
    %c260 = arith.constant 260 : index
    %260 = memref.load %arg2[%c260] : memref<462xf32, #tpu.memory_space<smem>>
    %c261 = arith.constant 261 : index
    %261 = memref.load %arg2[%c261] : memref<462xf32, #tpu.memory_space<smem>>
    %c262 = arith.constant 262 : index
    %262 = memref.load %arg2[%c262] : memref<462xf32, #tpu.memory_space<smem>>
    %c263 = arith.constant 263 : index
    %263 = memref.load %arg2[%c263] : memref<462xf32, #tpu.memory_space<smem>>
    %c264 = arith.constant 264 : index
    %264 = memref.load %arg2[%c264] : memref<462xf32, #tpu.memory_space<smem>>
    %c265 = arith.constant 265 : index
    %265 = memref.load %arg2[%c265] : memref<462xf32, #tpu.memory_space<smem>>
    %c266 = arith.constant 266 : index
    %266 = memref.load %arg2[%c266] : memref<462xf32, #tpu.memory_space<smem>>
    %c267 = arith.constant 267 : index
    %267 = memref.load %arg2[%c267] : memref<462xf32, #tpu.memory_space<smem>>
    %c268 = arith.constant 268 : index
    %268 = memref.load %arg2[%c268] : memref<462xf32, #tpu.memory_space<smem>>
    %c269 = arith.constant 269 : index
    %269 = memref.load %arg2[%c269] : memref<462xf32, #tpu.memory_space<smem>>
    %c270 = arith.constant 270 : index
    %270 = memref.load %arg2[%c270] : memref<462xf32, #tpu.memory_space<smem>>
    %c271 = arith.constant 271 : index
    %271 = memref.load %arg2[%c271] : memref<462xf32, #tpu.memory_space<smem>>
    %c272 = arith.constant 272 : index
    %272 = memref.load %arg2[%c272] : memref<462xf32, #tpu.memory_space<smem>>
    %c273 = arith.constant 273 : index
    %273 = memref.load %arg2[%c273] : memref<462xf32, #tpu.memory_space<smem>>
    %c274 = arith.constant 274 : index
    %274 = memref.load %arg2[%c274] : memref<462xf32, #tpu.memory_space<smem>>
    %c275 = arith.constant 275 : index
    %275 = memref.load %arg2[%c275] : memref<462xf32, #tpu.memory_space<smem>>
    %c276 = arith.constant 276 : index
    %276 = memref.load %arg2[%c276] : memref<462xf32, #tpu.memory_space<smem>>
    %c277 = arith.constant 277 : index
    %277 = memref.load %arg2[%c277] : memref<462xf32, #tpu.memory_space<smem>>
    %c278 = arith.constant 278 : index
    %278 = memref.load %arg2[%c278] : memref<462xf32, #tpu.memory_space<smem>>
    %c279 = arith.constant 279 : index
    %279 = memref.load %arg2[%c279] : memref<462xf32, #tpu.memory_space<smem>>
    %c280 = arith.constant 280 : index
    %280 = memref.load %arg2[%c280] : memref<462xf32, #tpu.memory_space<smem>>
    %c281 = arith.constant 281 : index
    %281 = memref.load %arg2[%c281] : memref<462xf32, #tpu.memory_space<smem>>
    %c282 = arith.constant 282 : index
    %282 = memref.load %arg2[%c282] : memref<462xf32, #tpu.memory_space<smem>>
    %c283 = arith.constant 283 : index
    %283 = memref.load %arg2[%c283] : memref<462xf32, #tpu.memory_space<smem>>
    %c284 = arith.constant 284 : index
    %284 = memref.load %arg2[%c284] : memref<462xf32, #tpu.memory_space<smem>>
    %c285 = arith.constant 285 : index
    %285 = memref.load %arg2[%c285] : memref<462xf32, #tpu.memory_space<smem>>
    %c286 = arith.constant 286 : index
    %286 = memref.load %arg2[%c286] : memref<462xf32, #tpu.memory_space<smem>>
    %c287 = arith.constant 287 : index
    %287 = memref.load %arg2[%c287] : memref<462xf32, #tpu.memory_space<smem>>
    %c288 = arith.constant 288 : index
    %288 = memref.load %arg2[%c288] : memref<462xf32, #tpu.memory_space<smem>>
    %c289 = arith.constant 289 : index
    %289 = memref.load %arg2[%c289] : memref<462xf32, #tpu.memory_space<smem>>
    %c290 = arith.constant 290 : index
    %290 = memref.load %arg2[%c290] : memref<462xf32, #tpu.memory_space<smem>>
    %c291 = arith.constant 291 : index
    %291 = memref.load %arg2[%c291] : memref<462xf32, #tpu.memory_space<smem>>
    %c292 = arith.constant 292 : index
    %292 = memref.load %arg2[%c292] : memref<462xf32, #tpu.memory_space<smem>>
    %c293 = arith.constant 293 : index
    %293 = memref.load %arg2[%c293] : memref<462xf32, #tpu.memory_space<smem>>
    %c294 = arith.constant 294 : index
    %294 = memref.load %arg2[%c294] : memref<462xf32, #tpu.memory_space<smem>>
    %c295 = arith.constant 295 : index
    %295 = memref.load %arg2[%c295] : memref<462xf32, #tpu.memory_space<smem>>
    %c296 = arith.constant 296 : index
    %296 = memref.load %arg2[%c296] : memref<462xf32, #tpu.memory_space<smem>>
    %c297 = arith.constant 297 : index
    %297 = memref.load %arg2[%c297] : memref<462xf32, #tpu.memory_space<smem>>
    %c298 = arith.constant 298 : index
    %298 = memref.load %arg2[%c298] : memref<462xf32, #tpu.memory_space<smem>>
    %c299 = arith.constant 299 : index
    %299 = memref.load %arg2[%c299] : memref<462xf32, #tpu.memory_space<smem>>
    %c300 = arith.constant 300 : index
    %300 = memref.load %arg2[%c300] : memref<462xf32, #tpu.memory_space<smem>>
    %c301 = arith.constant 301 : index
    %301 = memref.load %arg2[%c301] : memref<462xf32, #tpu.memory_space<smem>>
    %c302 = arith.constant 302 : index
    %302 = memref.load %arg2[%c302] : memref<462xf32, #tpu.memory_space<smem>>
    %c303 = arith.constant 303 : index
    %303 = memref.load %arg2[%c303] : memref<462xf32, #tpu.memory_space<smem>>
    %c304 = arith.constant 304 : index
    %304 = memref.load %arg2[%c304] : memref<462xf32, #tpu.memory_space<smem>>
    %c305 = arith.constant 305 : index
    %305 = memref.load %arg2[%c305] : memref<462xf32, #tpu.memory_space<smem>>
    %c306 = arith.constant 306 : index
    %306 = memref.load %arg2[%c306] : memref<462xf32, #tpu.memory_space<smem>>
    %c307 = arith.constant 307 : index
    %307 = memref.load %arg2[%c307] : memref<462xf32, #tpu.memory_space<smem>>
    %c308 = arith.constant 308 : index
    %308 = memref.load %arg2[%c308] : memref<462xf32, #tpu.memory_space<smem>>
    %c309 = arith.constant 309 : index
    %309 = memref.load %arg2[%c309] : memref<462xf32, #tpu.memory_space<smem>>
    %c310 = arith.constant 310 : index
    %310 = memref.load %arg2[%c310] : memref<462xf32, #tpu.memory_space<smem>>
    %c311 = arith.constant 311 : index
    %311 = memref.load %arg2[%c311] : memref<462xf32, #tpu.memory_space<smem>>
    %c312 = arith.constant 312 : index
    %312 = memref.load %arg2[%c312] : memref<462xf32, #tpu.memory_space<smem>>
    %c313 = arith.constant 313 : index
    %313 = memref.load %arg2[%c313] : memref<462xf32, #tpu.memory_space<smem>>
    %c314 = arith.constant 314 : index
    %314 = memref.load %arg2[%c314] : memref<462xf32, #tpu.memory_space<smem>>
    %c315 = arith.constant 315 : index
    %315 = memref.load %arg2[%c315] : memref<462xf32, #tpu.memory_space<smem>>
    %c316 = arith.constant 316 : index
    %316 = memref.load %arg2[%c316] : memref<462xf32, #tpu.memory_space<smem>>
    %c317 = arith.constant 317 : index
    %317 = memref.load %arg2[%c317] : memref<462xf32, #tpu.memory_space<smem>>
    %c318 = arith.constant 318 : index
    %318 = memref.load %arg2[%c318] : memref<462xf32, #tpu.memory_space<smem>>
    %c319 = arith.constant 319 : index
    %319 = memref.load %arg2[%c319] : memref<462xf32, #tpu.memory_space<smem>>
    %c320 = arith.constant 320 : index
    %320 = memref.load %arg2[%c320] : memref<462xf32, #tpu.memory_space<smem>>
    %c321 = arith.constant 321 : index
    %321 = memref.load %arg2[%c321] : memref<462xf32, #tpu.memory_space<smem>>
    %c322 = arith.constant 322 : index
    %322 = memref.load %arg2[%c322] : memref<462xf32, #tpu.memory_space<smem>>
    %c323 = arith.constant 323 : index
    %323 = memref.load %arg2[%c323] : memref<462xf32, #tpu.memory_space<smem>>
    %c324 = arith.constant 324 : index
    %324 = memref.load %arg2[%c324] : memref<462xf32, #tpu.memory_space<smem>>
    %c325 = arith.constant 325 : index
    %325 = memref.load %arg2[%c325] : memref<462xf32, #tpu.memory_space<smem>>
    %c326 = arith.constant 326 : index
    %326 = memref.load %arg2[%c326] : memref<462xf32, #tpu.memory_space<smem>>
    %c327 = arith.constant 327 : index
    %327 = memref.load %arg2[%c327] : memref<462xf32, #tpu.memory_space<smem>>
    %c328 = arith.constant 328 : index
    %328 = memref.load %arg2[%c328] : memref<462xf32, #tpu.memory_space<smem>>
    %c329 = arith.constant 329 : index
    %329 = memref.load %arg2[%c329] : memref<462xf32, #tpu.memory_space<smem>>
    %c330 = arith.constant 330 : index
    %330 = memref.load %arg2[%c330] : memref<462xf32, #tpu.memory_space<smem>>
    %c331 = arith.constant 331 : index
    %331 = memref.load %arg2[%c331] : memref<462xf32, #tpu.memory_space<smem>>
    %c332 = arith.constant 332 : index
    %332 = memref.load %arg2[%c332] : memref<462xf32, #tpu.memory_space<smem>>
    %c333 = arith.constant 333 : index
    %333 = memref.load %arg2[%c333] : memref<462xf32, #tpu.memory_space<smem>>
    %c334 = arith.constant 334 : index
    %334 = memref.load %arg2[%c334] : memref<462xf32, #tpu.memory_space<smem>>
    %c335 = arith.constant 335 : index
    %335 = memref.load %arg2[%c335] : memref<462xf32, #tpu.memory_space<smem>>
    %c336 = arith.constant 336 : index
    %336 = memref.load %arg2[%c336] : memref<462xf32, #tpu.memory_space<smem>>
    %c337 = arith.constant 337 : index
    %337 = memref.load %arg2[%c337] : memref<462xf32, #tpu.memory_space<smem>>
    %c338 = arith.constant 338 : index
    %338 = memref.load %arg2[%c338] : memref<462xf32, #tpu.memory_space<smem>>
    %c339 = arith.constant 339 : index
    %339 = memref.load %arg2[%c339] : memref<462xf32, #tpu.memory_space<smem>>
    %c340 = arith.constant 340 : index
    %340 = memref.load %arg2[%c340] : memref<462xf32, #tpu.memory_space<smem>>
    %c341 = arith.constant 341 : index
    %341 = memref.load %arg2[%c341] : memref<462xf32, #tpu.memory_space<smem>>
    %c342 = arith.constant 342 : index
    %342 = memref.load %arg2[%c342] : memref<462xf32, #tpu.memory_space<smem>>
    %c343 = arith.constant 343 : index
    %343 = memref.load %arg2[%c343] : memref<462xf32, #tpu.memory_space<smem>>
    %c344 = arith.constant 344 : index
    %344 = memref.load %arg2[%c344] : memref<462xf32, #tpu.memory_space<smem>>
    %c345 = arith.constant 345 : index
    %345 = memref.load %arg2[%c345] : memref<462xf32, #tpu.memory_space<smem>>
    %c346 = arith.constant 346 : index
    %346 = memref.load %arg2[%c346] : memref<462xf32, #tpu.memory_space<smem>>
    %c347 = arith.constant 347 : index
    %347 = memref.load %arg2[%c347] : memref<462xf32, #tpu.memory_space<smem>>
    %c348 = arith.constant 348 : index
    %348 = memref.load %arg2[%c348] : memref<462xf32, #tpu.memory_space<smem>>
    %c349 = arith.constant 349 : index
    %349 = memref.load %arg2[%c349] : memref<462xf32, #tpu.memory_space<smem>>
    %c350 = arith.constant 350 : index
    %350 = memref.load %arg2[%c350] : memref<462xf32, #tpu.memory_space<smem>>
    %c351 = arith.constant 351 : index
    %351 = memref.load %arg2[%c351] : memref<462xf32, #tpu.memory_space<smem>>
    %c352 = arith.constant 352 : index
    %352 = memref.load %arg2[%c352] : memref<462xf32, #tpu.memory_space<smem>>
    %c353 = arith.constant 353 : index
    %353 = memref.load %arg2[%c353] : memref<462xf32, #tpu.memory_space<smem>>
    %c354 = arith.constant 354 : index
    %354 = memref.load %arg2[%c354] : memref<462xf32, #tpu.memory_space<smem>>
    %c355 = arith.constant 355 : index
    %355 = memref.load %arg2[%c355] : memref<462xf32, #tpu.memory_space<smem>>
    %c356 = arith.constant 356 : index
    %356 = memref.load %arg2[%c356] : memref<462xf32, #tpu.memory_space<smem>>
    %c357 = arith.constant 357 : index
    %357 = memref.load %arg2[%c357] : memref<462xf32, #tpu.memory_space<smem>>
    %c358 = arith.constant 358 : index
    %358 = memref.load %arg2[%c358] : memref<462xf32, #tpu.memory_space<smem>>
    %c359 = arith.constant 359 : index
    %359 = memref.load %arg2[%c359] : memref<462xf32, #tpu.memory_space<smem>>
    %c360 = arith.constant 360 : index
    %360 = memref.load %arg2[%c360] : memref<462xf32, #tpu.memory_space<smem>>
    %c361 = arith.constant 361 : index
    %361 = memref.load %arg2[%c361] : memref<462xf32, #tpu.memory_space<smem>>
    %c362 = arith.constant 362 : index
    %362 = memref.load %arg2[%c362] : memref<462xf32, #tpu.memory_space<smem>>
    %c363 = arith.constant 363 : index
    %363 = memref.load %arg2[%c363] : memref<462xf32, #tpu.memory_space<smem>>
    %c364 = arith.constant 364 : index
    %364 = memref.load %arg2[%c364] : memref<462xf32, #tpu.memory_space<smem>>
    %c365 = arith.constant 365 : index
    %365 = memref.load %arg2[%c365] : memref<462xf32, #tpu.memory_space<smem>>
    %c366 = arith.constant 366 : index
    %366 = memref.load %arg2[%c366] : memref<462xf32, #tpu.memory_space<smem>>
    %c367 = arith.constant 367 : index
    %367 = memref.load %arg2[%c367] : memref<462xf32, #tpu.memory_space<smem>>
    %c368 = arith.constant 368 : index
    %368 = memref.load %arg2[%c368] : memref<462xf32, #tpu.memory_space<smem>>
    %c369 = arith.constant 369 : index
    %369 = memref.load %arg2[%c369] : memref<462xf32, #tpu.memory_space<smem>>
    %c370 = arith.constant 370 : index
    %370 = memref.load %arg2[%c370] : memref<462xf32, #tpu.memory_space<smem>>
    %c371 = arith.constant 371 : index
    %371 = memref.load %arg2[%c371] : memref<462xf32, #tpu.memory_space<smem>>
    %c372 = arith.constant 372 : index
    %372 = memref.load %arg2[%c372] : memref<462xf32, #tpu.memory_space<smem>>
    %c373 = arith.constant 373 : index
    %373 = memref.load %arg2[%c373] : memref<462xf32, #tpu.memory_space<smem>>
    %c374 = arith.constant 374 : index
    %374 = memref.load %arg2[%c374] : memref<462xf32, #tpu.memory_space<smem>>
    %c375 = arith.constant 375 : index
    %375 = memref.load %arg2[%c375] : memref<462xf32, #tpu.memory_space<smem>>
    %c376 = arith.constant 376 : index
    %376 = memref.load %arg2[%c376] : memref<462xf32, #tpu.memory_space<smem>>
    %c377 = arith.constant 377 : index
    %377 = memref.load %arg2[%c377] : memref<462xf32, #tpu.memory_space<smem>>
    %c378 = arith.constant 378 : index
    %378 = memref.load %arg2[%c378] : memref<462xf32, #tpu.memory_space<smem>>
    %c379 = arith.constant 379 : index
    %379 = memref.load %arg2[%c379] : memref<462xf32, #tpu.memory_space<smem>>
    %c380 = arith.constant 380 : index
    %380 = memref.load %arg2[%c380] : memref<462xf32, #tpu.memory_space<smem>>
    %c381 = arith.constant 381 : index
    %381 = memref.load %arg2[%c381] : memref<462xf32, #tpu.memory_space<smem>>
    %c382 = arith.constant 382 : index
    %382 = memref.load %arg2[%c382] : memref<462xf32, #tpu.memory_space<smem>>
    %c383 = arith.constant 383 : index
    %383 = memref.load %arg2[%c383] : memref<462xf32, #tpu.memory_space<smem>>
    %c384 = arith.constant 384 : index
    %384 = memref.load %arg2[%c384] : memref<462xf32, #tpu.memory_space<smem>>
    %c385 = arith.constant 385 : index
    %385 = memref.load %arg2[%c385] : memref<462xf32, #tpu.memory_space<smem>>
    %c386 = arith.constant 386 : index
    %386 = memref.load %arg2[%c386] : memref<462xf32, #tpu.memory_space<smem>>
    %c387 = arith.constant 387 : index
    %387 = memref.load %arg2[%c387] : memref<462xf32, #tpu.memory_space<smem>>
    %c388 = arith.constant 388 : index
    %388 = memref.load %arg2[%c388] : memref<462xf32, #tpu.memory_space<smem>>
    %c389 = arith.constant 389 : index
    %389 = memref.load %arg2[%c389] : memref<462xf32, #tpu.memory_space<smem>>
    %c390 = arith.constant 390 : index
    %390 = memref.load %arg2[%c390] : memref<462xf32, #tpu.memory_space<smem>>
    %c391 = arith.constant 391 : index
    %391 = memref.load %arg2[%c391] : memref<462xf32, #tpu.memory_space<smem>>
    %c392 = arith.constant 392 : index
    %392 = memref.load %arg2[%c392] : memref<462xf32, #tpu.memory_space<smem>>
    %c393 = arith.constant 393 : index
    %393 = memref.load %arg2[%c393] : memref<462xf32, #tpu.memory_space<smem>>
    %c394 = arith.constant 394 : index
    %394 = memref.load %arg2[%c394] : memref<462xf32, #tpu.memory_space<smem>>
    %c395 = arith.constant 395 : index
    %395 = memref.load %arg2[%c395] : memref<462xf32, #tpu.memory_space<smem>>
    %c396 = arith.constant 396 : index
    %396 = memref.load %arg2[%c396] : memref<462xf32, #tpu.memory_space<smem>>
    %c397 = arith.constant 397 : index
    %397 = memref.load %arg2[%c397] : memref<462xf32, #tpu.memory_space<smem>>
    %c398 = arith.constant 398 : index
    %398 = memref.load %arg2[%c398] : memref<462xf32, #tpu.memory_space<smem>>
    %c399 = arith.constant 399 : index
    %399 = memref.load %arg2[%c399] : memref<462xf32, #tpu.memory_space<smem>>
    %c400 = arith.constant 400 : index
    %400 = memref.load %arg2[%c400] : memref<462xf32, #tpu.memory_space<smem>>
    %c401 = arith.constant 401 : index
    %401 = memref.load %arg2[%c401] : memref<462xf32, #tpu.memory_space<smem>>
    %c402 = arith.constant 402 : index
    %402 = memref.load %arg2[%c402] : memref<462xf32, #tpu.memory_space<smem>>
    %c403 = arith.constant 403 : index
    %403 = memref.load %arg2[%c403] : memref<462xf32, #tpu.memory_space<smem>>
    %c404 = arith.constant 404 : index
    %404 = memref.load %arg2[%c404] : memref<462xf32, #tpu.memory_space<smem>>
    %c405 = arith.constant 405 : index
    %405 = memref.load %arg2[%c405] : memref<462xf32, #tpu.memory_space<smem>>
    %c406 = arith.constant 406 : index
    %406 = memref.load %arg2[%c406] : memref<462xf32, #tpu.memory_space<smem>>
    %c407 = arith.constant 407 : index
    %407 = memref.load %arg2[%c407] : memref<462xf32, #tpu.memory_space<smem>>
    %c408 = arith.constant 408 : index
    %408 = memref.load %arg2[%c408] : memref<462xf32, #tpu.memory_space<smem>>
    %c409 = arith.constant 409 : index
    %409 = memref.load %arg2[%c409] : memref<462xf32, #tpu.memory_space<smem>>
    %c410 = arith.constant 410 : index
    %410 = memref.load %arg2[%c410] : memref<462xf32, #tpu.memory_space<smem>>
    %c411 = arith.constant 411 : index
    %411 = memref.load %arg2[%c411] : memref<462xf32, #tpu.memory_space<smem>>
    %c412 = arith.constant 412 : index
    %412 = memref.load %arg2[%c412] : memref<462xf32, #tpu.memory_space<smem>>
    %c413 = arith.constant 413 : index
    %413 = memref.load %arg2[%c413] : memref<462xf32, #tpu.memory_space<smem>>
    %c414 = arith.constant 414 : index
    %414 = memref.load %arg2[%c414] : memref<462xf32, #tpu.memory_space<smem>>
    %c415 = arith.constant 415 : index
    %415 = memref.load %arg2[%c415] : memref<462xf32, #tpu.memory_space<smem>>
    %c416 = arith.constant 416 : index
    %416 = memref.load %arg2[%c416] : memref<462xf32, #tpu.memory_space<smem>>
    %c417 = arith.constant 417 : index
    %417 = memref.load %arg2[%c417] : memref<462xf32, #tpu.memory_space<smem>>
    %c418 = arith.constant 418 : index
    %418 = memref.load %arg2[%c418] : memref<462xf32, #tpu.memory_space<smem>>
    %c419 = arith.constant 419 : index
    %419 = memref.load %arg2[%c419] : memref<462xf32, #tpu.memory_space<smem>>
    %c420 = arith.constant 420 : index
    %420 = memref.load %arg2[%c420] : memref<462xf32, #tpu.memory_space<smem>>
    %c421 = arith.constant 421 : index
    %421 = memref.load %arg2[%c421] : memref<462xf32, #tpu.memory_space<smem>>
    %c422 = arith.constant 422 : index
    %422 = memref.load %arg2[%c422] : memref<462xf32, #tpu.memory_space<smem>>
    %c423 = arith.constant 423 : index
    %423 = memref.load %arg2[%c423] : memref<462xf32, #tpu.memory_space<smem>>
    %c424 = arith.constant 424 : index
    %424 = memref.load %arg2[%c424] : memref<462xf32, #tpu.memory_space<smem>>
    %c425 = arith.constant 425 : index
    %425 = memref.load %arg2[%c425] : memref<462xf32, #tpu.memory_space<smem>>
    %c426 = arith.constant 426 : index
    %426 = memref.load %arg2[%c426] : memref<462xf32, #tpu.memory_space<smem>>
    %c427 = arith.constant 427 : index
    %427 = memref.load %arg2[%c427] : memref<462xf32, #tpu.memory_space<smem>>
    %c428 = arith.constant 428 : index
    %428 = memref.load %arg2[%c428] : memref<462xf32, #tpu.memory_space<smem>>
    %c429 = arith.constant 429 : index
    %429 = memref.load %arg2[%c429] : memref<462xf32, #tpu.memory_space<smem>>
    %c430 = arith.constant 430 : index
    %430 = memref.load %arg2[%c430] : memref<462xf32, #tpu.memory_space<smem>>
    %c431 = arith.constant 431 : index
    %431 = memref.load %arg2[%c431] : memref<462xf32, #tpu.memory_space<smem>>
    %c432 = arith.constant 432 : index
    %432 = memref.load %arg2[%c432] : memref<462xf32, #tpu.memory_space<smem>>
    %c433 = arith.constant 433 : index
    %433 = memref.load %arg2[%c433] : memref<462xf32, #tpu.memory_space<smem>>
    %c434 = arith.constant 434 : index
    %434 = memref.load %arg2[%c434] : memref<462xf32, #tpu.memory_space<smem>>
    %c435 = arith.constant 435 : index
    %435 = memref.load %arg2[%c435] : memref<462xf32, #tpu.memory_space<smem>>
    %c436 = arith.constant 436 : index
    %436 = memref.load %arg2[%c436] : memref<462xf32, #tpu.memory_space<smem>>
    %c437 = arith.constant 437 : index
    %437 = memref.load %arg2[%c437] : memref<462xf32, #tpu.memory_space<smem>>
    %c438 = arith.constant 438 : index
    %438 = memref.load %arg2[%c438] : memref<462xf32, #tpu.memory_space<smem>>
    %c439 = arith.constant 439 : index
    %439 = memref.load %arg2[%c439] : memref<462xf32, #tpu.memory_space<smem>>
    %c440 = arith.constant 440 : index
    %440 = memref.load %arg2[%c440] : memref<462xf32, #tpu.memory_space<smem>>
    %c441 = arith.constant 441 : index
    %441 = memref.load %arg2[%c441] : memref<462xf32, #tpu.memory_space<smem>>
    %c442 = arith.constant 442 : index
    %442 = memref.load %arg2[%c442] : memref<462xf32, #tpu.memory_space<smem>>
    %c443 = arith.constant 443 : index
    %443 = memref.load %arg2[%c443] : memref<462xf32, #tpu.memory_space<smem>>
    %c444 = arith.constant 444 : index
    %444 = memref.load %arg2[%c444] : memref<462xf32, #tpu.memory_space<smem>>
    %c445 = arith.constant 445 : index
    %445 = memref.load %arg2[%c445] : memref<462xf32, #tpu.memory_space<smem>>
    %c446 = arith.constant 446 : index
    %446 = memref.load %arg2[%c446] : memref<462xf32, #tpu.memory_space<smem>>
    %c447 = arith.constant 447 : index
    %447 = memref.load %arg2[%c447] : memref<462xf32, #tpu.memory_space<smem>>
    %c448 = arith.constant 448 : index
    %448 = memref.load %arg2[%c448] : memref<462xf32, #tpu.memory_space<smem>>
    %c449 = arith.constant 449 : index
    %449 = memref.load %arg2[%c449] : memref<462xf32, #tpu.memory_space<smem>>
    %c450 = arith.constant 450 : index
    %450 = memref.load %arg2[%c450] : memref<462xf32, #tpu.memory_space<smem>>
    %c451 = arith.constant 451 : index
    %451 = memref.load %arg2[%c451] : memref<462xf32, #tpu.memory_space<smem>>
    %c452 = arith.constant 452 : index
    %452 = memref.load %arg2[%c452] : memref<462xf32, #tpu.memory_space<smem>>
    %c453 = arith.constant 453 : index
    %453 = memref.load %arg2[%c453] : memref<462xf32, #tpu.memory_space<smem>>
    %c454 = arith.constant 454 : index
    %454 = memref.load %arg2[%c454] : memref<462xf32, #tpu.memory_space<smem>>
    %c455 = arith.constant 455 : index
    %455 = memref.load %arg2[%c455] : memref<462xf32, #tpu.memory_space<smem>>
    %c456 = arith.constant 456 : index
    %456 = memref.load %arg2[%c456] : memref<462xf32, #tpu.memory_space<smem>>
    %c457 = arith.constant 457 : index
    %457 = memref.load %arg2[%c457] : memref<462xf32, #tpu.memory_space<smem>>
    %c458 = arith.constant 458 : index
    %458 = memref.load %arg2[%c458] : memref<462xf32, #tpu.memory_space<smem>>
    %c459 = arith.constant 459 : index
    %459 = memref.load %arg2[%c459] : memref<462xf32, #tpu.memory_space<smem>>
    %c460 = arith.constant 460 : index
    %460 = memref.load %arg2[%c460] : memref<462xf32, #tpu.memory_space<smem>>
    %c461 = arith.constant 461 : index
    %461 = memref.load %arg2[%c461] : memref<462xf32, #tpu.memory_space<smem>>
    %c0_0 = arith.constant 0 : index
    %c0_1 = arith.constant 0 : index
    %c0_2 = arith.constant 0 : index
    %462 = vector.load %arg1[%c0_0, %c0_1, %c0_2] : memref<2x16x128xf32, #tpu.memory_space<vmem>>, vector<2x16x128xf32>
    %463 = vector.extract_strided_slice %462 {offsets = [0, 0, 0], sizes = [1, 16, 128], strides = [1, 1, 1]} : vector<2x16x128xf32> to vector<1x16x128xf32>
    %464 = vector.shape_cast %463 : vector<1x16x128xf32> to vector<16x128xf32>
    %465 = vector.extract_strided_slice %462 {offsets = [1, 0, 0], sizes = [1, 16, 128], strides = [1, 1, 1]} : vector<2x16x128xf32> to vector<1x16x128xf32>
    %466 = vector.shape_cast %465 : vector<1x16x128xf32> to vector<16x128xf32>
    %467 = arith.mulf %0, %16 : f32
    %468 = arith.mulf %1, %20 : f32
    %469 = arith.addf %467, %468 : f32
    %470 = arith.mulf %2, %24 : f32
    %471 = arith.addf %469, %470 : f32
    %472 = arith.mulf %3, %28 : f32
    %473 = arith.addf %471, %472 : f32
    %474 = arith.addf %473, %32 : f32
    %475 = arith.mulf %0, %17 : f32
    %476 = arith.mulf %1, %21 : f32
    %477 = arith.addf %475, %476 : f32
    %478 = arith.mulf %2, %25 : f32
    %479 = arith.addf %477, %478 : f32
    %480 = arith.mulf %3, %29 : f32
    %481 = arith.addf %479, %480 : f32
    %482 = arith.addf %481, %33 : f32
    %483 = arith.mulf %0, %18 : f32
    %484 = arith.mulf %1, %22 : f32
    %485 = arith.addf %483, %484 : f32
    %486 = arith.mulf %2, %26 : f32
    %487 = arith.addf %485, %486 : f32
    %488 = arith.mulf %3, %30 : f32
    %489 = arith.addf %487, %488 : f32
    %490 = arith.addf %489, %34 : f32
    %491 = arith.mulf %0, %19 : f32
    %492 = arith.mulf %1, %23 : f32
    %493 = arith.addf %491, %492 : f32
    %494 = arith.mulf %2, %27 : f32
    %495 = arith.addf %493, %494 : f32
    %496 = arith.mulf %3, %31 : f32
    %497 = arith.addf %495, %496 : f32
    %498 = arith.addf %497, %35 : f32
    %499 = arith.mulf %4, %16 : f32
    %500 = arith.mulf %5, %20 : f32
    %501 = arith.addf %499, %500 : f32
    %502 = arith.mulf %6, %24 : f32
    %503 = arith.addf %501, %502 : f32
    %504 = arith.mulf %7, %28 : f32
    %505 = arith.addf %503, %504 : f32
    %506 = arith.addf %505, %32 : f32
    %507 = arith.mulf %4, %17 : f32
    %508 = arith.mulf %5, %21 : f32
    %509 = arith.addf %507, %508 : f32
    %510 = arith.mulf %6, %25 : f32
    %511 = arith.addf %509, %510 : f32
    %512 = arith.mulf %7, %29 : f32
    %513 = arith.addf %511, %512 : f32
    %514 = arith.addf %513, %33 : f32
    %515 = arith.mulf %4, %18 : f32
    %516 = arith.mulf %5, %22 : f32
    %517 = arith.addf %515, %516 : f32
    %518 = arith.mulf %6, %26 : f32
    %519 = arith.addf %517, %518 : f32
    %520 = arith.mulf %7, %30 : f32
    %521 = arith.addf %519, %520 : f32
    %522 = arith.addf %521, %34 : f32
    %523 = arith.mulf %4, %19 : f32
    %524 = arith.mulf %5, %23 : f32
    %525 = arith.addf %523, %524 : f32
    %526 = arith.mulf %6, %27 : f32
    %527 = arith.addf %525, %526 : f32
    %528 = arith.mulf %7, %31 : f32
    %529 = arith.addf %527, %528 : f32
    %530 = arith.addf %529, %35 : f32
    %531 = arith.mulf %8, %16 : f32
    %532 = arith.mulf %9, %20 : f32
    %533 = arith.addf %531, %532 : f32
    %534 = arith.mulf %10, %24 : f32
    %535 = arith.addf %533, %534 : f32
    %536 = arith.mulf %11, %28 : f32
    %537 = arith.addf %535, %536 : f32
    %538 = arith.addf %537, %32 : f32
    %539 = arith.mulf %8, %17 : f32
    %540 = arith.mulf %9, %21 : f32
    %541 = arith.addf %539, %540 : f32
    %542 = arith.mulf %10, %25 : f32
    %543 = arith.addf %541, %542 : f32
    %544 = arith.mulf %11, %29 : f32
    %545 = arith.addf %543, %544 : f32
    %546 = arith.addf %545, %33 : f32
    %547 = arith.mulf %8, %18 : f32
    %548 = arith.mulf %9, %22 : f32
    %549 = arith.addf %547, %548 : f32
    %550 = arith.mulf %10, %26 : f32
    %551 = arith.addf %549, %550 : f32
    %552 = arith.mulf %11, %30 : f32
    %553 = arith.addf %551, %552 : f32
    %554 = arith.addf %553, %34 : f32
    %555 = arith.mulf %8, %19 : f32
    %556 = arith.mulf %9, %23 : f32
    %557 = arith.addf %555, %556 : f32
    %558 = arith.mulf %10, %27 : f32
    %559 = arith.addf %557, %558 : f32
    %560 = arith.mulf %11, %31 : f32
    %561 = arith.addf %559, %560 : f32
    %562 = arith.addf %561, %35 : f32
    %563 = arith.mulf %12, %16 : f32
    %564 = arith.mulf %13, %20 : f32
    %565 = arith.addf %563, %564 : f32
    %566 = arith.mulf %14, %24 : f32
    %567 = arith.addf %565, %566 : f32
    %568 = arith.mulf %15, %28 : f32
    %569 = arith.addf %567, %568 : f32
    %570 = arith.addf %569, %32 : f32
    %571 = arith.mulf %12, %17 : f32
    %572 = arith.mulf %13, %21 : f32
    %573 = arith.addf %571, %572 : f32
    %574 = arith.mulf %14, %25 : f32
    %575 = arith.addf %573, %574 : f32
    %576 = arith.mulf %15, %29 : f32
    %577 = arith.addf %575, %576 : f32
    %578 = arith.addf %577, %33 : f32
    %579 = arith.mulf %12, %18 : f32
    %580 = arith.mulf %13, %22 : f32
    %581 = arith.addf %579, %580 : f32
    %582 = arith.mulf %14, %26 : f32
    %583 = arith.addf %581, %582 : f32
    %584 = arith.mulf %15, %30 : f32
    %585 = arith.addf %583, %584 : f32
    %586 = arith.addf %585, %34 : f32
    %587 = arith.mulf %12, %19 : f32
    %588 = arith.mulf %13, %23 : f32
    %589 = arith.addf %587, %588 : f32
    %590 = arith.mulf %14, %27 : f32
    %591 = arith.addf %589, %590 : f32
    %592 = arith.mulf %15, %31 : f32
    %593 = arith.addf %591, %592 : f32
    %594 = arith.addf %593, %35 : f32
    %595 = vector.broadcast %36 : f32 to vector<16x128xf32>
    %596 = arith.mulf %464, %595 : vector<16x128xf32>
    %597 = vector.broadcast %40 : f32 to vector<16x128xf32>
    %598 = arith.mulf %466, %597 : vector<16x128xf32>
    %599 = arith.addf %596, %598 : vector<16x128xf32>
    %600 = vector.broadcast %44 : f32 to vector<16x128xf32>
    %601 = arith.addf %599, %600 : vector<16x128xf32>
    %602 = vector.broadcast %37 : f32 to vector<16x128xf32>
    %603 = arith.mulf %464, %602 : vector<16x128xf32>
    %604 = vector.broadcast %41 : f32 to vector<16x128xf32>
    %605 = arith.mulf %466, %604 : vector<16x128xf32>
    %606 = arith.addf %603, %605 : vector<16x128xf32>
    %607 = vector.broadcast %45 : f32 to vector<16x128xf32>
    %608 = arith.addf %606, %607 : vector<16x128xf32>
    %609 = vector.broadcast %38 : f32 to vector<16x128xf32>
    %610 = arith.mulf %464, %609 : vector<16x128xf32>
    %611 = vector.broadcast %42 : f32 to vector<16x128xf32>
    %612 = arith.mulf %466, %611 : vector<16x128xf32>
    %613 = arith.addf %610, %612 : vector<16x128xf32>
    %614 = vector.broadcast %46 : f32 to vector<16x128xf32>
    %615 = arith.addf %613, %614 : vector<16x128xf32>
    %616 = vector.broadcast %39 : f32 to vector<16x128xf32>
    %617 = arith.mulf %464, %616 : vector<16x128xf32>
    %618 = vector.broadcast %43 : f32 to vector<16x128xf32>
    %619 = arith.mulf %466, %618 : vector<16x128xf32>
    %620 = arith.addf %617, %619 : vector<16x128xf32>
    %621 = vector.broadcast %47 : f32 to vector<16x128xf32>
    %622 = arith.addf %620, %621 : vector<16x128xf32>
    %623 = vector.broadcast %48 : f32 to vector<16x128xf32>
    %624 = arith.mulf %464, %623 : vector<16x128xf32>
    %625 = vector.broadcast %52 : f32 to vector<16x128xf32>
    %626 = arith.mulf %466, %625 : vector<16x128xf32>
    %627 = arith.addf %624, %626 : vector<16x128xf32>
    %628 = vector.broadcast %56 : f32 to vector<16x128xf32>
    %629 = arith.addf %627, %628 : vector<16x128xf32>
    %630 = vector.broadcast %49 : f32 to vector<16x128xf32>
    %631 = arith.mulf %464, %630 : vector<16x128xf32>
    %632 = vector.broadcast %53 : f32 to vector<16x128xf32>
    %633 = arith.mulf %466, %632 : vector<16x128xf32>
    %634 = arith.addf %631, %633 : vector<16x128xf32>
    %635 = vector.broadcast %57 : f32 to vector<16x128xf32>
    %636 = arith.addf %634, %635 : vector<16x128xf32>
    %637 = vector.broadcast %50 : f32 to vector<16x128xf32>
    %638 = arith.mulf %464, %637 : vector<16x128xf32>
    %639 = vector.broadcast %54 : f32 to vector<16x128xf32>
    %640 = arith.mulf %466, %639 : vector<16x128xf32>
    %641 = arith.addf %638, %640 : vector<16x128xf32>
    %642 = vector.broadcast %58 : f32 to vector<16x128xf32>
    %643 = arith.addf %641, %642 : vector<16x128xf32>
    %644 = vector.broadcast %51 : f32 to vector<16x128xf32>
    %645 = arith.mulf %464, %644 : vector<16x128xf32>
    %646 = vector.broadcast %55 : f32 to vector<16x128xf32>
    %647 = arith.mulf %466, %646 : vector<16x128xf32>
    %648 = arith.addf %645, %647 : vector<16x128xf32>
    %649 = vector.broadcast %59 : f32 to vector<16x128xf32>
    %650 = arith.addf %648, %649 : vector<16x128xf32>
    %cst = arith.constant 5.000000e-01 : f32
    %651 = arith.mulf %474, %cst : f32
    %652 = vector.broadcast %651 : f32 to vector<16x128xf32>
    %653 = arith.mulf %601, %652 : vector<16x128xf32>
    %cst_3 = arith.constant 5.000000e-01 : f32
    %654 = arith.mulf %482, %cst_3 : f32
    %655 = vector.broadcast %654 : f32 to vector<16x128xf32>
    %656 = arith.mulf %608, %655 : vector<16x128xf32>
    %657 = arith.addf %653, %656 : vector<16x128xf32>
    %cst_4 = arith.constant dense<0xFF800000> : vector<128xf32>
    %658 = vector.multi_reduction <maximumf>, %657, %cst_4 [0] : vector<16x128xf32> to vector<128xf32>
    %659 = vector.shape_cast %658 : vector<128xf32> to vector<1x128xf32>
    %660 = vector.broadcast %659 : vector<1x128xf32> to vector<16x128xf32>
    %661 = arith.subf %657, %660 : vector<16x128xf32>
    %662 = math.exp %661 : vector<16x128xf32>
    %cst_5 = arith.constant dense<0.000000e+00> : vector<128xf32>
    %663 = vector.multi_reduction <add>, %662, %cst_5 [0] : vector<16x128xf32> to vector<128xf32>
    %664 = vector.shape_cast %663 : vector<128xf32> to vector<1x128xf32>
    %665 = tpu.reciprocal %664 {approx = true} : vector<1x128xf32> -> vector<1x128xf32>
    %666 = vector.broadcast %665 : vector<1x128xf32> to vector<16x128xf32>
    %667 = arith.mulf %662, %666 : vector<16x128xf32>
    %668 = arith.mulf %667, %629 : vector<16x128xf32>
    %cst_6 = arith.constant dense<0.000000e+00> : vector<128xf32>
    %669 = vector.multi_reduction <add>, %668, %cst_6 [0] : vector<16x128xf32> to vector<128xf32>
    %670 = vector.shape_cast %669 : vector<128xf32> to vector<1x128xf32>
    %671 = vector.broadcast %474 : f32 to vector<1x128xf32>
    %672 = arith.addf %670, %671 : vector<1x128xf32>
    %673 = arith.mulf %667, %636 : vector<16x128xf32>
    %cst_7 = arith.constant dense<0.000000e+00> : vector<128xf32>
    %674 = vector.multi_reduction <add>, %673, %cst_7 [0] : vector<16x128xf32> to vector<128xf32>
    %675 = vector.shape_cast %674 : vector<128xf32> to vector<1x128xf32>
    %676 = vector.broadcast %482 : f32 to vector<1x128xf32>
    %677 = arith.addf %675, %676 : vector<1x128xf32>
    %cst_8 = arith.constant 5.000000e-01 : f32
    %678 = arith.mulf %490, %cst_8 : f32
    %679 = vector.broadcast %678 : f32 to vector<16x128xf32>
    %680 = arith.mulf %615, %679 : vector<16x128xf32>
    %cst_9 = arith.constant 5.000000e-01 : f32
    %681 = arith.mulf %498, %cst_9 : f32
    %682 = vector.broadcast %681 : f32 to vector<16x128xf32>
    %683 = arith.mulf %622, %682 : vector<16x128xf32>
    %684 = arith.addf %680, %683 : vector<16x128xf32>
    %cst_10 = arith.constant dense<0xFF800000> : vector<128xf32>
    %685 = vector.multi_reduction <maximumf>, %684, %cst_10 [0] : vector<16x128xf32> to vector<128xf32>
    %686 = vector.shape_cast %685 : vector<128xf32> to vector<1x128xf32>
    %687 = vector.broadcast %686 : vector<1x128xf32> to vector<16x128xf32>
    %688 = arith.subf %684, %687 : vector<16x128xf32>
    %689 = math.exp %688 : vector<16x128xf32>
    %cst_11 = arith.constant dense<0.000000e+00> : vector<128xf32>
    %690 = vector.multi_reduction <add>, %689, %cst_11 [0] : vector<16x128xf32> to vector<128xf32>
    %691 = vector.shape_cast %690 : vector<128xf32> to vector<1x128xf32>
    %692 = tpu.reciprocal %691 {approx = true} : vector<1x128xf32> -> vector<1x128xf32>
    %693 = vector.broadcast %692 : vector<1x128xf32> to vector<16x128xf32>
    %694 = arith.mulf %689, %693 : vector<16x128xf32>
    %695 = arith.mulf %694, %643 : vector<16x128xf32>
    %cst_12 = arith.constant dense<0.000000e+00> : vector<128xf32>
    %696 = vector.multi_reduction <add>, %695, %cst_12 [0] : vector<16x128xf32> to vector<128xf32>
    %697 = vector.shape_cast %696 : vector<128xf32> to vector<1x128xf32>
    %698 = vector.broadcast %490 : f32 to vector<1x128xf32>
    %699 = arith.addf %697, %698 : vector<1x128xf32>
    %700 = arith.mulf %694, %650 : vector<16x128xf32>
    %cst_13 = arith.constant dense<0.000000e+00> : vector<128xf32>
    %701 = vector.multi_reduction <add>, %700, %cst_13 [0] : vector<16x128xf32> to vector<128xf32>
    %702 = vector.shape_cast %701 : vector<128xf32> to vector<1x128xf32>
    %703 = vector.broadcast %498 : f32 to vector<1x128xf32>
    %704 = arith.addf %702, %703 : vector<1x128xf32>
    %cst_14 = arith.constant 5.000000e-01 : f32
    %705 = arith.mulf %506, %cst_14 : f32
    %706 = vector.broadcast %705 : f32 to vector<16x128xf32>
    %707 = arith.mulf %601, %706 : vector<16x128xf32>
    %cst_15 = arith.constant 5.000000e-01 : f32
    %708 = arith.mulf %514, %cst_15 : f32
    %709 = vector.broadcast %708 : f32 to vector<16x128xf32>
    %710 = arith.mulf %608, %709 : vector<16x128xf32>
    %711 = arith.addf %707, %710 : vector<16x128xf32>
    %cst_16 = arith.constant dense<0xFF800000> : vector<128xf32>
    %712 = vector.multi_reduction <maximumf>, %711, %cst_16 [0] : vector<16x128xf32> to vector<128xf32>
    %713 = vector.shape_cast %712 : vector<128xf32> to vector<1x128xf32>
    %714 = vector.broadcast %713 : vector<1x128xf32> to vector<16x128xf32>
    %715 = arith.subf %711, %714 : vector<16x128xf32>
    %716 = math.exp %715 : vector<16x128xf32>
    %cst_17 = arith.constant dense<0.000000e+00> : vector<128xf32>
    %717 = vector.multi_reduction <add>, %716, %cst_17 [0] : vector<16x128xf32> to vector<128xf32>
    %718 = vector.shape_cast %717 : vector<128xf32> to vector<1x128xf32>
    %719 = tpu.reciprocal %718 {approx = true} : vector<1x128xf32> -> vector<1x128xf32>
    %720 = vector.broadcast %719 : vector<1x128xf32> to vector<16x128xf32>
    %721 = arith.mulf %716, %720 : vector<16x128xf32>
    %722 = arith.mulf %721, %629 : vector<16x128xf32>
    %cst_18 = arith.constant dense<0.000000e+00> : vector<128xf32>
    %723 = vector.multi_reduction <add>, %722, %cst_18 [0] : vector<16x128xf32> to vector<128xf32>
    %724 = vector.shape_cast %723 : vector<128xf32> to vector<1x128xf32>
    %725 = vector.broadcast %506 : f32 to vector<1x128xf32>
    %726 = arith.addf %724, %725 : vector<1x128xf32>
    %727 = arith.mulf %721, %636 : vector<16x128xf32>
    %cst_19 = arith.constant dense<0.000000e+00> : vector<128xf32>
    %728 = vector.multi_reduction <add>, %727, %cst_19 [0] : vector<16x128xf32> to vector<128xf32>
    %729 = vector.shape_cast %728 : vector<128xf32> to vector<1x128xf32>
    %730 = vector.broadcast %514 : f32 to vector<1x128xf32>
    %731 = arith.addf %729, %730 : vector<1x128xf32>
    %cst_20 = arith.constant 5.000000e-01 : f32
    %732 = arith.mulf %522, %cst_20 : f32
    %733 = vector.broadcast %732 : f32 to vector<16x128xf32>
    %734 = arith.mulf %615, %733 : vector<16x128xf32>
    %cst_21 = arith.constant 5.000000e-01 : f32
    %735 = arith.mulf %530, %cst_21 : f32
    %736 = vector.broadcast %735 : f32 to vector<16x128xf32>
    %737 = arith.mulf %622, %736 : vector<16x128xf32>
    %738 = arith.addf %734, %737 : vector<16x128xf32>
    %cst_22 = arith.constant dense<0xFF800000> : vector<128xf32>
    %739 = vector.multi_reduction <maximumf>, %738, %cst_22 [0] : vector<16x128xf32> to vector<128xf32>
    %740 = vector.shape_cast %739 : vector<128xf32> to vector<1x128xf32>
    %741 = vector.broadcast %740 : vector<1x128xf32> to vector<16x128xf32>
    %742 = arith.subf %738, %741 : vector<16x128xf32>
    %743 = math.exp %742 : vector<16x128xf32>
    %cst_23 = arith.constant dense<0.000000e+00> : vector<128xf32>
    %744 = vector.multi_reduction <add>, %743, %cst_23 [0] : vector<16x128xf32> to vector<128xf32>
    %745 = vector.shape_cast %744 : vector<128xf32> to vector<1x128xf32>
    %746 = tpu.reciprocal %745 {approx = true} : vector<1x128xf32> -> vector<1x128xf32>
    %747 = vector.broadcast %746 : vector<1x128xf32> to vector<16x128xf32>
    %748 = arith.mulf %743, %747 : vector<16x128xf32>
    %749 = arith.mulf %748, %643 : vector<16x128xf32>
    %cst_24 = arith.constant dense<0.000000e+00> : vector<128xf32>
    %750 = vector.multi_reduction <add>, %749, %cst_24 [0] : vector<16x128xf32> to vector<128xf32>
    %751 = vector.shape_cast %750 : vector<128xf32> to vector<1x128xf32>
    %752 = vector.broadcast %522 : f32 to vector<1x128xf32>
    %753 = arith.addf %751, %752 : vector<1x128xf32>
    %754 = arith.mulf %748, %650 : vector<16x128xf32>
    %cst_25 = arith.constant dense<0.000000e+00> : vector<128xf32>
    %755 = vector.multi_reduction <add>, %754, %cst_25 [0] : vector<16x128xf32> to vector<128xf32>
    %756 = vector.shape_cast %755 : vector<128xf32> to vector<1x128xf32>
    %757 = vector.broadcast %530 : f32 to vector<1x128xf32>
    %758 = arith.addf %756, %757 : vector<1x128xf32>
    %cst_26 = arith.constant 5.000000e-01 : f32
    %759 = arith.mulf %538, %cst_26 : f32
    %760 = vector.broadcast %759 : f32 to vector<16x128xf32>
    %761 = arith.mulf %601, %760 : vector<16x128xf32>
    %cst_27 = arith.constant 5.000000e-01 : f32
    %762 = arith.mulf %546, %cst_27 : f32
    %763 = vector.broadcast %762 : f32 to vector<16x128xf32>
    %764 = arith.mulf %608, %763 : vector<16x128xf32>
    %765 = arith.addf %761, %764 : vector<16x128xf32>
    %cst_28 = arith.constant dense<0xFF800000> : vector<128xf32>
    %766 = vector.multi_reduction <maximumf>, %765, %cst_28 [0] : vector<16x128xf32> to vector<128xf32>
    %767 = vector.shape_cast %766 : vector<128xf32> to vector<1x128xf32>
    %768 = vector.broadcast %767 : vector<1x128xf32> to vector<16x128xf32>
    %769 = arith.subf %765, %768 : vector<16x128xf32>
    %770 = math.exp %769 : vector<16x128xf32>
    %cst_29 = arith.constant dense<0.000000e+00> : vector<128xf32>
    %771 = vector.multi_reduction <add>, %770, %cst_29 [0] : vector<16x128xf32> to vector<128xf32>
    %772 = vector.shape_cast %771 : vector<128xf32> to vector<1x128xf32>
    %773 = tpu.reciprocal %772 {approx = true} : vector<1x128xf32> -> vector<1x128xf32>
    %774 = vector.broadcast %773 : vector<1x128xf32> to vector<16x128xf32>
    %775 = arith.mulf %770, %774 : vector<16x128xf32>
    %776 = arith.mulf %775, %629 : vector<16x128xf32>
    %cst_30 = arith.constant dense<0.000000e+00> : vector<128xf32>
    %777 = vector.multi_reduction <add>, %776, %cst_30 [0] : vector<16x128xf32> to vector<128xf32>
    %778 = vector.shape_cast %777 : vector<128xf32> to vector<1x128xf32>
    %779 = vector.broadcast %538 : f32 to vector<1x128xf32>
    %780 = arith.addf %778, %779 : vector<1x128xf32>
    %781 = arith.mulf %775, %636 : vector<16x128xf32>
    %cst_31 = arith.constant dense<0.000000e+00> : vector<128xf32>
    %782 = vector.multi_reduction <add>, %781, %cst_31 [0] : vector<16x128xf32> to vector<128xf32>
    %783 = vector.shape_cast %782 : vector<128xf32> to vector<1x128xf32>
    %784 = vector.broadcast %546 : f32 to vector<1x128xf32>
    %785 = arith.addf %783, %784 : vector<1x128xf32>
    %cst_32 = arith.constant 5.000000e-01 : f32
    %786 = arith.mulf %554, %cst_32 : f32
    %787 = vector.broadcast %786 : f32 to vector<16x128xf32>
    %788 = arith.mulf %615, %787 : vector<16x128xf32>
    %cst_33 = arith.constant 5.000000e-01 : f32
    %789 = arith.mulf %562, %cst_33 : f32
    %790 = vector.broadcast %789 : f32 to vector<16x128xf32>
    %791 = arith.mulf %622, %790 : vector<16x128xf32>
    %792 = arith.addf %788, %791 : vector<16x128xf32>
    %cst_34 = arith.constant dense<0xFF800000> : vector<128xf32>
    %793 = vector.multi_reduction <maximumf>, %792, %cst_34 [0] : vector<16x128xf32> to vector<128xf32>
    %794 = vector.shape_cast %793 : vector<128xf32> to vector<1x128xf32>
    %795 = vector.broadcast %794 : vector<1x128xf32> to vector<16x128xf32>
    %796 = arith.subf %792, %795 : vector<16x128xf32>
    %797 = math.exp %796 : vector<16x128xf32>
    %cst_35 = arith.constant dense<0.000000e+00> : vector<128xf32>
    %798 = vector.multi_reduction <add>, %797, %cst_35 [0] : vector<16x128xf32> to vector<128xf32>
    %799 = vector.shape_cast %798 : vector<128xf32> to vector<1x128xf32>
    %800 = tpu.reciprocal %799 {approx = true} : vector<1x128xf32> -> vector<1x128xf32>
    %801 = vector.broadcast %800 : vector<1x128xf32> to vector<16x128xf32>
    %802 = arith.mulf %797, %801 : vector<16x128xf32>
    %803 = arith.mulf %802, %643 : vector<16x128xf32>
    %cst_36 = arith.constant dense<0.000000e+00> : vector<128xf32>
    %804 = vector.multi_reduction <add>, %803, %cst_36 [0] : vector<16x128xf32> to vector<128xf32>
    %805 = vector.shape_cast %804 : vector<128xf32> to vector<1x128xf32>
    %806 = vector.broadcast %554 : f32 to vector<1x128xf32>
    %807 = arith.addf %805, %806 : vector<1x128xf32>
    %808 = arith.mulf %802, %650 : vector<16x128xf32>
    %cst_37 = arith.constant dense<0.000000e+00> : vector<128xf32>
    %809 = vector.multi_reduction <add>, %808, %cst_37 [0] : vector<16x128xf32> to vector<128xf32>
    %810 = vector.shape_cast %809 : vector<128xf32> to vector<1x128xf32>
    %811 = vector.broadcast %562 : f32 to vector<1x128xf32>
    %812 = arith.addf %810, %811 : vector<1x128xf32>
    %cst_38 = arith.constant 5.000000e-01 : f32
    %813 = arith.mulf %570, %cst_38 : f32
    %814 = vector.broadcast %813 : f32 to vector<16x128xf32>
    %815 = arith.mulf %601, %814 : vector<16x128xf32>
    %cst_39 = arith.constant 5.000000e-01 : f32
    %816 = arith.mulf %578, %cst_39 : f32
    %817 = vector.broadcast %816 : f32 to vector<16x128xf32>
    %818 = arith.mulf %608, %817 : vector<16x128xf32>
    %819 = arith.addf %815, %818 : vector<16x128xf32>
    %cst_40 = arith.constant dense<0xFF800000> : vector<128xf32>
    %820 = vector.multi_reduction <maximumf>, %819, %cst_40 [0] : vector<16x128xf32> to vector<128xf32>
    %821 = vector.shape_cast %820 : vector<128xf32> to vector<1x128xf32>
    %822 = vector.broadcast %821 : vector<1x128xf32> to vector<16x128xf32>
    %823 = arith.subf %819, %822 : vector<16x128xf32>
    %824 = math.exp %823 : vector<16x128xf32>
    %cst_41 = arith.constant dense<0.000000e+00> : vector<128xf32>
    %825 = vector.multi_reduction <add>, %824, %cst_41 [0] : vector<16x128xf32> to vector<128xf32>
    %826 = vector.shape_cast %825 : vector<128xf32> to vector<1x128xf32>
    %827 = tpu.reciprocal %826 {approx = true} : vector<1x128xf32> -> vector<1x128xf32>
    %828 = vector.broadcast %827 : vector<1x128xf32> to vector<16x128xf32>
    %829 = arith.mulf %824, %828 : vector<16x128xf32>
    %830 = arith.mulf %829, %629 : vector<16x128xf32>
    %cst_42 = arith.constant dense<0.000000e+00> : vector<128xf32>
    %831 = vector.multi_reduction <add>, %830, %cst_42 [0] : vector<16x128xf32> to vector<128xf32>
    %832 = vector.shape_cast %831 : vector<128xf32> to vector<1x128xf32>
    %833 = vector.broadcast %570 : f32 to vector<1x128xf32>
    %834 = arith.addf %832, %833 : vector<1x128xf32>
    %835 = arith.mulf %829, %636 : vector<16x128xf32>
    %cst_43 = arith.constant dense<0.000000e+00> : vector<128xf32>
    %836 = vector.multi_reduction <add>, %835, %cst_43 [0] : vector<16x128xf32> to vector<128xf32>
    %837 = vector.shape_cast %836 : vector<128xf32> to vector<1x128xf32>
    %838 = vector.broadcast %578 : f32 to vector<1x128xf32>
    %839 = arith.addf %837, %838 : vector<1x128xf32>
    %cst_44 = arith.constant 5.000000e-01 : f32
    %840 = arith.mulf %586, %cst_44 : f32
    %841 = vector.broadcast %840 : f32 to vector<16x128xf32>
    %842 = arith.mulf %615, %841 : vector<16x128xf32>
    %cst_45 = arith.constant 5.000000e-01 : f32
    %843 = arith.mulf %594, %cst_45 : f32
    %844 = vector.broadcast %843 : f32 to vector<16x128xf32>
    %845 = arith.mulf %622, %844 : vector<16x128xf32>
    %846 = arith.addf %842, %845 : vector<16x128xf32>
    %cst_46 = arith.constant dense<0xFF800000> : vector<128xf32>
    %847 = vector.multi_reduction <maximumf>, %846, %cst_46 [0] : vector<16x128xf32> to vector<128xf32>
    %848 = vector.shape_cast %847 : vector<128xf32> to vector<1x128xf32>
    %849 = vector.broadcast %848 : vector<1x128xf32> to vector<16x128xf32>
    %850 = arith.subf %846, %849 : vector<16x128xf32>
    %851 = math.exp %850 : vector<16x128xf32>
    %cst_47 = arith.constant dense<0.000000e+00> : vector<128xf32>
    %852 = vector.multi_reduction <add>, %851, %cst_47 [0] : vector<16x128xf32> to vector<128xf32>
    %853 = vector.shape_cast %852 : vector<128xf32> to vector<1x128xf32>
    %854 = tpu.reciprocal %853 {approx = true} : vector<1x128xf32> -> vector<1x128xf32>
    %855 = vector.broadcast %854 : vector<1x128xf32> to vector<16x128xf32>
    %856 = arith.mulf %851, %855 : vector<16x128xf32>
    %857 = arith.mulf %856, %643 : vector<16x128xf32>
    %cst_48 = arith.constant dense<0.000000e+00> : vector<128xf32>
    %858 = vector.multi_reduction <add>, %857, %cst_48 [0] : vector<16x128xf32> to vector<128xf32>
    %859 = vector.shape_cast %858 : vector<128xf32> to vector<1x128xf32>
    %860 = vector.broadcast %586 : f32 to vector<1x128xf32>
    %861 = arith.addf %859, %860 : vector<1x128xf32>
    %862 = arith.mulf %856, %650 : vector<16x128xf32>
    %cst_49 = arith.constant dense<0.000000e+00> : vector<128xf32>
    %863 = vector.multi_reduction <add>, %862, %cst_49 [0] : vector<16x128xf32> to vector<128xf32>
    %864 = vector.shape_cast %863 : vector<128xf32> to vector<1x128xf32>
    %865 = vector.broadcast %594 : f32 to vector<1x128xf32>
    %866 = arith.addf %864, %865 : vector<1x128xf32>
    %867 = tpu.concatenate %672, %726, %780, %834 in 0 : vector<1x128xf32>, vector<1x128xf32>, vector<1x128xf32>, vector<1x128xf32> -> vector<4x128xf32>
    %868 = tpu.concatenate %677, %731, %785, %839 in 0 : vector<1x128xf32>, vector<1x128xf32>, vector<1x128xf32>, vector<1x128xf32> -> vector<4x128xf32>
    %869 = tpu.concatenate %699, %753, %807, %861 in 0 : vector<1x128xf32>, vector<1x128xf32>, vector<1x128xf32>, vector<1x128xf32> -> vector<4x128xf32>
    %870 = tpu.concatenate %704, %758, %812, %866 in 0 : vector<1x128xf32>, vector<1x128xf32>, vector<1x128xf32>, vector<1x128xf32> -> vector<4x128xf32>
    %871 = vector.broadcast %60 : f32 to vector<4x128xf32>
    %872 = arith.mulf %867, %871 : vector<4x128xf32>
    %873 = vector.broadcast %64 : f32 to vector<4x128xf32>
    %874 = arith.mulf %868, %873 : vector<4x128xf32>
    %875 = arith.addf %872, %874 : vector<4x128xf32>
    %876 = vector.broadcast %68 : f32 to vector<4x128xf32>
    %877 = arith.mulf %869, %876 : vector<4x128xf32>
    %878 = arith.addf %875, %877 : vector<4x128xf32>
    %879 = vector.broadcast %72 : f32 to vector<4x128xf32>
    %880 = arith.mulf %870, %879 : vector<4x128xf32>
    %881 = arith.addf %878, %880 : vector<4x128xf32>
    %882 = vector.broadcast %76 : f32 to vector<4x128xf32>
    %883 = arith.addf %881, %882 : vector<4x128xf32>
    %884 = vector.broadcast %61 : f32 to vector<4x128xf32>
    %885 = arith.mulf %867, %884 : vector<4x128xf32>
    %886 = vector.broadcast %65 : f32 to vector<4x128xf32>
    %887 = arith.mulf %868, %886 : vector<4x128xf32>
    %888 = arith.addf %885, %887 : vector<4x128xf32>
    %889 = vector.broadcast %69 : f32 to vector<4x128xf32>
    %890 = arith.mulf %869, %889 : vector<4x128xf32>
    %891 = arith.addf %888, %890 : vector<4x128xf32>
    %892 = vector.broadcast %73 : f32 to vector<4x128xf32>
    %893 = arith.mulf %870, %892 : vector<4x128xf32>
    %894 = arith.addf %891, %893 : vector<4x128xf32>
    %895 = vector.broadcast %77 : f32 to vector<4x128xf32>
    %896 = arith.addf %894, %895 : vector<4x128xf32>
    %897 = vector.broadcast %62 : f32 to vector<4x128xf32>
    %898 = arith.mulf %867, %897 : vector<4x128xf32>
    %899 = vector.broadcast %66 : f32 to vector<4x128xf32>
    %900 = arith.mulf %868, %899 : vector<4x128xf32>
    %901 = arith.addf %898, %900 : vector<4x128xf32>
    %902 = vector.broadcast %70 : f32 to vector<4x128xf32>
    %903 = arith.mulf %869, %902 : vector<4x128xf32>
    %904 = arith.addf %901, %903 : vector<4x128xf32>
    %905 = vector.broadcast %74 : f32 to vector<4x128xf32>
    %906 = arith.mulf %870, %905 : vector<4x128xf32>
    %907 = arith.addf %904, %906 : vector<4x128xf32>
    %908 = vector.broadcast %78 : f32 to vector<4x128xf32>
    %909 = arith.addf %907, %908 : vector<4x128xf32>
    %910 = vector.broadcast %63 : f32 to vector<4x128xf32>
    %911 = arith.mulf %867, %910 : vector<4x128xf32>
    %912 = vector.broadcast %67 : f32 to vector<4x128xf32>
    %913 = arith.mulf %868, %912 : vector<4x128xf32>
    %914 = arith.addf %911, %913 : vector<4x128xf32>
    %915 = vector.broadcast %71 : f32 to vector<4x128xf32>
    %916 = arith.mulf %869, %915 : vector<4x128xf32>
    %917 = arith.addf %914, %916 : vector<4x128xf32>
    %918 = vector.broadcast %75 : f32 to vector<4x128xf32>
    %919 = arith.mulf %870, %918 : vector<4x128xf32>
    %920 = arith.addf %917, %919 : vector<4x128xf32>
    %921 = vector.broadcast %79 : f32 to vector<4x128xf32>
    %922 = arith.addf %920, %921 : vector<4x128xf32>
    %cst_50 = arith.constant 0.000000e+00 : f32
    %923 = vector.broadcast %cst_50 : f32 to vector<4x128xf32>
    %924 = arith.maximumf %883, %923 : vector<4x128xf32>
    %925 = arith.addf %867, %924 : vector<4x128xf32>
    %cst_51 = arith.constant 0.000000e+00 : f32
    %926 = vector.broadcast %cst_51 : f32 to vector<4x128xf32>
    %927 = arith.maximumf %896, %926 : vector<4x128xf32>
    %928 = arith.addf %868, %927 : vector<4x128xf32>
    %cst_52 = arith.constant 0.000000e+00 : f32
    %929 = vector.broadcast %cst_52 : f32 to vector<4x128xf32>
    %930 = arith.maximumf %909, %929 : vector<4x128xf32>
    %931 = arith.addf %869, %930 : vector<4x128xf32>
    %cst_53 = arith.constant 0.000000e+00 : f32
    %932 = vector.broadcast %cst_53 : f32 to vector<4x128xf32>
    %933 = arith.maximumf %922, %932 : vector<4x128xf32>
    %934 = arith.addf %870, %933 : vector<4x128xf32>
    %935 = vector.broadcast %80 : f32 to vector<16x128xf32>
    %936 = arith.mulf %464, %935 : vector<16x128xf32>
    %937 = vector.broadcast %84 : f32 to vector<16x128xf32>
    %938 = arith.mulf %466, %937 : vector<16x128xf32>
    %939 = arith.addf %936, %938 : vector<16x128xf32>
    %940 = vector.broadcast %88 : f32 to vector<16x128xf32>
    %941 = arith.addf %939, %940 : vector<16x128xf32>
    %942 = vector.broadcast %81 : f32 to vector<16x128xf32>
    %943 = arith.mulf %464, %942 : vector<16x128xf32>
    %944 = vector.broadcast %85 : f32 to vector<16x128xf32>
    %945 = arith.mulf %466, %944 : vector<16x128xf32>
    %946 = arith.addf %943, %945 : vector<16x128xf32>
    %947 = vector.broadcast %89 : f32 to vector<16x128xf32>
    %948 = arith.addf %946, %947 : vector<16x128xf32>
    %949 = vector.broadcast %82 : f32 to vector<16x128xf32>
    %950 = arith.mulf %464, %949 : vector<16x128xf32>
    %951 = vector.broadcast %86 : f32 to vector<16x128xf32>
    %952 = arith.mulf %466, %951 : vector<16x128xf32>
    %953 = arith.addf %950, %952 : vector<16x128xf32>
    %954 = vector.broadcast %90 : f32 to vector<16x128xf32>
    %955 = arith.addf %953, %954 : vector<16x128xf32>
    %956 = vector.broadcast %83 : f32 to vector<16x128xf32>
    %957 = arith.mulf %464, %956 : vector<16x128xf32>
    %958 = vector.broadcast %87 : f32 to vector<16x128xf32>
    %959 = arith.mulf %466, %958 : vector<16x128xf32>
    %960 = arith.addf %957, %959 : vector<16x128xf32>
    %961 = vector.broadcast %91 : f32 to vector<16x128xf32>
    %962 = arith.addf %960, %961 : vector<16x128xf32>
    %963 = vector.broadcast %92 : f32 to vector<4x128xf32>
    %964 = arith.mulf %925, %963 : vector<4x128xf32>
    %965 = vector.broadcast %96 : f32 to vector<4x128xf32>
    %966 = arith.mulf %928, %965 : vector<4x128xf32>
    %967 = arith.addf %964, %966 : vector<4x128xf32>
    %968 = vector.broadcast %100 : f32 to vector<4x128xf32>
    %969 = arith.mulf %931, %968 : vector<4x128xf32>
    %970 = arith.addf %967, %969 : vector<4x128xf32>
    %971 = vector.broadcast %104 : f32 to vector<4x128xf32>
    %972 = arith.mulf %934, %971 : vector<4x128xf32>
    %973 = arith.addf %970, %972 : vector<4x128xf32>
    %974 = vector.broadcast %108 : f32 to vector<4x128xf32>
    %975 = arith.addf %973, %974 : vector<4x128xf32>
    %976 = vector.broadcast %93 : f32 to vector<4x128xf32>
    %977 = arith.mulf %925, %976 : vector<4x128xf32>
    %978 = vector.broadcast %97 : f32 to vector<4x128xf32>
    %979 = arith.mulf %928, %978 : vector<4x128xf32>
    %980 = arith.addf %977, %979 : vector<4x128xf32>
    %981 = vector.broadcast %101 : f32 to vector<4x128xf32>
    %982 = arith.mulf %931, %981 : vector<4x128xf32>
    %983 = arith.addf %980, %982 : vector<4x128xf32>
    %984 = vector.broadcast %105 : f32 to vector<4x128xf32>
    %985 = arith.mulf %934, %984 : vector<4x128xf32>
    %986 = arith.addf %983, %985 : vector<4x128xf32>
    %987 = vector.broadcast %109 : f32 to vector<4x128xf32>
    %988 = arith.addf %986, %987 : vector<4x128xf32>
    %989 = vector.broadcast %94 : f32 to vector<4x128xf32>
    %990 = arith.mulf %925, %989 : vector<4x128xf32>
    %991 = vector.broadcast %98 : f32 to vector<4x128xf32>
    %992 = arith.mulf %928, %991 : vector<4x128xf32>
    %993 = arith.addf %990, %992 : vector<4x128xf32>
    %994 = vector.broadcast %102 : f32 to vector<4x128xf32>
    %995 = arith.mulf %931, %994 : vector<4x128xf32>
    %996 = arith.addf %993, %995 : vector<4x128xf32>
    %997 = vector.broadcast %106 : f32 to vector<4x128xf32>
    %998 = arith.mulf %934, %997 : vector<4x128xf32>
    %999 = arith.addf %996, %998 : vector<4x128xf32>
    %1000 = vector.broadcast %110 : f32 to vector<4x128xf32>
    %1001 = arith.addf %999, %1000 : vector<4x128xf32>
    %1002 = vector.broadcast %95 : f32 to vector<4x128xf32>
    %1003 = arith.mulf %925, %1002 : vector<4x128xf32>
    %1004 = vector.broadcast %99 : f32 to vector<4x128xf32>
    %1005 = arith.mulf %928, %1004 : vector<4x128xf32>
    %1006 = arith.addf %1003, %1005 : vector<4x128xf32>
    %1007 = vector.broadcast %103 : f32 to vector<4x128xf32>
    %1008 = arith.mulf %931, %1007 : vector<4x128xf32>
    %1009 = arith.addf %1006, %1008 : vector<4x128xf32>
    %1010 = vector.broadcast %107 : f32 to vector<4x128xf32>
    %1011 = arith.mulf %934, %1010 : vector<4x128xf32>
    %1012 = arith.addf %1009, %1011 : vector<4x128xf32>
    %1013 = vector.broadcast %111 : f32 to vector<4x128xf32>
    %1014 = arith.addf %1012, %1013 : vector<4x128xf32>
    %1015 = vector.broadcast %112 : f32 to vector<4x128xf32>
    %1016 = arith.mulf %925, %1015 : vector<4x128xf32>
    %1017 = vector.broadcast %116 : f32 to vector<4x128xf32>
    %1018 = arith.mulf %928, %1017 : vector<4x128xf32>
    %1019 = arith.addf %1016, %1018 : vector<4x128xf32>
    %1020 = vector.broadcast %120 : f32 to vector<4x128xf32>
    %1021 = arith.mulf %931, %1020 : vector<4x128xf32>
    %1022 = arith.addf %1019, %1021 : vector<4x128xf32>
    %1023 = vector.broadcast %124 : f32 to vector<4x128xf32>
    %1024 = arith.mulf %934, %1023 : vector<4x128xf32>
    %1025 = arith.addf %1022, %1024 : vector<4x128xf32>
    %1026 = vector.broadcast %128 : f32 to vector<4x128xf32>
    %1027 = arith.addf %1025, %1026 : vector<4x128xf32>
    %1028 = vector.broadcast %113 : f32 to vector<4x128xf32>
    %1029 = arith.mulf %925, %1028 : vector<4x128xf32>
    %1030 = vector.broadcast %117 : f32 to vector<4x128xf32>
    %1031 = arith.mulf %928, %1030 : vector<4x128xf32>
    %1032 = arith.addf %1029, %1031 : vector<4x128xf32>
    %1033 = vector.broadcast %121 : f32 to vector<4x128xf32>
    %1034 = arith.mulf %931, %1033 : vector<4x128xf32>
    %1035 = arith.addf %1032, %1034 : vector<4x128xf32>
    %1036 = vector.broadcast %125 : f32 to vector<4x128xf32>
    %1037 = arith.mulf %934, %1036 : vector<4x128xf32>
    %1038 = arith.addf %1035, %1037 : vector<4x128xf32>
    %1039 = vector.broadcast %129 : f32 to vector<4x128xf32>
    %1040 = arith.addf %1038, %1039 : vector<4x128xf32>
    %1041 = vector.broadcast %114 : f32 to vector<4x128xf32>
    %1042 = arith.mulf %925, %1041 : vector<4x128xf32>
    %1043 = vector.broadcast %118 : f32 to vector<4x128xf32>
    %1044 = arith.mulf %928, %1043 : vector<4x128xf32>
    %1045 = arith.addf %1042, %1044 : vector<4x128xf32>
    %1046 = vector.broadcast %122 : f32 to vector<4x128xf32>
    %1047 = arith.mulf %931, %1046 : vector<4x128xf32>
    %1048 = arith.addf %1045, %1047 : vector<4x128xf32>
    %1049 = vector.broadcast %126 : f32 to vector<4x128xf32>
    %1050 = arith.mulf %934, %1049 : vector<4x128xf32>
    %1051 = arith.addf %1048, %1050 : vector<4x128xf32>
    %1052 = vector.broadcast %130 : f32 to vector<4x128xf32>
    %1053 = arith.addf %1051, %1052 : vector<4x128xf32>
    %1054 = vector.broadcast %115 : f32 to vector<4x128xf32>
    %1055 = arith.mulf %925, %1054 : vector<4x128xf32>
    %1056 = vector.broadcast %119 : f32 to vector<4x128xf32>
    %1057 = arith.mulf %928, %1056 : vector<4x128xf32>
    %1058 = arith.addf %1055, %1057 : vector<4x128xf32>
    %1059 = vector.broadcast %123 : f32 to vector<4x128xf32>
    %1060 = arith.mulf %931, %1059 : vector<4x128xf32>
    %1061 = arith.addf %1058, %1060 : vector<4x128xf32>
    %1062 = vector.broadcast %127 : f32 to vector<4x128xf32>
    %1063 = arith.mulf %934, %1062 : vector<4x128xf32>
    %1064 = arith.addf %1061, %1063 : vector<4x128xf32>
    %1065 = vector.broadcast %131 : f32 to vector<4x128xf32>
    %1066 = arith.addf %1064, %1065 : vector<4x128xf32>
    %1067 = vector.shape_cast %975 : vector<4x128xf32> to vector<4x1x128xf32>
    %1068 = vector.shape_cast %941 : vector<16x128xf32> to vector<1x16x128xf32>
    %1069 = vector.broadcast %1067 : vector<4x1x128xf32> to vector<4x16x128xf32>
    %1070 = vector.broadcast %1068 : vector<1x16x128xf32> to vector<4x16x128xf32>
    %1071 = arith.mulf %1069, %1070 : vector<4x16x128xf32>
    %1072 = vector.shape_cast %988 : vector<4x128xf32> to vector<4x1x128xf32>
    %1073 = vector.shape_cast %948 : vector<16x128xf32> to vector<1x16x128xf32>
    %1074 = vector.broadcast %1072 : vector<4x1x128xf32> to vector<4x16x128xf32>
    %1075 = vector.broadcast %1073 : vector<1x16x128xf32> to vector<4x16x128xf32>
    %1076 = arith.mulf %1074, %1075 : vector<4x16x128xf32>
    %1077 = arith.addf %1071, %1076 : vector<4x16x128xf32>
    %cst_54 = arith.constant 5.000000e-01 : f32
    %1078 = vector.broadcast %cst_54 : f32 to vector<4x16x128xf32>
    %1079 = arith.mulf %1077, %1078 : vector<4x16x128xf32>
    %cst_55 = arith.constant dense<0xFF800000> : vector<16x128xf32>
    %1080 = vector.multi_reduction <maximumf>, %1079, %cst_55 [0] : vector<4x16x128xf32> to vector<16x128xf32>
    %1081 = vector.shape_cast %1080 : vector<16x128xf32> to vector<1x16x128xf32>
    %1082 = vector.broadcast %1081 : vector<1x16x128xf32> to vector<4x16x128xf32>
    %1083 = arith.subf %1079, %1082 : vector<4x16x128xf32>
    %1084 = math.exp %1083 : vector<4x16x128xf32>
    %cst_56 = arith.constant dense<0.000000e+00> : vector<16x128xf32>
    %1085 = vector.multi_reduction <add>, %1084, %cst_56 [0] : vector<4x16x128xf32> to vector<16x128xf32>
    %1086 = vector.shape_cast %1085 : vector<16x128xf32> to vector<1x16x128xf32>
    %1087 = tpu.reciprocal %1086 {approx = true} : vector<1x16x128xf32> -> vector<1x16x128xf32>
    %1088 = vector.broadcast %1087 : vector<1x16x128xf32> to vector<4x16x128xf32>
    %1089 = arith.mulf %1084, %1088 : vector<4x16x128xf32>
    %1090 = vector.shape_cast %1027 : vector<4x128xf32> to vector<4x1x128xf32>
    %1091 = vector.broadcast %1090 : vector<4x1x128xf32> to vector<4x16x128xf32>
    %1092 = arith.mulf %1089, %1091 : vector<4x16x128xf32>
    %cst_57 = arith.constant dense<0.000000e+00> : vector<16x128xf32>
    %1093 = vector.multi_reduction <add>, %1092, %cst_57 [0] : vector<4x16x128xf32> to vector<16x128xf32>
    %1094 = arith.addf %941, %1093 : vector<16x128xf32>
    %1095 = vector.shape_cast %1040 : vector<4x128xf32> to vector<4x1x128xf32>
    %1096 = vector.broadcast %1095 : vector<4x1x128xf32> to vector<4x16x128xf32>
    %1097 = arith.mulf %1089, %1096 : vector<4x16x128xf32>
    %cst_58 = arith.constant dense<0.000000e+00> : vector<16x128xf32>
    %1098 = vector.multi_reduction <add>, %1097, %cst_58 [0] : vector<4x16x128xf32> to vector<16x128xf32>
    %1099 = arith.addf %948, %1098 : vector<16x128xf32>
    %1100 = vector.shape_cast %1001 : vector<4x128xf32> to vector<4x1x128xf32>
    %1101 = vector.shape_cast %955 : vector<16x128xf32> to vector<1x16x128xf32>
    %1102 = vector.broadcast %1100 : vector<4x1x128xf32> to vector<4x16x128xf32>
    %1103 = vector.broadcast %1101 : vector<1x16x128xf32> to vector<4x16x128xf32>
    %1104 = arith.mulf %1102, %1103 : vector<4x16x128xf32>
    %1105 = vector.shape_cast %1014 : vector<4x128xf32> to vector<4x1x128xf32>
    %1106 = vector.shape_cast %962 : vector<16x128xf32> to vector<1x16x128xf32>
    %1107 = vector.broadcast %1105 : vector<4x1x128xf32> to vector<4x16x128xf32>
    %1108 = vector.broadcast %1106 : vector<1x16x128xf32> to vector<4x16x128xf32>
    %1109 = arith.mulf %1107, %1108 : vector<4x16x128xf32>
    %1110 = arith.addf %1104, %1109 : vector<4x16x128xf32>
    %cst_59 = arith.constant 5.000000e-01 : f32
    %1111 = vector.broadcast %cst_59 : f32 to vector<4x16x128xf32>
    %1112 = arith.mulf %1110, %1111 : vector<4x16x128xf32>
    %cst_60 = arith.constant dense<0xFF800000> : vector<16x128xf32>
    %1113 = vector.multi_reduction <maximumf>, %1112, %cst_60 [0] : vector<4x16x128xf32> to vector<16x128xf32>
    %1114 = vector.shape_cast %1113 : vector<16x128xf32> to vector<1x16x128xf32>
    %1115 = vector.broadcast %1114 : vector<1x16x128xf32> to vector<4x16x128xf32>
    %1116 = arith.subf %1112, %1115 : vector<4x16x128xf32>
    %1117 = math.exp %1116 : vector<4x16x128xf32>
    %cst_61 = arith.constant dense<0.000000e+00> : vector<16x128xf32>
    %1118 = vector.multi_reduction <add>, %1117, %cst_61 [0] : vector<4x16x128xf32> to vector<16x128xf32>
    %1119 = vector.shape_cast %1118 : vector<16x128xf32> to vector<1x16x128xf32>
    %1120 = tpu.reciprocal %1119 {approx = true} : vector<1x16x128xf32> -> vector<1x16x128xf32>
    %1121 = vector.broadcast %1120 : vector<1x16x128xf32> to vector<4x16x128xf32>
    %1122 = arith.mulf %1117, %1121 : vector<4x16x128xf32>
    %1123 = vector.shape_cast %1053 : vector<4x128xf32> to vector<4x1x128xf32>
    %1124 = vector.broadcast %1123 : vector<4x1x128xf32> to vector<4x16x128xf32>
    %1125 = arith.mulf %1122, %1124 : vector<4x16x128xf32>
    %cst_62 = arith.constant dense<0.000000e+00> : vector<16x128xf32>
    %1126 = vector.multi_reduction <add>, %1125, %cst_62 [0] : vector<4x16x128xf32> to vector<16x128xf32>
    %1127 = arith.addf %955, %1126 : vector<16x128xf32>
    %1128 = vector.shape_cast %1066 : vector<4x128xf32> to vector<4x1x128xf32>
    %1129 = vector.broadcast %1128 : vector<4x1x128xf32> to vector<4x16x128xf32>
    %1130 = arith.mulf %1122, %1129 : vector<4x16x128xf32>
    %cst_63 = arith.constant dense<0.000000e+00> : vector<16x128xf32>
    %1131 = vector.multi_reduction <add>, %1130, %cst_63 [0] : vector<4x16x128xf32> to vector<16x128xf32>
    %1132 = arith.addf %962, %1131 : vector<16x128xf32>
    %1133 = vector.broadcast %132 : f32 to vector<16x128xf32>
    %1134 = arith.mulf %1094, %1133 : vector<16x128xf32>
    %1135 = vector.broadcast %136 : f32 to vector<16x128xf32>
    %1136 = arith.mulf %1099, %1135 : vector<16x128xf32>
    %1137 = arith.addf %1134, %1136 : vector<16x128xf32>
    %1138 = vector.broadcast %140 : f32 to vector<16x128xf32>
    %1139 = arith.mulf %1127, %1138 : vector<16x128xf32>
    %1140 = arith.addf %1137, %1139 : vector<16x128xf32>
    %1141 = vector.broadcast %144 : f32 to vector<16x128xf32>
    %1142 = arith.mulf %1132, %1141 : vector<16x128xf32>
    %1143 = arith.addf %1140, %1142 : vector<16x128xf32>
    %1144 = vector.broadcast %148 : f32 to vector<16x128xf32>
    %1145 = arith.addf %1143, %1144 : vector<16x128xf32>
    %1146 = vector.broadcast %133 : f32 to vector<16x128xf32>
    %1147 = arith.mulf %1094, %1146 : vector<16x128xf32>
    %1148 = vector.broadcast %137 : f32 to vector<16x128xf32>
    %1149 = arith.mulf %1099, %1148 : vector<16x128xf32>
    %1150 = arith.addf %1147, %1149 : vector<16x128xf32>
    %1151 = vector.broadcast %141 : f32 to vector<16x128xf32>
    %1152 = arith.mulf %1127, %1151 : vector<16x128xf32>
    %1153 = arith.addf %1150, %1152 : vector<16x128xf32>
    %1154 = vector.broadcast %145 : f32 to vector<16x128xf32>
    %1155 = arith.mulf %1132, %1154 : vector<16x128xf32>
    %1156 = arith.addf %1153, %1155 : vector<16x128xf32>
    %1157 = vector.broadcast %149 : f32 to vector<16x128xf32>
    %1158 = arith.addf %1156, %1157 : vector<16x128xf32>
    %1159 = vector.broadcast %134 : f32 to vector<16x128xf32>
    %1160 = arith.mulf %1094, %1159 : vector<16x128xf32>
    %1161 = vector.broadcast %138 : f32 to vector<16x128xf32>
    %1162 = arith.mulf %1099, %1161 : vector<16x128xf32>
    %1163 = arith.addf %1160, %1162 : vector<16x128xf32>
    %1164 = vector.broadcast %142 : f32 to vector<16x128xf32>
    %1165 = arith.mulf %1127, %1164 : vector<16x128xf32>
    %1166 = arith.addf %1163, %1165 : vector<16x128xf32>
    %1167 = vector.broadcast %146 : f32 to vector<16x128xf32>
    %1168 = arith.mulf %1132, %1167 : vector<16x128xf32>
    %1169 = arith.addf %1166, %1168 : vector<16x128xf32>
    %1170 = vector.broadcast %150 : f32 to vector<16x128xf32>
    %1171 = arith.addf %1169, %1170 : vector<16x128xf32>
    %1172 = vector.broadcast %135 : f32 to vector<16x128xf32>
    %1173 = arith.mulf %1094, %1172 : vector<16x128xf32>
    %1174 = vector.broadcast %139 : f32 to vector<16x128xf32>
    %1175 = arith.mulf %1099, %1174 : vector<16x128xf32>
    %1176 = arith.addf %1173, %1175 : vector<16x128xf32>
    %1177 = vector.broadcast %143 : f32 to vector<16x128xf32>
    %1178 = arith.mulf %1127, %1177 : vector<16x128xf32>
    %1179 = arith.addf %1176, %1178 : vector<16x128xf32>
    %1180 = vector.broadcast %147 : f32 to vector<16x128xf32>
    %1181 = arith.mulf %1132, %1180 : vector<16x128xf32>
    %1182 = arith.addf %1179, %1181 : vector<16x128xf32>
    %1183 = vector.broadcast %151 : f32 to vector<16x128xf32>
    %1184 = arith.addf %1182, %1183 : vector<16x128xf32>
    %cst_64 = arith.constant 0.000000e+00 : f32
    %1185 = vector.broadcast %cst_64 : f32 to vector<16x128xf32>
    %1186 = arith.maximumf %1145, %1185 : vector<16x128xf32>
    %1187 = arith.addf %1094, %1186 : vector<16x128xf32>
    %cst_65 = arith.constant 0.000000e+00 : f32
    %1188 = vector.broadcast %cst_65 : f32 to vector<16x128xf32>
    %1189 = arith.maximumf %1158, %1188 : vector<16x128xf32>
    %1190 = arith.addf %1099, %1189 : vector<16x128xf32>
    %cst_66 = arith.constant 0.000000e+00 : f32
    %1191 = vector.broadcast %cst_66 : f32 to vector<16x128xf32>
    %1192 = arith.maximumf %1171, %1191 : vector<16x128xf32>
    %1193 = arith.addf %1127, %1192 : vector<16x128xf32>
    %cst_67 = arith.constant 0.000000e+00 : f32
    %1194 = vector.broadcast %cst_67 : f32 to vector<16x128xf32>
    %1195 = arith.maximumf %1184, %1194 : vector<16x128xf32>
    %1196 = arith.addf %1132, %1195 : vector<16x128xf32>
    %1197 = arith.mulf %152, %168 : f32
    %1198 = arith.mulf %153, %172 : f32
    %1199 = arith.addf %1197, %1198 : f32
    %1200 = arith.mulf %154, %176 : f32
    %1201 = arith.addf %1199, %1200 : f32
    %1202 = arith.mulf %155, %180 : f32
    %1203 = arith.addf %1201, %1202 : f32
    %1204 = arith.addf %1203, %184 : f32
    %1205 = arith.mulf %152, %169 : f32
    %1206 = arith.mulf %153, %173 : f32
    %1207 = arith.addf %1205, %1206 : f32
    %1208 = arith.mulf %154, %177 : f32
    %1209 = arith.addf %1207, %1208 : f32
    %1210 = arith.mulf %155, %181 : f32
    %1211 = arith.addf %1209, %1210 : f32
    %1212 = arith.addf %1211, %185 : f32
    %1213 = arith.mulf %152, %170 : f32
    %1214 = arith.mulf %153, %174 : f32
    %1215 = arith.addf %1213, %1214 : f32
    %1216 = arith.mulf %154, %178 : f32
    %1217 = arith.addf %1215, %1216 : f32
    %1218 = arith.mulf %155, %182 : f32
    %1219 = arith.addf %1217, %1218 : f32
    %1220 = arith.addf %1219, %186 : f32
    %1221 = arith.mulf %152, %171 : f32
    %1222 = arith.mulf %153, %175 : f32
    %1223 = arith.addf %1221, %1222 : f32
    %1224 = arith.mulf %154, %179 : f32
    %1225 = arith.addf %1223, %1224 : f32
    %1226 = arith.mulf %155, %183 : f32
    %1227 = arith.addf %1225, %1226 : f32
    %1228 = arith.addf %1227, %187 : f32
    %1229 = arith.mulf %156, %168 : f32
    %1230 = arith.mulf %157, %172 : f32
    %1231 = arith.addf %1229, %1230 : f32
    %1232 = arith.mulf %158, %176 : f32
    %1233 = arith.addf %1231, %1232 : f32
    %1234 = arith.mulf %159, %180 : f32
    %1235 = arith.addf %1233, %1234 : f32
    %1236 = arith.addf %1235, %184 : f32
    %1237 = arith.mulf %156, %169 : f32
    %1238 = arith.mulf %157, %173 : f32
    %1239 = arith.addf %1237, %1238 : f32
    %1240 = arith.mulf %158, %177 : f32
    %1241 = arith.addf %1239, %1240 : f32
    %1242 = arith.mulf %159, %181 : f32
    %1243 = arith.addf %1241, %1242 : f32
    %1244 = arith.addf %1243, %185 : f32
    %1245 = arith.mulf %156, %170 : f32
    %1246 = arith.mulf %157, %174 : f32
    %1247 = arith.addf %1245, %1246 : f32
    %1248 = arith.mulf %158, %178 : f32
    %1249 = arith.addf %1247, %1248 : f32
    %1250 = arith.mulf %159, %182 : f32
    %1251 = arith.addf %1249, %1250 : f32
    %1252 = arith.addf %1251, %186 : f32
    %1253 = arith.mulf %156, %171 : f32
    %1254 = arith.mulf %157, %175 : f32
    %1255 = arith.addf %1253, %1254 : f32
    %1256 = arith.mulf %158, %179 : f32
    %1257 = arith.addf %1255, %1256 : f32
    %1258 = arith.mulf %159, %183 : f32
    %1259 = arith.addf %1257, %1258 : f32
    %1260 = arith.addf %1259, %187 : f32
    %1261 = arith.mulf %160, %168 : f32
    %1262 = arith.mulf %161, %172 : f32
    %1263 = arith.addf %1261, %1262 : f32
    %1264 = arith.mulf %162, %176 : f32
    %1265 = arith.addf %1263, %1264 : f32
    %1266 = arith.mulf %163, %180 : f32
    %1267 = arith.addf %1265, %1266 : f32
    %1268 = arith.addf %1267, %184 : f32
    %1269 = arith.mulf %160, %169 : f32
    %1270 = arith.mulf %161, %173 : f32
    %1271 = arith.addf %1269, %1270 : f32
    %1272 = arith.mulf %162, %177 : f32
    %1273 = arith.addf %1271, %1272 : f32
    %1274 = arith.mulf %163, %181 : f32
    %1275 = arith.addf %1273, %1274 : f32
    %1276 = arith.addf %1275, %185 : f32
    %1277 = arith.mulf %160, %170 : f32
    %1278 = arith.mulf %161, %174 : f32
    %1279 = arith.addf %1277, %1278 : f32
    %1280 = arith.mulf %162, %178 : f32
    %1281 = arith.addf %1279, %1280 : f32
    %1282 = arith.mulf %163, %182 : f32
    %1283 = arith.addf %1281, %1282 : f32
    %1284 = arith.addf %1283, %186 : f32
    %1285 = arith.mulf %160, %171 : f32
    %1286 = arith.mulf %161, %175 : f32
    %1287 = arith.addf %1285, %1286 : f32
    %1288 = arith.mulf %162, %179 : f32
    %1289 = arith.addf %1287, %1288 : f32
    %1290 = arith.mulf %163, %183 : f32
    %1291 = arith.addf %1289, %1290 : f32
    %1292 = arith.addf %1291, %187 : f32
    %1293 = arith.mulf %164, %168 : f32
    %1294 = arith.mulf %165, %172 : f32
    %1295 = arith.addf %1293, %1294 : f32
    %1296 = arith.mulf %166, %176 : f32
    %1297 = arith.addf %1295, %1296 : f32
    %1298 = arith.mulf %167, %180 : f32
    %1299 = arith.addf %1297, %1298 : f32
    %1300 = arith.addf %1299, %184 : f32
    %1301 = arith.mulf %164, %169 : f32
    %1302 = arith.mulf %165, %173 : f32
    %1303 = arith.addf %1301, %1302 : f32
    %1304 = arith.mulf %166, %177 : f32
    %1305 = arith.addf %1303, %1304 : f32
    %1306 = arith.mulf %167, %181 : f32
    %1307 = arith.addf %1305, %1306 : f32
    %1308 = arith.addf %1307, %185 : f32
    %1309 = arith.mulf %164, %170 : f32
    %1310 = arith.mulf %165, %174 : f32
    %1311 = arith.addf %1309, %1310 : f32
    %1312 = arith.mulf %166, %178 : f32
    %1313 = arith.addf %1311, %1312 : f32
    %1314 = arith.mulf %167, %182 : f32
    %1315 = arith.addf %1313, %1314 : f32
    %1316 = arith.addf %1315, %186 : f32
    %1317 = arith.mulf %164, %171 : f32
    %1318 = arith.mulf %165, %175 : f32
    %1319 = arith.addf %1317, %1318 : f32
    %1320 = arith.mulf %166, %179 : f32
    %1321 = arith.addf %1319, %1320 : f32
    %1322 = arith.mulf %167, %183 : f32
    %1323 = arith.addf %1321, %1322 : f32
    %1324 = arith.addf %1323, %187 : f32
    %1325 = vector.broadcast %188 : f32 to vector<16x128xf32>
    %1326 = arith.mulf %1187, %1325 : vector<16x128xf32>
    %1327 = vector.broadcast %192 : f32 to vector<16x128xf32>
    %1328 = arith.mulf %1190, %1327 : vector<16x128xf32>
    %1329 = arith.addf %1326, %1328 : vector<16x128xf32>
    %1330 = vector.broadcast %196 : f32 to vector<16x128xf32>
    %1331 = arith.mulf %1193, %1330 : vector<16x128xf32>
    %1332 = arith.addf %1329, %1331 : vector<16x128xf32>
    %1333 = vector.broadcast %200 : f32 to vector<16x128xf32>
    %1334 = arith.mulf %1196, %1333 : vector<16x128xf32>
    %1335 = arith.addf %1332, %1334 : vector<16x128xf32>
    %1336 = vector.broadcast %204 : f32 to vector<16x128xf32>
    %1337 = arith.addf %1335, %1336 : vector<16x128xf32>
    %1338 = vector.broadcast %189 : f32 to vector<16x128xf32>
    %1339 = arith.mulf %1187, %1338 : vector<16x128xf32>
    %1340 = vector.broadcast %193 : f32 to vector<16x128xf32>
    %1341 = arith.mulf %1190, %1340 : vector<16x128xf32>
    %1342 = arith.addf %1339, %1341 : vector<16x128xf32>
    %1343 = vector.broadcast %197 : f32 to vector<16x128xf32>
    %1344 = arith.mulf %1193, %1343 : vector<16x128xf32>
    %1345 = arith.addf %1342, %1344 : vector<16x128xf32>
    %1346 = vector.broadcast %201 : f32 to vector<16x128xf32>
    %1347 = arith.mulf %1196, %1346 : vector<16x128xf32>
    %1348 = arith.addf %1345, %1347 : vector<16x128xf32>
    %1349 = vector.broadcast %205 : f32 to vector<16x128xf32>
    %1350 = arith.addf %1348, %1349 : vector<16x128xf32>
    %1351 = vector.broadcast %190 : f32 to vector<16x128xf32>
    %1352 = arith.mulf %1187, %1351 : vector<16x128xf32>
    %1353 = vector.broadcast %194 : f32 to vector<16x128xf32>
    %1354 = arith.mulf %1190, %1353 : vector<16x128xf32>
    %1355 = arith.addf %1352, %1354 : vector<16x128xf32>
    %1356 = vector.broadcast %198 : f32 to vector<16x128xf32>
    %1357 = arith.mulf %1193, %1356 : vector<16x128xf32>
    %1358 = arith.addf %1355, %1357 : vector<16x128xf32>
    %1359 = vector.broadcast %202 : f32 to vector<16x128xf32>
    %1360 = arith.mulf %1196, %1359 : vector<16x128xf32>
    %1361 = arith.addf %1358, %1360 : vector<16x128xf32>
    %1362 = vector.broadcast %206 : f32 to vector<16x128xf32>
    %1363 = arith.addf %1361, %1362 : vector<16x128xf32>
    %1364 = vector.broadcast %191 : f32 to vector<16x128xf32>
    %1365 = arith.mulf %1187, %1364 : vector<16x128xf32>
    %1366 = vector.broadcast %195 : f32 to vector<16x128xf32>
    %1367 = arith.mulf %1190, %1366 : vector<16x128xf32>
    %1368 = arith.addf %1365, %1367 : vector<16x128xf32>
    %1369 = vector.broadcast %199 : f32 to vector<16x128xf32>
    %1370 = arith.mulf %1193, %1369 : vector<16x128xf32>
    %1371 = arith.addf %1368, %1370 : vector<16x128xf32>
    %1372 = vector.broadcast %203 : f32 to vector<16x128xf32>
    %1373 = arith.mulf %1196, %1372 : vector<16x128xf32>
    %1374 = arith.addf %1371, %1373 : vector<16x128xf32>
    %1375 = vector.broadcast %207 : f32 to vector<16x128xf32>
    %1376 = arith.addf %1374, %1375 : vector<16x128xf32>
    %1377 = vector.broadcast %208 : f32 to vector<16x128xf32>
    %1378 = arith.mulf %1187, %1377 : vector<16x128xf32>
    %1379 = vector.broadcast %212 : f32 to vector<16x128xf32>
    %1380 = arith.mulf %1190, %1379 : vector<16x128xf32>
    %1381 = arith.addf %1378, %1380 : vector<16x128xf32>
    %1382 = vector.broadcast %216 : f32 to vector<16x128xf32>
    %1383 = arith.mulf %1193, %1382 : vector<16x128xf32>
    %1384 = arith.addf %1381, %1383 : vector<16x128xf32>
    %1385 = vector.broadcast %220 : f32 to vector<16x128xf32>
    %1386 = arith.mulf %1196, %1385 : vector<16x128xf32>
    %1387 = arith.addf %1384, %1386 : vector<16x128xf32>
    %1388 = vector.broadcast %224 : f32 to vector<16x128xf32>
    %1389 = arith.addf %1387, %1388 : vector<16x128xf32>
    %1390 = vector.broadcast %209 : f32 to vector<16x128xf32>
    %1391 = arith.mulf %1187, %1390 : vector<16x128xf32>
    %1392 = vector.broadcast %213 : f32 to vector<16x128xf32>
    %1393 = arith.mulf %1190, %1392 : vector<16x128xf32>
    %1394 = arith.addf %1391, %1393 : vector<16x128xf32>
    %1395 = vector.broadcast %217 : f32 to vector<16x128xf32>
    %1396 = arith.mulf %1193, %1395 : vector<16x128xf32>
    %1397 = arith.addf %1394, %1396 : vector<16x128xf32>
    %1398 = vector.broadcast %221 : f32 to vector<16x128xf32>
    %1399 = arith.mulf %1196, %1398 : vector<16x128xf32>
    %1400 = arith.addf %1397, %1399 : vector<16x128xf32>
    %1401 = vector.broadcast %225 : f32 to vector<16x128xf32>
    %1402 = arith.addf %1400, %1401 : vector<16x128xf32>
    %1403 = vector.broadcast %210 : f32 to vector<16x128xf32>
    %1404 = arith.mulf %1187, %1403 : vector<16x128xf32>
    %1405 = vector.broadcast %214 : f32 to vector<16x128xf32>
    %1406 = arith.mulf %1190, %1405 : vector<16x128xf32>
    %1407 = arith.addf %1404, %1406 : vector<16x128xf32>
    %1408 = vector.broadcast %218 : f32 to vector<16x128xf32>
    %1409 = arith.mulf %1193, %1408 : vector<16x128xf32>
    %1410 = arith.addf %1407, %1409 : vector<16x128xf32>
    %1411 = vector.broadcast %222 : f32 to vector<16x128xf32>
    %1412 = arith.mulf %1196, %1411 : vector<16x128xf32>
    %1413 = arith.addf %1410, %1412 : vector<16x128xf32>
    %1414 = vector.broadcast %226 : f32 to vector<16x128xf32>
    %1415 = arith.addf %1413, %1414 : vector<16x128xf32>
    %1416 = vector.broadcast %211 : f32 to vector<16x128xf32>
    %1417 = arith.mulf %1187, %1416 : vector<16x128xf32>
    %1418 = vector.broadcast %215 : f32 to vector<16x128xf32>
    %1419 = arith.mulf %1190, %1418 : vector<16x128xf32>
    %1420 = arith.addf %1417, %1419 : vector<16x128xf32>
    %1421 = vector.broadcast %219 : f32 to vector<16x128xf32>
    %1422 = arith.mulf %1193, %1421 : vector<16x128xf32>
    %1423 = arith.addf %1420, %1422 : vector<16x128xf32>
    %1424 = vector.broadcast %223 : f32 to vector<16x128xf32>
    %1425 = arith.mulf %1196, %1424 : vector<16x128xf32>
    %1426 = arith.addf %1423, %1425 : vector<16x128xf32>
    %1427 = vector.broadcast %227 : f32 to vector<16x128xf32>
    %1428 = arith.addf %1426, %1427 : vector<16x128xf32>
    %cst_68 = arith.constant 5.000000e-01 : f32
    %1429 = arith.mulf %1204, %cst_68 : f32
    %1430 = vector.broadcast %1429 : f32 to vector<16x128xf32>
    %1431 = arith.mulf %1337, %1430 : vector<16x128xf32>
    %cst_69 = arith.constant 5.000000e-01 : f32
    %1432 = arith.mulf %1212, %cst_69 : f32
    %1433 = vector.broadcast %1432 : f32 to vector<16x128xf32>
    %1434 = arith.mulf %1350, %1433 : vector<16x128xf32>
    %1435 = arith.addf %1431, %1434 : vector<16x128xf32>
    %cst_70 = arith.constant dense<0xFF800000> : vector<128xf32>
    %1436 = vector.multi_reduction <maximumf>, %1435, %cst_70 [0] : vector<16x128xf32> to vector<128xf32>
    %1437 = vector.shape_cast %1436 : vector<128xf32> to vector<1x128xf32>
    %1438 = vector.broadcast %1437 : vector<1x128xf32> to vector<16x128xf32>
    %1439 = arith.subf %1435, %1438 : vector<16x128xf32>
    %1440 = math.exp %1439 : vector<16x128xf32>
    %cst_71 = arith.constant dense<0.000000e+00> : vector<128xf32>
    %1441 = vector.multi_reduction <add>, %1440, %cst_71 [0] : vector<16x128xf32> to vector<128xf32>
    %1442 = vector.shape_cast %1441 : vector<128xf32> to vector<1x128xf32>
    %1443 = tpu.reciprocal %1442 {approx = true} : vector<1x128xf32> -> vector<1x128xf32>
    %1444 = vector.broadcast %1443 : vector<1x128xf32> to vector<16x128xf32>
    %1445 = arith.mulf %1440, %1444 : vector<16x128xf32>
    %1446 = arith.mulf %1445, %1389 : vector<16x128xf32>
    %cst_72 = arith.constant dense<0.000000e+00> : vector<128xf32>
    %1447 = vector.multi_reduction <add>, %1446, %cst_72 [0] : vector<16x128xf32> to vector<128xf32>
    %1448 = vector.shape_cast %1447 : vector<128xf32> to vector<1x128xf32>
    %1449 = vector.broadcast %1204 : f32 to vector<1x128xf32>
    %1450 = arith.addf %1448, %1449 : vector<1x128xf32>
    %1451 = arith.mulf %1445, %1402 : vector<16x128xf32>
    %cst_73 = arith.constant dense<0.000000e+00> : vector<128xf32>
    %1452 = vector.multi_reduction <add>, %1451, %cst_73 [0] : vector<16x128xf32> to vector<128xf32>
    %1453 = vector.shape_cast %1452 : vector<128xf32> to vector<1x128xf32>
    %1454 = vector.broadcast %1212 : f32 to vector<1x128xf32>
    %1455 = arith.addf %1453, %1454 : vector<1x128xf32>
    %cst_74 = arith.constant 5.000000e-01 : f32
    %1456 = arith.mulf %1220, %cst_74 : f32
    %1457 = vector.broadcast %1456 : f32 to vector<16x128xf32>
    %1458 = arith.mulf %1363, %1457 : vector<16x128xf32>
    %cst_75 = arith.constant 5.000000e-01 : f32
    %1459 = arith.mulf %1228, %cst_75 : f32
    %1460 = vector.broadcast %1459 : f32 to vector<16x128xf32>
    %1461 = arith.mulf %1376, %1460 : vector<16x128xf32>
    %1462 = arith.addf %1458, %1461 : vector<16x128xf32>
    %cst_76 = arith.constant dense<0xFF800000> : vector<128xf32>
    %1463 = vector.multi_reduction <maximumf>, %1462, %cst_76 [0] : vector<16x128xf32> to vector<128xf32>
    %1464 = vector.shape_cast %1463 : vector<128xf32> to vector<1x128xf32>
    %1465 = vector.broadcast %1464 : vector<1x128xf32> to vector<16x128xf32>
    %1466 = arith.subf %1462, %1465 : vector<16x128xf32>
    %1467 = math.exp %1466 : vector<16x128xf32>
    %cst_77 = arith.constant dense<0.000000e+00> : vector<128xf32>
    %1468 = vector.multi_reduction <add>, %1467, %cst_77 [0] : vector<16x128xf32> to vector<128xf32>
    %1469 = vector.shape_cast %1468 : vector<128xf32> to vector<1x128xf32>
    %1470 = tpu.reciprocal %1469 {approx = true} : vector<1x128xf32> -> vector<1x128xf32>
    %1471 = vector.broadcast %1470 : vector<1x128xf32> to vector<16x128xf32>
    %1472 = arith.mulf %1467, %1471 : vector<16x128xf32>
    %1473 = arith.mulf %1472, %1415 : vector<16x128xf32>
    %cst_78 = arith.constant dense<0.000000e+00> : vector<128xf32>
    %1474 = vector.multi_reduction <add>, %1473, %cst_78 [0] : vector<16x128xf32> to vector<128xf32>
    %1475 = vector.shape_cast %1474 : vector<128xf32> to vector<1x128xf32>
    %1476 = vector.broadcast %1220 : f32 to vector<1x128xf32>
    %1477 = arith.addf %1475, %1476 : vector<1x128xf32>
    %1478 = arith.mulf %1472, %1428 : vector<16x128xf32>
    %cst_79 = arith.constant dense<0.000000e+00> : vector<128xf32>
    %1479 = vector.multi_reduction <add>, %1478, %cst_79 [0] : vector<16x128xf32> to vector<128xf32>
    %1480 = vector.shape_cast %1479 : vector<128xf32> to vector<1x128xf32>
    %1481 = vector.broadcast %1228 : f32 to vector<1x128xf32>
    %1482 = arith.addf %1480, %1481 : vector<1x128xf32>
    %cst_80 = arith.constant 5.000000e-01 : f32
    %1483 = arith.mulf %1236, %cst_80 : f32
    %1484 = vector.broadcast %1483 : f32 to vector<16x128xf32>
    %1485 = arith.mulf %1337, %1484 : vector<16x128xf32>
    %cst_81 = arith.constant 5.000000e-01 : f32
    %1486 = arith.mulf %1244, %cst_81 : f32
    %1487 = vector.broadcast %1486 : f32 to vector<16x128xf32>
    %1488 = arith.mulf %1350, %1487 : vector<16x128xf32>
    %1489 = arith.addf %1485, %1488 : vector<16x128xf32>
    %cst_82 = arith.constant dense<0xFF800000> : vector<128xf32>
    %1490 = vector.multi_reduction <maximumf>, %1489, %cst_82 [0] : vector<16x128xf32> to vector<128xf32>
    %1491 = vector.shape_cast %1490 : vector<128xf32> to vector<1x128xf32>
    %1492 = vector.broadcast %1491 : vector<1x128xf32> to vector<16x128xf32>
    %1493 = arith.subf %1489, %1492 : vector<16x128xf32>
    %1494 = math.exp %1493 : vector<16x128xf32>
    %cst_83 = arith.constant dense<0.000000e+00> : vector<128xf32>
    %1495 = vector.multi_reduction <add>, %1494, %cst_83 [0] : vector<16x128xf32> to vector<128xf32>
    %1496 = vector.shape_cast %1495 : vector<128xf32> to vector<1x128xf32>
    %1497 = tpu.reciprocal %1496 {approx = true} : vector<1x128xf32> -> vector<1x128xf32>
    %1498 = vector.broadcast %1497 : vector<1x128xf32> to vector<16x128xf32>
    %1499 = arith.mulf %1494, %1498 : vector<16x128xf32>
    %1500 = arith.mulf %1499, %1389 : vector<16x128xf32>
    %cst_84 = arith.constant dense<0.000000e+00> : vector<128xf32>
    %1501 = vector.multi_reduction <add>, %1500, %cst_84 [0] : vector<16x128xf32> to vector<128xf32>
    %1502 = vector.shape_cast %1501 : vector<128xf32> to vector<1x128xf32>
    %1503 = vector.broadcast %1236 : f32 to vector<1x128xf32>
    %1504 = arith.addf %1502, %1503 : vector<1x128xf32>
    %1505 = arith.mulf %1499, %1402 : vector<16x128xf32>
    %cst_85 = arith.constant dense<0.000000e+00> : vector<128xf32>
    %1506 = vector.multi_reduction <add>, %1505, %cst_85 [0] : vector<16x128xf32> to vector<128xf32>
    %1507 = vector.shape_cast %1506 : vector<128xf32> to vector<1x128xf32>
    %1508 = vector.broadcast %1244 : f32 to vector<1x128xf32>
    %1509 = arith.addf %1507, %1508 : vector<1x128xf32>
    %cst_86 = arith.constant 5.000000e-01 : f32
    %1510 = arith.mulf %1252, %cst_86 : f32
    %1511 = vector.broadcast %1510 : f32 to vector<16x128xf32>
    %1512 = arith.mulf %1363, %1511 : vector<16x128xf32>
    %cst_87 = arith.constant 5.000000e-01 : f32
    %1513 = arith.mulf %1260, %cst_87 : f32
    %1514 = vector.broadcast %1513 : f32 to vector<16x128xf32>
    %1515 = arith.mulf %1376, %1514 : vector<16x128xf32>
    %1516 = arith.addf %1512, %1515 : vector<16x128xf32>
    %cst_88 = arith.constant dense<0xFF800000> : vector<128xf32>
    %1517 = vector.multi_reduction <maximumf>, %1516, %cst_88 [0] : vector<16x128xf32> to vector<128xf32>
    %1518 = vector.shape_cast %1517 : vector<128xf32> to vector<1x128xf32>
    %1519 = vector.broadcast %1518 : vector<1x128xf32> to vector<16x128xf32>
    %1520 = arith.subf %1516, %1519 : vector<16x128xf32>
    %1521 = math.exp %1520 : vector<16x128xf32>
    %cst_89 = arith.constant dense<0.000000e+00> : vector<128xf32>
    %1522 = vector.multi_reduction <add>, %1521, %cst_89 [0] : vector<16x128xf32> to vector<128xf32>
    %1523 = vector.shape_cast %1522 : vector<128xf32> to vector<1x128xf32>
    %1524 = tpu.reciprocal %1523 {approx = true} : vector<1x128xf32> -> vector<1x128xf32>
    %1525 = vector.broadcast %1524 : vector<1x128xf32> to vector<16x128xf32>
    %1526 = arith.mulf %1521, %1525 : vector<16x128xf32>
    %1527 = arith.mulf %1526, %1415 : vector<16x128xf32>
    %cst_90 = arith.constant dense<0.000000e+00> : vector<128xf32>
    %1528 = vector.multi_reduction <add>, %1527, %cst_90 [0] : vector<16x128xf32> to vector<128xf32>
    %1529 = vector.shape_cast %1528 : vector<128xf32> to vector<1x128xf32>
    %1530 = vector.broadcast %1252 : f32 to vector<1x128xf32>
    %1531 = arith.addf %1529, %1530 : vector<1x128xf32>
    %1532 = arith.mulf %1526, %1428 : vector<16x128xf32>
    %cst_91 = arith.constant dense<0.000000e+00> : vector<128xf32>
    %1533 = vector.multi_reduction <add>, %1532, %cst_91 [0] : vector<16x128xf32> to vector<128xf32>
    %1534 = vector.shape_cast %1533 : vector<128xf32> to vector<1x128xf32>
    %1535 = vector.broadcast %1260 : f32 to vector<1x128xf32>
    %1536 = arith.addf %1534, %1535 : vector<1x128xf32>
    %cst_92 = arith.constant 5.000000e-01 : f32
    %1537 = arith.mulf %1268, %cst_92 : f32
    %1538 = vector.broadcast %1537 : f32 to vector<16x128xf32>
    %1539 = arith.mulf %1337, %1538 : vector<16x128xf32>
    %cst_93 = arith.constant 5.000000e-01 : f32
    %1540 = arith.mulf %1276, %cst_93 : f32
    %1541 = vector.broadcast %1540 : f32 to vector<16x128xf32>
    %1542 = arith.mulf %1350, %1541 : vector<16x128xf32>
    %1543 = arith.addf %1539, %1542 : vector<16x128xf32>
    %cst_94 = arith.constant dense<0xFF800000> : vector<128xf32>
    %1544 = vector.multi_reduction <maximumf>, %1543, %cst_94 [0] : vector<16x128xf32> to vector<128xf32>
    %1545 = vector.shape_cast %1544 : vector<128xf32> to vector<1x128xf32>
    %1546 = vector.broadcast %1545 : vector<1x128xf32> to vector<16x128xf32>
    %1547 = arith.subf %1543, %1546 : vector<16x128xf32>
    %1548 = math.exp %1547 : vector<16x128xf32>
    %cst_95 = arith.constant dense<0.000000e+00> : vector<128xf32>
    %1549 = vector.multi_reduction <add>, %1548, %cst_95 [0] : vector<16x128xf32> to vector<128xf32>
    %1550 = vector.shape_cast %1549 : vector<128xf32> to vector<1x128xf32>
    %1551 = tpu.reciprocal %1550 {approx = true} : vector<1x128xf32> -> vector<1x128xf32>
    %1552 = vector.broadcast %1551 : vector<1x128xf32> to vector<16x128xf32>
    %1553 = arith.mulf %1548, %1552 : vector<16x128xf32>
    %1554 = arith.mulf %1553, %1389 : vector<16x128xf32>
    %cst_96 = arith.constant dense<0.000000e+00> : vector<128xf32>
    %1555 = vector.multi_reduction <add>, %1554, %cst_96 [0] : vector<16x128xf32> to vector<128xf32>
    %1556 = vector.shape_cast %1555 : vector<128xf32> to vector<1x128xf32>
    %1557 = vector.broadcast %1268 : f32 to vector<1x128xf32>
    %1558 = arith.addf %1556, %1557 : vector<1x128xf32>
    %1559 = arith.mulf %1553, %1402 : vector<16x128xf32>
    %cst_97 = arith.constant dense<0.000000e+00> : vector<128xf32>
    %1560 = vector.multi_reduction <add>, %1559, %cst_97 [0] : vector<16x128xf32> to vector<128xf32>
    %1561 = vector.shape_cast %1560 : vector<128xf32> to vector<1x128xf32>
    %1562 = vector.broadcast %1276 : f32 to vector<1x128xf32>
    %1563 = arith.addf %1561, %1562 : vector<1x128xf32>
    %cst_98 = arith.constant 5.000000e-01 : f32
    %1564 = arith.mulf %1284, %cst_98 : f32
    %1565 = vector.broadcast %1564 : f32 to vector<16x128xf32>
    %1566 = arith.mulf %1363, %1565 : vector<16x128xf32>
    %cst_99 = arith.constant 5.000000e-01 : f32
    %1567 = arith.mulf %1292, %cst_99 : f32
    %1568 = vector.broadcast %1567 : f32 to vector<16x128xf32>
    %1569 = arith.mulf %1376, %1568 : vector<16x128xf32>
    %1570 = arith.addf %1566, %1569 : vector<16x128xf32>
    %cst_100 = arith.constant dense<0xFF800000> : vector<128xf32>
    %1571 = vector.multi_reduction <maximumf>, %1570, %cst_100 [0] : vector<16x128xf32> to vector<128xf32>
    %1572 = vector.shape_cast %1571 : vector<128xf32> to vector<1x128xf32>
    %1573 = vector.broadcast %1572 : vector<1x128xf32> to vector<16x128xf32>
    %1574 = arith.subf %1570, %1573 : vector<16x128xf32>
    %1575 = math.exp %1574 : vector<16x128xf32>
    %cst_101 = arith.constant dense<0.000000e+00> : vector<128xf32>
    %1576 = vector.multi_reduction <add>, %1575, %cst_101 [0] : vector<16x128xf32> to vector<128xf32>
    %1577 = vector.shape_cast %1576 : vector<128xf32> to vector<1x128xf32>
    %1578 = tpu.reciprocal %1577 {approx = true} : vector<1x128xf32> -> vector<1x128xf32>
    %1579 = vector.broadcast %1578 : vector<1x128xf32> to vector<16x128xf32>
    %1580 = arith.mulf %1575, %1579 : vector<16x128xf32>
    %1581 = arith.mulf %1580, %1415 : vector<16x128xf32>
    %cst_102 = arith.constant dense<0.000000e+00> : vector<128xf32>
    %1582 = vector.multi_reduction <add>, %1581, %cst_102 [0] : vector<16x128xf32> to vector<128xf32>
    %1583 = vector.shape_cast %1582 : vector<128xf32> to vector<1x128xf32>
    %1584 = vector.broadcast %1284 : f32 to vector<1x128xf32>
    %1585 = arith.addf %1583, %1584 : vector<1x128xf32>
    %1586 = arith.mulf %1580, %1428 : vector<16x128xf32>
    %cst_103 = arith.constant dense<0.000000e+00> : vector<128xf32>
    %1587 = vector.multi_reduction <add>, %1586, %cst_103 [0] : vector<16x128xf32> to vector<128xf32>
    %1588 = vector.shape_cast %1587 : vector<128xf32> to vector<1x128xf32>
    %1589 = vector.broadcast %1292 : f32 to vector<1x128xf32>
    %1590 = arith.addf %1588, %1589 : vector<1x128xf32>
    %cst_104 = arith.constant 5.000000e-01 : f32
    %1591 = arith.mulf %1300, %cst_104 : f32
    %1592 = vector.broadcast %1591 : f32 to vector<16x128xf32>
    %1593 = arith.mulf %1337, %1592 : vector<16x128xf32>
    %cst_105 = arith.constant 5.000000e-01 : f32
    %1594 = arith.mulf %1308, %cst_105 : f32
    %1595 = vector.broadcast %1594 : f32 to vector<16x128xf32>
    %1596 = arith.mulf %1350, %1595 : vector<16x128xf32>
    %1597 = arith.addf %1593, %1596 : vector<16x128xf32>
    %cst_106 = arith.constant dense<0xFF800000> : vector<128xf32>
    %1598 = vector.multi_reduction <maximumf>, %1597, %cst_106 [0] : vector<16x128xf32> to vector<128xf32>
    %1599 = vector.shape_cast %1598 : vector<128xf32> to vector<1x128xf32>
    %1600 = vector.broadcast %1599 : vector<1x128xf32> to vector<16x128xf32>
    %1601 = arith.subf %1597, %1600 : vector<16x128xf32>
    %1602 = math.exp %1601 : vector<16x128xf32>
    %cst_107 = arith.constant dense<0.000000e+00> : vector<128xf32>
    %1603 = vector.multi_reduction <add>, %1602, %cst_107 [0] : vector<16x128xf32> to vector<128xf32>
    %1604 = vector.shape_cast %1603 : vector<128xf32> to vector<1x128xf32>
    %1605 = tpu.reciprocal %1604 {approx = true} : vector<1x128xf32> -> vector<1x128xf32>
    %1606 = vector.broadcast %1605 : vector<1x128xf32> to vector<16x128xf32>
    %1607 = arith.mulf %1602, %1606 : vector<16x128xf32>
    %1608 = arith.mulf %1607, %1389 : vector<16x128xf32>
    %cst_108 = arith.constant dense<0.000000e+00> : vector<128xf32>
    %1609 = vector.multi_reduction <add>, %1608, %cst_108 [0] : vector<16x128xf32> to vector<128xf32>
    %1610 = vector.shape_cast %1609 : vector<128xf32> to vector<1x128xf32>
    %1611 = vector.broadcast %1300 : f32 to vector<1x128xf32>
    %1612 = arith.addf %1610, %1611 : vector<1x128xf32>
    %1613 = arith.mulf %1607, %1402 : vector<16x128xf32>
    %cst_109 = arith.constant dense<0.000000e+00> : vector<128xf32>
    %1614 = vector.multi_reduction <add>, %1613, %cst_109 [0] : vector<16x128xf32> to vector<128xf32>
    %1615 = vector.shape_cast %1614 : vector<128xf32> to vector<1x128xf32>
    %1616 = vector.broadcast %1308 : f32 to vector<1x128xf32>
    %1617 = arith.addf %1615, %1616 : vector<1x128xf32>
    %cst_110 = arith.constant 5.000000e-01 : f32
    %1618 = arith.mulf %1316, %cst_110 : f32
    %1619 = vector.broadcast %1618 : f32 to vector<16x128xf32>
    %1620 = arith.mulf %1363, %1619 : vector<16x128xf32>
    %cst_111 = arith.constant 5.000000e-01 : f32
    %1621 = arith.mulf %1324, %cst_111 : f32
    %1622 = vector.broadcast %1621 : f32 to vector<16x128xf32>
    %1623 = arith.mulf %1376, %1622 : vector<16x128xf32>
    %1624 = arith.addf %1620, %1623 : vector<16x128xf32>
    %cst_112 = arith.constant dense<0xFF800000> : vector<128xf32>
    %1625 = vector.multi_reduction <maximumf>, %1624, %cst_112 [0] : vector<16x128xf32> to vector<128xf32>
    %1626 = vector.shape_cast %1625 : vector<128xf32> to vector<1x128xf32>
    %1627 = vector.broadcast %1626 : vector<1x128xf32> to vector<16x128xf32>
    %1628 = arith.subf %1624, %1627 : vector<16x128xf32>
    %1629 = math.exp %1628 : vector<16x128xf32>
    %cst_113 = arith.constant dense<0.000000e+00> : vector<128xf32>
    %1630 = vector.multi_reduction <add>, %1629, %cst_113 [0] : vector<16x128xf32> to vector<128xf32>
    %1631 = vector.shape_cast %1630 : vector<128xf32> to vector<1x128xf32>
    %1632 = tpu.reciprocal %1631 {approx = true} : vector<1x128xf32> -> vector<1x128xf32>
    %1633 = vector.broadcast %1632 : vector<1x128xf32> to vector<16x128xf32>
    %1634 = arith.mulf %1629, %1633 : vector<16x128xf32>
    %1635 = arith.mulf %1634, %1415 : vector<16x128xf32>
    %cst_114 = arith.constant dense<0.000000e+00> : vector<128xf32>
    %1636 = vector.multi_reduction <add>, %1635, %cst_114 [0] : vector<16x128xf32> to vector<128xf32>
    %1637 = vector.shape_cast %1636 : vector<128xf32> to vector<1x128xf32>
    %1638 = vector.broadcast %1316 : f32 to vector<1x128xf32>
    %1639 = arith.addf %1637, %1638 : vector<1x128xf32>
    %1640 = arith.mulf %1634, %1428 : vector<16x128xf32>
    %cst_115 = arith.constant dense<0.000000e+00> : vector<128xf32>
    %1641 = vector.multi_reduction <add>, %1640, %cst_115 [0] : vector<16x128xf32> to vector<128xf32>
    %1642 = vector.shape_cast %1641 : vector<128xf32> to vector<1x128xf32>
    %1643 = vector.broadcast %1324 : f32 to vector<1x128xf32>
    %1644 = arith.addf %1642, %1643 : vector<1x128xf32>
    %1645 = tpu.concatenate %1450, %1504, %1558, %1612 in 0 : vector<1x128xf32>, vector<1x128xf32>, vector<1x128xf32>, vector<1x128xf32> -> vector<4x128xf32>
    %1646 = tpu.concatenate %1455, %1509, %1563, %1617 in 0 : vector<1x128xf32>, vector<1x128xf32>, vector<1x128xf32>, vector<1x128xf32> -> vector<4x128xf32>
    %1647 = tpu.concatenate %1477, %1531, %1585, %1639 in 0 : vector<1x128xf32>, vector<1x128xf32>, vector<1x128xf32>, vector<1x128xf32> -> vector<4x128xf32>
    %1648 = tpu.concatenate %1482, %1536, %1590, %1644 in 0 : vector<1x128xf32>, vector<1x128xf32>, vector<1x128xf32>, vector<1x128xf32> -> vector<4x128xf32>
    %1649 = vector.broadcast %228 : f32 to vector<4x128xf32>
    %1650 = arith.mulf %1645, %1649 : vector<4x128xf32>
    %1651 = vector.broadcast %232 : f32 to vector<4x128xf32>
    %1652 = arith.mulf %1646, %1651 : vector<4x128xf32>
    %1653 = arith.addf %1650, %1652 : vector<4x128xf32>
    %1654 = vector.broadcast %236 : f32 to vector<4x128xf32>
    %1655 = arith.mulf %1647, %1654 : vector<4x128xf32>
    %1656 = arith.addf %1653, %1655 : vector<4x128xf32>
    %1657 = vector.broadcast %240 : f32 to vector<4x128xf32>
    %1658 = arith.mulf %1648, %1657 : vector<4x128xf32>
    %1659 = arith.addf %1656, %1658 : vector<4x128xf32>
    %1660 = vector.broadcast %244 : f32 to vector<4x128xf32>
    %1661 = arith.addf %1659, %1660 : vector<4x128xf32>
    %1662 = vector.broadcast %229 : f32 to vector<4x128xf32>
    %1663 = arith.mulf %1645, %1662 : vector<4x128xf32>
    %1664 = vector.broadcast %233 : f32 to vector<4x128xf32>
    %1665 = arith.mulf %1646, %1664 : vector<4x128xf32>
    %1666 = arith.addf %1663, %1665 : vector<4x128xf32>
    %1667 = vector.broadcast %237 : f32 to vector<4x128xf32>
    %1668 = arith.mulf %1647, %1667 : vector<4x128xf32>
    %1669 = arith.addf %1666, %1668 : vector<4x128xf32>
    %1670 = vector.broadcast %241 : f32 to vector<4x128xf32>
    %1671 = arith.mulf %1648, %1670 : vector<4x128xf32>
    %1672 = arith.addf %1669, %1671 : vector<4x128xf32>
    %1673 = vector.broadcast %245 : f32 to vector<4x128xf32>
    %1674 = arith.addf %1672, %1673 : vector<4x128xf32>
    %1675 = vector.broadcast %230 : f32 to vector<4x128xf32>
    %1676 = arith.mulf %1645, %1675 : vector<4x128xf32>
    %1677 = vector.broadcast %234 : f32 to vector<4x128xf32>
    %1678 = arith.mulf %1646, %1677 : vector<4x128xf32>
    %1679 = arith.addf %1676, %1678 : vector<4x128xf32>
    %1680 = vector.broadcast %238 : f32 to vector<4x128xf32>
    %1681 = arith.mulf %1647, %1680 : vector<4x128xf32>
    %1682 = arith.addf %1679, %1681 : vector<4x128xf32>
    %1683 = vector.broadcast %242 : f32 to vector<4x128xf32>
    %1684 = arith.mulf %1648, %1683 : vector<4x128xf32>
    %1685 = arith.addf %1682, %1684 : vector<4x128xf32>
    %1686 = vector.broadcast %246 : f32 to vector<4x128xf32>
    %1687 = arith.addf %1685, %1686 : vector<4x128xf32>
    %1688 = vector.broadcast %231 : f32 to vector<4x128xf32>
    %1689 = arith.mulf %1645, %1688 : vector<4x128xf32>
    %1690 = vector.broadcast %235 : f32 to vector<4x128xf32>
    %1691 = arith.mulf %1646, %1690 : vector<4x128xf32>
    %1692 = arith.addf %1689, %1691 : vector<4x128xf32>
    %1693 = vector.broadcast %239 : f32 to vector<4x128xf32>
    %1694 = arith.mulf %1647, %1693 : vector<4x128xf32>
    %1695 = arith.addf %1692, %1694 : vector<4x128xf32>
    %1696 = vector.broadcast %243 : f32 to vector<4x128xf32>
    %1697 = arith.mulf %1648, %1696 : vector<4x128xf32>
    %1698 = arith.addf %1695, %1697 : vector<4x128xf32>
    %1699 = vector.broadcast %247 : f32 to vector<4x128xf32>
    %1700 = arith.addf %1698, %1699 : vector<4x128xf32>
    %cst_116 = arith.constant 0.000000e+00 : f32
    %1701 = vector.broadcast %cst_116 : f32 to vector<4x128xf32>
    %1702 = arith.maximumf %1661, %1701 : vector<4x128xf32>
    %1703 = arith.addf %1645, %1702 : vector<4x128xf32>
    %cst_117 = arith.constant 0.000000e+00 : f32
    %1704 = vector.broadcast %cst_117 : f32 to vector<4x128xf32>
    %1705 = arith.maximumf %1674, %1704 : vector<4x128xf32>
    %1706 = arith.addf %1646, %1705 : vector<4x128xf32>
    %cst_118 = arith.constant 0.000000e+00 : f32
    %1707 = vector.broadcast %cst_118 : f32 to vector<4x128xf32>
    %1708 = arith.maximumf %1687, %1707 : vector<4x128xf32>
    %1709 = arith.addf %1647, %1708 : vector<4x128xf32>
    %cst_119 = arith.constant 0.000000e+00 : f32
    %1710 = vector.broadcast %cst_119 : f32 to vector<4x128xf32>
    %1711 = arith.maximumf %1700, %1710 : vector<4x128xf32>
    %1712 = arith.addf %1648, %1711 : vector<4x128xf32>
    %1713 = vector.broadcast %248 : f32 to vector<16x128xf32>
    %1714 = arith.mulf %1187, %1713 : vector<16x128xf32>
    %1715 = vector.broadcast %252 : f32 to vector<16x128xf32>
    %1716 = arith.mulf %1190, %1715 : vector<16x128xf32>
    %1717 = arith.addf %1714, %1716 : vector<16x128xf32>
    %1718 = vector.broadcast %256 : f32 to vector<16x128xf32>
    %1719 = arith.mulf %1193, %1718 : vector<16x128xf32>
    %1720 = arith.addf %1717, %1719 : vector<16x128xf32>
    %1721 = vector.broadcast %260 : f32 to vector<16x128xf32>
    %1722 = arith.mulf %1196, %1721 : vector<16x128xf32>
    %1723 = arith.addf %1720, %1722 : vector<16x128xf32>
    %1724 = vector.broadcast %264 : f32 to vector<16x128xf32>
    %1725 = arith.addf %1723, %1724 : vector<16x128xf32>
    %1726 = vector.broadcast %249 : f32 to vector<16x128xf32>
    %1727 = arith.mulf %1187, %1726 : vector<16x128xf32>
    %1728 = vector.broadcast %253 : f32 to vector<16x128xf32>
    %1729 = arith.mulf %1190, %1728 : vector<16x128xf32>
    %1730 = arith.addf %1727, %1729 : vector<16x128xf32>
    %1731 = vector.broadcast %257 : f32 to vector<16x128xf32>
    %1732 = arith.mulf %1193, %1731 : vector<16x128xf32>
    %1733 = arith.addf %1730, %1732 : vector<16x128xf32>
    %1734 = vector.broadcast %261 : f32 to vector<16x128xf32>
    %1735 = arith.mulf %1196, %1734 : vector<16x128xf32>
    %1736 = arith.addf %1733, %1735 : vector<16x128xf32>
    %1737 = vector.broadcast %265 : f32 to vector<16x128xf32>
    %1738 = arith.addf %1736, %1737 : vector<16x128xf32>
    %1739 = vector.broadcast %250 : f32 to vector<16x128xf32>
    %1740 = arith.mulf %1187, %1739 : vector<16x128xf32>
    %1741 = vector.broadcast %254 : f32 to vector<16x128xf32>
    %1742 = arith.mulf %1190, %1741 : vector<16x128xf32>
    %1743 = arith.addf %1740, %1742 : vector<16x128xf32>
    %1744 = vector.broadcast %258 : f32 to vector<16x128xf32>
    %1745 = arith.mulf %1193, %1744 : vector<16x128xf32>
    %1746 = arith.addf %1743, %1745 : vector<16x128xf32>
    %1747 = vector.broadcast %262 : f32 to vector<16x128xf32>
    %1748 = arith.mulf %1196, %1747 : vector<16x128xf32>
    %1749 = arith.addf %1746, %1748 : vector<16x128xf32>
    %1750 = vector.broadcast %266 : f32 to vector<16x128xf32>
    %1751 = arith.addf %1749, %1750 : vector<16x128xf32>
    %1752 = vector.broadcast %251 : f32 to vector<16x128xf32>
    %1753 = arith.mulf %1187, %1752 : vector<16x128xf32>
    %1754 = vector.broadcast %255 : f32 to vector<16x128xf32>
    %1755 = arith.mulf %1190, %1754 : vector<16x128xf32>
    %1756 = arith.addf %1753, %1755 : vector<16x128xf32>
    %1757 = vector.broadcast %259 : f32 to vector<16x128xf32>
    %1758 = arith.mulf %1193, %1757 : vector<16x128xf32>
    %1759 = arith.addf %1756, %1758 : vector<16x128xf32>
    %1760 = vector.broadcast %263 : f32 to vector<16x128xf32>
    %1761 = arith.mulf %1196, %1760 : vector<16x128xf32>
    %1762 = arith.addf %1759, %1761 : vector<16x128xf32>
    %1763 = vector.broadcast %267 : f32 to vector<16x128xf32>
    %1764 = arith.addf %1762, %1763 : vector<16x128xf32>
    %1765 = vector.broadcast %268 : f32 to vector<4x128xf32>
    %1766 = arith.mulf %1703, %1765 : vector<4x128xf32>
    %1767 = vector.broadcast %272 : f32 to vector<4x128xf32>
    %1768 = arith.mulf %1706, %1767 : vector<4x128xf32>
    %1769 = arith.addf %1766, %1768 : vector<4x128xf32>
    %1770 = vector.broadcast %276 : f32 to vector<4x128xf32>
    %1771 = arith.mulf %1709, %1770 : vector<4x128xf32>
    %1772 = arith.addf %1769, %1771 : vector<4x128xf32>
    %1773 = vector.broadcast %280 : f32 to vector<4x128xf32>
    %1774 = arith.mulf %1712, %1773 : vector<4x128xf32>
    %1775 = arith.addf %1772, %1774 : vector<4x128xf32>
    %1776 = vector.broadcast %284 : f32 to vector<4x128xf32>
    %1777 = arith.addf %1775, %1776 : vector<4x128xf32>
    %1778 = vector.broadcast %269 : f32 to vector<4x128xf32>
    %1779 = arith.mulf %1703, %1778 : vector<4x128xf32>
    %1780 = vector.broadcast %273 : f32 to vector<4x128xf32>
    %1781 = arith.mulf %1706, %1780 : vector<4x128xf32>
    %1782 = arith.addf %1779, %1781 : vector<4x128xf32>
    %1783 = vector.broadcast %277 : f32 to vector<4x128xf32>
    %1784 = arith.mulf %1709, %1783 : vector<4x128xf32>
    %1785 = arith.addf %1782, %1784 : vector<4x128xf32>
    %1786 = vector.broadcast %281 : f32 to vector<4x128xf32>
    %1787 = arith.mulf %1712, %1786 : vector<4x128xf32>
    %1788 = arith.addf %1785, %1787 : vector<4x128xf32>
    %1789 = vector.broadcast %285 : f32 to vector<4x128xf32>
    %1790 = arith.addf %1788, %1789 : vector<4x128xf32>
    %1791 = vector.broadcast %270 : f32 to vector<4x128xf32>
    %1792 = arith.mulf %1703, %1791 : vector<4x128xf32>
    %1793 = vector.broadcast %274 : f32 to vector<4x128xf32>
    %1794 = arith.mulf %1706, %1793 : vector<4x128xf32>
    %1795 = arith.addf %1792, %1794 : vector<4x128xf32>
    %1796 = vector.broadcast %278 : f32 to vector<4x128xf32>
    %1797 = arith.mulf %1709, %1796 : vector<4x128xf32>
    %1798 = arith.addf %1795, %1797 : vector<4x128xf32>
    %1799 = vector.broadcast %282 : f32 to vector<4x128xf32>
    %1800 = arith.mulf %1712, %1799 : vector<4x128xf32>
    %1801 = arith.addf %1798, %1800 : vector<4x128xf32>
    %1802 = vector.broadcast %286 : f32 to vector<4x128xf32>
    %1803 = arith.addf %1801, %1802 : vector<4x128xf32>
    %1804 = vector.broadcast %271 : f32 to vector<4x128xf32>
    %1805 = arith.mulf %1703, %1804 : vector<4x128xf32>
    %1806 = vector.broadcast %275 : f32 to vector<4x128xf32>
    %1807 = arith.mulf %1706, %1806 : vector<4x128xf32>
    %1808 = arith.addf %1805, %1807 : vector<4x128xf32>
    %1809 = vector.broadcast %279 : f32 to vector<4x128xf32>
    %1810 = arith.mulf %1709, %1809 : vector<4x128xf32>
    %1811 = arith.addf %1808, %1810 : vector<4x128xf32>
    %1812 = vector.broadcast %283 : f32 to vector<4x128xf32>
    %1813 = arith.mulf %1712, %1812 : vector<4x128xf32>
    %1814 = arith.addf %1811, %1813 : vector<4x128xf32>
    %1815 = vector.broadcast %287 : f32 to vector<4x128xf32>
    %1816 = arith.addf %1814, %1815 : vector<4x128xf32>
    %1817 = vector.broadcast %288 : f32 to vector<4x128xf32>
    %1818 = arith.mulf %1703, %1817 : vector<4x128xf32>
    %1819 = vector.broadcast %292 : f32 to vector<4x128xf32>
    %1820 = arith.mulf %1706, %1819 : vector<4x128xf32>
    %1821 = arith.addf %1818, %1820 : vector<4x128xf32>
    %1822 = vector.broadcast %296 : f32 to vector<4x128xf32>
    %1823 = arith.mulf %1709, %1822 : vector<4x128xf32>
    %1824 = arith.addf %1821, %1823 : vector<4x128xf32>
    %1825 = vector.broadcast %300 : f32 to vector<4x128xf32>
    %1826 = arith.mulf %1712, %1825 : vector<4x128xf32>
    %1827 = arith.addf %1824, %1826 : vector<4x128xf32>
    %1828 = vector.broadcast %304 : f32 to vector<4x128xf32>
    %1829 = arith.addf %1827, %1828 : vector<4x128xf32>
    %1830 = vector.broadcast %289 : f32 to vector<4x128xf32>
    %1831 = arith.mulf %1703, %1830 : vector<4x128xf32>
    %1832 = vector.broadcast %293 : f32 to vector<4x128xf32>
    %1833 = arith.mulf %1706, %1832 : vector<4x128xf32>
    %1834 = arith.addf %1831, %1833 : vector<4x128xf32>
    %1835 = vector.broadcast %297 : f32 to vector<4x128xf32>
    %1836 = arith.mulf %1709, %1835 : vector<4x128xf32>
    %1837 = arith.addf %1834, %1836 : vector<4x128xf32>
    %1838 = vector.broadcast %301 : f32 to vector<4x128xf32>
    %1839 = arith.mulf %1712, %1838 : vector<4x128xf32>
    %1840 = arith.addf %1837, %1839 : vector<4x128xf32>
    %1841 = vector.broadcast %305 : f32 to vector<4x128xf32>
    %1842 = arith.addf %1840, %1841 : vector<4x128xf32>
    %1843 = vector.broadcast %290 : f32 to vector<4x128xf32>
    %1844 = arith.mulf %1703, %1843 : vector<4x128xf32>
    %1845 = vector.broadcast %294 : f32 to vector<4x128xf32>
    %1846 = arith.mulf %1706, %1845 : vector<4x128xf32>
    %1847 = arith.addf %1844, %1846 : vector<4x128xf32>
    %1848 = vector.broadcast %298 : f32 to vector<4x128xf32>
    %1849 = arith.mulf %1709, %1848 : vector<4x128xf32>
    %1850 = arith.addf %1847, %1849 : vector<4x128xf32>
    %1851 = vector.broadcast %302 : f32 to vector<4x128xf32>
    %1852 = arith.mulf %1712, %1851 : vector<4x128xf32>
    %1853 = arith.addf %1850, %1852 : vector<4x128xf32>
    %1854 = vector.broadcast %306 : f32 to vector<4x128xf32>
    %1855 = arith.addf %1853, %1854 : vector<4x128xf32>
    %1856 = vector.broadcast %291 : f32 to vector<4x128xf32>
    %1857 = arith.mulf %1703, %1856 : vector<4x128xf32>
    %1858 = vector.broadcast %295 : f32 to vector<4x128xf32>
    %1859 = arith.mulf %1706, %1858 : vector<4x128xf32>
    %1860 = arith.addf %1857, %1859 : vector<4x128xf32>
    %1861 = vector.broadcast %299 : f32 to vector<4x128xf32>
    %1862 = arith.mulf %1709, %1861 : vector<4x128xf32>
    %1863 = arith.addf %1860, %1862 : vector<4x128xf32>
    %1864 = vector.broadcast %303 : f32 to vector<4x128xf32>
    %1865 = arith.mulf %1712, %1864 : vector<4x128xf32>
    %1866 = arith.addf %1863, %1865 : vector<4x128xf32>
    %1867 = vector.broadcast %307 : f32 to vector<4x128xf32>
    %1868 = arith.addf %1866, %1867 : vector<4x128xf32>
    %1869 = vector.shape_cast %1777 : vector<4x128xf32> to vector<4x1x128xf32>
    %1870 = vector.shape_cast %1725 : vector<16x128xf32> to vector<1x16x128xf32>
    %1871 = vector.broadcast %1869 : vector<4x1x128xf32> to vector<4x16x128xf32>
    %1872 = vector.broadcast %1870 : vector<1x16x128xf32> to vector<4x16x128xf32>
    %1873 = arith.mulf %1871, %1872 : vector<4x16x128xf32>
    %1874 = vector.shape_cast %1790 : vector<4x128xf32> to vector<4x1x128xf32>
    %1875 = vector.shape_cast %1738 : vector<16x128xf32> to vector<1x16x128xf32>
    %1876 = vector.broadcast %1874 : vector<4x1x128xf32> to vector<4x16x128xf32>
    %1877 = vector.broadcast %1875 : vector<1x16x128xf32> to vector<4x16x128xf32>
    %1878 = arith.mulf %1876, %1877 : vector<4x16x128xf32>
    %1879 = arith.addf %1873, %1878 : vector<4x16x128xf32>
    %cst_120 = arith.constant 5.000000e-01 : f32
    %1880 = vector.broadcast %cst_120 : f32 to vector<4x16x128xf32>
    %1881 = arith.mulf %1879, %1880 : vector<4x16x128xf32>
    %cst_121 = arith.constant dense<0xFF800000> : vector<16x128xf32>
    %1882 = vector.multi_reduction <maximumf>, %1881, %cst_121 [0] : vector<4x16x128xf32> to vector<16x128xf32>
    %1883 = vector.shape_cast %1882 : vector<16x128xf32> to vector<1x16x128xf32>
    %1884 = vector.broadcast %1883 : vector<1x16x128xf32> to vector<4x16x128xf32>
    %1885 = arith.subf %1881, %1884 : vector<4x16x128xf32>
    %1886 = math.exp %1885 : vector<4x16x128xf32>
    %cst_122 = arith.constant dense<0.000000e+00> : vector<16x128xf32>
    %1887 = vector.multi_reduction <add>, %1886, %cst_122 [0] : vector<4x16x128xf32> to vector<16x128xf32>
    %1888 = vector.shape_cast %1887 : vector<16x128xf32> to vector<1x16x128xf32>
    %1889 = tpu.reciprocal %1888 {approx = true} : vector<1x16x128xf32> -> vector<1x16x128xf32>
    %1890 = vector.broadcast %1889 : vector<1x16x128xf32> to vector<4x16x128xf32>
    %1891 = arith.mulf %1886, %1890 : vector<4x16x128xf32>
    %1892 = vector.shape_cast %1829 : vector<4x128xf32> to vector<4x1x128xf32>
    %1893 = vector.broadcast %1892 : vector<4x1x128xf32> to vector<4x16x128xf32>
    %1894 = arith.mulf %1891, %1893 : vector<4x16x128xf32>
    %cst_123 = arith.constant dense<0.000000e+00> : vector<16x128xf32>
    %1895 = vector.multi_reduction <add>, %1894, %cst_123 [0] : vector<4x16x128xf32> to vector<16x128xf32>
    %1896 = arith.addf %1725, %1895 : vector<16x128xf32>
    %1897 = vector.shape_cast %1842 : vector<4x128xf32> to vector<4x1x128xf32>
    %1898 = vector.broadcast %1897 : vector<4x1x128xf32> to vector<4x16x128xf32>
    %1899 = arith.mulf %1891, %1898 : vector<4x16x128xf32>
    %cst_124 = arith.constant dense<0.000000e+00> : vector<16x128xf32>
    %1900 = vector.multi_reduction <add>, %1899, %cst_124 [0] : vector<4x16x128xf32> to vector<16x128xf32>
    %1901 = arith.addf %1738, %1900 : vector<16x128xf32>
    %1902 = vector.shape_cast %1803 : vector<4x128xf32> to vector<4x1x128xf32>
    %1903 = vector.shape_cast %1751 : vector<16x128xf32> to vector<1x16x128xf32>
    %1904 = vector.broadcast %1902 : vector<4x1x128xf32> to vector<4x16x128xf32>
    %1905 = vector.broadcast %1903 : vector<1x16x128xf32> to vector<4x16x128xf32>
    %1906 = arith.mulf %1904, %1905 : vector<4x16x128xf32>
    %1907 = vector.shape_cast %1816 : vector<4x128xf32> to vector<4x1x128xf32>
    %1908 = vector.shape_cast %1764 : vector<16x128xf32> to vector<1x16x128xf32>
    %1909 = vector.broadcast %1907 : vector<4x1x128xf32> to vector<4x16x128xf32>
    %1910 = vector.broadcast %1908 : vector<1x16x128xf32> to vector<4x16x128xf32>
    %1911 = arith.mulf %1909, %1910 : vector<4x16x128xf32>
    %1912 = arith.addf %1906, %1911 : vector<4x16x128xf32>
    %cst_125 = arith.constant 5.000000e-01 : f32
    %1913 = vector.broadcast %cst_125 : f32 to vector<4x16x128xf32>
    %1914 = arith.mulf %1912, %1913 : vector<4x16x128xf32>
    %cst_126 = arith.constant dense<0xFF800000> : vector<16x128xf32>
    %1915 = vector.multi_reduction <maximumf>, %1914, %cst_126 [0] : vector<4x16x128xf32> to vector<16x128xf32>
    %1916 = vector.shape_cast %1915 : vector<16x128xf32> to vector<1x16x128xf32>
    %1917 = vector.broadcast %1916 : vector<1x16x128xf32> to vector<4x16x128xf32>
    %1918 = arith.subf %1914, %1917 : vector<4x16x128xf32>
    %1919 = math.exp %1918 : vector<4x16x128xf32>
    %cst_127 = arith.constant dense<0.000000e+00> : vector<16x128xf32>
    %1920 = vector.multi_reduction <add>, %1919, %cst_127 [0] : vector<4x16x128xf32> to vector<16x128xf32>
    %1921 = vector.shape_cast %1920 : vector<16x128xf32> to vector<1x16x128xf32>
    %1922 = tpu.reciprocal %1921 {approx = true} : vector<1x16x128xf32> -> vector<1x16x128xf32>
    %1923 = vector.broadcast %1922 : vector<1x16x128xf32> to vector<4x16x128xf32>
    %1924 = arith.mulf %1919, %1923 : vector<4x16x128xf32>
    %1925 = vector.shape_cast %1855 : vector<4x128xf32> to vector<4x1x128xf32>
    %1926 = vector.broadcast %1925 : vector<4x1x128xf32> to vector<4x16x128xf32>
    %1927 = arith.mulf %1924, %1926 : vector<4x16x128xf32>
    %cst_128 = arith.constant dense<0.000000e+00> : vector<16x128xf32>
    %1928 = vector.multi_reduction <add>, %1927, %cst_128 [0] : vector<4x16x128xf32> to vector<16x128xf32>
    %1929 = arith.addf %1751, %1928 : vector<16x128xf32>
    %1930 = vector.shape_cast %1868 : vector<4x128xf32> to vector<4x1x128xf32>
    %1931 = vector.broadcast %1930 : vector<4x1x128xf32> to vector<4x16x128xf32>
    %1932 = arith.mulf %1924, %1931 : vector<4x16x128xf32>
    %cst_129 = arith.constant dense<0.000000e+00> : vector<16x128xf32>
    %1933 = vector.multi_reduction <add>, %1932, %cst_129 [0] : vector<4x16x128xf32> to vector<16x128xf32>
    %1934 = arith.addf %1764, %1933 : vector<16x128xf32>
    %1935 = vector.broadcast %308 : f32 to vector<16x128xf32>
    %1936 = arith.mulf %1896, %1935 : vector<16x128xf32>
    %1937 = vector.broadcast %312 : f32 to vector<16x128xf32>
    %1938 = arith.mulf %1901, %1937 : vector<16x128xf32>
    %1939 = arith.addf %1936, %1938 : vector<16x128xf32>
    %1940 = vector.broadcast %316 : f32 to vector<16x128xf32>
    %1941 = arith.mulf %1929, %1940 : vector<16x128xf32>
    %1942 = arith.addf %1939, %1941 : vector<16x128xf32>
    %1943 = vector.broadcast %320 : f32 to vector<16x128xf32>
    %1944 = arith.mulf %1934, %1943 : vector<16x128xf32>
    %1945 = arith.addf %1942, %1944 : vector<16x128xf32>
    %1946 = vector.broadcast %324 : f32 to vector<16x128xf32>
    %1947 = arith.addf %1945, %1946 : vector<16x128xf32>
    %1948 = vector.broadcast %309 : f32 to vector<16x128xf32>
    %1949 = arith.mulf %1896, %1948 : vector<16x128xf32>
    %1950 = vector.broadcast %313 : f32 to vector<16x128xf32>
    %1951 = arith.mulf %1901, %1950 : vector<16x128xf32>
    %1952 = arith.addf %1949, %1951 : vector<16x128xf32>
    %1953 = vector.broadcast %317 : f32 to vector<16x128xf32>
    %1954 = arith.mulf %1929, %1953 : vector<16x128xf32>
    %1955 = arith.addf %1952, %1954 : vector<16x128xf32>
    %1956 = vector.broadcast %321 : f32 to vector<16x128xf32>
    %1957 = arith.mulf %1934, %1956 : vector<16x128xf32>
    %1958 = arith.addf %1955, %1957 : vector<16x128xf32>
    %1959 = vector.broadcast %325 : f32 to vector<16x128xf32>
    %1960 = arith.addf %1958, %1959 : vector<16x128xf32>
    %1961 = vector.broadcast %310 : f32 to vector<16x128xf32>
    %1962 = arith.mulf %1896, %1961 : vector<16x128xf32>
    %1963 = vector.broadcast %314 : f32 to vector<16x128xf32>
    %1964 = arith.mulf %1901, %1963 : vector<16x128xf32>
    %1965 = arith.addf %1962, %1964 : vector<16x128xf32>
    %1966 = vector.broadcast %318 : f32 to vector<16x128xf32>
    %1967 = arith.mulf %1929, %1966 : vector<16x128xf32>
    %1968 = arith.addf %1965, %1967 : vector<16x128xf32>
    %1969 = vector.broadcast %322 : f32 to vector<16x128xf32>
    %1970 = arith.mulf %1934, %1969 : vector<16x128xf32>
    %1971 = arith.addf %1968, %1970 : vector<16x128xf32>
    %1972 = vector.broadcast %326 : f32 to vector<16x128xf32>
    %1973 = arith.addf %1971, %1972 : vector<16x128xf32>
    %1974 = vector.broadcast %311 : f32 to vector<16x128xf32>
    %1975 = arith.mulf %1896, %1974 : vector<16x128xf32>
    %1976 = vector.broadcast %315 : f32 to vector<16x128xf32>
    %1977 = arith.mulf %1901, %1976 : vector<16x128xf32>
    %1978 = arith.addf %1975, %1977 : vector<16x128xf32>
    %1979 = vector.broadcast %319 : f32 to vector<16x128xf32>
    %1980 = arith.mulf %1929, %1979 : vector<16x128xf32>
    %1981 = arith.addf %1978, %1980 : vector<16x128xf32>
    %1982 = vector.broadcast %323 : f32 to vector<16x128xf32>
    %1983 = arith.mulf %1934, %1982 : vector<16x128xf32>
    %1984 = arith.addf %1981, %1983 : vector<16x128xf32>
    %1985 = vector.broadcast %327 : f32 to vector<16x128xf32>
    %1986 = arith.addf %1984, %1985 : vector<16x128xf32>
    %cst_130 = arith.constant 0.000000e+00 : f32
    %1987 = vector.broadcast %cst_130 : f32 to vector<16x128xf32>
    %1988 = arith.maximumf %1947, %1987 : vector<16x128xf32>
    %1989 = arith.addf %1896, %1988 : vector<16x128xf32>
    %cst_131 = arith.constant 0.000000e+00 : f32
    %1990 = vector.broadcast %cst_131 : f32 to vector<16x128xf32>
    %1991 = arith.maximumf %1960, %1990 : vector<16x128xf32>
    %1992 = arith.addf %1901, %1991 : vector<16x128xf32>
    %cst_132 = arith.constant 0.000000e+00 : f32
    %1993 = vector.broadcast %cst_132 : f32 to vector<16x128xf32>
    %1994 = arith.maximumf %1973, %1993 : vector<16x128xf32>
    %1995 = arith.addf %1929, %1994 : vector<16x128xf32>
    %cst_133 = arith.constant 0.000000e+00 : f32
    %1996 = vector.broadcast %cst_133 : f32 to vector<16x128xf32>
    %1997 = arith.maximumf %1986, %1996 : vector<16x128xf32>
    %1998 = arith.addf %1934, %1997 : vector<16x128xf32>
    %1999 = arith.mulf %328, %332 : f32
    %2000 = arith.mulf %329, %336 : f32
    %2001 = arith.addf %1999, %2000 : f32
    %2002 = arith.mulf %330, %340 : f32
    %2003 = arith.addf %2001, %2002 : f32
    %2004 = arith.mulf %331, %344 : f32
    %2005 = arith.addf %2003, %2004 : f32
    %2006 = arith.addf %2005, %348 : f32
    %2007 = arith.mulf %328, %333 : f32
    %2008 = arith.mulf %329, %337 : f32
    %2009 = arith.addf %2007, %2008 : f32
    %2010 = arith.mulf %330, %341 : f32
    %2011 = arith.addf %2009, %2010 : f32
    %2012 = arith.mulf %331, %345 : f32
    %2013 = arith.addf %2011, %2012 : f32
    %2014 = arith.addf %2013, %349 : f32
    %2015 = arith.mulf %328, %334 : f32
    %2016 = arith.mulf %329, %338 : f32
    %2017 = arith.addf %2015, %2016 : f32
    %2018 = arith.mulf %330, %342 : f32
    %2019 = arith.addf %2017, %2018 : f32
    %2020 = arith.mulf %331, %346 : f32
    %2021 = arith.addf %2019, %2020 : f32
    %2022 = arith.addf %2021, %350 : f32
    %2023 = arith.mulf %328, %335 : f32
    %2024 = arith.mulf %329, %339 : f32
    %2025 = arith.addf %2023, %2024 : f32
    %2026 = arith.mulf %330, %343 : f32
    %2027 = arith.addf %2025, %2026 : f32
    %2028 = arith.mulf %331, %347 : f32
    %2029 = arith.addf %2027, %2028 : f32
    %2030 = arith.addf %2029, %351 : f32
    %2031 = vector.broadcast %352 : f32 to vector<16x128xf32>
    %2032 = arith.mulf %1989, %2031 : vector<16x128xf32>
    %2033 = vector.broadcast %356 : f32 to vector<16x128xf32>
    %2034 = arith.mulf %1992, %2033 : vector<16x128xf32>
    %2035 = arith.addf %2032, %2034 : vector<16x128xf32>
    %2036 = vector.broadcast %360 : f32 to vector<16x128xf32>
    %2037 = arith.mulf %1995, %2036 : vector<16x128xf32>
    %2038 = arith.addf %2035, %2037 : vector<16x128xf32>
    %2039 = vector.broadcast %364 : f32 to vector<16x128xf32>
    %2040 = arith.mulf %1998, %2039 : vector<16x128xf32>
    %2041 = arith.addf %2038, %2040 : vector<16x128xf32>
    %2042 = vector.broadcast %368 : f32 to vector<16x128xf32>
    %2043 = arith.addf %2041, %2042 : vector<16x128xf32>
    %2044 = vector.broadcast %353 : f32 to vector<16x128xf32>
    %2045 = arith.mulf %1989, %2044 : vector<16x128xf32>
    %2046 = vector.broadcast %357 : f32 to vector<16x128xf32>
    %2047 = arith.mulf %1992, %2046 : vector<16x128xf32>
    %2048 = arith.addf %2045, %2047 : vector<16x128xf32>
    %2049 = vector.broadcast %361 : f32 to vector<16x128xf32>
    %2050 = arith.mulf %1995, %2049 : vector<16x128xf32>
    %2051 = arith.addf %2048, %2050 : vector<16x128xf32>
    %2052 = vector.broadcast %365 : f32 to vector<16x128xf32>
    %2053 = arith.mulf %1998, %2052 : vector<16x128xf32>
    %2054 = arith.addf %2051, %2053 : vector<16x128xf32>
    %2055 = vector.broadcast %369 : f32 to vector<16x128xf32>
    %2056 = arith.addf %2054, %2055 : vector<16x128xf32>
    %2057 = vector.broadcast %354 : f32 to vector<16x128xf32>
    %2058 = arith.mulf %1989, %2057 : vector<16x128xf32>
    %2059 = vector.broadcast %358 : f32 to vector<16x128xf32>
    %2060 = arith.mulf %1992, %2059 : vector<16x128xf32>
    %2061 = arith.addf %2058, %2060 : vector<16x128xf32>
    %2062 = vector.broadcast %362 : f32 to vector<16x128xf32>
    %2063 = arith.mulf %1995, %2062 : vector<16x128xf32>
    %2064 = arith.addf %2061, %2063 : vector<16x128xf32>
    %2065 = vector.broadcast %366 : f32 to vector<16x128xf32>
    %2066 = arith.mulf %1998, %2065 : vector<16x128xf32>
    %2067 = arith.addf %2064, %2066 : vector<16x128xf32>
    %2068 = vector.broadcast %370 : f32 to vector<16x128xf32>
    %2069 = arith.addf %2067, %2068 : vector<16x128xf32>
    %2070 = vector.broadcast %355 : f32 to vector<16x128xf32>
    %2071 = arith.mulf %1989, %2070 : vector<16x128xf32>
    %2072 = vector.broadcast %359 : f32 to vector<16x128xf32>
    %2073 = arith.mulf %1992, %2072 : vector<16x128xf32>
    %2074 = arith.addf %2071, %2073 : vector<16x128xf32>
    %2075 = vector.broadcast %363 : f32 to vector<16x128xf32>
    %2076 = arith.mulf %1995, %2075 : vector<16x128xf32>
    %2077 = arith.addf %2074, %2076 : vector<16x128xf32>
    %2078 = vector.broadcast %367 : f32 to vector<16x128xf32>
    %2079 = arith.mulf %1998, %2078 : vector<16x128xf32>
    %2080 = arith.addf %2077, %2079 : vector<16x128xf32>
    %2081 = vector.broadcast %371 : f32 to vector<16x128xf32>
    %2082 = arith.addf %2080, %2081 : vector<16x128xf32>
    %2083 = vector.broadcast %372 : f32 to vector<16x128xf32>
    %2084 = arith.mulf %1989, %2083 : vector<16x128xf32>
    %2085 = vector.broadcast %376 : f32 to vector<16x128xf32>
    %2086 = arith.mulf %1992, %2085 : vector<16x128xf32>
    %2087 = arith.addf %2084, %2086 : vector<16x128xf32>
    %2088 = vector.broadcast %380 : f32 to vector<16x128xf32>
    %2089 = arith.mulf %1995, %2088 : vector<16x128xf32>
    %2090 = arith.addf %2087, %2089 : vector<16x128xf32>
    %2091 = vector.broadcast %384 : f32 to vector<16x128xf32>
    %2092 = arith.mulf %1998, %2091 : vector<16x128xf32>
    %2093 = arith.addf %2090, %2092 : vector<16x128xf32>
    %2094 = vector.broadcast %388 : f32 to vector<16x128xf32>
    %2095 = arith.addf %2093, %2094 : vector<16x128xf32>
    %2096 = vector.broadcast %373 : f32 to vector<16x128xf32>
    %2097 = arith.mulf %1989, %2096 : vector<16x128xf32>
    %2098 = vector.broadcast %377 : f32 to vector<16x128xf32>
    %2099 = arith.mulf %1992, %2098 : vector<16x128xf32>
    %2100 = arith.addf %2097, %2099 : vector<16x128xf32>
    %2101 = vector.broadcast %381 : f32 to vector<16x128xf32>
    %2102 = arith.mulf %1995, %2101 : vector<16x128xf32>
    %2103 = arith.addf %2100, %2102 : vector<16x128xf32>
    %2104 = vector.broadcast %385 : f32 to vector<16x128xf32>
    %2105 = arith.mulf %1998, %2104 : vector<16x128xf32>
    %2106 = arith.addf %2103, %2105 : vector<16x128xf32>
    %2107 = vector.broadcast %389 : f32 to vector<16x128xf32>
    %2108 = arith.addf %2106, %2107 : vector<16x128xf32>
    %2109 = vector.broadcast %374 : f32 to vector<16x128xf32>
    %2110 = arith.mulf %1989, %2109 : vector<16x128xf32>
    %2111 = vector.broadcast %378 : f32 to vector<16x128xf32>
    %2112 = arith.mulf %1992, %2111 : vector<16x128xf32>
    %2113 = arith.addf %2110, %2112 : vector<16x128xf32>
    %2114 = vector.broadcast %382 : f32 to vector<16x128xf32>
    %2115 = arith.mulf %1995, %2114 : vector<16x128xf32>
    %2116 = arith.addf %2113, %2115 : vector<16x128xf32>
    %2117 = vector.broadcast %386 : f32 to vector<16x128xf32>
    %2118 = arith.mulf %1998, %2117 : vector<16x128xf32>
    %2119 = arith.addf %2116, %2118 : vector<16x128xf32>
    %2120 = vector.broadcast %390 : f32 to vector<16x128xf32>
    %2121 = arith.addf %2119, %2120 : vector<16x128xf32>
    %2122 = vector.broadcast %375 : f32 to vector<16x128xf32>
    %2123 = arith.mulf %1989, %2122 : vector<16x128xf32>
    %2124 = vector.broadcast %379 : f32 to vector<16x128xf32>
    %2125 = arith.mulf %1992, %2124 : vector<16x128xf32>
    %2126 = arith.addf %2123, %2125 : vector<16x128xf32>
    %2127 = vector.broadcast %383 : f32 to vector<16x128xf32>
    %2128 = arith.mulf %1995, %2127 : vector<16x128xf32>
    %2129 = arith.addf %2126, %2128 : vector<16x128xf32>
    %2130 = vector.broadcast %387 : f32 to vector<16x128xf32>
    %2131 = arith.mulf %1998, %2130 : vector<16x128xf32>
    %2132 = arith.addf %2129, %2131 : vector<16x128xf32>
    %2133 = vector.broadcast %391 : f32 to vector<16x128xf32>
    %2134 = arith.addf %2132, %2133 : vector<16x128xf32>
    %cst_134 = arith.constant 5.000000e-01 : f32
    %2135 = arith.mulf %2006, %cst_134 : f32
    %2136 = vector.broadcast %2135 : f32 to vector<16x128xf32>
    %2137 = arith.mulf %2043, %2136 : vector<16x128xf32>
    %cst_135 = arith.constant 5.000000e-01 : f32
    %2138 = arith.mulf %2014, %cst_135 : f32
    %2139 = vector.broadcast %2138 : f32 to vector<16x128xf32>
    %2140 = arith.mulf %2056, %2139 : vector<16x128xf32>
    %2141 = arith.addf %2137, %2140 : vector<16x128xf32>
    %cst_136 = arith.constant dense<0xFF800000> : vector<128xf32>
    %2142 = vector.multi_reduction <maximumf>, %2141, %cst_136 [0] : vector<16x128xf32> to vector<128xf32>
    %2143 = vector.shape_cast %2142 : vector<128xf32> to vector<1x128xf32>
    %2144 = vector.broadcast %2143 : vector<1x128xf32> to vector<16x128xf32>
    %2145 = arith.subf %2141, %2144 : vector<16x128xf32>
    %2146 = math.exp %2145 : vector<16x128xf32>
    %cst_137 = arith.constant dense<0.000000e+00> : vector<128xf32>
    %2147 = vector.multi_reduction <add>, %2146, %cst_137 [0] : vector<16x128xf32> to vector<128xf32>
    %2148 = vector.shape_cast %2147 : vector<128xf32> to vector<1x128xf32>
    %2149 = tpu.reciprocal %2148 {approx = true} : vector<1x128xf32> -> vector<1x128xf32>
    %2150 = vector.broadcast %2149 : vector<1x128xf32> to vector<16x128xf32>
    %2151 = arith.mulf %2146, %2150 : vector<16x128xf32>
    %2152 = arith.mulf %2151, %2095 : vector<16x128xf32>
    %cst_138 = arith.constant dense<0.000000e+00> : vector<128xf32>
    %2153 = vector.multi_reduction <add>, %2152, %cst_138 [0] : vector<16x128xf32> to vector<128xf32>
    %2154 = vector.shape_cast %2153 : vector<128xf32> to vector<1x128xf32>
    %2155 = vector.broadcast %2006 : f32 to vector<1x128xf32>
    %2156 = arith.addf %2154, %2155 : vector<1x128xf32>
    %2157 = arith.mulf %2151, %2108 : vector<16x128xf32>
    %cst_139 = arith.constant dense<0.000000e+00> : vector<128xf32>
    %2158 = vector.multi_reduction <add>, %2157, %cst_139 [0] : vector<16x128xf32> to vector<128xf32>
    %2159 = vector.shape_cast %2158 : vector<128xf32> to vector<1x128xf32>
    %2160 = vector.broadcast %2014 : f32 to vector<1x128xf32>
    %2161 = arith.addf %2159, %2160 : vector<1x128xf32>
    %cst_140 = arith.constant 5.000000e-01 : f32
    %2162 = arith.mulf %2022, %cst_140 : f32
    %2163 = vector.broadcast %2162 : f32 to vector<16x128xf32>
    %2164 = arith.mulf %2069, %2163 : vector<16x128xf32>
    %cst_141 = arith.constant 5.000000e-01 : f32
    %2165 = arith.mulf %2030, %cst_141 : f32
    %2166 = vector.broadcast %2165 : f32 to vector<16x128xf32>
    %2167 = arith.mulf %2082, %2166 : vector<16x128xf32>
    %2168 = arith.addf %2164, %2167 : vector<16x128xf32>
    %cst_142 = arith.constant dense<0xFF800000> : vector<128xf32>
    %2169 = vector.multi_reduction <maximumf>, %2168, %cst_142 [0] : vector<16x128xf32> to vector<128xf32>
    %2170 = vector.shape_cast %2169 : vector<128xf32> to vector<1x128xf32>
    %2171 = vector.broadcast %2170 : vector<1x128xf32> to vector<16x128xf32>
    %2172 = arith.subf %2168, %2171 : vector<16x128xf32>
    %2173 = math.exp %2172 : vector<16x128xf32>
    %cst_143 = arith.constant dense<0.000000e+00> : vector<128xf32>
    %2174 = vector.multi_reduction <add>, %2173, %cst_143 [0] : vector<16x128xf32> to vector<128xf32>
    %2175 = vector.shape_cast %2174 : vector<128xf32> to vector<1x128xf32>
    %2176 = tpu.reciprocal %2175 {approx = true} : vector<1x128xf32> -> vector<1x128xf32>
    %2177 = vector.broadcast %2176 : vector<1x128xf32> to vector<16x128xf32>
    %2178 = arith.mulf %2173, %2177 : vector<16x128xf32>
    %2179 = arith.mulf %2178, %2121 : vector<16x128xf32>
    %cst_144 = arith.constant dense<0.000000e+00> : vector<128xf32>
    %2180 = vector.multi_reduction <add>, %2179, %cst_144 [0] : vector<16x128xf32> to vector<128xf32>
    %2181 = vector.shape_cast %2180 : vector<128xf32> to vector<1x128xf32>
    %2182 = vector.broadcast %2022 : f32 to vector<1x128xf32>
    %2183 = arith.addf %2181, %2182 : vector<1x128xf32>
    %2184 = arith.mulf %2178, %2134 : vector<16x128xf32>
    %cst_145 = arith.constant dense<0.000000e+00> : vector<128xf32>
    %2185 = vector.multi_reduction <add>, %2184, %cst_145 [0] : vector<16x128xf32> to vector<128xf32>
    %2186 = vector.shape_cast %2185 : vector<128xf32> to vector<1x128xf32>
    %2187 = vector.broadcast %2030 : f32 to vector<1x128xf32>
    %2188 = arith.addf %2186, %2187 : vector<1x128xf32>
    %2189 = vector.broadcast %392 : f32 to vector<1x128xf32>
    %2190 = arith.mulf %2156, %2189 : vector<1x128xf32>
    %2191 = vector.broadcast %396 : f32 to vector<1x128xf32>
    %2192 = arith.mulf %2161, %2191 : vector<1x128xf32>
    %2193 = arith.addf %2190, %2192 : vector<1x128xf32>
    %2194 = vector.broadcast %400 : f32 to vector<1x128xf32>
    %2195 = arith.mulf %2183, %2194 : vector<1x128xf32>
    %2196 = arith.addf %2193, %2195 : vector<1x128xf32>
    %2197 = vector.broadcast %404 : f32 to vector<1x128xf32>
    %2198 = arith.mulf %2188, %2197 : vector<1x128xf32>
    %2199 = arith.addf %2196, %2198 : vector<1x128xf32>
    %2200 = vector.broadcast %408 : f32 to vector<1x128xf32>
    %2201 = arith.addf %2199, %2200 : vector<1x128xf32>
    %2202 = vector.broadcast %393 : f32 to vector<1x128xf32>
    %2203 = arith.mulf %2156, %2202 : vector<1x128xf32>
    %2204 = vector.broadcast %397 : f32 to vector<1x128xf32>
    %2205 = arith.mulf %2161, %2204 : vector<1x128xf32>
    %2206 = arith.addf %2203, %2205 : vector<1x128xf32>
    %2207 = vector.broadcast %401 : f32 to vector<1x128xf32>
    %2208 = arith.mulf %2183, %2207 : vector<1x128xf32>
    %2209 = arith.addf %2206, %2208 : vector<1x128xf32>
    %2210 = vector.broadcast %405 : f32 to vector<1x128xf32>
    %2211 = arith.mulf %2188, %2210 : vector<1x128xf32>
    %2212 = arith.addf %2209, %2211 : vector<1x128xf32>
    %2213 = vector.broadcast %409 : f32 to vector<1x128xf32>
    %2214 = arith.addf %2212, %2213 : vector<1x128xf32>
    %2215 = vector.broadcast %394 : f32 to vector<1x128xf32>
    %2216 = arith.mulf %2156, %2215 : vector<1x128xf32>
    %2217 = vector.broadcast %398 : f32 to vector<1x128xf32>
    %2218 = arith.mulf %2161, %2217 : vector<1x128xf32>
    %2219 = arith.addf %2216, %2218 : vector<1x128xf32>
    %2220 = vector.broadcast %402 : f32 to vector<1x128xf32>
    %2221 = arith.mulf %2183, %2220 : vector<1x128xf32>
    %2222 = arith.addf %2219, %2221 : vector<1x128xf32>
    %2223 = vector.broadcast %406 : f32 to vector<1x128xf32>
    %2224 = arith.mulf %2188, %2223 : vector<1x128xf32>
    %2225 = arith.addf %2222, %2224 : vector<1x128xf32>
    %2226 = vector.broadcast %410 : f32 to vector<1x128xf32>
    %2227 = arith.addf %2225, %2226 : vector<1x128xf32>
    %2228 = vector.broadcast %395 : f32 to vector<1x128xf32>
    %2229 = arith.mulf %2156, %2228 : vector<1x128xf32>
    %2230 = vector.broadcast %399 : f32 to vector<1x128xf32>
    %2231 = arith.mulf %2161, %2230 : vector<1x128xf32>
    %2232 = arith.addf %2229, %2231 : vector<1x128xf32>
    %2233 = vector.broadcast %403 : f32 to vector<1x128xf32>
    %2234 = arith.mulf %2183, %2233 : vector<1x128xf32>
    %2235 = arith.addf %2232, %2234 : vector<1x128xf32>
    %2236 = vector.broadcast %407 : f32 to vector<1x128xf32>
    %2237 = arith.mulf %2188, %2236 : vector<1x128xf32>
    %2238 = arith.addf %2235, %2237 : vector<1x128xf32>
    %2239 = vector.broadcast %411 : f32 to vector<1x128xf32>
    %2240 = arith.addf %2238, %2239 : vector<1x128xf32>
    %cst_146 = arith.constant 0.000000e+00 : f32
    %2241 = vector.broadcast %cst_146 : f32 to vector<1x128xf32>
    %2242 = arith.maximumf %2201, %2241 : vector<1x128xf32>
    %2243 = arith.addf %2156, %2242 : vector<1x128xf32>
    %cst_147 = arith.constant 0.000000e+00 : f32
    %2244 = vector.broadcast %cst_147 : f32 to vector<1x128xf32>
    %2245 = arith.maximumf %2214, %2244 : vector<1x128xf32>
    %2246 = arith.addf %2161, %2245 : vector<1x128xf32>
    %cst_148 = arith.constant 0.000000e+00 : f32
    %2247 = vector.broadcast %cst_148 : f32 to vector<1x128xf32>
    %2248 = arith.maximumf %2227, %2247 : vector<1x128xf32>
    %2249 = arith.addf %2183, %2248 : vector<1x128xf32>
    %cst_149 = arith.constant 0.000000e+00 : f32
    %2250 = vector.broadcast %cst_149 : f32 to vector<1x128xf32>
    %2251 = arith.maximumf %2240, %2250 : vector<1x128xf32>
    %2252 = arith.addf %2188, %2251 : vector<1x128xf32>
    %2253 = vector.broadcast %412 : f32 to vector<1x128xf32>
    %2254 = arith.mulf %2243, %2253 : vector<1x128xf32>
    %2255 = vector.broadcast %422 : f32 to vector<1x128xf32>
    %2256 = arith.mulf %2246, %2255 : vector<1x128xf32>
    %2257 = arith.addf %2254, %2256 : vector<1x128xf32>
    %2258 = vector.broadcast %432 : f32 to vector<1x128xf32>
    %2259 = arith.mulf %2249, %2258 : vector<1x128xf32>
    %2260 = arith.addf %2257, %2259 : vector<1x128xf32>
    %2261 = vector.broadcast %442 : f32 to vector<1x128xf32>
    %2262 = arith.mulf %2252, %2261 : vector<1x128xf32>
    %2263 = arith.addf %2260, %2262 : vector<1x128xf32>
    %2264 = vector.broadcast %452 : f32 to vector<1x128xf32>
    %2265 = arith.addf %2263, %2264 : vector<1x128xf32>
    %2266 = vector.broadcast %413 : f32 to vector<1x128xf32>
    %2267 = arith.mulf %2243, %2266 : vector<1x128xf32>
    %2268 = vector.broadcast %423 : f32 to vector<1x128xf32>
    %2269 = arith.mulf %2246, %2268 : vector<1x128xf32>
    %2270 = arith.addf %2267, %2269 : vector<1x128xf32>
    %2271 = vector.broadcast %433 : f32 to vector<1x128xf32>
    %2272 = arith.mulf %2249, %2271 : vector<1x128xf32>
    %2273 = arith.addf %2270, %2272 : vector<1x128xf32>
    %2274 = vector.broadcast %443 : f32 to vector<1x128xf32>
    %2275 = arith.mulf %2252, %2274 : vector<1x128xf32>
    %2276 = arith.addf %2273, %2275 : vector<1x128xf32>
    %2277 = vector.broadcast %453 : f32 to vector<1x128xf32>
    %2278 = arith.addf %2276, %2277 : vector<1x128xf32>
    %2279 = vector.broadcast %414 : f32 to vector<1x128xf32>
    %2280 = arith.mulf %2243, %2279 : vector<1x128xf32>
    %2281 = vector.broadcast %424 : f32 to vector<1x128xf32>
    %2282 = arith.mulf %2246, %2281 : vector<1x128xf32>
    %2283 = arith.addf %2280, %2282 : vector<1x128xf32>
    %2284 = vector.broadcast %434 : f32 to vector<1x128xf32>
    %2285 = arith.mulf %2249, %2284 : vector<1x128xf32>
    %2286 = arith.addf %2283, %2285 : vector<1x128xf32>
    %2287 = vector.broadcast %444 : f32 to vector<1x128xf32>
    %2288 = arith.mulf %2252, %2287 : vector<1x128xf32>
    %2289 = arith.addf %2286, %2288 : vector<1x128xf32>
    %2290 = vector.broadcast %454 : f32 to vector<1x128xf32>
    %2291 = arith.addf %2289, %2290 : vector<1x128xf32>
    %2292 = vector.broadcast %415 : f32 to vector<1x128xf32>
    %2293 = arith.mulf %2243, %2292 : vector<1x128xf32>
    %2294 = vector.broadcast %425 : f32 to vector<1x128xf32>
    %2295 = arith.mulf %2246, %2294 : vector<1x128xf32>
    %2296 = arith.addf %2293, %2295 : vector<1x128xf32>
    %2297 = vector.broadcast %435 : f32 to vector<1x128xf32>
    %2298 = arith.mulf %2249, %2297 : vector<1x128xf32>
    %2299 = arith.addf %2296, %2298 : vector<1x128xf32>
    %2300 = vector.broadcast %445 : f32 to vector<1x128xf32>
    %2301 = arith.mulf %2252, %2300 : vector<1x128xf32>
    %2302 = arith.addf %2299, %2301 : vector<1x128xf32>
    %2303 = vector.broadcast %455 : f32 to vector<1x128xf32>
    %2304 = arith.addf %2302, %2303 : vector<1x128xf32>
    %2305 = vector.broadcast %416 : f32 to vector<1x128xf32>
    %2306 = arith.mulf %2243, %2305 : vector<1x128xf32>
    %2307 = vector.broadcast %426 : f32 to vector<1x128xf32>
    %2308 = arith.mulf %2246, %2307 : vector<1x128xf32>
    %2309 = arith.addf %2306, %2308 : vector<1x128xf32>
    %2310 = vector.broadcast %436 : f32 to vector<1x128xf32>
    %2311 = arith.mulf %2249, %2310 : vector<1x128xf32>
    %2312 = arith.addf %2309, %2311 : vector<1x128xf32>
    %2313 = vector.broadcast %446 : f32 to vector<1x128xf32>
    %2314 = arith.mulf %2252, %2313 : vector<1x128xf32>
    %2315 = arith.addf %2312, %2314 : vector<1x128xf32>
    %2316 = vector.broadcast %456 : f32 to vector<1x128xf32>
    %2317 = arith.addf %2315, %2316 : vector<1x128xf32>
    %2318 = vector.broadcast %417 : f32 to vector<1x128xf32>
    %2319 = arith.mulf %2243, %2318 : vector<1x128xf32>
    %2320 = vector.broadcast %427 : f32 to vector<1x128xf32>
    %2321 = arith.mulf %2246, %2320 : vector<1x128xf32>
    %2322 = arith.addf %2319, %2321 : vector<1x128xf32>
    %2323 = vector.broadcast %437 : f32 to vector<1x128xf32>
    %2324 = arith.mulf %2249, %2323 : vector<1x128xf32>
    %2325 = arith.addf %2322, %2324 : vector<1x128xf32>
    %2326 = vector.broadcast %447 : f32 to vector<1x128xf32>
    %2327 = arith.mulf %2252, %2326 : vector<1x128xf32>
    %2328 = arith.addf %2325, %2327 : vector<1x128xf32>
    %2329 = vector.broadcast %457 : f32 to vector<1x128xf32>
    %2330 = arith.addf %2328, %2329 : vector<1x128xf32>
    %2331 = vector.broadcast %418 : f32 to vector<1x128xf32>
    %2332 = arith.mulf %2243, %2331 : vector<1x128xf32>
    %2333 = vector.broadcast %428 : f32 to vector<1x128xf32>
    %2334 = arith.mulf %2246, %2333 : vector<1x128xf32>
    %2335 = arith.addf %2332, %2334 : vector<1x128xf32>
    %2336 = vector.broadcast %438 : f32 to vector<1x128xf32>
    %2337 = arith.mulf %2249, %2336 : vector<1x128xf32>
    %2338 = arith.addf %2335, %2337 : vector<1x128xf32>
    %2339 = vector.broadcast %448 : f32 to vector<1x128xf32>
    %2340 = arith.mulf %2252, %2339 : vector<1x128xf32>
    %2341 = arith.addf %2338, %2340 : vector<1x128xf32>
    %2342 = vector.broadcast %458 : f32 to vector<1x128xf32>
    %2343 = arith.addf %2341, %2342 : vector<1x128xf32>
    %2344 = vector.broadcast %419 : f32 to vector<1x128xf32>
    %2345 = arith.mulf %2243, %2344 : vector<1x128xf32>
    %2346 = vector.broadcast %429 : f32 to vector<1x128xf32>
    %2347 = arith.mulf %2246, %2346 : vector<1x128xf32>
    %2348 = arith.addf %2345, %2347 : vector<1x128xf32>
    %2349 = vector.broadcast %439 : f32 to vector<1x128xf32>
    %2350 = arith.mulf %2249, %2349 : vector<1x128xf32>
    %2351 = arith.addf %2348, %2350 : vector<1x128xf32>
    %2352 = vector.broadcast %449 : f32 to vector<1x128xf32>
    %2353 = arith.mulf %2252, %2352 : vector<1x128xf32>
    %2354 = arith.addf %2351, %2353 : vector<1x128xf32>
    %2355 = vector.broadcast %459 : f32 to vector<1x128xf32>
    %2356 = arith.addf %2354, %2355 : vector<1x128xf32>
    %2357 = vector.broadcast %420 : f32 to vector<1x128xf32>
    %2358 = arith.mulf %2243, %2357 : vector<1x128xf32>
    %2359 = vector.broadcast %430 : f32 to vector<1x128xf32>
    %2360 = arith.mulf %2246, %2359 : vector<1x128xf32>
    %2361 = arith.addf %2358, %2360 : vector<1x128xf32>
    %2362 = vector.broadcast %440 : f32 to vector<1x128xf32>
    %2363 = arith.mulf %2249, %2362 : vector<1x128xf32>
    %2364 = arith.addf %2361, %2363 : vector<1x128xf32>
    %2365 = vector.broadcast %450 : f32 to vector<1x128xf32>
    %2366 = arith.mulf %2252, %2365 : vector<1x128xf32>
    %2367 = arith.addf %2364, %2366 : vector<1x128xf32>
    %2368 = vector.broadcast %460 : f32 to vector<1x128xf32>
    %2369 = arith.addf %2367, %2368 : vector<1x128xf32>
    %2370 = vector.broadcast %421 : f32 to vector<1x128xf32>
    %2371 = arith.mulf %2243, %2370 : vector<1x128xf32>
    %2372 = vector.broadcast %431 : f32 to vector<1x128xf32>
    %2373 = arith.mulf %2246, %2372 : vector<1x128xf32>
    %2374 = arith.addf %2371, %2373 : vector<1x128xf32>
    %2375 = vector.broadcast %441 : f32 to vector<1x128xf32>
    %2376 = arith.mulf %2249, %2375 : vector<1x128xf32>
    %2377 = arith.addf %2374, %2376 : vector<1x128xf32>
    %2378 = vector.broadcast %451 : f32 to vector<1x128xf32>
    %2379 = arith.mulf %2252, %2378 : vector<1x128xf32>
    %2380 = arith.addf %2377, %2379 : vector<1x128xf32>
    %2381 = vector.broadcast %461 : f32 to vector<1x128xf32>
    %2382 = arith.addf %2380, %2381 : vector<1x128xf32>
    %2383 = tpu.concatenate %2265, %2278, %2291, %2304, %2317, %2330, %2343, %2356, %2369, %2382 in 0 : vector<1x128xf32>, vector<1x128xf32>, vector<1x128xf32>, vector<1x128xf32>, vector<1x128xf32>, vector<1x128xf32>, vector<1x128xf32>, vector<1x128xf32>, vector<1x128xf32>, vector<1x128xf32> -> vector<10x128xf32>
    %c0_150 = arith.constant 0 : index
    %c0_151 = arith.constant 0 : index
    %2384 = vector.load %arg3[%c0_150, %c0_151] : memref<10x128xf32, #tpu.memory_space<vmem>>, vector<10x128xf32>
    tpu.vector_store %arg3[%c0_150, %c0_151], %2383 {strides = array<i32>} : memref<10x128xf32, #tpu.memory_space<vmem>>, vector<10x128xf32>,
    return
  }
  func.func @transform_0(%arg0: i32) -> (i32, i32, i32) {
    %c0_i32 = arith.constant 0 : i32
    %c0_i32_0 = arith.constant 0 : i32
    %c0_i32_1 = arith.constant 0 : i32
    return %c0_i32, %c0_i32_0, %arg0 : i32, i32, i32
  }
  func.func @transform_1(%arg0: i32) -> i32 {
    %c0_i32 = arith.constant 0 : i32
    %c0_i32_0 = arith.constant 0 : i32
    return %c0_i32 : i32
  }
  func.func @transform_2(%arg0: i32) -> (i32, i32) {
    %c0_i32 = arith.constant 0 : i32
    %c0_i32_0 = arith.constant 0 : i32
    return %c0_i32, %arg0 : i32, i32
  }
}

</mosaic_0001>

<bundles_post_ra>
// kernel: tpu_custom_call.1
= control target key start
LH: loop header
LB: loop body
LE: loop exit
PB: predicated region body
PF: predicated region fallthrough
CT: control target
= control target key end

     0   :  { %s9923_s0 = inlined_call_operand.hbm [shape: f32[2,16,128], index: 0, kind: input, shape index: {}]   ;;  %s9924_s1 = inlined_call_operand.hbm [shape: f32[462], index: 1, kind: input, shape index: {}]   ;;  %s9925_s2 = inlined_call_operand.hbm [shape: f32[10,128], index: 2, kind: output, shape index: {}]  }
   0x1   :  { %10341 = sst [smem:[#allocation109_spill]] %s9925_s2 }
   0x2   :  { %7 = vsyncpa [#allocation3], 0 }
   0x3   :  { %8 = vsyncpa [#allocation5], 0 }
   0x4   :  { %9 = vsyncpa [#allocation4], 0  ;;  %s4989_s9 = smov [#allocation2]   ;;  %s4929_s13 = scalar_lea.hbm %s9923_s0, 512 }
   0x5   :  { %s15_s10 = sshll.u32 %s4989_s9, 4  ;;  %p4930_p0 = scmp.ne.s32.totalorder %s9923_s0, %s4929_s13  ;;  %s16_s10 = int_to_ptr.vmem [resolvable:$true] %s15_s10 }
   0x6   :  { %p4933_p1 = scmp.lt.u32.totalorder %s4929_s13, %s9923_s0 }
   0x8   :  { %p4935_p2 = pnand %p4933_p1, %p4930_p0 }
   0xa   :  { %4938 = shalt.err (!%p4935_p2)
}
   0xb   :  { %s4939_s18 = scalar_lea.vmem %s16_s10, 512  ;;  %p4944_p4 = scmp.lt.s32.totalorder %s16_s10, %s16_s10 }
   0xc   :  { %p4940_p3 = scmp.ne.s32.totalorder %s16_s10, %s4939_s18  ;;  %p4945_p5 = scmp.lt.s32.totalorder %s4939_s18, %s4939_s18 }
   0xe   :  { %p4946_p6 = por %p4945_p5, %p4944_p4 }
  0x10   :  { %p4947_p7 = pnand %p4946_p6, %p4940_p3 }
  0x12   :  { %4950 = shalt.err (!%p4947_p7)
}
  0x13   :  { %s9926_s19 = smov 128   ;;  %s9927_s20 = smov 8  }
  0x14   :  { %21 = dma.hbm_to_vmem [thread:$0]  %s9923_s0, 512, %s16_s10, [#allocation3], %s9926_s19, %s9926_s19, %s9927_s20  }
  0x15   :  { %s4951_s25 = scalar_lea.hbm %s9924_s1, 64 }
  0x16   :  { %p4952_p8 = scmp.ne.s32.totalorder %s9924_s1, %s4951_s25  ;;  %p4955_p9 = scmp.lt.u32.totalorder %s4951_s25, %s9924_s1 }
  0x18   :  { %p4957_p10 = pnand %p4955_p9, %p4952_p8 }
  0x1a   :  { %4960 = shalt.err (!%p4957_p10)
}
  0x1b   :  { %s4992_s30 = smov [#allocation6]  }
  0x1c   :  { %29 = dma.hbm_to_smem %s9924_s1, 64, %s4992_s30, [#allocation5]  }
  0x1d   :  { %4983 = dma.done.wait [#allocation3], 512  }
  0x1e   :  { %4984 = vsyncadd [#allocation3], 4294966784 }
  0x1f   :  { %4985 = dma.done.wait [#allocation5], 64  }
  0x20   :  { %4986 = vsyncadd [#allocation5], 4294967232 }
  0x21   :  { %36 = sfence }
  0x22   :  { %s5037_s0 = sld [smem:[#allocation6]]  ;;  %s5039_s5 = sld [smem:[#allocation6 + $0x1]]  ;;  %v5260_v0 = vld [vmem:[#allocation2] sm:$0xff]  ;;  %v5267_v1 = vld [vmem:[#allocation2 + $0x8] sm:$0xff]  ;;  %v5269_v2 = vld [vmem:[#allocation2 + $0x10] sm:$0xff]  ;;  %vm1159_vm0 = vcmask 1040384  }
  0x23   :  { %s5041_s6 = sld [smem:[#allocation6 + $0x2]]  ;;  %s5043_s7 = sld [smem:[#allocation6 + $0x3]]  ;;  %v5271_v3 = vld [vmem:[#allocation2 + $0x18] sm:$0xff]  ;;  %vm1161_vm1 = vcmask 1041408   ;;  %vm1163_vm2 = vcmask 1042432   ;;  %vm4241_vm3 = vcmask 1043456  }
  0x24   :  { %s5045_s8 = sld [smem:[#allocation6 + $0x4]]  ;;  %s5047_s9 = sld [smem:[#allocation6 + $0x5]]  ;;  %vm4243_vm4 = vcmask 1044480   ;;  %vm4245_vm5 = vcmask 1045504   ;;  %vm4247_vm6 = vcmask 1046528  }
  0x25   :  { %s5049_s10 = sld [smem:[#allocation6 + $0x6]]  ;;  %s5051_s1 = sld [smem:[#allocation6 + $0x7]] }
  0x26   :  { %s5053_s11 = sld [smem:[#allocation6 + $0x8]]  ;;  %s5055_s12 = sld [smem:[#allocation6 + $0x9]] }
  0x27   :  { %s5057_s13 = sld [smem:[#allocation6 + $0xa]]  ;;  %s5059_s14 = sld [smem:[#allocation6 + $0xb]] }
  0x28   :  { %s5061_s15 = sld [smem:[#allocation6 + $0xc]]  ;;  %s5063_s16 = sld [smem:[#allocation6 + $0xd]] }
  0x29   :  { %10342 = sst [smem:[#allocation11_spill]] %s5043_s7  ;;  %s5065_s17 = sld [smem:[#allocation6 + $0xe]] }
  0x2a   :  { %10343 = sst [smem:[#allocation12_spill]] %s5047_s9  ;;  %s5067_s18 = sld [smem:[#allocation6 + $0xf]] }
  0x2b   :  { %10344 = sst [smem:[#allocation13_spill]] %s5049_s10  ;;  %s5069_s21 = sld [smem:[#allocation6 + $0x10]] }
  0x2c   :  { %10345 = sst [smem:[#allocation14_spill]] %s5051_s1  ;;  %s5071_s22 = sld [smem:[#allocation6 + $0x11]] }
  0x2d   :  { %10346 = sst [smem:[#allocation15_spill]] %s5053_s11  ;;  %s5073_s23 = sld [smem:[#allocation6 + $0x12]] }
  0x2e   :  { %10347 = sst [smem:[#allocation16_spill]] %s5055_s12  ;;  %s5075_s24 = sld [smem:[#allocation6 + $0x13]] }
  0x2f   :  { %10348 = sst [smem:[#allocation17_spill]] %s5057_s13  ;;  %s5077_s25 = sld [smem:[#allocation6 + $0x14]] }
  0x30   :  { %10349 = sst [smem:[#allocation18_spill]] %s5059_s14  ;;  %s5079_s26 = sld [smem:[#allocation6 + $0x15]] }
  0x31   :  { %10350 = sst [smem:[#allocation19_spill]] %s5061_s15  ;;  %s5081_s27 = sld [smem:[#allocation6 + $0x16]] }
  0x32   :  { %10351 = sst [smem:[#allocation20_spill]] %s5063_s16  ;;  %s5083_s28 = sld [smem:[#allocation6 + $0x17]] }
  0x33   :  { %10352 = sst [smem:[#allocation21_spill]] %s5065_s17  ;;  %s5085_s29 = sld [smem:[#allocation6 + $0x18]] }
  0x34   :  { %10353 = sst [smem:[#allocation22_spill]] %s5067_s18  ;;  %s5087_s30 = sld [smem:[#allocation6 + $0x19]] }
  0x35   :  { %10354 = sst [smem:[#allocation23_spill]] %s5069_s21  ;;  %s5089_s3 = sld [smem:[#allocation6 + $0x1a]] }
  0x36   :  { %10355 = sst [smem:[#allocation24_spill]] %s5071_s22  ;;  %s5091_s4 = sld [smem:[#allocation6 + $0x1b]] }
  0x37   :  { %10356 = sst [smem:[#allocation25_spill]] %s5073_s23  ;;  %s5093_s19 = sld [smem:[#allocation6 + $0x1c]] }
  0x38   :  { %10357 = sst [smem:[#allocation26_spill]] %s5075_s24  ;;  %s5095_s20 = sld [smem:[#allocation6 + $0x1d]] }
  0x39   :  { %10358 = sst [smem:[#allocation27_spill]] %s5077_s25  ;;  %s5097_s2 = sld [smem:[#allocation6 + $0x1e]] }
  0x3a   :  { %10359 = sst [smem:[#allocation28_spill]] %s5079_s26  ;;  %s5099_s18 = sld [smem:[#allocation6 + $0x1f]] }
  0x3b   :  { %10360 = sst [smem:[#allocation29_spill]] %s5081_s27  ;;  %s5101_s17 = sld [smem:[#allocation6 + $0x20]] }
  0x3c   :  { %10361 = sst [smem:[#allocation30_spill]] %s5083_s28  ;;  %s5103_s16 = sld [smem:[#allocation6 + $0x21]] }
  0x3d   :  { %10362 = sst [smem:[#allocation31_spill]] %s5085_s29  ;;  %s5105_s15 = sld [smem:[#allocation6 + $0x22]] }
  0x3e   :  { %10363 = sst [smem:[#allocation32_spill]] %s5087_s30  ;;  %s5107_s14 = sld [smem:[#allocation6 + $0x23]] }
  0x3f   :  { %10364 = sst [smem:[#allocation33_spill]] %s5089_s3  ;;  %s5109_s13 = sld [smem:[#allocation6 + $0x24]] }
  0x40   :  { %10365 = sst [smem:[#allocation34_spill]] %s5091_s4  ;;  %s5111_s12 = sld [smem:[#allocation6 + $0x25]] }
  0x41   :  { %10366 = sst [smem:[#allocation35_spill]] %s5093_s19  ;;  %s5113_s11 = sld [smem:[#allocation6 + $0x26]] }
  0x42   :  { %10367 = sst [smem:[#allocation36_spill]] %s5095_s20  ;;  %s5117_s1 = sld [smem:[#allocation6 + $0x28]] }
  0x43   :  { %10368 = sst [smem:[#allocation37_spill]] %s5097_s2  ;;  %s5139_s10 = sld [smem:[#allocation6 + $0x2f]] }
  0x44   :  { %10369 = sst [smem:[#allocation38_spill]] %s5099_s18  ;;  %s5143_s9 = sld [smem:[#allocation6 + $0x30]] }
  0x45   :  { %10370 = sst [smem:[#allocation39_spill]] %s5101_s17  ;;  %s5115_s17 = sld [smem:[#allocation6 + $0x27]] }
  0x46   :  { %10371 = sst [smem:[#allocation40_spill]] %s5103_s16  ;;  %s5121_s16 = sld [smem:[#allocation6 + $0x2a]] }
  0x47   :  { %10372 = sst [smem:[#allocation41_spill]] %s5105_s15  ;;  %s5119_s15 = sld [smem:[#allocation6 + $0x29]] }
  0x48   :  { %10373 = sst [smem:[#allocation42_spill]] %s5107_s14  ;;  %s503_s14 = smul.f32 %s5069_s21, %s5037_s0 }
  0x49   :  { %10374 = sst [smem:[#allocation43_spill]] %s5109_s13  ;;  %s5123_s13 = sld [smem:[#allocation6 + $0x2b]] }
  0x4a   :  { %10375 = sst [smem:[#allocation44_spill]] %s5111_s12  ;;  %s504_s12 = smul.f32 %s5077_s25, %s5039_s5 }
  0x4b   :  { %10376 = sst [smem:[#allocation45_spill]] %s5113_s11  ;;  %s5127_s11 = sld [smem:[#allocation6 + $0x2c]] }
  0x4c   :  { %10377 = sst [smem:[#allocation46_spill]] %s5115_s17  ;;  %s5131_s17 = sld [smem:[#allocation6 + $0x2d]] }
  0x4d   :  { %10378 = sst [smem:[#allocation47_spill]] %s5117_s1  ;;  %s506_s1 = smul.f32 %s5085_s29, %s5041_s6 }
  0x4e   :  { %10379 = sst [smem:[#allocation48_spill]] %s5119_s15  ;;  %s5135_s15 = sld [smem:[#allocation6 + $0x2e]] }
  0x4f   :  { %10380 = sst [smem:[#allocation49_spill]] %s5121_s16  ;;  %s5147_s25 = sld [smem:[#allocation6 + $0x31]] }
  0x50   :  { %10381 = sst [smem:[#allocation50_spill]] %s5123_s13  ;;  %s5151_s29 = sld [smem:[#allocation6 + $0x32]] }
  0x51   :  { %10382 = sst [smem:[#allocation51_spill]] %s5127_s11  ;;  %s512_s11 = smul.f32 %s5079_s26, %s5039_s5 }
  0x52   :  { %10383 = sst [smem:[#allocation52_spill]] %s5131_s17  ;;  %s519_s13 = smul.f32 %s5073_s23, %s5037_s0 }
  0x53   :  { %10385 = sst [smem:[#allocation54_spill]] %s5139_s10  ;;  %s5159_s10 = sld [smem:[#allocation6 + $0x34]] }
  0x54   :  { %10384 = sst [smem:[#allocation53_spill]] %s5135_s15  ;;  %s5155_s15 = sld [smem:[#allocation6 + $0x33]] }
  0x55   :  { %10386 = sst [smem:[#allocation55_spill]] %s5143_s9  ;;  %s520_s9 = smul.f32 %s5081_s27, %s5039_s5 }
  0x56   :  { %10387 = sst [smem:[#allocation56_spill]] %s5147_s25  ;;  %s10391_s26 = sld [smem:[#allocation12_spill]] }
  0x57   :  { %10388 = sst [smem:[#allocation57_spill]] %s5151_s29  ;;  %s10392_s22 = sld [smem:[#allocation27_spill]] }
  0x58   :  { %s505_s19 = sadd.f32 %s504_s12, %s503_s14  ;;  %s10393_s25 = sld [smem:[#allocation35_spill]] }
  0x59   :  { %10390 = sst [smem:[#allocation59_spill]] %s5159_s10  ;;  %s10394_s30 = sld [smem:[#allocation13_spill]] }
  0x5a   :  { %10389 = sst [smem:[#allocation58_spill]] %s5155_s15  ;;  %s10395_s29 = sld [smem:[#allocation31_spill]] }
  0x5b   :  { %s5165_s16 = sld [smem:[#allocation6 + $0x35]]  ;;  %s10398_s23 = sld [smem:[#allocation14_spill]] }
  0x5c   :  { %s10397_s20 = sld [smem:[#allocation24_spill]]  ;;  %s5169_s10 = sld [smem:[#allocation6 + $0x36]] }
  0x5d   :  { %s527_s27 = smul.f32 %s5075_s24, %s5037_s0  ;;  %s5173_s12 = sld [smem:[#allocation6 + $0x37]] }
  0x5e   :  { %s528_s14 = smul.f32 %s5083_s28, %s5039_s5  ;;  %s10401_s3 = sld [smem:[#allocation28_spill]] }
  0x5f   :  { %s507_s17 = sadd.f32 %s506_s1, %s505_s19  ;;  %s530_s2 = smul.f32 %s5091_s4, %s5041_s6 }
  0x60   :  { %s10403_s15 = sld [smem:[#allocation32_spill]]  ;;  %s10406_s5 = sld [smem:[#allocation36_spill]] }
  0x61   :  { %10396 = sst [smem:[#allocation60_spill]] %s5165_s16  ;;  %s10402_s16 = sld [smem:[#allocation39_spill]] }
  0x62   :  { %10399 = sst [smem:[#allocation61_spill]] %s5169_s10  ;;  %s5179_s10 = sld [smem:[#allocation6 + $0x38]] }
  0x63   :  { %10400 = sst [smem:[#allocation62_spill]] %s5173_s12  ;;  %s5183_s12 = sld [smem:[#allocation6 + $0x39]] }
  0x64   :  { %s535_s28 = smul.f32 %s5069_s21, %s5045_s8  ;;  %s5187_s1 = sld [smem:[#allocation6 + $0x3a]] }
  0x65   :  { %s536_s19 = smul.f32 %s10392_s22, %s10391_s26  ;;  %s10410_s24 = sld [smem:[#allocation33_spill]] }
  0x66   :  { %s10408_s4 = smul.f32 %s10393_s25, %s5043_s7  ;;  %s10430_s22 = sld [smem:[#allocation35_spill]] }
  0x67   :  { %s10411_s21 = smul.f32 %s10397_s20, %s5037_s0  ;;  %s521_s0 = sadd.f32 %s520_s9, %s519_s13 }
  0x68   :  { %10404 = sst [smem:[#allocation63_spill]] %s5179_s10  ;;  %s10419_s9 = sld [smem:[#allocation30_spill]] }
  0x69   :  { %10405 = sst [smem:[#allocation64_spill]] %s5183_s12  ;;  %s538_s12 = smul.f32 %s10395_s29, %s10394_s30 }
  0x6a   :  { %10407 = sst [smem:[#allocation65_spill]] %s5187_s1  ;;  %s10414_s29 = smov %s5043_s7 }
  0x6b   :  { %s509_s10 = sadd.f32 %s10408_s4, %s507_s17  ;;  %s5201_s4 = sld [smem:[#allocation6 + $0x3b]] }
  0x6c   :  { %s513_s1 = sadd.f32 %s512_s11, %s10411_s21  ;;  %s544_s11 = smul.f32 %s10401_s3, %s10391_s26 }
  0x6d   :  { %s10415_s21 = sld [smem:[#allocation37_spill]]  ;;  %s5208_s7 = sadd.f32 %s10402_s16, %s509_s10 }
  0x6e   :  { %s529_s10 = sadd.f32 %s528_s14, %s527_s27  ;;  %s10421_s16 = sld [smem:[#allocation40_spill]] }
  0x6f   :  { %10416 = sst [smem:[#allocation11_spill]] %s5208_s7  ;;  %s10422_s25 = smul.f32 %s10410_s24, %s5041_s6 }
  0x70   :  { %s10424_s13 = sld [smem:[#allocation15_spill]]  ;;  %s537_s27 = sadd.f32 %s536_s19, %s535_s28 }
  0x71   :  { %10413 = sst [smem:[#allocation66_spill]] %s5201_s4  ;;  %s10417_s4 = smul.f32 %s10403_s15, %s5041_s6 }
  0x72   :  { %s523_s15 = sadd.f32 %s10422_s25, %s521_s0  ;;  %s10425_s14 = sld [smem:[#allocation23_spill]] }
  0x73   :  { %s515_s20 = sadd.f32 %s10417_s4, %s513_s1  ;;  %s10423_s1 = sld [smem:[#allocation38_spill]] }
  0x74   :  { %s10426_s7 = sld [smem:[#allocation41_spill]]  ;;  %s10427_s6 = smul.f32 %s10406_s5, %s10414_s29 }
  0x75   :  { %s10428_s0 = sld [smem:[#allocation16_spill]]  ;;  %s10431_s28 = sld [smem:[#allocation17_spill]] }
  0x76   :  { %s517_s25 = sadd.f32 %s10427_s6, %s515_s20  ;;  %s10433_s5 = sld [smem:[#allocation24_spill]] }
  0x77   :  { %s531_s24 = sadd.f32 %s530_s2, %s529_s10  ;;  %s10434_s20 = smul.f32 %s10415_s21, %s10414_s29 }
  0x78   :  { %s10435_s2 = sld [smem:[#allocation18_spill]]  ;;  %s539_s6 = sadd.f32 %s538_s12, %s537_s27 }
  0x79   :  { %s525_s19 = sadd.f32 %s10434_s20, %s523_s15  ;;  %s10436_s17 = sld [smem:[#allocation42_spill]] }
  0x7a   :  { %s5241_s15 = sadd.f32 %s10421_s16, %s517_s25  ;;  %s10438_s20 = sld [smem:[#allocation43_spill]] }
  0x7b   :  { %s10439_s10 = smul.f32 %s10423_s1, %s10414_s29  ;;  %s10440_s26 = sld [smem:[#allocation47_spill]] }
  0x7c   :  { %10437 = sst [smem:[#allocation18_spill]] %s5241_s15  ;;  %s10441_s27 = sld [smem:[#allocation25_spill]] }
  0x7d   :  { %s533_s12 = sadd.f32 %s10439_s10, %s531_s24  ;;  %s10442_s3 = sld [smem:[#allocation29_spill]] }
  0x7e   :  { %s10443_s21 = sld [smem:[#allocation12_spill]]  ;;  %s5251_s25 = sadd.f32 %s10426_s7, %s525_s19 }
  0x7f   :  { %s10446_s15 = sld [smem:[#allocation39_spill]]  ;;  %s10447_s1 = smul.f32 %s10430_s22, %s10398_s23 }
  0x80   :  { %10445 = sst [smem:[#allocation43_spill]] %s5251_s25  ;;  %s10448_s29 = sld [smem:[#allocation32_spill]]  ;;  %v631_v4 = vstv %s10438_s20 }
  0x81   :  { %s541_s10 = sadd.f32 %s10447_s1, %s539_s6  ;;  %s10449_s24 = sld [smem:[#allocation44_spill]]  ;;  %v634_v5 = vstv %s10440_s26  ;;  %v632_v8 = vmul.f32 %v631_v4, %v5260_v0  ;;  %v633_v9 = vmul.f32 %v631_v4, %v5267_v1 }
  0x82   :  { %s10450_s30 = sld [smem:[#allocation48_spill]]  ;;  %s10451_s7 = smul.f32 %s10433_s5, %s5045_s8  ;;  %v635_v10 = vmul.f32 %v634_v5, %v5269_v2  ;;  %v636_v11 = vmul.f32 %v634_v5, %v5271_v3 }
  0x83   :  { %s10452_s19 = sld [smem:[#allocation13_spill]]  ;;  %s10453_s4 = sld [smem:[#allocation36_spill]] }
  0x84   :  { %s545_s25 = sadd.f32 %s544_s11, %s10451_s7  ;;  %s10455_s1 = sld [smem:[#allocation26_spill]]  ;;  %v637_v16 = vadd.f32 %v635_v10, %v632_v8  ;;  %v638_v17 = vadd.f32 %v636_v11, %v633_v9 }
  0x85   :  { %s5274_s23 = sadd.f32 %s10436_s17, %s533_s12  ;;  %s10456_s6 = smov %s10419_s9 }
  0x86   :  { %s10457_s7 = sld [smem:[#allocation33_spill]]  ;;  %s10458_s11 = smul.f32 %s10441_s27, %s5045_s8 }
  0x87   :  { %10454 = sst [smem:[#allocation47_spill]] %s5274_s23  ;;  %s10459_s9 = smul.f32 %s10442_s3, %s10443_s21  ;;  %v642_v6 = vstv %s10449_s24 }
  0x88   :  { %s10460_s18 = smov %s10425_s14  ;;  %s10461_s12 = sld [smem:[#allocation27_spill]]  ;;  %v645_v7 = vstv %s10450_s30  ;;  %v643_v12 = vmul.f32 %v642_v6, %v5260_v0  ;;  %v644_v13 = vmul.f32 %v642_v6, %v5267_v1 }
  0x89   :  { %s553_s22 = sadd.f32 %s10459_s9, %s10458_s11  ;;  %s10463_s20 = smul.f32 %s10448_s29, %s10452_s19  ;;  %v646_v14 = vmul.f32 %v645_v7, %v5269_v2  ;;  %v647_v15 = vmul.f32 %v645_v7, %v5271_v3 }
  0x8a   :  { %s5289_s17 = sadd.f32 %s10446_s15, %s541_s10  ;;  %s10464_s26 = sld [smem:[#allocation14_spill]] }
  0x8b   :  { %s547_s5 = sadd.f32 %s10463_s20, %s545_s25  ;;  %s10465_s11 = sld [smem:[#allocation37_spill]]  ;;  %v648_v20 = vadd.f32 %v646_v14, %v643_v12  ;;  %v5351_v21 = vadd.f32 %v647_v15, %v644_v13 }
  0x8c   :  { %10462 = sst [smem:[#allocation12_spill]] %s5289_s17  ;;  %s10466_s23 = sld [smem:[#allocation34_spill]] }
  0x8d   :  { %s10467_s10 = smul.f32 %s10455_s1, %s5045_s8  ;;  %s10469_s25 = sld [smem:[#allocation51_spill]] }
  0x8e   :  { %s10468_s24 = smul.f32 %s10456_s6, %s10443_s21  ;;  %s10473_s16 = sld [smem:[#allocation45_spill]] }
  0x8f   :  { %s10470_s9 = smul.f32 %s10457_s7, %s10452_s19  ;;  %s10474_s21 = sld [smem:[#allocation31_spill]] }
  0x90   :  { %s561_s30 = sadd.f32 %s10468_s24, %s10467_s10  ;;  %s10471_s29 = smul.f32 %s10460_s18, %s10424_s13 }
  0x91   :  { %s555_s14 = sadd.f32 %s10470_s9, %s553_s22  ;;  %s10472_s15 = smul.f32 %s10461_s12, %s10428_s0 }
  0x92   :  { %s10475_s22 = sld [smem:[#allocation52_spill]]  ;;  %s10476_s9 = smul.f32 %s10453_s4, %s10464_s26 }
  0x93   :  { %s569_s8 = sadd.f32 %s10472_s15, %s10471_s29  ;;  %s10477_s24 = sld [smem:[#allocation49_spill]]  ;;  %v639_v18 = vstv %s10469_s25 }
  0x94   :  { %s549_s17 = sadd.f32 %s10476_s9, %s547_s5  ;;  %s10478_s20 = sld [smem:[#allocation40_spill]]  ;;  %v653_v19 = vstv %s10473_s16  ;;  %v5360_v24 = vadd.f32 %v639_v18, %v637_v16  ;;  %v5362_v25 = vadd.f32 %v639_v18, %v638_v17 }
  0x95   :  { %s10479_s15 = sld [smem:[#allocation38_spill]]  ;;  %s10480_s29 = smul.f32 %s10466_s23, %s10452_s19  ;;  %v654_v28 = vmul.f32 %v653_v19, %v5260_v0  ;;  %v655_v29 = vmul.f32 %v653_v19, %v5267_v1 }
  0x96   :  { %s10481_s7 = sld [smem:[#allocation46_spill]]  ;;  %s10482_s12 = sld [smem:[#allocation50_spill]] }
  0x97   :  { %s563_s10 = sadd.f32 %s10480_s29, %s561_s30  ;;  %s10483_s18 = smul.f32 %s10465_s11, %s10464_s26 }
  0x98   :  { %s10484_s5 = sld [smem:[#allocation19_spill]]  ;;  %s10485_s9 = sld [smem:[#allocation23_spill]]  ;;  %v650_v22 = vstv %s10475_s22 }
  0x99   :  { %s557_s4 = sadd.f32 %s10483_s18, %s555_s14  ;;  %s10486_s19 = smul.f32 %s10474_s21, %s10431_s28  ;;  %v656_v23 = vstv %s10477_s24  ;;  %v5424_v48 = vadd.f32 %v650_v22, %v648_v20  ;;  %v5471_v8 = vadd.f32 %v650_v22, %v5351_v21 }
  0x9a   :  { %s10487_s30 = sld [smem:[#allocation55_spill]]  ;;  %s10488_s13 = sld [smem:[#allocation59_spill]]  ;;  %v657_v32 = vmul.f32 %v656_v23, %v5269_v2  ;;  %v658_v33 = vmul.f32 %v656_v23, %v5271_v3 }
  0x9b   :  { %s571_s29 = sadd.f32 %s10486_s19, %s569_s8  ;;  %s10489_s27 = sld [smem:[#allocation41_spill]] }
  0x9c   :  { %s10490_s25 = sld [smem:[#allocation20_spill]]  ;;  %s10491_s11 = sld [smem:[#allocation27_spill]]  ;;  %v664_v26 = vstv %s10481_s7  ;;  %v667_v27 = vstv %s10482_s12  ;;  %v659_v52 = vadd.f32 %v657_v32, %v654_v28  ;;  %v660_v53 = vadd.f32 %v658_v33, %v655_v29 }
  0x9d   :  { %s5356_s14 = sadd.f32 %s10478_s20, %s549_s17  ;;  %s10493_s18 = sld [smem:[#allocation56_spill]]  ;;  %v665_v36 = vmul.f32 %v664_v26, %v5260_v0  ;;  %v666_v37 = vmul.f32 %v664_v26, %v5267_v1  ;;  %v668_v38 = vmul.f32 %v667_v27, %v5269_v2  ;;  %v669_v39 = vmul.f32 %v667_v27, %v5271_v3 }
  0x9e   :  { %s10494_s3 = sld [smem:[#allocation60_spill]]  ;;  %s10495_s16 = sld [smem:[#allocation35_spill]] }
  0x9f   :  { %10492 = sst [smem:[#allocation44_spill]] %s5356_s14  ;;  %s10496_s8 = sld [smem:[#allocation21_spill]]  ;;  %v670_v54 = vadd.f32 %v668_v38, %v665_v36  ;;  %v671_v56 = vadd.f32 %v669_v39, %v666_v37 }
  0xa0   :  { %s10497_s19 = smul.f32 %s10479_s15, %s10464_s26  ;;  %s10498_s17 = sld [smem:[#allocation24_spill]]  ;;  %v675_v30 = vstv %s10487_s30  ;;  %v678_v31 = vstv %s10488_s13 }
  0xa1   :  { %s10499_s24 = sld [smem:[#allocation15_spill]]  ;;  %s10500_s0 = sld [smem:[#allocation28_spill]]  ;;  %v676_v40 = vmul.f32 %v675_v30, %v5260_v0  ;;  %v677_v41 = vmul.f32 %v675_v30, %v5267_v1  ;;  %v679_v42 = vmul.f32 %v678_v31, %v5269_v2  ;;  %v680_v43 = vmul.f32 %v678_v31, %v5271_v3 }
  0xa2   :  { %s565_s1 = sadd.f32 %s10497_s19, %s563_s10  ;;  %s10501_s14 = sld [smem:[#allocation16_spill]] }
  0xa3   :  { %s5376_s6 = sadd.f32 %s10489_s27, %s557_s4  ;;  %s10504_s7 = sld [smem:[#allocation42_spill]]  ;;  %v686_v34 = vstv %s10493_s18  ;;  %v681_v57 = vadd.f32 %v679_v42, %v676_v40  ;;  %v682_v58 = vadd.f32 %v680_v43, %v677_v41 }
  0xa4   :  { %v689_v35 = vstv %s10494_s3  ;;  %s10505_s12 = smul.f32 %s10495_s16, %s10435_s2  ;;  %s10506_s30 = sld [smem:[#allocation25_spill]]  ;;  %v687_v44 = vmul.f32 %v686_v34, %v5260_v0  ;;  %v688_v45 = vmul.f32 %v686_v34, %v5267_v1 }
  0xa5   :  { %10503 = sst [smem:[#allocation48_spill]] %s5376_s6  ;;  %s10507_s13 = sld [smem:[#allocation29_spill]]  ;;  %v690_v46 = vmul.f32 %v689_v35, %v5269_v2  ;;  %v691_v47 = vmul.f32 %v689_v35, %v5271_v3 }
  0xa6   :  { %s573_s26 = sadd.f32 %s10505_s12, %s571_s29  ;;  %s10510_s18 = sld [smem:[#allocation53_spill]] }
  0xa7   :  { %s10508_s4 = smul.f32 %s10498_s17, %s10499_s24  ;;  %s10511_s19 = sld [smem:[#allocation54_spill]]  ;;  %v692_v60 = vadd.f32 %v690_v46, %v687_v44  ;;  %v693_v61 = vadd.f32 %v691_v47, %v688_v45 }
  0xa8   :  { %s10509_s3 = smul.f32 %s10500_s0, %s10501_s14  ;;  %s10512_s10 = sld [smem:[#allocation57_spill]] }
  0xa9   :  { %s10513_s28 = sld [smem:[#allocation39_spill]]  ;;  %s10514_s23 = sld [smem:[#allocation32_spill]] }
  0xaa   :  { %s577_s29 = sadd.f32 %s10509_s3, %s10508_s4  ;;  %s10516_s15 = sld [smem:[#allocation61_spill]] }
  0xab   :  { %s5406_s6 = sadd.f32 %s10504_s7, %s565_s1  ;;  %s10517_s4 = sld [smem:[#allocation17_spill]] }
  0xac   :  { %s10518_s3 = smul.f32 %s10506_s30, %s10499_s24  ;;  %s10520_s1 = sld [smem:[#allocation63_spill]]  ;;  %v661_v49 = vstv %s10510_s18 }
  0xad   :  { %10515 = sst [smem:[#allocation13_spill]] %s5406_s6  ;;  %s10519_s12 = smul.f32 %s10507_s13, %s10501_s14  ;;  %v672_v50 = vstv %s10511_s19  ;;  %v5473_v9 = vadd.f32 %v661_v49, %v659_v52  ;;  %v5475_v10 = vadd.f32 %v661_v49, %v660_v53 }
  0xae   :  { %s10521_s27 = sld [smem:[#allocation26_spill]]  ;;  %s10522_s7 = sld [smem:[#allocation30_spill]]  ;;  %v697_v51 = vstv %s10512_s10  ;;  %v5477_v11 = vadd.f32 %v672_v50, %v670_v54  ;;  %v5482_v12 = vadd.f32 %v672_v50, %v671_v56 }
  0xaf   :  { %s585_s20 = sadd.f32 %s10519_s12, %s10518_s3  ;;  %s10523_s6 = sld [smem:[#allocation64_spill]]  ;;  %v698_v63 = vmul.f32 %v697_v51, %v5260_v0  ;;  %v699_v4 = vmul.f32 %v697_v51, %v5267_v1 }
  0xb0   :  { %s5430_s17 = sadd.f32 %s10513_s28, %s573_s26  ;;  %s10524_s12 = sld [smem:[#allocation33_spill]]  ;;  %v700_v55 = vstv %s10516_s15 }
  0xb1   :  { %s10525_s3 = smul.f32 %s10514_s23, %s10517_s4  ;;  %s10526_s18 = sld [smem:[#allocation58_spill]]  ;;  %v701_v5 = vmul.f32 %v700_v55, %v5269_v2  ;;  %v702_v6 = vmul.f32 %v700_v55, %v5271_v3 }
  0xb2   :  { %v683_v59 = vstv %s10520_s1  ;;  %s10529_s15 = sld [smem:[#allocation36_spill]]  ;;  %s10531_s0 = sld [smem:[#allocation65_spill]] }
  0xb3   :  { %s579_s16 = sadd.f32 %s10525_s3, %s577_s29  ;;  %s10532_s28 = sld [smem:[#allocation11_spill]]  ;;  %v5484_v13 = vadd.f32 %v683_v59, %v681_v57  ;;  %v5486_v14 = vadd.f32 %v683_v59, %v682_v58  ;;  %v703_v20 = vadd.f32 %v701_v5, %v698_v63  ;;  %v704_v21 = vadd.f32 %v702_v6, %v699_v4 }
  0xb4   :  { %s10527_s26 = smul.f32 %s10521_s27, %s10499_s24  ;;  %s10533_s1 = sld [smem:[#allocation34_spill]] }
  0xb5   :  { %s10528_s10 = smul.f32 %s10522_s7, %s10501_s14  ;;  %v694_v62 = vstv %s10523_s6  ;;  %s10536_s6 = sld [smem:[#allocation62_spill]] }
  0xb6   :  { %s10530_s29 = smul.f32 %s10524_s12, %s10517_s4  ;;  %s10542_s22 = sld [smem:[#allocation66_spill]]  ;;  %v5493_v16 = vadd.f32 %v694_v62, %v692_v60  ;;  %v5495_v17 = vadd.f32 %v694_v62, %v693_v61 }
  0xb7   :  { %s593_s19 = sadd.f32 %s10528_s10, %s10527_s26  ;;  %v708_v7 = vstv %s10526_s18  ;;  %s10534_s14 = smul.f32 %s10485_s9, %s10484_s5 }
  0xb8   :  { %s587_s3 = sadd.f32 %s10530_s29, %s585_s20  ;;  %s10535_s24 = smul.f32 %s10491_s11, %s10490_s25  ;;  %v705_v15 = vstv %s10531_s0  ;;  %v5498_v18 = vmul.f32 %v708_v7, %v5260_v0  ;;  %v5506_v22 = vmul.f32 %v708_v7, %v5267_v1 }
  0xb9   :  { %s10537_s20 = sld [smem:[#allocation18_spill]]  ;;  %s10538_s29 = sld [smem:[#allocation37_spill]]  ;;  %v5547_v38 = vadd.f32 %v705_v15, %v703_v20  ;;  %v5549_v39 = vadd.f32 %v705_v15, %v704_v21 }
  0xba   :  { %s601_s26 = sadd.f32 %s10535_s24, %s10534_s14  ;;  %s10539_s23 = smul.f32 %s10529_s15, %s10435_s2 }
  0xbb   :  { %s10540_s11 = sld [smem:[#allocation43_spill]]  ;;  %s10541_s9 = smov %s10474_s21  ;;  %v711_v19 = vstv %s10536_s6 }
  0xbc   :  { %s581_s18 = sadd.f32 %s10539_s23, %s579_s16  ;;  %s719_s14 = smul.f32 0.5, %s10532_s28  ;;  %v716_v26 = vstv %s10542_s22  ;;  %v5520_v29 = vmul.f32 %v711_v19, %v5269_v2  ;;  %v5529_v32 = vmul.f32 %v711_v19, %v5271_v3 }
  0xbd   :  { %s10543_s24 = smul.f32 %s10533_s1, %s10517_s4  ;;  %s10544_s21 = sld [smem:[#allocation47_spill]] }
  0xbe   :  { %s10545_s23 = sld [smem:[#allocation40_spill]]  ;;  %s10547_s15 = sld [smem:[#allocation12_spill]]  ;;  %v720_v23 = vstv %s719_s14 }
  0xbf   :  { %s595_s10 = sadd.f32 %s10543_s24, %s593_s19  ;;  %s723_s16 = smul.f32 0.5, %s10537_s20  ;;  %v721_v0 = vmul.f32 %v720_v23, %v5360_v24  ;;  %v722_v27 = vmul.f32 %v720_v23, %v5362_v25 }
  0xc0   :  { %s10546_s27 = smul.f32 %s10538_s29, %s10435_s2  ;;  %s10548_s0 = sld [smem:[#allocation38_spill]] }
  0xc1   :  { %s774_s4 = smul.f32 0.5, %s10540_s11  ;;  %s10550_s28 = sld [smem:[#allocation44_spill]]  ;;  %v724_v28 = vstv %s723_s16 }
  0xc2   :  { %s589_s12 = sadd.f32 %s10546_s27, %s587_s3  ;;  %s10549_s19 = smul.f32 %s10541_s9, %s10496_s8  ;;  %v725_v1 = vmul.f32 %v724_v28, %v5424_v48  ;;  %v726_v30 = vmul.f32 %v724_v28, %v5471_v8 }
  0xc3   :  { %s10551_s6 = sld [smem:[#allocation41_spill]]  ;;  %s778_s27 = smul.f32 0.5, %s10544_s21  ;;  %v775_v31 = vstv %s774_s4 }
  0xc4   :  { %s603_s24 = sadd.f32 %s10549_s19, %s601_s26  ;;  %s10552_s20 = sld [smem:[#allocation48_spill]]  ;;  %v776_v33 = vmul.f32 %v775_v31, %v5473_v9  ;;  %v777_v2 = vmul.f32 %v775_v31, %v5475_v10  ;;  %v5537_v35 = vadd.f32 %v725_v1, %v721_v0  ;;  %v5539_v36 = vadd.f32 %v726_v30, %v722_v27 }
  0xc5   :  { %s5517_s3 = sadd.f32 %s10545_s23, %s581_s18  ;;  %s10553_s9 = sld [smem:[#allocation35_spill]]  ;;  %v779_v34 = vstv %s778_s27 }
  0xc6   :  { %s10554_s26 = sld [smem:[#allocation22_spill]]  ;;  %s829_s14 = smul.f32 0.5, %s10547_s15  ;;  %v780_v3 = vmul.f32 %v779_v34, %v5477_v11  ;;  %v781_v37 = vmul.f32 %v779_v34, %v5482_v12  ;;  %v729_v42 = vmax.f32 %v5537_v35, %v5539_v36 }
  0xc7   :  { %s10555_s19 = smul.f32 %s10548_s0, %s10435_s2  ;;  %s10556_s18 = sld [smem:[#allocation13_spill]] }
  0xc8   :  { %s10557_s16 = sld [smem:[#allocation24_spill]]  ;;  %s10558_s21 = sld [smem:[#allocation28_spill]]  ;;  %v830_v40 = vstv %s829_s14  ;;  %v5560_v43 = vadd.f32 %v780_v3, %v776_v33  ;;  %v5562_v44 = vadd.f32 %v781_v37, %v777_v2  ;;  %v730_v51 = vrot.slane %v729_v42, 4 }
  0xc9   :  { %s597_s11 = sadd.f32 %s10555_s19, %s595_s10  ;;  %s833_s22 = smul.f32 0.5, %s10550_s28  ;;  %v831_v45 = vmul.f32 %v830_v40, %v5360_v24  ;;  %v832_v46 = vmul.f32 %v830_v40, %v5362_v25 }
  0xca   :  { %s5535_s23 = sadd.f32 %s10551_s6, %s589_s12  ;;  %s10559_s2 = sld [smem:[#allocation42_spill]]  ;;  %v784_v52 = vmax.f32 %v5560_v43, %v5562_v44  ;;  %v731_v59 = vmax.f32 %v729_v42, %v730_v51 }
  0xcb   :  { %s884_s10 = smul.f32 0.5, %s10552_s20  ;;  %v834_v41 = vstv %s833_s22 }
  0xcc   :  { %s10560_s4 = smul.f32 %s10553_s9, %s10554_s26  ;;  %v835_v47 = vmul.f32 %v834_v41, %v5424_v48  ;;  %v836_v49 = vmul.f32 %v834_v41, %v5471_v8  ;;  %v785_v60 = vrot.slane %v784_v52, 4  ;;  %v732_v7 = vrot.slane %v731_v59, 2 }
  0xcd   :  { %s888_s12 = smul.f32 0.5, %s10556_s18  ;;  %v885_v50 = vstv %s884_s10  ;;  %s10568_s10 = sld [smem:[#allocation33_spill]] }
  0xce   :  { %s605_s19 = sadd.f32 %s10560_s4, %s603_s24  ;;  %s10561_s27 = smul.f32 %s10557_s16, %s10484_s5  ;;  %v886_v53 = vmul.f32 %v885_v50, %v5473_v9  ;;  %v887_v54 = vmul.f32 %v885_v50, %v5475_v10  ;;  %v5588_v55 = vadd.f32 %v835_v47, %v831_v45  ;;  %v5590_v56 = vadd.f32 %v836_v49, %v832_v46 }
  0xcf   :  { %s10562_s28 = smul.f32 %s10558_s21, %s10490_s25  ;;  %s10563_s24 = sld [smem:[#allocation39_spill]]  ;;  %v889_v57 = vstv %s888_s12  ;;  %v786_v15 = vmax.f32 %v784_v52, %v785_v60  ;;  %v733_v28 = vmax.f32 %v731_v59, %v732_v7 }
  0xd0   :  { %s939_s9 = smul.f32 0.5, %s5430_s17  ;;  %s5567_s4 = sadd.f32 %s10559_s2, %s597_s11  ;;  %v890_v61 = vmul.f32 %v889_v57, %v5477_v11  ;;  %v891_v62 = vmul.f32 %v889_v57, %v5482_v12  ;;  %v839_v63 = vmax.f32 %v5588_v55, %v5590_v56 }
  0xd1   :  { %s609_s15 = sadd.f32 %s10562_s28, %s10561_s27  ;;  %s10564_s28 = sld [smem:[#allocation32_spill]]  ;;  %v787_v1 = vrot.slane %v786_v15, 2  ;;  %v734_v37 = vrot.slane %v733_v28, 1 }
  0xd2   :  { %s10565_s21 = sld [smem:[#allocation36_spill]]  ;;  %s943_s22 = smul.f32 0.5, %s5517_s3  ;;  %v940_v58 = vstv %s939_s9  ;;  %v5609_v19 = vadd.f32 %v890_v61, %v886_v53  ;;  %v5611_v20 = vadd.f32 %v891_v62, %v887_v54  ;;  %v840_v21 = vrot.slane %v839_v63, 4 }
  0xd3   :  { %s10566_s14 = smul.f32 %s10506_s30, %s10484_s5  ;;  %v941_v4 = vmul.f32 %v940_v58, %v5360_v24  ;;  %v942_v5 = vmul.f32 %v940_v58, %v5362_v25  ;;  %v788_v40 = vmax.f32 %v786_v15, %v787_v1  ;;  %v735_v50 = vmax.f32 %v733_v28, %v734_v37 }
  0xd4   :  { %s10567_s16 = smul.f32 %s10507_s13, %s10490_s25  ;;  %v944_v6 = vstv %s943_s22  ;;  %v894_v30 = vmax.f32 %v5609_v19, %v5611_v20  ;;  %v841_v33 = vmax.f32 %v839_v63, %v840_v21 }
  0xd5   :  { %s624_s18 = smul.f32 %s10522_s7, %s10490_s25  ;;  %s5586_s11 = sadd.f32 %s10563_s24, %s605_s19  ;;  %v945_v23 = vmul.f32 %v944_v6, %v5424_v48  ;;  %v946_v0 = vmul.f32 %v944_v6, %v5471_v8  ;;  %v789_v51 = vrot.slane %v788_v40, 1  ;;  %v736_v60 = vsub.f32 %v5537_v35, %v735_v50 }
  0xd6   :  { %s617_s27 = sadd.f32 %s10567_s16, %s10566_s14  ;;  %s994_s25 = smul.f32 0.5, %s5535_s23  ;;  %v895_v41 = vrot.slane %v894_v30, 4  ;;  %v842_v45 = vrot.slane %v841_v33, 2  ;;  %v737_v61 = vsub.f32 %v5539_v36, %v735_v50 }
  0xd7   :  { %s10569_s7 = smul.f32 %s10564_s28, %s10496_s8  ;;  %s10570_s14 = sld [smem:[#allocation26_spill]]  ;;  %v5625_v2 = vadd.f32 %v945_v23, %v941_v4  ;;  %v5627_v34 = vadd.f32 %v946_v0, %v942_v5  ;;  %v790_v62 = vmax.f32 %v788_v40, %v789_v51  ;;  %v738_v15 = vmul.f32 1.442695, %v736_v60 }
  0xd8   :  { %s612_s13 = smul.f32 %s10565_s21, %s10554_s26  ;;  %v995_v27 = vstv %s994_s25  ;;  %v896_v52 = vmax.f32 %v894_v30, %v895_v41  ;;  %v843_v54 = vmax.f32 %v841_v33, %v842_v45  ;;  %v740_v21 = vmul.f32 1.442695, %v737_v61  ;;  %s5871_s25 = sld [smem:[#allocation6 + $0x43]] }
  0xd9   :  { %s611_s30 = sadd.f32 %s10569_s7, %s609_s15  ;;  %s620_s19 = smul.f32 %s10538_s29, %s10554_s26  ;;  %v996_v31 = vmul.f32 %v995_v27, %v5473_v9  ;;  %v997_v3 = vmul.f32 %v995_v27, %v5475_v10  ;;  %v949_v46 = vmax.f32 %v5625_v2, %v5627_v34  ;;  %v791_v23 = vsub.f32 %v5560_v43, %v790_v62 }
  0xda   :  { %s10571_s15 = smul.f32 %s10568_s10, %s10496_s8  ;;  %v897_v63 = vrot.slane %v896_v52, 2  ;;  %v844_v4 = vrot.slane %v843_v54, 1  ;;  %v792_v35 = vsub.f32 %v5562_v44, %v790_v62  ;;  %4737 = vpow2.f32 %v738_v15  ;;  %s10575_s7 = sld [smem:[#allocation11_spill]] }
  0xdb   :  { %s998_s24 = smul.f32 0.5, %s5567_s4  ;;  %s613_s21 = sadd.f32 %s612_s13, %s611_s30  ;;  %v950_v57 = vrot.slane %v949_v46, 4  ;;  %v793_v1 = vmul.f32 1.442695, %v791_v23  ;;  %4739 = vpow2.f32 %v740_v21 }
  0xdc   :  { %s619_s12 = sadd.f32 %s10571_s15, %s617_s27  ;;  %s626_s28 = smul.f32 %s10533_s1, %s10496_s8  ;;  %v845_v36 = vmax.f32 %v843_v54, %v844_v4  ;;  %v898_v0 = vmax.f32 %v896_v52, %v897_v63  ;;  %v795_v30 = vmul.f32 1.442695, %v792_v35 }
  0xdd   :  { %s10572_s9 = smul.f32 %s10570_s14, %s10484_s5  ;;  %s10573_s5 = sld [smem:[#allocation40_spill]]  ;;  %v999_v42 = vstv %s998_s24  ;;  %v951_v5 = vmax.f32 %v949_v46, %v950_v57  ;;  %4741 = vpow2.f32 %v793_v1 }
  0xde   :  { %s1049_s22 = smul.f32 0.5, %s5586_s11  ;;  %s621_s8 = sadd.f32 %s620_s19, %s619_s12  ;;  %v1000_v47 = vmul.f32 %v999_v42, %v5477_v11  ;;  %v1001_v49 = vmul.f32 %v999_v42, %v5482_v12  ;;  %v847_v43 = vsub.f32 %v5590_v56, %v845_v36  ;;  %v899_v33 = vrot.slane %v898_v0, 1 }
  0xdf   :  { %s625_s29 = sadd.f32 %s624_s18, %s10572_s9  ;;  %s628_s18 = smul.f32 %s10548_s0, %s10554_s26  ;;  %v952_v27 = vrot.slane %v951_v5, 2  ;;  %4743 = vpow2.f32 %v795_v30 }
  0xe0   :  { %v1050_v53 = vstv %s1049_s22  ;;  %v5639_v58 = vadd.f32 %v1000_v47, %v996_v31  ;;  %v5641_v59 = vadd.f32 %v1001_v49, %v997_v3  ;;  %s5644_s0 = sadd.f32 %s10551_s6, %s621_s8  ;;  %v850_v41 = vmul.f32 1.442695, %v847_v43  ;;  %s10576_s30 = sld [smem:[#allocation18_spill]] }
  0xe1   :  { %s627_s1 = sadd.f32 %s626_s28, %s625_s29  ;;  %v1051_v7 = vmul.f32 %v1050_v53, %v5360_v24  ;;  %v1052_v31 = vmul.f32 %v1050_v53, %v5362_v25  ;;  %v846_v24 = vsub.f32 %v5588_v55, %v845_v36  ;;  %v953_v44 = vmax.f32 %v951_v5, %v952_v27  ;;  %s10577_s13 = sld [smem:[#allocation43_spill]] }
  0xe2   :  { %v1004_v6 = vmax.f32 %v5639_v58, %v5641_v59  ;;  %s1104_s10 = smul.f32 0.5, %s5644_s0  ;;  %v900_v42 = vmax.f32 %v898_v0, %v899_v33  ;;  %v714_v53 = vadd.f32 %v5520_v29, %v5498_v18  ;;  %s10578_s14 = sld [smem:[#allocation47_spill]]  ;;  %v761_v43 = vstv %s10575_s7 }
  0xe3   :  { %s5637_s16 = sadd.f32 %s10573_s5, %s613_s21  ;;  %v848_v40 = vmul.f32 1.442695, %v846_v24  ;;  %v954_v45 = vrot.slane %v953_v44, 1  ;;  %s10579_s19 = sld [smem:[#allocation12_spill]] }
  0xe4   :  { %s629_s26 = sadd.f32 %s628_s18, %s627_s1  ;;  %v1005_v28 = vrot.slane %v1004_v6, 4  ;;  %v901_v55 = vsub.f32 %v5609_v19, %v900_v42  ;;  %v902_v56 = vsub.f32 %v5611_v20, %v900_v42  ;;  %v1105_v49 = vstv %s1104_s10  ;;  %v5678_v4 = vpop.eup %4737  ;;  %s10580_s15 = sld [smem:[#allocation44_spill]] }
  0xe5   :  { %s1053_s6 = smul.f32 0.5, %s5637_s16  ;;  %4745 = vpow2.f32 %v848_v40  ;;  %v955_v50 = vmax.f32 %v953_v44, %v954_v45  ;;  %v1106_v20 = vmul.f32 %v1105_v49, %v5473_v9  ;;  %v1107_v62 = vmul.f32 %v1105_v49, %v5475_v10  ;;  %s10581_s12 = sld [smem:[#allocation13_spill]] }
  0xe6   :  { %s5656_s27 = sadd.f32 %s10559_s2, %s629_s26  ;;  %v1006_v3 = vmax.f32 %v1004_v6, %v1005_v28  ;;  %4747 = vpow2.f32 %v850_v41  ;;  %v903_v54 = vmul.f32 1.442695, %v901_v55  ;;  %v905_v57 = vmul.f32 1.442695, %v902_v56  ;;  %v5680_v6 = vpop.eup %4739  ;;  %s5738_s24 = sld [smem:[#allocation6 + $0x3c]] }
  0xe7   :  { %v1054_v37 = vstv %s1053_s6  ;;  %v957_v19 = vsub.f32 %v5627_v34, %v955_v50  ;;  %v5686_v15 = vpop.eup %4741  ;;  %v742_v10 = vadd.f32 %v5680_v6, %v5678_v4  ;;  %v772_v40 = vstv %s10576_s30  ;;  %s5742_s9 = sld [smem:[#allocation6 + $0x3d]]  ;;  %s5744_s29 = sld [smem:[#allocation6 + $0x40]] }
  0xe8   :  { %v1007_v25 = vrot.slane %v1006_v3, 2  ;;  %v1055_v46 = vmul.f32 %v1054_v37, %v5424_v48  ;;  %v1056_v47 = vmul.f32 %v1054_v37, %v5471_v8  ;;  %s1108_s2 = smul.f32 0.5, %s5656_s27  ;;  %v956_v8 = vsub.f32 %v5625_v2, %v955_v50  ;;  %s5748_s28 = sld [smem:[#allocation6 + $0x44]] }
  0xe9   :  { %4749 = vpow2.f32 %v903_v54  ;;  %v960_v29 = vmul.f32 1.442695, %v957_v19  ;;  %v715_v2 = vadd.f32 %v5529_v32, %v5506_v22  ;;  %v5692_v35 = vpop.eup %4743  ;;  %v743_v32 = vrot.slane %v742_v10, 4  ;;  %s5750_s21 = sld [smem:[#allocation6 + $0x48]]  ;;  %s5753_s22 = sld [smem:[#allocation6 + $0x41]] }
  0xea   :  { %v1008_v51 = vmax.f32 %v1006_v3, %v1007_v25  ;;  %v5666_v52 = vadd.f32 %v1055_v46, %v1051_v7  ;;  %v5670_v48 = vadd.f32 %v1056_v47, %v1052_v31  ;;  %v1109_v63 = vstv %s1108_s2  ;;  %s5755_s5 = sld [smem:[#allocation6 + $0x4c]]  ;;  %s5760_s8 = sld [smem:[#allocation6 + $0x45]] }
  0xeb   :  { %4751 = vpow2.f32 %v905_v57  ;;  %v958_v18 = vmul.f32 1.442695, %v956_v8  ;;  %v1110_v9 = vmul.f32 %v1109_v63, %v5477_v11  ;;  %v1111_v7 = vmul.f32 %v1109_v63, %v5482_v12  ;;  %s5762_s1 = sld [smem:[#allocation6 + $0x49]]  ;;  %s5770_s18 = sld [smem:[#allocation6 + $0x50]] }
  0xec   :  { %v1009_v60 = vrot.slane %v1008_v51, 1  ;;  %v1059_v61 = vmax.f32 %v5666_v52, %v5670_v48  ;;  %v797_v36 = vadd.f32 %v5692_v35, %v5686_v15  ;;  %v744_v24 = vadd.f32 %v743_v32, %v742_v10  ;;  %s5851_s26 = sld [smem:[#allocation6 + $0x54]]  ;;  %s5860_s6 = sld [smem:[#allocation6 + $0x3e]] }
  0xed   :  { %4753 = vpow2.f32 %v958_v18  ;;  %v5694_v11 = vadd.f32 %v1110_v9, %v1106_v20  ;;  %v5696_v12 = vadd.f32 %v1111_v7, %v1107_v62  ;;  %v816_v42 = vstv %s10577_s13  ;;  %s5862_s10 = sld [smem:[#allocation6 + $0x3f]]  ;;  %s5867_s2 = sld [smem:[#allocation6 + $0x51]] }
  0xee   :  { %v1010_v5 = vmax.f32 %v1008_v51, %v1009_v60  ;;  %v1060_v34 = vrot.slane %v1059_v61, 4  ;;  %4755 = vpow2.f32 %v960_v29  ;;  %v798_v33 = vrot.slane %v797_v36, 4  ;;  %10582 = sst [smem:[#allocation14_spill]] %s5748_s28  ;;  %s5873_s7 = sld [smem:[#allocation6 + $0x55]] }
  0xef   :  { %v5700_v28 = vpop.eup %4745  ;;  %v1114_v30 = vmax.f32 %v5694_v11, %v5696_v12  ;;  %v745_v37 = vrot.slane %v744_v24, 2  ;;  %v827_v25 = vstv %s10578_s14  ;;  %v871_v51 = vstv %s10579_s19  ;;  %10583 = sst [smem:[#allocation51_spill]] %s5750_s21  ;;  %s5877_s30 = sld [smem:[#allocation6 + $0x4d]] }
  0xf0   :  { %v1011_v21 = vsub.f32 %v5639_v58, %v1010_v5  ;;  %v1012_v23 = vsub.f32 %v5641_v59, %v1010_v5  ;;  %v1061_v22 = vmax.f32 %v1059_v61, %v1060_v34  ;;  %v5704_v58 = vadd.f32 %v716_v26, %v714_v53  ;;  %v5712_v31 = vpop.eup %4747  ;;  %10584 = sst [smem:[#allocation45_spill]] %s5755_s5  ;;  %s5881_s13 = sld [smem:[#allocation6 + $0x46]] }
  0xf1   :  { %v5708_v59 = vadd.f32 %v716_v26, %v715_v2  ;;  %v852_v44 = vadd.f32 %v5712_v31, %v5700_v28  ;;  %v1115_v26 = vrot.slane %v1114_v30, 4  ;;  %v799_v41 = vadd.f32 %v798_v33, %v797_v36  ;;  %10585 = sst [smem:[#allocation52_spill]] %s5760_s8  ;;  %s5885_s14 = sld [smem:[#allocation6 + $0x47]] }
  0xf2   :  { %v1013_v0 = vmul.f32 1.442695, %v1011_v21  ;;  %v1015_v27 = vmul.f32 1.442695, %v1012_v23  ;;  %v1062_v1 = vrot.slane %v1061_v22, 2  ;;  %v746_v49 = vadd.f32 %v745_v37, %v744_v24  ;;  %10586 = sst [smem:[#allocation49_spill]] %s5762_s1 }
  0xf3   :  { %v5719_v45 = vpop.eup %4749  ;;  %v853_v46 = vrot.slane %v852_v44, 4  ;;  %v1116_v55 = vmax.f32 %v1114_v30, %v1115_v26  ;;  %v800_v50 = vrot.slane %v799_v41, 2  ;;  %v882_v53 = vstv %s10580_s15  ;;  %s5887_s19 = sld [smem:[#allocation6 + $0x58]]  ;;  %s5890_s15 = sld [smem:[#allocation6 + $0x4a]] }
  0xf4   :  { %4757 = vpow2.f32 %v1013_v0  ;;  %v1063_v3 = vmax.f32 %v1061_v22, %v1062_v1  ;;  %v747_v20 = vrot.slane %v746_v49, 1  ;;  %v926_v62 = vstv %s10552_s20  ;;  %s5865_s20 = sld [smem:[#allocation6 + $0x42]]  ;;  %s5899_s5 = sld [smem:[#allocation6 + $0x4b]] }
  0xf5   :  { %4759 = vpow2.f32 %v1015_v27  ;;  %v5722_v56 = vpop.eup %4751  ;;  %v854_v54 = vadd.f32 %v853_v46, %v852_v44  ;;  %v1117_v19 = vrot.slane %v1116_v55, 2  ;;  %v801_v61 = vadd.f32 %v800_v50, %v799_v41  ;;  %10587 = sst [smem:[#allocation46_spill]] %s5877_s30  ;;  %s5901_s1 = sld [smem:[#allocation6 + $0x52]] }
  0xf6   :  { %v1064_v47 = vrot.slane %v1063_v3, 1  ;;  %v907_v57 = vadd.f32 %v5722_v56, %v5719_v45  ;;  %v937_v63 = vstv %s10581_s12  ;;  %v748_v9 = vadd.f32 %v747_v20, %v746_v49  ;;  %10588 = sst [smem:[#allocation50_spill]] %s5881_s13  ;;  %s5892_s12 = sld [smem:[#allocation6 + $0x4e]] }
  0xf7   :  { %v5728_v60 = vpop.eup %4753  ;;  %v855_v29 = vrot.slane %v854_v54, 2  ;;  %v802_v7 = vrot.slane %v801_v61, 1  ;;  %v1118_v21 = vmax.f32 %v1116_v55, %v1117_v19  ;;  %v981_v33 = vstv %s5430_s17  ;;  %10589 = sst [smem:[#allocation19_spill]] %s5885_s14  ;;  %s5912_s21 = sld [smem:[#allocation6 + $0x56]] }
  0xf8   :  { %v1065_v8 = vmax.f32 %v1063_v3, %v1064_v47  ;;  %v5732_v18 = vpop.eup %4755  ;;  %v908_v5 = vrot.slane %v907_v57, 4  ;;  %4761 = vrcp.f32 %v748_v9  ;;  %v992_v46 = vstv %s5517_s3  ;;  %s5926_s17 = sld [smem:[#allocation6 + $0x59]]  ;;  %s5932_s3 = sld [smem:[#allocation6 + $0x53]] }
  0xf9   :  { %v962_v10 = vadd.f32 %v5732_v18, %v5728_v60  ;;  %v856_v23 = vadd.f32 %v855_v29, %v854_v54  ;;  %v1119_v27 = vrot.slane %v1118_v21, 1  ;;  %10590 = sst [smem:[#allocation23_spill]] %s5890_s15  ;;  %s6038_s8 = sld [smem:[#allocation6 + $0x67]] }
  0xfa   :  { %v1066_v2 = vsub.f32 %v5666_v52, %v1065_v8  ;;  %v1067_v34 = vsub.f32 %v5670_v48, %v1065_v8  ;;  %v909_v22 = vadd.f32 %v908_v5, %v907_v57  ;;  %v803_v52 = vadd.f32 %v802_v7, %v801_v61  ;;  %10592 = sst [smem:[#allocation59_spill]] %s5899_s5  ;;  %s6040_s28 = sld [smem:[#allocation6 + $0x6b]] }
  0xfb   :  { %v963_v48 = vrot.slane %v962_v10, 4  ;;  %v857_v30 = vrot.slane %v856_v23, 1  ;;  %v1120_v26 = vmax.f32 %v1118_v21, %v1119_v27  ;;  %v1036_v57 = vstv %s5535_s23  ;;  %s5974_s23 = sld [smem:[#allocation6 + $0x5b]] }
  0xfc   :  { %v1068_v32 = vmul.f32 1.442695, %v1066_v2  ;;  %v1070_v36 = vmul.f32 1.442695, %v1067_v34  ;;  %v910_v24 = vrot.slane %v909_v22, 2  ;;  %v1047_v8 = vstv %s5567_s4  ;;  %10591 = sst [smem:[#allocation55_spill]] %s5892_s12 }
  0xfd   :  { %v964_v44 = vadd.f32 %v963_v48, %v962_v10  ;;  %v858_v37 = vadd.f32 %v857_v30, %v856_v23  ;;  %v1121_v49 = vsub.f32 %v5694_v11, %v1120_v26  ;;  %v1122_v50 = vsub.f32 %v5696_v12, %v1120_v26  ;;  %s5980_s4 = sld [smem:[#allocation6 + $0x5c]] }
  0xfe   :  { %v5740_v0 = vpop.eup %4757  ;;  %4763 = vpow2.f32 %v1068_v32  ;;  %v911_v41 = vadd.f32 %v910_v24, %v909_v22  ;;  %v1091_v61 = vstv %s5586_s11  ;;  %s6084_s11 = sld [smem:[#allocation6 + $0x71]] }
  0xff   :  { %v5746_v1 = vpop.eup %4759  ;;  %4765 = vrcp.f32 %v803_v52  ;;  %v965_v47 = vrot.slane %v964_v44, 2  ;;  %v1123_v11 = vmul.f32 1.442695, %v1121_v49  ;;  %v1125_v7 = vmul.f32 1.442695, %v1122_v50  ;;  %10601 = sst [smem:[#allocation29_spill]] %s6038_s8 }
 0x100   :  { %v1017_v3 = vadd.f32 %v5746_v1, %v5740_v0  ;;  %4767 = vpow2.f32 %v1070_v36  ;;  %v912_v54 = vrot.slane %v911_v41, 1  ;;  %10602 = sst [smem:[#allocation53_spill]] %s6040_s28 }
 0x101   :  { %4769 = vrcp.f32 %v858_v37  ;;  %v966_v19 = vadd.f32 %v965_v47, %v964_v44  ;;  %10594 = sst [smem:[#allocation27_spill]] %s5974_s23 }
 0x102   :  { %v1018_v55 = vrot.slane %v1017_v3, 4  ;;  %v913_v5 = vadd.f32 %v912_v54, %v911_v41  ;;  %v4762_v32 = vpop.eup %4761 }
 0x103   :  { %v967_v34 = vrot.slane %v966_v19, 1  ;;  %v750_v24 = vmul.f32 %v4762_v32, %v5678_v4  ;;  %v751_v44 = vmul.f32 %v4762_v32, %v5680_v6 }
 0x104   :  { %v1019_v20 = vadd.f32 %v1018_v55, %v1017_v3  ;;  %4771 = vrcp.f32 %v913_v5 }
 0x105   :  { %v968_v3 = vadd.f32 %v967_v34, %v966_v19  ;;  %4773 = vpow2.f32 %v1123_v11  ;;  %v752_v49 = vmul.f32 %v750_v24, %v5484_v13  ;;  %v753_v50 = vmul.f32 %v751_v44, %v5486_v14 }
 0x106   :  { %v1020_v9 = vrot.slane %v1019_v20, 2  ;;  %4775 = vpow2.f32 %v1125_v7  ;;  %v763_v54 = vmul.f32 %v750_v24, %v5493_v16  ;;  %v764_v4 = vmul.f32 %v751_v44, %v5495_v17 }
 0x107   :  { %v754_v34 = vadd.f32 %v753_v50, %v752_v49  ;;  %4777 = vrcp.f32 %v968_v3  ;;  %v1234_v7 = vstv %s5770_s18  ;;  %s5942_s18 = sld [smem:[#allocation6 + $0x57]] }
 0x108   :  { %v1021_v36 = vadd.f32 %v1020_v9, %v1019_v20  ;;  %v5781_v30 = vpop.eup %4763  ;;  %v765_v9 = vadd.f32 %v764_v4, %v763_v54 }
 0x109   :  { %v4766_v26 = vpop.eup %4765  ;;  %v755_v52 = vrot.slane %v754_v34, 4 }
 0x10a   :  { %v1022_v37 = vrot.slane %v1021_v36, 1  ;;  %v5787_v55 = vpop.eup %4767  ;;  %v805_v6 = vmul.f32 %v4766_v26, %v5686_v15  ;;  %v806_v19 = vmul.f32 %v4766_v26, %v5692_v35  ;;  %v766_v35 = vrot.slane %v765_v9, 4 }
 0x10b   :  { %v5797_v5 = vadd.f32 %v5787_v55, %v5781_v30  ;;  %v4770_v11 = vpop.eup %4769  ;;  %v756_v50 = vadd.f32 %v755_v52, %v754_v34 }
 0x10c   :  { %v1023_v20 = vadd.f32 %v1022_v37, %v1021_v36  ;;  %v807_v32 = vmul.f32 %v805_v6, %v5547_v38  ;;  %v808_v24 = vmul.f32 %v806_v19, %v5549_v39  ;;  %v818_v44 = vmul.f32 %v805_v6, %v5704_v58 }
 0x10d   :  { %v819_v15 = vmul.f32 %v806_v19, %v5708_v59  ;;  %v860_v36 = vmul.f32 %v4770_v11, %v5700_v28  ;;  %v861_v26 = vmul.f32 %v4770_v11, %v5712_v31  ;;  %v1073_v3 = vrot.slane %v5797_v5, 4 }
 0x10e   :  { %v809_v37 = vadd.f32 %v808_v24, %v807_v32  ;;  %4779 = vrcp.f32 %v1023_v20  ;;  %v4772_v49 = vpop.eup %4771  ;;  %v767_v54 = vadd.f32 %v766_v35, %v765_v9  ;;  %v757_v31 = vrot.slane %v756_v50, 2 }
 0x10f   :  { %v820_v47 = vadd.f32 %v819_v15, %v818_v44  ;;  %v862_v4 = vmul.f32 %v860_v36, %v5484_v13  ;;  %v863_v6 = vmul.f32 %v861_v26, %v5486_v14  ;;  %v873_v41 = vmul.f32 %v860_v36, %v5493_v16  ;;  %v5811_v23 = vpop.eup %4773 }
 0x110   :  { %v810_v22 = vrot.slane %v809_v37, 4  ;;  %v874_v28 = vmul.f32 %v861_v26, %v5495_v17  ;;  %v768_v11 = vrot.slane %v767_v54, 2  ;;  %v915_v32 = vmul.f32 %v4772_v49, %v5719_v45  ;;  %v5814_v24 = vpop.eup %4775 }
 0x111   :  { %v821_v19 = vrot.slane %v820_v47, 4  ;;  %v864_v20 = vadd.f32 %v863_v6, %v862_v4  ;;  %v916_v44 = vmul.f32 %v4772_v49, %v5722_v56  ;;  %v758_v15 = vadd.f32 %v757_v31, %v756_v50  ;;  %v4778_v4 = vpop.eup %4777 }
 0x112   :  { %v811_v52 = vadd.f32 %v810_v22, %v809_v37  ;;  %v875_v9 = vadd.f32 %v874_v28, %v873_v41  ;;  %v769_v35 = vadd.f32 %v768_v11, %v767_v54  ;;  %v917_v36 = vmul.f32 %v915_v32, %v5547_v38 }
 0x113   :  { %v822_v34 = vadd.f32 %v821_v19, %v820_v47  ;;  %v865_v10 = vrot.slane %v864_v20, 4  ;;  %v918_v48 = vmul.f32 %v916_v44, %v5549_v39  ;;  %v759_v6 = vrot.slane %v758_v15, 1 }
 0x114   :  { %v812_v26 = vrot.slane %v811_v52, 2  ;;  %v876_v12 = vrot.slane %v875_v9, 4  ;;  %v770_v45 = vrot.slane %v769_v35, 1  ;;  %v928_v22 = vmul.f32 %v915_v32, %v5704_v58 }
 0x115   :  { %v823_v27 = vrot.slane %v822_v34, 2  ;;  %v866_v21 = vadd.f32 %v865_v10, %v864_v20  ;;  %v919_v37 = vadd.f32 %v918_v48, %v917_v36  ;;  %v760_v49 = vadd.f32 %v759_v6, %v758_v15 }
 0x116   :  { %v813_v41 = vadd.f32 %v812_v26, %v811_v52  ;;  %v877_v47 = vadd.f32 %v876_v12, %v875_v9  ;;  %v771_v50 = vadd.f32 %v770_v45, %v769_v35  ;;  %v929_v19 = vmul.f32 %v916_v44, %v5708_v59 }
 0x117   :  { %v824_v56 = vadd.f32 %v823_v27, %v822_v34  ;;  %v867_v54 = vrot.slane %v866_v21, 2  ;;  %v920_v29 = vrot.slane %v919_v37, 4  ;;  %v762_v10 = vadd.f32 %v761_v43, %v760_v49 }
 0x118   :  { %v4780_v28 = vpop.eup %4779  ;;  %v814_v31 = vrot.slane %v813_v41, 1  ;;  %v878_v2 = vrot.slane %v877_v47, 2  ;;  %v5825_v20 = vadd.f32 %v772_v40, %v771_v50  ;;  %v930_v12 = vadd.f32 %v929_v19, %v928_v22 }
 0x119   :  { %v825_v11 = vrot.slane %v824_v56, 1  ;;  %v868_v27 = vadd.f32 %v867_v54, %v866_v21  ;;  %v921_v34 = vadd.f32 %v920_v29, %v919_v37  ;;  %v970_v15 = vmul.f32 %v4778_v4, %v5728_v60 }
 0x11a   :  { %v815_v48 = vadd.f32 %v814_v31, %v813_v41  ;;  %v879_v52 = vadd.f32 %v878_v2, %v877_v47  ;;  %v931_v44 = vrot.slane %v930_v12, 4  ;;  %v971_v35 = vmul.f32 %v4778_v4, %v5732_v18 }
 0x11b   :  { %v826_v32 = vadd.f32 %v825_v11, %v824_v56  ;;  %v869_v9 = vrot.slane %v868_v27, 1  ;;  %v922_v21 = vrot.slane %v921_v34, 2  ;;  %v972_v29 = vmul.f32 %v970_v15, %v5484_v13 }
 0x11c   :  { %v5831_v36 = vadd.f32 %v816_v42, %v815_v48  ;;  %v880_v40 = vrot.slane %v879_v52, 1  ;;  %v932_v2 = vadd.f32 %v931_v44, %v930_v12  ;;  %v973_v6 = vmul.f32 %v971_v35, %v5486_v14 }
 0x11d   :  { %v5835_v43 = vadd.f32 %v827_v25, %v826_v32  ;;  %v870_v26 = vadd.f32 %v869_v9, %v868_v27  ;;  %v923_v60 = vadd.f32 %v922_v21, %v921_v34  ;;  %v983_v18 = vmul.f32 %v970_v15, %v5493_v16 }
 0x11e   :  { %v881_v45 = vadd.f32 %v880_v40, %v879_v52  ;;  %v984_v4 = vmul.f32 %v971_v35, %v5495_v17  ;;  %v933_v22 = vrot.slane %v932_v2, 2  ;;  %v974_v41 = vadd.f32 %v973_v6, %v972_v29 }
 0x11f   :  { %v872_v42 = vadd.f32 %v871_v51, %v870_v26  ;;  %v1025_v25 = vmul.f32 %v4780_v28, %v5740_v0  ;;  %v924_v47 = vrot.slane %v923_v60, 1  ;;  %v1026_v49 = vmul.f32 %v4780_v28, %v5746_v1 }
 0x120   :  { %v883_v56 = vadd.f32 %v882_v53, %v881_v45  ;;  %v985_v37 = vadd.f32 %v984_v4, %v983_v18  ;;  %v934_v50 = vadd.f32 %v933_v22, %v932_v2  ;;  %v975_v54 = vrot.slane %v974_v41, 4 }
 0x121   :  { %v1027_v19 = vmul.f32 %v1025_v25, %v5547_v38  ;;  %v1038_v31 = vmul.f32 %v1025_v25, %v5704_v58  ;;  %v925_v11 = vadd.f32 %v924_v47, %v923_v60  ;;  %v1028_v51 = vmul.f32 %v1026_v49, %v5549_v39 }
 0x122   :  { %v986_v27 = vrot.slane %v985_v37, 4  ;;  %v1039_v12 = vmul.f32 %v1026_v49, %v5708_v59  ;;  %v935_v53 = vrot.slane %v934_v50, 1  ;;  %v976_v0 = vadd.f32 %v975_v54, %v974_v41 }
 0x123   :  { %v1074_v1 = vadd.f32 %v1073_v3, %v5797_v5  ;;  %v1127_v28 = vadd.f32 %v5814_v24, %v5811_v23  ;;  %v927_v48 = vadd.f32 %v926_v62, %v925_v11  ;;  %v1029_v52 = vadd.f32 %v1028_v51, %v1027_v19  ;;  %v5894_v19 = vld [vmem:[#allocation2] sm:$0xff] }
 0x124   :  { %v987_v32 = vadd.f32 %v986_v27, %v985_v37  ;;  %v1040_v34 = vadd.f32 %v1039_v12, %v1038_v31  ;;  %v936_v9 = vadd.f32 %v935_v53, %v934_v50  ;;  %v977_v44 = vrot.slane %v976_v0, 2  ;;  %v5905_v27 = vld [vmem:[#allocation2 + $0x8] sm:$0xff] }
 0x125   :  { %v1075_v15 = vrot.slane %v1074_v1, 2  ;;  %v1128_v35 = vrot.slane %v1127_v28, 4  ;;  %v1030_v5 = vrot.slane %v1029_v52, 4  ;;  %v1160_v21 = vsel %vm1159_vm0, %v762_v10, %v872_v42 }
 0x126   :  { %v988_v40 = vrot.slane %v987_v32, 2  ;;  %v1041_v3 = vrot.slane %v1040_v34, 4  ;;  %v938_v62 = vadd.f32 %v937_v63, %v936_v9  ;;  %v978_v26 = vadd.f32 %v977_v44, %v976_v0 }
 0x127   :  { %v1076_v2 = vadd.f32 %v1075_v15, %v1074_v1  ;;  %v1129_v29 = vadd.f32 %v1128_v35, %v1127_v28  ;;  %v1031_v45 = vadd.f32 %v1030_v5, %v1029_v52  ;;  %v1165_v18 = vsel %vm1159_vm0, %v5825_v20, %v883_v56 }
 0x128   :  { %v989_v6 = vadd.f32 %v988_v40, %v987_v32  ;;  %v1042_v60 = vadd.f32 %v1041_v3, %v1040_v34  ;;  %v979_v10 = vrot.slane %v978_v26, 1  ;;  %v1168_v63 = vsel %vm1159_vm0, %v5831_v36, %v927_v48  ;;  %v5922_v48 = vld [vmem:[#allocation2 + $0x18] sm:$0xff] }
 0x129   :  { %v1077_v4 = vrot.slane %v1076_v2, 1  ;;  %v1130_v42 = vrot.slane %v1129_v29, 2  ;;  %v1032_v41 = vrot.slane %v1031_v45, 2  ;;  %v1171_v47 = vsel %vm1159_vm0, %v5835_v43, %v938_v62 }
 0x12a   :  { %v990_v22 = vrot.slane %v989_v6, 1  ;;  %v1043_v25 = vrot.slane %v1042_v60, 2  ;;  %v980_v20 = vadd.f32 %v979_v10, %v978_v26  ;;  %v1237_v49 = vstv %s5851_s26  ;;  %s5910_s26 = sld [smem:[#allocation6 + $0x4f]] }
 0x12b   :  { %v1078_v56 = vadd.f32 %v1077_v4, %v1076_v2  ;;  %v1131_v37 = vadd.f32 %v1130_v42, %v1129_v29  ;;  %v1033_v50 = vadd.f32 %v1032_v41, %v1031_v45  ;;  %v1235_v43 = vmul.f32 %v5894_v19, %v1234_v7 }
 0x12c   :  { %v991_v36 = vadd.f32 %v990_v22, %v989_v6  ;;  %v1044_v54 = vadd.f32 %v1043_v25, %v1042_v60  ;;  %v982_v31 = vadd.f32 %v981_v33, %v980_v20  ;;  %v1236_v51 = vmul.f32 %v5905_v27, %v1234_v7  ;;  %v5916_v33 = vld [vmem:[#allocation2 + $0x10] sm:$0xff] }
 0x12d   :  { %4781 = vrcp.f32 %v1078_v56  ;;  %v1132_v11 = vrot.slane %v1131_v37, 1  ;;  %v1034_v53 = vrot.slane %v1033_v50, 1  ;;  %v1238_v1 = vmul.f32 %v5916_v33, %v1237_v49 }
 0x12e   :  { %v993_v12 = vadd.f32 %v992_v46, %v991_v36  ;;  %v1045_v0 = vrot.slane %v1044_v54, 1  ;;  %v5920_v7 = vsel %vm1161_vm1, %v1160_v21, %v982_v31  ;;  %v1239_v46 = vmul.f32 %v5922_v48, %v1237_v49 }
 0x12f   :  { %v1133_v28 = vadd.f32 %v1132_v11, %v1131_v37  ;;  %v1245_v32 = vstv %s5867_s2  ;;  %v1035_v52 = vadd.f32 %v1034_v53, %v1033_v50  ;;  %v1248_v44 = vstv %s5873_s7  ;;  %s5944_s2 = sld [smem:[#allocation6 + $0x5a]]  ;;  %s5994_s7 = sld [smem:[#allocation6 + $0x5e]] }
 0x130   :  { %10593 = sst [smem:[#allocation20_spill]] %s5910_s26  ;;  %v1046_v34 = vadd.f32 %v1045_v0, %v1044_v54  ;;  %v5929_v9 = vsel %vm1161_vm1, %v1165_v18, %v993_v12  ;;  %v1198_v15 = vstv %s5877_s30  ;;  %v1200_v35 = vstv %s5860_s6  ;;  %s6020_s30 = sld [smem:[#allocation6 + $0x5f]] }
 0x131   :  { %4783 = vrcp.f32 %v1133_v28  ;;  %v1202_v40 = vstv %s5865_s20  ;;  %v1037_v5 = vadd.f32 %v1036_v57, %v1035_v52  ;;  %v1205_v21 = vstv %s5881_s13  ;;  %s6035_s13 = sld [smem:[#allocation6 + $0x63]]  ;;  %s6363_s6 = sld [smem:[#allocation6 + $0x94]] }
 0x132   :  { %v1048_v3 = vadd.f32 %v1047_v8, %v1046_v34  ;;  %v1240_v62 = vadd.f32 %v1238_v1, %v1235_v43  ;;  %v1241_v26 = vadd.f32 %v1239_v46, %v1236_v51  ;;  %v1242_v2 = vstv %s5887_s19  ;;  %s5996_s19 = sld [smem:[#allocation6 + $0x64]]  ;;  %s6127_s20 = sld [smem:[#allocation6 + $0x73]] }
 0x133   :  { %v1246_v29 = vmul.f32 %v5894_v19, %v1245_v32  ;;  %v1249_v6 = vmul.f32 %v5916_v33, %v1248_v44  ;;  %v5950_v57 = vsel %vm1161_vm1, %v1168_v63, %v1037_v5  ;;  %v1208_v45 = vstv %s5890_s15  ;;  %s6028_s15 = sld [smem:[#allocation6 + $0x6a]] }
 0x134   :  { %v5953_v8 = vsel %vm1161_vm1, %v1171_v47, %v1048_v3  ;;  %v1211_v60 = vstv %s5892_s12  ;;  %v1213_v18 = vstv %s5862_s10  ;;  %v1215_v10 = vstv %s5871_s25  ;;  %s6014_s12 = sld [smem:[#allocation6 + $0x6d]]  ;;  %s6129_s10 = sld [smem:[#allocation6 + $0x77]] }
 0x135   :  { %v1218_v4 = vstv %s5885_s14  ;;  %v1256_v42 = vstv %s5901_s1  ;;  %v1221_v22 = vstv %s5899_s5  ;;  %v1224_v41 = vstv %s5910_s26  ;;  %s5988_s1 = sld [smem:[#allocation6 + $0x60]]  ;;  %s6012_s26 = sld [smem:[#allocation6 + $0x69]] }
 0x136   :  { %v5963_v25 = vadd.f32 %v1242_v2, %v1240_v62  ;;  %v1259_v20 = vstv %s5912_s21  ;;  %v5966_v37 = vadd.f32 %v1242_v2, %v1241_v26  ;;  %v1247_v63 = vmul.f32 %v5905_v27, %v1245_v32  ;;  %s5986_s21 = sld [smem:[#allocation6 + $0x5d]]  ;;  %10598 = sst [smem:[#allocation15_spill]] %s6020_s30 }
 0x137   :  { %v4782_v56 = vpop.eup %4781  ;;  %v1250_v47 = vmul.f32 %v5922_v48, %v1248_v44  ;;  %v1251_v49 = vadd.f32 %v1249_v6, %v1246_v29  ;;  %v1253_v54 = vstv %s5926_s17  ;;  %v1257_v43 = vmul.f32 %v5894_v19, %v1256_v42  ;;  %s6000_s17 = sld [smem:[#allocation6 + $0x68]]  ;;  %s6022_s5 = sld [smem:[#allocation6 + $0x62]] }
 0x138   :  { %v1080_v36 = vmul.f32 %v4782_v56, %v5781_v30  ;;  %v1081_v50 = vmul.f32 %v4782_v56, %v5787_v55  ;;  %v1258_v31 = vmul.f32 %v5905_v27, %v1256_v42  ;;  %v1260_v11 = vmul.f32 %v5916_v33, %v1259_v20  ;;  %10595 = sst [smem:[#allocation56_spill]] %s5996_s19  ;;  %s6026_s14 = sld [smem:[#allocation6 + $0x66]] }
 0x139   :  { %v1261_v51 = vmul.f32 %v5922_v48, %v1259_v20  ;;  %v1267_v12 = vstv %s5932_s3  ;;  %v1252_v28 = vadd.f32 %v1250_v47, %v1247_v63  ;;  %v5990_v46 = vadd.f32 %v1253_v54, %v1251_v49  ;;  %s6002_s3 = sld [smem:[#allocation6 + $0x6c]]  ;;  %10599 = sst [smem:[#allocation16_spill]] %s6028_s15 }
 0x13a   :  { %v1082_v30 = vmul.f32 %v1080_v36, %v5484_v13  ;;  %v1083_v55 = vmul.f32 %v1081_v50, %v5486_v14  ;;  %v1093_v53 = vmul.f32 %v1080_v36, %v5493_v16  ;;  %v1094_v0 = vmul.f32 %v1081_v50, %v5495_v17  ;;  %10597 = sst [smem:[#allocation21_spill]] %s6014_s12  ;;  %s6371_s25 = sld [smem:[#allocation6 + $0x96]] }
 0x13b   :  { %v4784_v1 = vpop.eup %4783  ;;  %v1264_v32 = vstv %s5944_s2  ;;  %v1270_v52 = vstv %s5942_s18  ;;  %v1262_v34 = vadd.f32 %v1260_v11, %v1257_v43  ;;  %v1263_v44 = vadd.f32 %v1261_v51, %v1258_v31  ;;  %s6006_s18 = sld [smem:[#allocation6 + $0x61]]  ;;  %s6008_s2 = sld [smem:[#allocation6 + $0x65]] }
 0x13c   :  { %v1084_v13 = vadd.f32 %v1083_v55, %v1082_v30  ;;  %v1095_v14 = vadd.f32 %v1094_v0, %v1093_v53  ;;  %v1135_v16 = vmul.f32 %v4784_v1, %v5811_v23  ;;  %v1136_v17 = vmul.f32 %v4784_v1, %v5814_v24  ;;  %10600 = sst [smem:[#allocation25_spill]] %s6035_s13 }
 0x13d   :  { %v1268_v5 = vmul.f32 %v5894_v19, %v1267_v12  ;;  %v1269_v3 = vmul.f32 %v5905_v27, %v1267_v12  ;;  %v1271_v27 = vmul.f32 %v5916_v33, %v1270_v52  ;;  %v1272_v29 = vmul.f32 %v5922_v48, %v1270_v52  ;;  %10658 = sst [smem:[#allocation24_spill]] %s6363_s6  ;;  %s6461_s6 = sld [smem:[#allocation6 + $0xb1]] }
 0x13e   :  { %v1085_v62 = vrot.slane %v1084_v13, 4  ;;  %v1096_v26 = vrot.slane %v1095_v14, 4  ;;  %v1137_v23 = vmul.f32 %v1135_v16, %v5547_v38  ;;  %v1138_v24 = vmul.f32 %v1136_v17, %v5549_v39 }
 0x13f   :  { %10596 = sst [smem:[#allocation60_spill]] %s6002_s3  ;;  %v1148_v2 = vmul.f32 %v1135_v16, %v5704_v58  ;;  %v1149_v19 = vmul.f32 %v1136_v17, %v5708_v59  ;;  %v6024_v42 = vadd.f32 %v1253_v54, %v1252_v28  ;;  %v6030_v59 = vadd.f32 %v1264_v32, %v1262_v34 }
 0x140   :  { %v1086_v38 = vadd.f32 %v1085_v62, %v1084_v13  ;;  %v1097_v39 = vadd.f32 %v1096_v26, %v1095_v14  ;;  %v1139_v6 = vadd.f32 %v1138_v24, %v1137_v23  ;;  %v6032_v33 = vadd.f32 %v1264_v32, %v1263_v44  ;;  %10660 = sst [smem:[#allocation42_spill]] %s6371_s25  ;;  %s6417_s25 = sld [smem:[#allocation6 + $0xa2]] }
 0x141   :  { %v1150_v58 = vadd.f32 %v1149_v19, %v1148_v2  ;;  %v1275_v48 = vstv %s5974_s23  ;;  %v1278_v47 = vstv %s5980_s4  ;;  %v6042_v36 = vadd.f32 %v1271_v27, %v1268_v5  ;;  %s6047_s23 = sld [smem:[#allocation6 + $0x70]] }
 0x142   :  { %v1087_v20 = vrot.slane %v1086_v38, 2  ;;  %v1098_v56 = vrot.slane %v1097_v39, 2  ;;  %v1140_v63 = vrot.slane %v1139_v6, 4  ;;  %v6044_v50 = vadd.f32 %v1272_v29, %v1269_v3  ;;  %s6380_s4 = sld [smem:[#allocation6 + $0x98]] }
 0x143   :  { %v1151_v49 = vrot.slane %v1150_v58, 4  ;;  %v1280_v54 = vstv %s5988_s1  ;;  %v1283_v51 = vstv %s5996_s19  ;;  %v1286_v30 = vstv %s6000_s17  ;;  %s6057_s19 = sld [smem:[#allocation6 + $0x74]]  ;;  %s6256_s17 = sld [smem:[#allocation6 + $0x81]] }
 0x144   :  { %v1088_v43 = vadd.f32 %v1087_v20, %v1086_v38  ;;  %v1099_v31 = vadd.f32 %v1098_v56, %v1097_v39  ;;  %v1141_v11 = vadd.f32 %v1140_v63, %v1139_v6  ;;  %v1289_v55 = vstv %s6002_s3  ;;  %s6073_s3 = sld [smem:[#allocation6 + $0x7c]]  ;;  %s6382_s1 = sld [smem:[#allocation6 + $0x99]] }
 0x145   :  { %v1152_v12 = vadd.f32 %v1151_v49, %v1150_v58  ;;  %v1291_v53 = vstv %s5986_s21  ;;  %v1293_v32 = vstv %s6006_s18  ;;  %v1296_v13 = vstv %s6008_s2  ;;  %s6248_s21 = sld [smem:[#allocation6 + $0x6f]]  ;;  %s6268_s2 = sld [smem:[#allocation6 + $0x83]] }
 0x146   :  { %v1089_v0 = vrot.slane %v1088_v43, 1  ;;  %v1100_v1 = vrot.slane %v1099_v31, 1  ;;  %v1142_v28 = vrot.slane %v1141_v11, 2  ;;  %v1299_v14 = vstv %s6012_s26  ;;  %s6246_s26 = sld [smem:[#allocation6 + $0x6e]]  ;;  %10669 = sst [smem:[#allocation18_spill]] %s6417_s25 }
 0x147   :  { %10603 = sst [smem:[#allocation54_spill]] %s6047_s23  ;;  %v1153_v52 = vrot.slane %v1152_v12, 2  ;;  %v1302_v16 = vstv %s6014_s12  ;;  %v1304_v5 = vstv %s5994_s7  ;;  %v1306_v62 = vstv %s6022_s5  ;;  %s6071_s12 = sld [smem:[#allocation6 + $0x78]] }
 0x148   :  { %v1090_v17 = vadd.f32 %v1089_v0, %v1088_v43  ;;  %v1101_v34 = vadd.f32 %v1100_v1, %v1099_v31  ;;  %v1143_v44 = vadd.f32 %v1142_v28, %v1141_v11  ;;  %v1309_v26 = vstv %s6026_s14  ;;  %s6254_s7 = sld [smem:[#allocation6 + $0x80]]  ;;  %s6386_s5 = sld [smem:[#allocation6 + $0x9a]] }
 0x149   :  { %10604 = sst [smem:[#allocation57_spill]] %s6057_s19  ;;  %v1154_v3 = vadd.f32 %v1153_v52, %v1152_v12  ;;  %v1312_v23 = vstv %s6028_s15  ;;  %v10605_v2 = vstv %s5637_s16  ;;  %v1317_v29 = vstv %s6020_s30  ;;  %s6086_s16 = sld [smem:[#allocation6 + $0x75]] }
 0x14a   :  { %v1092_v24 = vadd.f32 %v1091_v61, %v1090_v17  ;;  %v1103_v19 = vadd.f32 %v10605_v2, %v1101_v34  ;;  %v1144_v27 = vrot.slane %v1143_v44, 1  ;;  %v1319_v39 = vstv %s6035_s13  ;;  %s6122_s13 = sld [smem:[#allocation6 + $0x76]]  ;;  %s6139_s30 = sld [smem:[#allocation6 + $0x7a]] }
 0x14b   :  { %v1155_v38 = vrot.slane %v1154_v3, 1  ;;  %v1322_v6 = vstv %s6038_s8  ;;  %v1325_v58 = vstv %s6040_s28  ;;  %v1330_v63 = vstv %s6047_s23  ;;  %s6097_s28 = sld [smem:[#allocation6 + $0x79]]  ;;  %s6099_s8 = sld [smem:[#allocation6 + $0x7d]] }
 0x14c   :  { %v1145_v61 = vadd.f32 %v1144_v27, %v1143_v44  ;;  %v6077_v20 = vsel %vm1163_vm2, %v5920_v7, %v1092_v24  ;;  %v6081_v56 = vsel %vm1163_vm2, %v5929_v9, %v1103_v19  ;;  %v10606_v43 = vstv %s5738_s24  ;;  %s10611_s24 = sld [smem:[#allocation14_spill]]  ;;  %s6120_s23 = sld [smem:[#allocation6 + $0x72]] }
 0x14d   :  { %v1156_v49 = vadd.f32 %v1155_v38, %v1154_v3  ;;  %v1175_v31 = vmul.f32 %v10606_v43, %v6077_v20  ;;  %v10607_v11 = vstv %s5744_s29  ;;  %v10608_v7 = vstv %s5742_s9  ;;  %s10612_s29 = sld [smem:[#allocation52_spill]]  ;;  %s6151_s15 = sld [smem:[#allocation6 + $0x7b]] }
 0x14e   :  { %v1177_v12 = vmul.f32 %v10607_v11, %v6081_v56  ;;  %v1188_v0 = vmul.f32 %v10608_v7, %v6077_v20  ;;  %v10609_v9 = vstv %s5644_s0  ;;  %v10610_v28 = vstv %s5753_s22  ;;  %s10615_s0 = sld [smem:[#allocation51_spill]]  ;;  %s10616_s22 = sld [smem:[#allocation49_spill]] }
 0x14f   :  { %v1147_v1 = vadd.f32 %v10609_v9, %v1145_v61  ;;  %v1190_v52 = vmul.f32 %v10610_v28, %v6081_v56  ;;  %v1201_v17 = vmul.f32 %v1200_v35, %v6077_v20  ;;  %v1203_v34 = vmul.f32 %v1202_v40, %v6081_v56  ;;  %s6289_s9 = sld [smem:[#allocation6 + $0x86]]  ;;  %s6388_s14 = sld [smem:[#allocation6 + $0x9b]] }
 0x150   :  { %v10613_v44 = vstv %s5656_s27  ;;  %v1178_v24 = vadd.f32 %v1177_v12, %v1175_v31  ;;  %v1214_v2 = vmul.f32 %v1213_v18, %v6077_v20  ;;  %v1216_v19 = vmul.f32 %v1215_v10, %v6081_v56  ;;  %s6365_s27 = sld [smem:[#allocation6 + $0x95]]  ;;  %s6401_s18 = sld [smem:[#allocation6 + $0x9e]] }
 0x151   :  { %v1158_v3 = vadd.f32 %v10613_v44, %v1156_v49  ;;  %v1170_v35 = vsel %vm1163_vm2, %v5950_v57, %v1147_v1  ;;  %v1191_v40 = vadd.f32 %v1190_v52, %v1188_v0  ;;  %v1204_v27 = vadd.f32 %v1203_v34, %v1201_v17  ;;  %s6430_s25 = sld [smem:[#allocation6 + $0xa6]]  ;;  %10684 = sst [smem:[#allocation46_spill]] %s6461_s6 }
 0x152   :  { %v1332_v38 = vstv %s6057_s19  ;;  %v10619_v10 = vstv %s10611_s24  ;;  %v1206_v57 = vmul.f32 %v1205_v21, %v1170_v35  ;;  %s6141_s19 = sld [smem:[#allocation6 + $0x7e]]  ;;  %v1217_v0 = vadd.f32 %v1216_v19, %v1214_v2  ;;  %s10624_s24 = sld [smem:[#allocation45_spill]] }
 0x153   :  { %v1173_v18 = vsel %vm1163_vm2, %v5953_v8, %v1158_v3  ;;  %v1180_v61 = vmul.f32 %v10619_v10, %v1170_v35  ;;  %v10621_v49 = vstv %s10612_s29  ;;  %v1219_v21 = vmul.f32 %v1218_v4, %v1170_v35  ;;  %s6279_s29 = sld [smem:[#allocation6 + $0x85]] }
 0x154   :  { %v1193_v43 = vmul.f32 %v10621_v49, %v1170_v35  ;;  %v10622_v31 = vstv %s10615_s0  ;;  %v10623_v12 = vstv %s10616_s22  ;;  %v1209_v8 = vmul.f32 %v1208_v45, %v1173_v18  ;;  %s6153_s0 = sld [smem:[#allocation6 + $0x7f]]  ;;  %s6351_s22 = sld [smem:[#allocation6 + $0x91]] }
 0x155   :  { %v1183_v11 = vmul.f32 %v10622_v31, %v1173_v18  ;;  %v1196_v7 = vmul.f32 %v10623_v12, %v1173_v18  ;;  %v1181_v9 = vadd.f32 %v1180_v61, %v1178_v24  ;;  %v1207_v28 = vadd.f32 %v1206_v57, %v1204_v27  ;;  %10643 = sst [smem:[#allocation63_spill]] %s6289_s9 }
 0x156   :  { %v1194_v1 = vadd.f32 %v1193_v43, %v1191_v40  ;;  %v1222_v52 = vmul.f32 %v1221_v22, %v1173_v18  ;;  %v1335_v45 = vstv %s6071_s12  ;;  %v1338_v17 = vstv %s6073_s3  ;;  %s6266_s3 = sld [smem:[#allocation6 + $0x82]]  ;;  %10659 = sst [smem:[#allocation28_spill]] %s6365_s27 }
 0x157   :  { %v1184_v34 = vadd.f32 %v1183_v11, %v1181_v9  ;;  %v1210_v3 = vadd.f32 %v1209_v8, %v1207_v28  ;;  %v1220_v24 = vadd.f32 %v1219_v21, %v1217_v0  ;;  %v1343_v2 = vstv %s6084_s11  ;;  %s6355_s12 = sld [smem:[#allocation6 + $0x92]]  ;;  %s6357_s11 = sld [smem:[#allocation6 + $0x93]] }
 0x158   :  { %v1197_v44 = vadd.f32 %v1196_v7, %v1194_v1  ;;  %v1345_v19 = vstv %s6086_s16  ;;  %v1348_v4 = vstv %s6097_s28  ;;  %v1351_v40 = vstv %s6099_s8  ;;  %s6277_s16 = sld [smem:[#allocation6 + $0x84]]  ;;  %s6291_s28 = sld [smem:[#allocation6 + $0x87]] }
 0x159   :  { %v10628_v27 = vstv %s10624_s24  ;;  %v1212_v61 = vadd.f32 %v1211_v60, %v1210_v3  ;;  %v1223_v49 = vadd.f32 %v1222_v52, %v1220_v24  ;;  %v1356_v43 = vstv %s6120_s23  ;;  %10642 = sst [smem:[#allocation17_spill]] %s6279_s29  ;;  %s6304_s8 = sld [smem:[#allocation6 + $0x88]] }
 0x15a   :  { %v1186_v10 = vadd.f32 %v10628_v27, %v1184_v34  ;;  %v1199_v22 = vadd.f32 %v1198_v15, %v1197_v44  ;;  %v1358_v57 = vstv %s6122_s13  ;;  %v4993_v31 = vmov 1966171168   ;;  %s6306_s23 = sld [smem:[#allocation6 + $0x89]]  ;;  %s6317_s13 = sld [smem:[#allocation6 + $0x8a]] }
 0x15b   :  { %v1384_v11 = vunpack.c.l.s4 %v4993_v31  ;;  %v1386_v12 = vlaneseq  ;;  %v1225_v7 = vadd.f32 %v1224_v41, %v1223_v49  ;;  %v1230_v9 = vmax.f32 %v1212_v61, 0.0  ;;  %10655 = sst [smem:[#allocation48_spill]] %s6351_s22  ;;  %s6373_s24 = sld [smem:[#allocation6 + $0x97]] }
 0x15c   :  { %v1226_v8 = vmax.f32 %v1186_v10, 0.0  ;;  %v1228_v0 = vmax.f32 %v1199_v22, 0.0  ;;  %v1361_v1 = vstv %s6139_s30  ;;  %v1364_v15 = vstv %s6141_s19  ;;  %s6319_s30 = sld [smem:[#allocation6 + $0x8b]]  ;;  %s6338_s19 = sld [smem:[#allocation6 + $0x8e]] }
 0x15d   :  { %v1369_v60 = vstv %s6127_s20  ;;  %v1371_v28 = vstv %s6129_s10  ;;  %v6183_v41 = vadd.f32 %v1230_v9, %v1170_v35  ;;  %v1232_v34 = vmax.f32 %v1225_v7, 0.0  ;;  %s6330_s20 = sld [smem:[#allocation6 + $0x8c]]  ;;  %s6332_s10 = sld [smem:[#allocation6 + $0x8d]] }
 0x15e   :  { %v6178_v21 = vadd.f32 %v1226_v8, %v6077_v20  ;;  %v6181_v52 = vadd.f32 %v1228_v0, %v6081_v56  ;;  %v1374_v44 = vstv %s6151_s15  ;;  %v1377_v3 = vstv %s6153_s0  ;;  %10641 = sst [smem:[#allocation61_spill]] %s6277_s16  ;;  %s6340_s15 = sld [smem:[#allocation6 + $0x8f]] }
 0x15f   :  { %v1385_v24 = vunpack.c.0.s8 %v1384_v11  ;;  %v6187_v27 = vshrl.u32 %v1386_v12, 7  ;;  %v6189_v10 = vadd.f32 %v1232_v34, %v1173_v18  ;;  %v1284_v35 = vmul.f32 %v1283_v51, %v6183_v41  ;;  %10644 = sst [smem:[#allocation30_spill]] %s6291_s28  ;;  %s6349_s0 = sld [smem:[#allocation6 + $0x90]] }
 0x160   :  { %v1279_v20 = vmul.f32 %v1278_v47, %v6178_v21  ;;  %v1281_v56 = vmul.f32 %v1280_v54, %v6181_v52  ;;  %v1292_v22 = vmul.f32 %v1291_v53, %v6178_v21  ;;  %v1294_v61 = vmul.f32 %v1293_v32, %v6181_v52  ;;  %10645 = sst [smem:[#allocation64_spill]] %s6304_s8  ;;  %s6496_s28 = sld [smem:[#allocation6 + $0xbb]] }
 0x161   :  { %v1297_v18 = vmul.f32 %v1296_v13, %v6183_v41  ;;  %v1305_v47 = vmul.f32 %v1304_v5, %v6178_v21  ;;  %v1287_v51 = vmul.f32 %v1286_v30, %v6189_v10  ;;  %v1300_v49 = vmul.f32 %v1299_v14, %v6189_v10  ;;  %10646 = sst [smem:[#allocation58_spill]] %s6306_s23  ;;  %s6427_s27 = sld [smem:[#allocation6 + $0xa5]] }
 0x162   :  { %v1282_v54 = vadd.f32 %v1281_v56, %v1279_v20  ;;  %v1307_v53 = vmul.f32 %v1306_v62, %v6181_v52  ;;  %v1295_v32 = vadd.f32 %v1294_v61, %v1292_v22  ;;  %v1310_v31 = vmul.f32 %v1309_v26, %v6183_v41  ;;  %10648 = sst [smem:[#allocation65_spill]] %s6317_s13  ;;  %s6449_s22 = sld [smem:[#allocation6 + $0xad]] }
 0x163   :  { %v1313_v13 = vmul.f32 %v1312_v23, %v6189_v10  ;;  %v1318_v5 = vmul.f32 %v1317_v29, %v6178_v21  ;;  %v1320_v30 = vmul.f32 %v1319_v39, %v6181_v52  ;;  %v1323_v14 = vmul.f32 %v1322_v6, %v6183_v41  ;;  %10649 = sst [smem:[#allocation34_spill]] %s6319_s30  ;;  %s6494_s30 = sld [smem:[#allocation6 + $0xba]] }
 0x164   :  { %v1285_v11 = vadd.f32 %v1284_v35, %v1282_v54  ;;  %v1308_v12 = vadd.f32 %v1307_v53, %v1305_v47  ;;  %v1298_v62 = vadd.f32 %v1297_v18, %v1295_v32  ;;  %v1326_v7 = vmul.f32 %v1325_v58, %v6189_v10  ;;  %10650 = sst [smem:[#allocation62_spill]] %s6330_s20  ;;  %s6516_s13 = sld [smem:[#allocation6 + $0xc0]] }
 0x165   :  { %v1331_v26 = vmul.f32 %v1330_v63, %v6178_v21  ;;  %v1333_v23 = vmul.f32 %v1332_v38, %v6181_v52  ;;  %v1321_v0 = vadd.f32 %v1320_v30, %v1318_v5  ;;  %v1336_v39 = vmul.f32 %v1335_v45, %v6183_v41  ;;  %10651 = sst [smem:[#allocation37_spill]] %s6332_s10  ;;  %s6452_s10 = sld [smem:[#allocation6 + $0xae]] }
 0x166   :  { %v1288_v29 = vadd.f32 %v1287_v51, %v1285_v11  ;;  %v1311_v8 = vadd.f32 %v1310_v31, %v1308_v12  ;;  %v1301_v6 = vadd.f32 %v1300_v49, %v1298_v62  ;;  %v1339_v63 = vmul.f32 %v1338_v17, %v6189_v10  ;;  %10652 = sst [smem:[#allocation31_spill]] %s6338_s19 }
 0x167   :  { %v1334_v58 = vadd.f32 %v1333_v23, %v1331_v26  ;;  %v1344_v9 = vmul.f32 %v1343_v2, %v6178_v21  ;;  %v1324_v45 = vadd.f32 %v1323_v14, %v1321_v0  ;;  %v1346_v34 = vmul.f32 %v1345_v19, %v6181_v52  ;;  %10653 = sst [smem:[#allocation38_spill]] %s6340_s15  ;;  %s6411_s15 = sld [smem:[#allocation6 + $0xa1]] }
 0x168   :  { %v6258_v38 = vadd.f32 %v1313_v13, %v1311_v8  ;;  %v6264_v20 = vsub.s32 %v1385_v24, %v6187_v27  ;;  %v1290_v17 = vadd.f32 %v1289_v55, %v1288_v29  ;;  %v1303_v2 = vadd.f32 %v1302_v16, %v1301_v6  ;;  %10654 = sst [smem:[#allocation41_spill]] %s6349_s0  ;;  %s6425_s19 = sld [smem:[#allocation6 + $0xa4]] }
 0x169   :  { %v1337_v56 = vadd.f32 %v1336_v39, %v1334_v58  ;;  %v1349_v35 = vmul.f32 %v1348_v4, %v6183_v41  ;;  %v6281_v19 = vadd.f32 %v1326_v7, %v1324_v45  ;;  %v1347_v24 = vadd.f32 %v1346_v34, %v1344_v9  ;;  %10656 = sst [smem:[#allocation35_spill]] %s6355_s12  ;;  %s6419_s12 = sld [smem:[#allocation6 + $0xa3]] }
 0x16a   :  { %10640 = vst [vmem:[#allocation67_spill] sm:$0xff] %v6264_v20  ;;  %v1352_v22 = vmul.f32 %v1351_v40, %v6189_v10  ;;  %v1357_v55 = vmul.f32 %v1356_v43, %v6178_v21  ;;  %v6296_v16 = vadd.f32 %v1275_v48, %v6042_v36  ;;  %v1359_v61 = vmul.f32 %v1358_v57, %v6181_v52  ;;  %10657 = sst [smem:[#allocation22_spill]] %s6357_s11  ;;  %s6409_s11 = sld [smem:[#allocation6 + $0xa0]] }
 0x16b   :  { %v1340_v4 = vadd.f32 %v1339_v63, %v1337_v56  ;;  %v1362_v40 = vmul.f32 %v1361_v1, %v6183_v41  ;;  %v1350_v43 = vadd.f32 %v1349_v35, %v1347_v24  ;;  %v1370_v18 = vmul.f32 %v1369_v60, %v6178_v21  ;;  %10661 = sst [smem:[#allocation39_spill]] %s6373_s24  ;;  %s6403_s24 = sld [smem:[#allocation6 + $0x9f]] }
 0x16c   :  { %v1372_v47 = vmul.f32 %v1371_v28, %v6181_v52  ;;  %v6315_v36 = vsub.s32 0, %v6187_v27  ;;  %v1360_v57 = vadd.f32 %v1359_v61, %v1357_v55  ;;  %v1365_v1 = vmul.f32 %v1364_v15, %v6189_v10  ;;  %10662 = sst [smem:[#allocation32_spill]] %s6388_s14 }
 0x16d   :  { %v1375_v60 = vmul.f32 %v1374_v44, %v6183_v41  ;;  %v1378_v28 = vmul.f32 %v1377_v3, %v6189_v10  ;;  %v6334_v21 = vadd.f32 %v1352_v22, %v1350_v43  ;;  %v1389_v27 = vrot.slane %v1290_v17, %v6264_v20  ;;  %10665 = sst [smem:[#allocation26_spill]] %s6401_s18  ;;  %s6737_s18 = sld [smem:[#allocation6 + $0xe1]] }
 0x16e   :  { %10647 = vst [vmem:[#allocation68_spill] sm:$0xff] %v6315_v36  ;;  %v1373_v52 = vadd.f32 %v1372_v47, %v1370_v18  ;;  %v1442_v54 = vrot.slane %v1303_v2, %v6264_v20  ;;  %v6345_v15 = vadd.f32 %v1275_v48, %v6044_v50  ;;  %v1315_v41 = vstv %s6246_s26  ;;  %s6393_s26 = sld [smem:[#allocation6 + $0x9c]]  ;;  %10668 = sst [smem:[#allocation11_spill]] %s6411_s15 }
 0x16f   :  { %v1328_v44 = vstv %s6248_s21  ;;  %v1363_v3 = vadd.f32 %v1362_v40, %v1360_v57  ;;  %v1341_v10 = vstv %s6254_s7  ;;  %v1390_v49 = vcombine.high %v1389_v27, %v1389_v27  ;;  %s6395_s7 = sld [smem:[#allocation6 + $0x9d]]  ;;  %10670 = sst [smem:[#allocation43_spill]] %s6419_s12 }
 0x170   :  { %v1376_v51 = vadd.f32 %v1375_v60, %v1373_v52  ;;  %v1397_v53 = vrot.slane %v1389_v27, %v6264_v20  ;;  %v1354_v32 = vstv %s6256_s17  ;;  %v1443_v48 = vcombine.high %v1442_v54, %v1442_v54  ;;  %10667 = sst [smem:[#allocation66_spill]] %s6409_s11  ;;  %s6434_s15 = sld [smem:[#allocation6 + $0xa8]] }
 0x171   :  { %v6360_v31 = vadd.f32 %v1365_v1, %v1363_v3  ;;  %v1450_v50 = vrot.slane %v1442_v54, %v6264_v20  ;;  %v1404_v5 = vrot.slane %v1390_v49, %v6264_v20  ;;  %v6376_v30 = vadd.f32 %v1315_v41, %v6258_v38  ;;  %10666 = sst [smem:[#allocation40_spill]] %s6403_s24  ;;  %s6432_s12 = sld [smem:[#allocation6 + $0xa7]] }
 0x172   :  { %v6367_v13 = vadd.f32 %v1378_v28, %v1376_v51  ;;  %v1405_v11 = vcombine.high %v1397_v53, %v1397_v53  ;;  %v1410_v12 = vrot.slane %v1397_v53, %v6315_v36  ;;  %v1457_v14 = vrot.slane %v1443_v48, %v6264_v20  ;;  %10671 = sst [smem:[#allocation47_spill]] %s6425_s19  ;;  %s6454_s21 = sld [smem:[#allocation6 + $0xaf]] }
 0x173   :  { %v1458_v62 = vcombine.high %v1450_v50, %v1450_v50  ;;  %v1463_v7 = vrot.slane %v1450_v50, %v6315_v36  ;;  %v1342_v26 = vadd.f32 %v1341_v10, %v1340_v4  ;;  %v1406_v23 = vcombine.high %v1404_v5, %v1404_v5  ;;  %10672 = sst [smem:[#allocation12_spill]] %s6427_s27  ;;  %s6447_s19 = sld [smem:[#allocation6 + $0xac]] }
 0x174   :  { %v1414_v29 = vrot.slane %v1404_v5, %v6315_v36  ;;  %v1418_v8 = vrot.slane %v1405_v11, %v6315_v36  ;;  %v1427_v0 = vmul.f32 %v1410_v12, %v5963_v25  ;;  %v1428_v39 = vmul.f32 %v1410_v12, %v5966_v37  ;;  %10663 = sst [smem:[#allocation36_spill]] %s6393_s26  ;;  %s6469_s11 = sld [smem:[#allocation6 + $0xb3]] }
 0x175   :  { %v1459_v6 = vcombine.high %v1457_v14, %v1457_v14  ;;  %v1467_v58 = vrot.slane %v1457_v14, %v6315_v36  ;;  %10664 = sst [smem:[#allocation33_spill]] %s6395_s7  ;;  %v1422_v63 = vrot.slane %v1406_v23, %v6315_v36  ;;  %v1471_v17 = vrot.slane %v1458_v62, %v6315_v36  ;;  %s6436_s27 = sld [smem:[#allocation6 + $0xa9]] }
 0x176   :  { %v1429_v9 = vmul.f32 %v1414_v29, %v5963_v25  ;;  %v1430_v38 = vmul.f32 %v1414_v29, %v5966_v37  ;;  %v1431_v45 = vmul.f32 %v1418_v8, %v5963_v25  ;;  %v1432_v34 = vmul.f32 %v1418_v8, %v5966_v37  ;;  %10673 = sst [smem:[#allocation44_spill]] %s6430_s25  ;;  %s6440_s25 = sld [smem:[#allocation6 + $0xab]] }
 0x177   :  { %v1475_v2 = vrot.slane %v1459_v6, %v6315_v36  ;;  %v1480_v56 = vmul.f32 %v1463_v7, %v5990_v46  ;;  %v1433_v35 = vmul.f32 %v1422_v63, %v5963_v25  ;;  %v1434_v24 = vmul.f32 %v1422_v63, %v5966_v37  ;;  %10674 = sst [smem:[#allocation13_spill]] %s6432_s12  ;;  %s6483_s17 = sld [smem:[#allocation6 + $0xb8]] }
 0x178   :  { %v1481_v22 = vmul.f32 %v1463_v7, %v6024_v42  ;;  %v1482_v55 = vmul.f32 %v1467_v58, %v5990_v46  ;;  %v1483_v4 = vmul.f32 %v1467_v58, %v6024_v42  ;;  %v1484_v61 = vmul.f32 %v1471_v17, %v5990_v46  ;;  %10675 = sst [smem:[#allocation14_spill]] %s6434_s15  ;;  %s6438_s12 = sld [smem:[#allocation6 + $0xaa]] }
 0x179   :  { %v1485_v40 = vmul.f32 %v1471_v17, %v6024_v42  ;;  %v1486_v43 = vmul.f32 %v1475_v2, %v5990_v46  ;;  %v1487_v18 = vmul.f32 %v1475_v2, %v6024_v42  ;;  %v1488_v47 = vadd.f32 %v1480_v56, %v1427_v0  ;;  %10679 = sst [smem:[#allocation49_spill]] %s6447_s19 }
 0x17a   :  { %v1489_v57 = vadd.f32 %v1481_v22, %v1428_v39  ;;  %v1490_v1 = vadd.f32 %v1482_v55, %v1429_v9  ;;  %v1491_v60 = vadd.f32 %v1483_v4, %v1430_v38  ;;  %v1492_v28 = vadd.f32 %v1484_v61, %v1431_v45  ;;  %10680 = sst [smem:[#allocation23_spill]] %s6449_s22 }
 0x17b   :  { %v1493_v52 = vadd.f32 %v1485_v40, %v1432_v34  ;;  %v1494_v27 = vadd.f32 %v1486_v43, %v1433_v35  ;;  %v1495_v54 = vadd.f32 %v1487_v18, %v1434_v24  ;;  %v1496_v41 = vmul.f32 0.5, %v1488_v47  ;;  %10676 = sst [smem:[#allocation52_spill]] %s6436_s27 }
 0x17c   :  { %v1497_v3 = vmul.f32 0.5, %v1489_v57  ;;  %v1498_v10 = vmul.f32 0.5, %v1490_v1  ;;  %v1499_v51 = vmul.f32 0.5, %v1491_v60  ;;  %v1500_v49 = vmul.f32 0.5, %v1492_v28  ;;  %10678 = sst [smem:[#allocation51_spill]] %s6440_s25 }
 0x17d   :  { %v1501_v53 = vmul.f32 0.5, %v1493_v52  ;;  %v1502_v48 = vmul.f32 0.5, %v1494_v27  ;;  %v1329_v50 = vadd.f32 %v1328_v44, %v6281_v19  ;;  %v1367_v5 = vstv %s6266_s3  ;;  %10681 = sst [smem:[#allocation19_spill]] %s6452_s10 }
 0x17e   :  { %10677 = sst [smem:[#allocation50_spill]] %s6438_s12  ;;  %v1503_v11 = vmul.f32 0.5, %v1495_v54  ;;  %v1557_v12 = vrot.slane %v1342_v26, %v6264_v20  ;;  %v1380_v14 = vstv %s6268_s2  ;;  %v1504_v62 = vmax.f32 %v1496_v41, %v1500_v49  ;;  %s6459_s3 = sld [smem:[#allocation6 + $0xb0]] }
 0x17f   :  { %v1505_v7 = vmax.f32 %v1498_v10, %v1502_v48  ;;  %v1507_v23 = vmax.f32 %v1497_v3, %v1501_v53  ;;  %10682 = sst [smem:[#allocation59_spill]] %s6454_s21  ;;  %v1962_v44 = vstv %s6277_s16  ;;  %v1965_v29 = vstv %s6304_s8  ;;  %s6467_s2 = sld [smem:[#allocation6 + $0xb2]] }
 0x180   :  { %v1508_v19 = vmax.f32 %v1499_v51, %v1503_v11  ;;  %v1970_v8 = vstv %s6330_s20  ;;  %v1679_v0 = vrot.slane %v6376_v30, %v6264_v20  ;;  %v1975_v39 = vstv %s6349_s0  ;;  %10686 = sst [smem:[#allocation20_spill]] %s6469_s11  ;;  %s6475_s20 = sld [smem:[#allocation6 + $0xb4]] }
 0x181   :  { %v1506_v26 = vmax.f32 %v1504_v62, %v1505_v7  ;;  %v1983_v6 = vstv %s6279_s29  ;;  %v1355_v58 = vadd.f32 %v1354_v32, %v6334_v21  ;;  %v1558_v9 = vcombine.high %v1557_v12, %v1557_v12  ;;  %s6477_s8 = sld [smem:[#allocation6 + $0xb5]]  ;;  %s6479_s0 = sld [smem:[#allocation6 + $0xb6]] }
 0x182   :  { %v1509_v63 = vmax.f32 %v1507_v23, %v1508_v19  ;;  %v1732_v38 = vrot.slane %v1329_v50, %v6264_v20  ;;  %s6481_s29 = sld [smem:[#allocation6 + $0xb7]]  ;;  %10691 = sst [smem:[#allocation29_spill]] %s6483_s17  ;;  %v1680_v22 = vcombine.high %v1679_v0, %v1679_v0  ;;  %v1687_v55 = vrot.slane %v1679_v0, %v6264_v20 }
 0x183   :  { %v1510_v45 = vsub.f32 %v1496_v41, %v1506_v26  ;;  %v1512_v34 = vsub.f32 %v1498_v10, %v1506_v26  ;;  %v1514_v30 = vsub.f32 %v1500_v49, %v1506_v26  ;;  %v1516_v17 = vsub.f32 %v1502_v48, %v1506_v26  ;;  %s6486_s16 = sld [smem:[#allocation6 + $0xb9]]  ;;  %10693 = sst [smem:[#allocation54_spill]] %s6494_s30 }
 0x184   :  { %10683 = sst [smem:[#allocation45_spill]] %s6459_s3  ;;  %v1511_v2 = vsub.f32 %v1497_v3, %v1509_v63  ;;  %v1513_v56 = vsub.f32 %v1499_v51, %v1509_v63  ;;  %v1515_v35 = vsub.f32 %v1501_v53, %v1509_v63  ;;  %v1517_v21 = vsub.f32 %v1503_v11, %v1509_v63  ;;  %s6509_s17 = sld [smem:[#allocation6 + $0xbd]] }
 0x185   :  { %10685 = sst [smem:[#allocation55_spill]] %s6467_s2  ;;  %v1518_v32 = vmul.f32 1.442695, %v1510_v45  ;;  %v1522_v24 = vmul.f32 1.442695, %v1512_v34  ;;  %v6489_v4 = vadd.f32 %v1367_v5, %v6360_v31  ;;  %v6492_v61 = vadd.f32 %v1380_v14, %v6367_v13  ;;  %s6511_s30 = sld [smem:[#allocation6 + $0xbe]] }
 0x186   :  { %10687 = sst [smem:[#allocation56_spill]] %s6475_s20  ;;  %v1520_v40 = vmul.f32 1.442695, %v1511_v2  ;;  %v1524_v43 = vmul.f32 1.442695, %v1513_v56  ;;  %v6499_v47 = vrot.slane %v1557_v12, %v6264_v20  ;;  %v6502_v57 = vrot.slane %v1558_v9, %v6264_v20  ;;  %s10745_s11 = sld [smem:[#allocation65_spill]] }
 0x187   :  { %10688 = sst [smem:[#allocation16_spill]] %s6477_s8  ;;  %4785 = vpow2.f32 %v1518_v32  ;;  %v1526_v18 = vmul.f32 1.442695, %v1514_v30  ;;  %v1528_v31 = vmul.f32 1.442695, %v1515_v35  ;;  %v6507_v1 = vrot.slane %v1355_v58, %v6264_v20 }
 0x188   :  { %10689 = sst [smem:[#allocation15_spill]] %s6479_s0  ;;  %4787 = vpow2.f32 %v1520_v40  ;;  %v1530_v13 = vmul.f32 1.442695, %v1516_v17  ;;  %v1532_v60 = vmul.f32 1.442695, %v1517_v21  ;;  %v1694_v28 = vrot.slane %v1680_v22, %v6264_v20 }
 0x189   :  { %10690 = sst [smem:[#allocation25_spill]] %s6481_s29  ;;  %4789 = vpow2.f32 %v1522_v24  ;;  %v1695_v52 = vcombine.high %v1687_v55, %v1687_v55  ;;  %v1700_v27 = vrot.slane %v1687_v55, %v6315_v36  ;;  %v1733_v54 = vcombine.high %v1732_v38, %v1732_v38 }
 0x18a   :  { %10692 = sst [smem:[#allocation53_spill]] %s6486_s16  ;;  %s6504_s16 = sld [smem:[#allocation6 + $0xbc]]  ;;  %4791 = vpow2.f32 %v1524_v43  ;;  %v1740_v41 = vrot.slane %v1732_v38, %v6264_v20  ;;  %v1696_v3 = vcombine.high %v1694_v28, %v1694_v28  ;;  %v1704_v10 = vrot.slane %v1694_v28, %v6315_v36 }
 0x18b   :  { %10694 = sst [smem:[#allocation57_spill]] %s6496_s28  ;;  %s6514_s28 = sld [smem:[#allocation6 + $0xbf]]  ;;  %4793 = vpow2.f32 %v1526_v18  ;;  %v1708_v51 = vrot.slane %v1695_v52, %v6315_v36  ;;  %v1573_v49 = vcombine.high %v6499_v47, %v6499_v47  ;;  %v1619_v53 = vcombine.high %v6507_v1, %v6507_v1 }
 0x18c   :  { %10696 = sst [smem:[#allocation21_spill]] %s6509_s17  ;;  %4795 = vpow2.f32 %v1528_v31  ;;  %v1747_v48 = vrot.slane %v1733_v54, %v6264_v20  ;;  %v6541_v50 = vrot.slane %v6507_v1, %v6264_v20  ;;  %v1712_v5 = vrot.slane %v1696_v3, %v6315_v36 }
 0x18d   :  { %10697 = sst [smem:[#allocation27_spill]] %s6511_s30  ;;  %s6522_s17 = sld [smem:[#allocation6 + $0xc2]]  ;;  %4797 = vpow2.f32 %v1530_v13  ;;  %v1717_v11 = vmul.f32 %v1700_v27, %v6030_v59  ;;  %v1718_v12 = vmul.f32 %v1700_v27, %v6032_v33  ;;  %v1719_v14 = vmul.f32 %v1704_v10, %v6030_v59 }
 0x18e   :  { %10699 = sst [smem:[#allocation70_spill]] %s6516_s13  ;;  %s6526_s30 = sld [smem:[#allocation6 + $0xc3]]  ;;  %4799 = vpow2.f32 %v1532_v60  ;;  %v1748_v62 = vcombine.high %v1740_v41, %v1740_v41  ;;  %v1720_v7 = vmul.f32 %v1704_v10, %v6032_v33  ;;  %v1721_v23 = vmul.f32 %v1708_v51, %v6030_v59 }
 0x18f   :  { %v1749_v19 = vcombine.high %v1747_v48, %v1747_v48  ;;  %v1753_v26 = vrot.slane %v1740_v41, %v6315_v36  ;;  %v1722_v0 = vmul.f32 %v1708_v51, %v6032_v33  ;;  %v1723_v58 = vmul.f32 %v1712_v5, %v6030_v59  ;;  %10735 = sst [smem:[#allocation103_spill]] %s6737_s18 }
 0x190   :  { %10695 = sst [smem:[#allocation60_spill]] %s6504_s16  ;;  %v1757_v63 = vrot.slane %v1747_v48, %v6315_v36  ;;  %v1761_v9 = vrot.slane %v1748_v62, %v6315_v36  ;;  %v1724_v45 = vmul.f32 %v1712_v5, %v6032_v33  ;;  %v1634_v1 = vcombine.high %v6541_v50, %v6541_v50 }
 0x191   :  { %10698 = sst [smem:[#allocation69_spill]] %s6514_s28  ;;  %s6520_s16 = sld [smem:[#allocation6 + $0xc1]]  ;;  %v6566_v38 = vpop.eup %4785  ;;  %v1765_v34 = vrot.slane %v1749_v19, %v6315_v36  ;;  %v1770_v30 = vmul.f32 %v1753_v26, %v6296_v16  ;;  %v1771_v17 = vmul.f32 %v1753_v26, %v6345_v15 }
 0x192   :  { %s6528_s28 = sld [smem:[#allocation6 + $0xc4]]  ;;  %v6576_v2 = vpop.eup %4787  ;;  %v1772_v56 = vmul.f32 %v1757_v63, %v6296_v16  ;;  %v1773_v35 = vmul.f32 %v1757_v63, %v6345_v15  ;;  %v1774_v21 = vmul.f32 %v1761_v9, %v6296_v16  ;;  %v1775_v32 = vmul.f32 %v1761_v9, %v6345_v15 }
 0x193   :  { %10701 = sst [smem:[#allocation72_spill]] %s6522_s17  ;;  %s6535_s17 = sld [smem:[#allocation6 + $0xc5]]  ;;  %v6586_v24 = vpop.eup %4789  ;;  %v1776_v22 = vmul.f32 %v1765_v34, %v6296_v16  ;;  %v1777_v55 = vmul.f32 %v1765_v34, %v6345_v15  ;;  %v1778_v40 = vadd.f32 %v1770_v30, %v1717_v11  ;;  %v1779_v43 = vadd.f32 %v1771_v17, %v1718_v12 }
 0x194   :  { %10702 = sst [smem:[#allocation73_spill]] %s6526_s30  ;;  %s6545_s30 = sld [smem:[#allocation6 + $0xc7]]  ;;  %v6594_v18 = vpop.eup %4791  ;;  %v1534_v31 = vadd.f32 %v6586_v24, %v6566_v38  ;;  %v1780_v13 = vadd.f32 %v1772_v56, %v1719_v14  ;;  %v1781_v60 = vadd.f32 %v1773_v35, %v1720_v7  ;;  %v1782_v28 = vadd.f32 %v1774_v21, %v1721_v23 }
 0x195   :  { %v6602_v52 = vpop.eup %4793  ;;  %v1537_v27 = vadd.f32 %v6594_v18, %v6576_v2  ;;  %v1783_v54 = vadd.f32 %v1775_v32, %v1722_v0  ;;  %v1784_v41 = vadd.f32 %v1776_v22, %v1723_v58  ;;  %v1785_v3 = vadd.f32 %v1777_v55, %v1724_v45 }
 0x196   :  { %v6610_v10 = vpop.eup %4795  ;;  %v1535_v51 = vadd.f32 %v6602_v52, %v1534_v31  ;;  %v1786_v48 = vmul.f32 0.5, %v1778_v40  ;;  %v1787_v5 = vmul.f32 0.5, %v1779_v43  ;;  %v1788_v11 = vmul.f32 0.5, %v1780_v13 }
 0x197   :  { %10700 = sst [smem:[#allocation71_spill]] %s6520_s16  ;;  %s6537_s16 = sld [smem:[#allocation6 + $0xc6]]  ;;  %v6615_v12 = vpop.eup %4797  ;;  %v1538_v14 = vadd.f32 %v6610_v10, %v1537_v27  ;;  %v6620_v62 = vmul.f32 0.5, %v1781_v60  ;;  %v6622_v7 = vmul.f32 0.5, %v1782_v28  ;;  %v6624_v23 = vmul.f32 0.5, %v1783_v54 }
 0x198   :  { %10703 = sst [smem:[#allocation74_spill]] %s6528_s28  ;;  %s6547_s28 = sld [smem:[#allocation6 + $0xc8]]  ;;  %v6626_v19 = vpop.eup %4799  ;;  %v1536_v26 = vadd.f32 %v6615_v12, %v1535_v51  ;;  %v6631_v0 = vmul.f32 0.5, %v1784_v41  ;;  %v6633_v58 = vmul.f32 0.5, %v1785_v3  ;;  %v1847_v63 = vrot.slane %v6489_v4, %v6264_v20 }
 0x199   :  { %10704 = sst [smem:[#allocation75_spill]] %s6535_s17  ;;  %s6553_s17 = sld [smem:[#allocation6 + $0xca]]  ;;  %v1539_v9 = vadd.f32 %v6626_v19, %v1538_v14  ;;  %v1794_v45 = vmax.f32 %v1786_v48, %v6622_v7  ;;  %v1797_v34 = vmax.f32 %v1787_v5, %v6624_v23  ;;  %v1908_v30 = vrot.slane %v6492_v61, %v6264_v20 }
 0x19a   :  { %10706 = sst [smem:[#allocation77_spill]] %s6545_s30  ;;  %s6558_s30 = sld [smem:[#allocation6 + $0xcb]]  ;;  %4801 = vrcp.f32 %v1536_v26  ;;  %v1795_v4 = vmax.f32 %v1788_v11, %v6631_v0  ;;  %v1798_v17 = vmax.f32 %v6620_v62, %v6633_v58  ;;  %v1986_v56 = vstv %s6306_s23 }
 0x19b   :  { %4803 = vrcp.f32 %v1539_v9  ;;  %v1574_v61 = vcombine.high %v6502_v57, %v6502_v57  ;;  %v6662_v35 = vrot.slane %v6499_v47, %v6315_v36  ;;  %v1633_v21 = vrot.slane %v1619_v53, %v6264_v20  ;;  %s6806_s23 = sld [smem:[#allocation6 + $0xe3]] }
 0x19c   :  { %v6674_v32 = vrot.slane %v6502_v57, %v6315_v36  ;;  %v6680_v22 = vrot.slane %v1573_v49, %v6315_v36  ;;  %v1796_v55 = vmax.f32 %v1794_v45, %v1795_v4  ;;  %v6682_v40 = vmax.f32 %v1797_v34, %v1798_v17 }
 0x19d   :  { %10705 = sst [smem:[#allocation76_spill]] %s6537_s16  ;;  %s6551_s16 = sld [smem:[#allocation6 + $0xc9]]  ;;  %v1635_v57 = vcombine.high %v1633_v21, %v1633_v21  ;;  %v1848_v53 = vcombine.high %v1847_v63, %v1847_v63  ;;  %v1909_v43 = vcombine.high %v1908_v30, %v1908_v30  ;;  %v1590_v41 = vrot.slane %v1574_v61, %v6315_v36 }
 0x19e   :  { %10707 = sst [smem:[#allocation78_spill]] %s6547_s28  ;;  %s6560_s28 = sld [smem:[#allocation6 + $0xcc]]  ;;  %v1800_v47 = vsub.f32 %v1786_v48, %v1796_v55  ;;  %v1801_v49 = vsub.f32 %v1787_v5, %v6682_v40  ;;  %v1802_v31 = vsub.f32 %v1788_v11, %v1796_v55  ;;  %v1803_v13 = vsub.f32 %v6620_v62, %v6682_v40 }
 0x19f   :  { %10709 = sst [smem:[#allocation80_spill]] %s6553_s17  ;;  %s6568_s17 = sld [smem:[#allocation6 + $0xcd]]  ;;  %v1804_v60 = vsub.f32 %v6622_v7, %v1796_v55  ;;  %v1805_v28 = vsub.f32 %v6624_v23, %v6682_v40  ;;  %v1806_v27 = vsub.f32 %v6631_v0, %v1796_v55  ;;  %v1807_v54 = vsub.f32 %v6633_v58, %v6682_v40 }
 0x1a0   :  { %10710 = sst [smem:[#allocation81_spill]] %s6558_s30  ;;  %s6578_s30 = sld [smem:[#allocation6 + $0xcf]]  ;;  %v1808_v3 = vmul.f32 1.442695, %v1800_v47  ;;  %v1810_v51 = vmul.f32 1.442695, %v1801_v49  ;;  %v1639_v5 = vrot.slane %v6541_v50, %v6315_v36  ;;  %v1643_v11 = vrot.slane %v1633_v21, %v6315_v36 }
 0x1a1   :  { %v1812_v48 = vmul.f32 1.442695, %v1802_v31  ;;  %v1647_v14 = vrot.slane %v1634_v1, %v6315_v36  ;;  %v1651_v62 = vrot.slane %v1635_v57, %v6315_v36  ;;  %v6726_v7 = vrot.slane %v1847_v63, %v6264_v20  ;;  %10749 = sst [smem:[#allocation65_spill]] %s6806_s23 }
 0x1a2   :  { %4805 = vpow2.f32 %v1808_v3  ;;  %v6729_v50 = vrot.slane %v1848_v53, %v6264_v20  ;;  %v2004_v23 = vstv %s6289_s9  ;;  %v1814_v26 = vmul.f32 1.442695, %v1803_v13  ;;  %s6782_s9 = sld [smem:[#allocation6 + $0xe2]] }
 0x1a3   :  { %10708 = sst [smem:[#allocation79_spill]] %s6551_s16  ;;  %s6570_s16 = sld [smem:[#allocation6 + $0xce]]  ;;  %4807 = vpow2.f32 %v1810_v51  ;;  %v6740_v0 = vrot.slane %v1908_v30, %v6264_v20  ;;  %v6743_v63 = vrot.slane %v1909_v43, %v6264_v20  ;;  %v1816_v45 = vmul.f32 1.442695, %v1804_v60 }
 0x1a4   :  { %10711 = sst [smem:[#allocation82_spill]] %s6560_s28  ;;  %s6580_s28 = sld [smem:[#allocation6 + $0xd0]]  ;;  %v4802_v9 = vpop.eup %4801  ;;  %4809 = vpow2.f32 %v1812_v48  ;;  %v6747_v34 = vmul.f32 1.442695, %v1805_v28  ;;  %v6749_v4 = vmul.f32 1.442695, %v1806_v27 }
 0x1a5   :  { %10712 = sst [smem:[#allocation83_spill]] %s6568_s17  ;;  %s6590_s17 = sld [smem:[#allocation6 + $0xd2]]  ;;  %v4804_v17 = vpop.eup %4803  ;;  %v1542_v30 = vmul.f32 %v4802_v9, %v6566_v38  ;;  %v1544_v61 = vmul.f32 %v4802_v9, %v6586_v24  ;;  %v1546_v21 = vmul.f32 %v4802_v9, %v6602_v52  ;;  %v1548_v55 = vmul.f32 %v4802_v9, %v6615_v12 }
 0x1a6   :  { %10714 = sst [smem:[#allocation85_spill]] %s6578_s30  ;;  %s6598_s30 = sld [smem:[#allocation6 + $0xd4]]  ;;  %v1543_v1 = vmul.f32 %v4804_v17, %v6576_v2  ;;  %v1545_v57 = vmul.f32 %v4804_v17, %v6594_v18  ;;  %v1547_v38 = vmul.f32 %v4804_v17, %v6610_v10  ;;  %v1549_v53 = vmul.f32 %v4804_v17, %v6626_v19 }
 0x1a7   :  { %v1595_v24 = vmul.f32 %v6662_v35, %v1542_v30  ;;  %v1597_v52 = vmul.f32 %v6674_v32, %v1544_v61  ;;  %v1599_v2 = vmul.f32 %v6680_v22, %v1546_v21  ;;  %v1601_v18 = vmul.f32 %v1590_v41, %v1548_v55 }
 0x1a8   :  { %10740 = sst [smem:[#allocation104_spill]] %s6782_s9  ;;  %v1596_v10 = vmul.f32 %v6662_v35, %v1543_v1  ;;  %v1598_v12 = vmul.f32 %v6674_v32, %v1545_v57  ;;  %v1600_v19 = vmul.f32 %v6680_v22, %v1547_v38  ;;  %v1602_v43 = vmul.f32 %v1590_v41, %v1549_v53  ;;  %s10744_s9 = smul.f32 %s6477_s8, %s6388_s14 }
 0x1a9   :  { %10713 = sst [smem:[#allocation84_spill]] %s6570_s16  ;;  %s6588_s16 = sld [smem:[#allocation6 + $0xd1]]  ;;  %v1603_v47 = vadd.f32 %v1597_v52, %v1595_v24  ;;  %v1656_v49 = vmul.f32 %v1639_v5, %v1542_v30  ;;  %v1657_v31 = vmul.f32 %v1639_v5, %v1543_v1  ;;  %v1658_v13 = vmul.f32 %v1643_v11, %v1544_v61 }
 0x1aa   :  { %10715 = sst [smem:[#allocation86_spill]] %s6580_s28  ;;  %s6596_s28 = sld [smem:[#allocation6 + $0xd3]]  ;;  %v1606_v35 = vadd.f32 %v1598_v12, %v1596_v10  ;;  %v1659_v60 = vmul.f32 %v1643_v11, %v1545_v57  ;;  %v1660_v28 = vmul.f32 %v1647_v14, %v1546_v21  ;;  %v1661_v32 = vmul.f32 %v1647_v14, %v1547_v38 }
 0x1ab   :  { %10717 = sst [smem:[#allocation88_spill]] %s6590_s17  ;;  %s6604_s17 = sld [smem:[#allocation6 + $0xd5]]  ;;  %v1604_v22 = vadd.f32 %v1603_v47, %v1599_v2  ;;  %v1662_v27 = vmul.f32 %v1651_v62, %v1548_v55  ;;  %v1663_v41 = vmul.f32 %v1651_v62, %v1549_v53  ;;  %v1664_v3 = vadd.f32 %v1658_v13, %v1656_v49 }
 0x1ac   :  { %10719 = sst [smem:[#allocation90_spill]] %s6598_s30  ;;  %s6648_s30 = sld [smem:[#allocation6 + $0xdb]]  ;;  %v6804_v51 = vpop.eup %4805  ;;  %v1607_v48 = vadd.f32 %v1606_v35, %v1600_v19  ;;  %v1667_v5 = vadd.f32 %v1659_v60, %v1657_v31  ;;  %4811 = vpow2.f32 %v1814_v26  ;;  %v1822_v11 = vmul.f32 1.442695, %v1807_v54 }
 0x1ad   :  { %v6813_v14 = vpop.eup %4807  ;;  %v1605_v62 = vadd.f32 %v1604_v22, %v1601_v18  ;;  %v1665_v9 = vadd.f32 %v1664_v3, %v1660_v28  ;;  %4813 = vpow2.f32 %v1816_v45  ;;  %v2007_v17 = vstv %s10745_s11 }
 0x1ae   :  { %v6821_v26 = vpop.eup %4809  ;;  %v1608_v58 = vadd.f32 %v1607_v48, %v1602_v43  ;;  %v1668_v40 = vadd.f32 %v1667_v5, %v1661_v32  ;;  %4815 = vpow2.f32 %v6747_v34  ;;  %v1863_v60 = vcombine.high %v6726_v7, %v6726_v7 }
 0x1af   :  { %10716 = sst [smem:[#allocation87_spill]] %s6588_s16  ;;  %s6606_s16 = sld [smem:[#allocation6 + $0xd6]]  ;;  %v6831_v45 = vadd.f32 %v1605_v62, %v5963_v25  ;;  %v1666_v30 = vadd.f32 %v1665_v9, %v1662_v27  ;;  %4817 = vpow2.f32 %v6749_v4  ;;  %v1824_v34 = vadd.f32 %v6821_v26, %v6804_v51 }
 0x1b0   :  { %10718 = sst [smem:[#allocation89_spill]] %s6596_s28  ;;  %s6612_s28 = sld [smem:[#allocation6 + $0xd7]]  ;;  %v6842_v25 = vadd.f32 %v1608_v58, %v5966_v37  ;;  %v1669_v61 = vadd.f32 %v1668_v40, %v1663_v41  ;;  %4819 = vpow2.f32 %v1822_v11  ;;  %v1864_v28 = vcombine.high %v6729_v50, %v6729_v50 }
 0x1b1   :  { %10720 = sst [smem:[#allocation91_spill]] %s6604_s17  ;;  %s10732_s17 = smul.f32 %s6434_s15, %s6380_s4  ;;  %v6854_v21 = vadd.f32 %v1666_v30, %v5990_v46  ;;  %v1963_v37 = vmul.f32 %v1962_v44, %v6831_v45  ;;  %v1984_v55 = vmul.f32 %v1983_v6, %v6831_v45  ;;  %v2005_v1 = vmul.f32 %v2004_v23, %v6831_v45 }
 0x1b2   :  { %10726 = sst [smem:[#allocation97_spill]] %s6648_s30  ;;  %s6670_s30 = sld [smem:[#allocation6 + $0xdd]]  ;;  %v6874_v46 = vadd.f32 %v1669_v61, %v6024_v42  ;;  %v1964_v57 = vmul.f32 %v1962_v44, %v6842_v25  ;;  %v1985_v38 = vmul.f32 %v1983_v6, %v6842_v25  ;;  %v2006_v53 = vmul.f32 %v2004_v23, %v6842_v25 }
 0x1b3   :  { %s10747_s15 = smul.f32 %s6467_s2, %s6386_s5  ;;  %v1966_v42 = vmul.f32 %v1965_v29, %v6854_v21  ;;  %v1987_v44 = vmul.f32 %v1986_v56, %v6854_v21  ;;  %v2008_v24 = vmul.f32 %v2007_v17, %v6854_v21  ;;  %v1924_v41 = vcombine.high %v6740_v0, %v6740_v0 }
 0x1b4   :  { %v1967_v23 = vmul.f32 %v1965_v29, %v6874_v46  ;;  %v1988_v52 = vmul.f32 %v1986_v56, %v6874_v46  ;;  %v2009_v2 = vmul.f32 %v2007_v17, %v6874_v46  ;;  %v1925_v3 = vcombine.high %v6743_v63, %v6743_v63 }
 0x1b5   :  { %10721 = sst [smem:[#allocation92_spill]] %s6606_s16  ;;  %s6617_s16 = sld [smem:[#allocation6 + $0xd8]]  ;;  %v6919_v10 = vadd.f32 %v1966_v42, %v1963_v37  ;;  %v6921_v12 = vadd.f32 %v1987_v44, %v1984_v55  ;;  %v6923_v19 = vadd.f32 %v2008_v24, %v2005_v1  ;;  %v6997_v30 = vrot.slane %v6729_v50, %v6315_v36 }
 0x1b6   :  { %10722 = sst [smem:[#allocation93_spill]] %s6612_s28  ;;  %s6628_s28 = sld [smem:[#allocation6 + $0xd9]]  ;;  %v6931_v56 = vpop.eup %4811  ;;  %v6933_v43 = vadd.f32 %v1967_v23, %v1964_v57  ;;  %v6935_v47 = vadd.f32 %v1988_v52, %v1985_v38  ;;  %v6937_v49 = vadd.f32 %v2009_v2, %v2006_v53  ;;  %v7014_v50 = vrot.slane %v6740_v0, %v6315_v36 }
 0x1b7   :  { %v6945_v13 = vpop.eup %4813  ;;  %v1827_v35 = vadd.f32 %v6931_v56, %v6813_v14  ;;  %v7023_v37 = vrot.slane %v6743_v63, %v6315_v36  ;;  %v7026_v55 = vrot.slane %v1924_v41, %v6315_v36  ;;  %v7029_v0 = vrot.slane %v1925_v3, %v6315_v36 }
 0x1b8   :  { %10728 = sst [smem:[#allocation99_spill]] %s6670_s30  ;;  %s6692_s30 = sld [smem:[#allocation6 + $0xdf]]  ;;  %v6963_v22 = vpop.eup %4815  ;;  %v1825_v27 = vadd.f32 %v6945_v13, %v1824_v34 }
 0x1b9   :  { %v6977_v5 = vpop.eup %4817  ;;  %v1828_v11 = vadd.f32 %v6963_v22, %v1827_v35 }
 0x1ba   :  { %v6988_v58 = vpop.eup %4819  ;;  %v1826_v40 = vadd.f32 %v6977_v5, %v1825_v27 }
 0x1bb   :  { %10723 = sst [smem:[#allocation94_spill]] %s6617_s16  ;;  %s6639_s16 = sld [smem:[#allocation6 + $0xda]]  ;;  %v1829_v61 = vadd.f32 %v6988_v58, %v1828_v11 }
 0x1bc   :  { %10724 = sst [smem:[#allocation95_spill]] %s6628_s28  ;;  %s2071_s28 = smul.f32 %s6449_s22, %s6382_s1  ;;  %4821 = vrcp.f32 %v1826_v40 }
 0x1bd   :  { %4823 = vrcp.f32 %v1829_v61 }
 0x1be   :  { %10730 = sst [smem:[#allocation101_spill]] %s6692_s30  ;;  %s10734_s30 = smul.f32 %s6436_s27, %s6380_s4 }
 0x1c0   :  { %s2072_s22 = sadd.f32 %s2071_s28, %s10734_s30  ;;  %s10736_s30 = smul.f32 %s6459_s3, %s6386_s5 }
 0x1c1   :  { %10725 = sst [smem:[#allocation96_spill]] %s6639_s16  ;;  %s6656_s16 = sld [smem:[#allocation6 + $0xdc]] }
 0x1c2   :  { %s10737_s28 = smul.f32 %s6461_s6, %s6386_s5  ;;  %s10777_s6 = sld [smem:[#allocation25_spill]] }
 0x1c4   :  { %s2074_s24 = sadd.f32 %s10737_s28, %s2072_s22  ;;  %s10741_s22 = sld [smem:[#allocation26_spill]] }
 0x1c5   :  { %s10754_s28 = sld [smem:[#allocation50_spill]] }
 0x1c6   :  { %s2076_s29 = sadd.f32 %s10744_s9, %s2074_s24  ;;  %s10751_s9 = sld [smem:[#allocation53_spill]] }
 0x1c7   :  { %10727 = sst [smem:[#allocation98_spill]] %s6656_s16  ;;  %s6686_s16 = sld [smem:[#allocation6 + $0xde]] }
 0x1cc   :  { %s6826_s23 = sadd.f32 %s10751_s9, %s2076_s29  ;;  %s10762_s29 = smul.f32 %s6479_s0, %s6388_s14 }
 0x1cd   :  { %10729 = sst [smem:[#allocation100_spill]] %s6686_s16  ;;  %s6699_s16 = sld [smem:[#allocation6 + $0xe0]] }
 0x1ce   :  { %s10764_s9 = smul.f32 %s6440_s25, %s6380_s4  ;;  %s10789_s25 = sld [smem:[#allocation16_spill]] }
 0x1d3   :  { %10731 = sst [smem:[#allocation102_spill]] %s6699_s16  ;;  %s10733_s16 = smul.f32 %s6447_s19, %s6382_s1 }
 0x1d4   :  { %s10750_s19 = sld [smem:[#allocation30_spill]] }
 0x1d5   :  { %s2064_s13 = sadd.f32 %s10733_s16, %s10732_s17 }
 0x1d7   :  { %s2066_s17 = sadd.f32 %s10736_s30, %s2064_s13  ;;  %s10738_s13 = smul.f32 %s6438_s12, %s6380_s4 }
 0x1d8   :  { %s10739_s30 = smul.f32 %s6452_s10, %s6382_s1  ;;  %s10746_s10 = sld [smem:[#allocation29_spill]] }
 0x1d9   :  { %s10748_s12 = sld [smem:[#allocation23_spill]] }
 0x1da   :  { %s2080_s16 = sadd.f32 %s10739_s30, %s10738_s13  ;;  %s10742_s13 = sld [smem:[#allocation40_spill]]  ;;  %v2025_v54 = vstv %s10750_s19 }
 0x1db   :  { %s10743_s30 = smul.f32 %s6475_s20, %s6388_s14  ;;  %s10761_s20 = sld [smem:[#allocation19_spill]]  ;;  %v2026_v6 = vmul.f32 %v2025_v54, %v6831_v45  ;;  %v2027_v18 = vmul.f32 %v2025_v54, %v6842_v25  ;;  %v6993_v54 = vrot.slane %v6726_v7, %v6315_v36  ;;  %v7010_v7 = vrot.slane %v1864_v28, %v6315_v36 }
 0x1dc   :  { %s10765_s14 = smul.f32 %s6454_s21, %s6382_s1  ;;  %s10788_s21 = sld [smem:[#allocation28_spill]] }
 0x1dd   :  { %s2068_s18 = sadd.f32 %s10743_s30, %s2066_s17  ;;  %s10753_s30 = sld [smem:[#allocation34_spill]] }
 0x1de   :  { %s2082_s17 = sadd.f32 %s10747_s15, %s2080_s16  ;;  %s10783_s16 = sld [smem:[#allocation48_spill]] }
 0x1df   :  { %s6817_s15 = sadd.f32 %s10746_s10, %s2068_s18  ;;  %s10760_s10 = sld [smem:[#allocation49_spill]] }
 0x1e0   :  { %10756 = sst [smem:[#allocation34_spill]] %s6826_s23  ;;  %s10767_s18 = sld [smem:[#allocation54_spill]] }
 0x1e1   :  { %10752 = sst [smem:[#allocation30_spill]] %s6817_s15  ;;  %s10772_s8 = smul.f32 %s10748_s12, %s6395_s7 }
 0x1e2   :  { %s10759_s15 = sld [smem:[#allocation14_spill]]  ;;  %s2084_s19 = sadd.f32 %s10762_s29, %s2082_s17  ;;  %v2001_v34 = vstv %s10788_s21 }
 0x1e3   :  { %v2028_v4 = vstv %s10753_s30  ;;  %s2088_s17 = sadd.f32 %s10765_s14, %s10764_s9  ;;  %s10770_s9 = sld [smem:[#allocation20_spill]] }
 0x1e4   :  { %s10771_s29 = smul.f32 %s6436_s27, %s6393_s26  ;;  %v2029_v29 = vmul.f32 %v2028_v4, %v6854_v21  ;;  %v2030_v31 = vmul.f32 %v2028_v4, %v6874_v46  ;;  %s10787_s30 = sld [smem:[#allocation11_spill]]  ;;  %v1996_v17 = vstv %s10783_s16  ;;  %v7007_v4 = vrot.slane %v1863_v60, %v6315_v36 }
 0x1e5   :  { %s10769_s1 = smul.f32 %s10760_s10, %s6395_s7  ;;  %s10800_s21 = sld [smem:[#allocation38_spill]] }
 0x1e6   :  { %s6902_s24 = sadd.f32 %s10767_s18, %s2084_s19  ;;  %s10776_s23 = smul.f32 %s6459_s3, %s10741_s22  ;;  %v6953_v32 = vadd.f32 %v2029_v29, %v2026_v6  ;;  %v6970_v48 = vadd.f32 %v2030_v31, %v2027_v18  ;;  %v4822_v31 = vpop.eup %4821 }
 0x1e7   :  { %s10803_s16 = sld [smem:[#allocation39_spill]]  ;;  %s10805_s3 = sld [smem:[#allocation60_spill]]  ;;  %v4824_v3 = vpop.eup %4823  ;;  %v1832_v35 = vmul.f32 %v4822_v31, %v6804_v51  ;;  %v1834_v61 = vmul.f32 %v4822_v31, %v6821_v26  ;;  %v1836_v41 = vmul.f32 %v4822_v31, %v6945_v13  ;;  %v1838_v28 = vmul.f32 %v4822_v31, %v6977_v5 }
 0x1e8   :  { %s10768_s4 = smul.f32 %s10759_s15, %s6393_s26  ;;  %10773 = sst [smem:[#allocation61_spill]] %s6902_s24  ;;  %v1833_v11 = vmul.f32 %v4824_v3, %v6813_v14  ;;  %v1835_v51 = vmul.f32 %v4824_v3, %v6931_v56  ;;  %v1837_v26 = vmul.f32 %v4824_v3, %v6963_v22  ;;  %v1839_v27 = vmul.f32 %v4824_v3, %v6988_v58 }
 0x1e9   :  { %s10775_s11 = smul.f32 %s10770_s9, %s6386_s5  ;;  %s10778_s5 = sld [smem:[#allocation32_spill]]  ;;  %v1885_v13 = vmul.f32 %v6993_v54, %v1832_v35  ;;  %v1887_v14 = vmul.f32 %v6997_v30, %v1834_v61  ;;  %v1889_v5 = vmul.f32 %v7007_v4, %v1836_v41  ;;  %v1891_v56 = vmul.f32 %v7010_v7, %v1838_v28 }
 0x1ea   :  { %s2096_s14 = sadd.f32 %s10769_s1, %s10768_s4  ;;  %s10784_s24 = sld [smem:[#allocation56_spill]]  ;;  %v1886_v22 = vmul.f32 %v6993_v54, %v1833_v11  ;;  %v1888_v58 = vmul.f32 %v6997_v30, %v1835_v51  ;;  %v1890_v31 = vmul.f32 %v7007_v4, %v1837_v26  ;;  %v1892_v3 = vmul.f32 %v7010_v7, %v1839_v27 }
 0x1eb   :  { %s2104_s4 = sadd.f32 %s10772_s8, %s10771_s29  ;;  %s10774_s8 = sld [smem:[#allocation46_spill]]  ;;  %v2033_v38 = vstv %s10800_s21  ;;  %v1893_v52 = vadd.f32 %v1887_v14, %v1885_v13  ;;  %v1946_v40 = vmul.f32 %v7014_v50, %v1832_v35  ;;  %v1947_v60 = vmul.f32 %v7014_v50, %v1833_v11 }
 0x1ec   :  { %s2090_s29 = sadd.f32 %s10775_s11, %s2088_s17  ;;  %s10780_s11 = sld [smem:[#allocation66_spill]]  ;;  %v1948_v54 = vmul.f32 %v7023_v37, %v1834_v61  ;;  %v1896_v30 = vadd.f32 %v1888_v58, %v1886_v22  ;;  %v1949_v4 = vmul.f32 %v7023_v37, %v1835_v51  ;;  %v1950_v7 = vmul.f32 %v7026_v55, %v1836_v41 }
 0x1ed   :  { %s2098_s19 = sadd.f32 %s10776_s23, %s2096_s14  ;;  %s10781_s14 = sld [smem:[#allocation24_spill]]  ;;  %v2043_v42 = vstv %s10803_s16  ;;  %v2190_v44 = vstv %s10805_s3  ;;  %v1951_v13 = vmul.f32 %v7026_v55, %v1837_v26  ;;  %v1894_v50 = vadd.f32 %v1893_v52, %v1889_v5 }
 0x1ee   :  { %s10782_s23 = sld [smem:[#allocation37_spill]]  ;;  %s10806_s10 = sld [smem:[#allocation15_spill]]  ;;  %v1952_v35 = vmul.f32 %v7029_v0, %v1838_v28  ;;  %v1953_v11 = vmul.f32 %v7029_v0, %v1839_v27  ;;  %v1954_v37 = vadd.f32 %v1948_v54, %v1946_v40  ;;  %v1897_v55 = vadd.f32 %v1896_v30, %v1890_v31 }
 0x1ef   :  { %s10812_s15 = sld [smem:[#allocation51_spill]]  ;;  %v1957_v41 = vadd.f32 %v1949_v4, %v1947_v60  ;;  %v1895_v0 = vadd.f32 %v1894_v50, %v1891_v56 }
 0x1f0   :  { %s10858_s3 = sld [smem:[#allocation11_spill]]  ;;  %v1955_v27 = vadd.f32 %v1954_v37, %v1950_v7  ;;  %v1898_v61 = vadd.f32 %v1897_v55, %v1892_v3 }
 0x1f1   :  { %s10779_s17 = smul.f32 %s10774_s8, %s10741_s22  ;;  %v1958_v51 = vadd.f32 %v1957_v41, %v1951_v13  ;;  %v7224_v5 = vadd.f32 %v1895_v0, %v6030_v59 }
 0x1f2   :  { %v1956_v56 = vadd.f32 %v1955_v27, %v1952_v35  ;;  %v7240_v31 = vadd.f32 %v1898_v61, %v6032_v33 }
 0x1f3   :  { %s2106_s1 = sadd.f32 %s10779_s17, %s2104_s4  ;;  %s10785_s4 = smul.f32 %s10754_s28, %s6393_s26  ;;  %v1980_v62 = vstv %s10781_s14  ;;  %v1959_v59 = vadd.f32 %v1958_v51, %v1953_v11  ;;  %v1971_v33 = vmul.f32 %v1970_v8, %v7224_v5  ;;  %v2034_v61 = vmul.f32 %v2033_v38, %v7224_v5 }
 0x1f4   :  { %s10786_s17 = smul.f32 %s10761_s20, %s6395_s7  ;;  %v1991_v9 = vstv %s10782_s23  ;;  %s10799_s14 = sld [smem:[#allocation29_spill]]  ;;  %v7257_v30 = vadd.f32 %v1956_v56, %v6296_v16  ;;  %v1972_v13 = vmul.f32 %v1970_v8, %v7240_v31  ;;  %v2035_v51 = vmul.f32 %v2033_v38, %v7240_v31 }
 0x1f5   :  { %s10790_s20 = smul.f32 %s10777_s6, %s10778_s5  ;;  %s10796_s5 = sld [smem:[#allocation31_spill]]  ;;  %v1992_v4 = vmul.f32 %v1991_v9, %v7224_v5  ;;  %v7274_v16 = vadd.f32 %v1959_v59, %v6345_v15  ;;  %v1993_v50 = vmul.f32 %v1991_v9, %v7240_v31  ;;  %v1973_v11 = vadd.f32 %v1971_v33, %v6919_v10 }
 0x1f6   :  { %s2112_s9 = sadd.f32 %s10786_s17, %s10785_s4  ;;  %s10793_s7 = smul.f32 %s10784_s24, %s10742_s13  ;;  %v1976_v15 = vmul.f32 %v1975_v39, %v7257_v30  ;;  %v1997_v9 = vmul.f32 %v1996_v17, %v7257_v30  ;;  %v2037_v38 = vadd.f32 %v2035_v51, %v6970_v48 }
 0x1f7   :  { %s2092_s4 = sadd.f32 %s10790_s20, %s2090_s29  ;;  %s10794_s20 = sld [smem:[#allocation57_spill]]  ;;  %v1994_v8 = vadd.f32 %v1992_v4, %v6921_v12  ;;  %v1977_v10 = vmul.f32 %v1975_v39, %v7274_v16  ;;  %v1995_v37 = vadd.f32 %v1993_v50, %v6935_v47  ;;  %v1998_v12 = vmul.f32 %v1996_v17, %v7274_v16 }
 0x1f8   :  { %s2100_s26 = sadd.f32 %s10793_s7, %s2098_s19  ;;  %s10795_s29 = smul.f32 %s10789_s25, %s10742_s13  ;;  %v2036_v4 = vadd.f32 %v2034_v61, %v6953_v32 }
 0x1f9   :  { %s10797_s19 = sld [smem:[#allocation35_spill]]  ;;  %s10798_s17 = sld [smem:[#allocation42_spill]]  ;;  %v1999_v55 = vadd.f32 %v1997_v9, %v1994_v8  ;;  %v2000_v41 = vadd.f32 %v1998_v12, %v1995_v37 }
 0x1fa   :  { %s2108_s7 = sadd.f32 %s10795_s29, %s2106_s1  ;;  %s10801_s1 = smul.f32 %s6467_s2, %s10741_s22 }
 0x1fb   :  { %s10802_s29 = sld [smem:[#allocation22_spill]]  ;;  %s10804_s6 = sld [smem:[#allocation53_spill]]  ;;  %v2012_v63 = vstv %s10796_s5  ;;  %v2003_v56 = vadd.f32 %v2001_v34, %v2000_v41 }
 0x1fc   :  { %s2114_s0 = sadd.f32 %s10801_s1, %s2112_s9  ;;  %s10808_s1 = sld [smem:[#allocation70_spill]]  ;;  %v2013_v7 = vmul.f32 %v2012_v63, %v7224_v5  ;;  %v2014_v35 = vmul.f32 %v2012_v63, %v7240_v31  ;;  %v1974_v63 = vadd.f32 %v1972_v13, %v6933_v43  ;;  %v1978_v43 = vadd.f32 %v1976_v15, %v1973_v11 }
 0x1fd   :  { %s7032_s9 = sadd.f32 %s10794_s20, %s2092_s4  ;;  %s10809_s24 = sld [smem:[#allocation74_spill]]  ;;  %v2051_v11 = vmax.f32 %v2003_v56, 0.0 }
 0x1fe   :  { %s10810_s22 = sld [smem:[#allocation78_spill]]  ;;  %s10814_s20 = sld [smem:[#allocation59_spill]]  ;;  %v2015_v39 = vadd.f32 %v2013_v7, %v6923_v19  ;;  %v2016_v47 = vadd.f32 %v2014_v35, %v6937_v49  ;;  %v1979_v17 = vadd.f32 %v1977_v10, %v1974_v63  ;;  %v1981_v19 = vadd.f32 %v1980_v62, %v1978_v43 }
 0x1ff   :  { %10807 = sst [smem:[#allocation17_spill]] %s7032_s9  ;;  %v2017_v1 = vstv %s10797_s19  ;;  %s10813_s4 = sld [smem:[#allocation36_spill]]  ;;  %v2022_v57 = vstv %s10798_s17  ;;  %v2002_v49 = vadd.f32 %v2001_v34, %v1999_v55 }
 0x200   :  { %s10815_s9 = sld [smem:[#allocation33_spill]]  ;;  %s7040_s27 = sadd.f32 %s10799_s14, %s2100_s26  ;;  %v2018_v0 = vmul.f32 %v2017_v1, %v7257_v30  ;;  %v2019_v27 = vmul.f32 %v2017_v1, %v7274_v16  ;;  %v1982_v1 = vadd.f32 %v1980_v62, %v1979_v17  ;;  %v2046_v32 = vmax.f32 %v1981_v19, 0.0 }
 0x201   :  { %s10818_s5 = sld [smem:[#allocation21_spill]]  ;;  %s2135_s19 = smul.f32 %s10748_s12, %s10787_s30  ;;  %v2038_v53 = vstv %s10802_s29  ;;  %v2050_v35 = vmax.f32 %v2002_v49, 0.0 }
 0x202   :  { %10817 = sst [smem:[#allocation63_spill]] %s7040_s27  ;;  %s10819_s17 = sld [smem:[#allocation71_spill]]  ;;  %v2193_v24 = vstv %s10808_s1  ;;  %v2020_v59 = vadd.f32 %v2018_v0, %v2015_v39  ;;  %v2021_v33 = vadd.f32 %v2019_v27, %v2016_v47  ;;  %v2039_v7 = vmul.f32 %v2038_v53, %v7257_v30 }
 0x203   :  { %s10820_s14 = sld [smem:[#allocation75_spill]]  ;;  %s10822_s27 = sld [smem:[#allocation14_spill]]  ;;  %v2198_v6 = vstv %s10809_s24  ;;  %v2040_v62 = vmul.f32 %v2038_v53, %v7274_v16  ;;  %v2047_v50 = vmax.f32 %v1982_v1, 0.0 }
 0x204   :  { %s10823_s12 = sld [smem:[#allocation49_spill]]  ;;  %s7048_s21 = sadd.f32 %s10804_s6, %s2108_s7  ;;  %v2203_v23 = vstv %s10810_s22  ;;  %v2023_v34 = vadd.f32 %v2022_v57, %v2020_v59  ;;  %v2024_v13 = vadd.f32 %v2022_v57, %v2021_v33  ;;  %v2041_v48 = vadd.f32 %v2039_v7, %v2036_v4 }
 0x205   :  { %s10827_s7 = smul.f32 %s10806_s10, %s10742_s13  ;;  %s10831_s10 = sld [smem:[#allocation52_spill]]  ;;  %v2042_v53 = vadd.f32 %v2040_v62, %v2037_v38  ;;  %v7381_v57 = vadd.f32 %v2046_v32, %v6831_v45  ;;  %v7384_v15 = vadd.f32 %v2047_v50, %v6842_v25  ;;  %v7395_v45 = vadd.f32 %v2050_v35, %v6854_v21 }
 0x206   :  { %10824 = sst [smem:[#allocation64_spill]] %s7048_s21  ;;  %s10832_s13 = sld [smem:[#allocation18_spill]]  ;;  %v2054_v8 = vmax.f32 %v2023_v34, 0.0  ;;  %v2055_v9 = vmax.f32 %v2024_v13, 0.0  ;;  %v2044_v63 = vadd.f32 %v2043_v42, %v2041_v48  ;;  %v7398_v25 = vadd.f32 %v2051_v11, %v6874_v46 }
 0x207   :  { %s2116_s8 = sadd.f32 %s10827_s7, %s2114_s0  ;;  %s10835_s18 = smul.f32 %s10812_s15, %s10813_s4  ;;  %v2211_v2 = vstv %s10818_s5  ;;  %v2045_v10 = vadd.f32 %v2043_v42, %v2042_v53  ;;  %v2191_v21 = vmul.f32 %v2190_v44, %v7381_v57  ;;  %v2192_v46 = vmul.f32 %v2190_v44, %v7384_v15 }
 0x208   :  { %s10836_s25 = smul.f32 %s10814_s20, %s10815_s9  ;;  %s10840_s4 = sld [smem:[#allocation54_spill]]  ;;  %v2214_v18 = vstv %s10819_s17  ;;  %10976 = vst [vmem:[#allocation105_spill] sm:$0xff] %v7398_v25  ;;  %v7405_v37 = vadd.f32 %v2054_v8, %v7224_v5  ;;  %v7408_v12 = vadd.f32 %v2055_v9, %v7240_v31  ;;  %v2058_v42 = vmax.f32 %v2044_v63, 0.0 }
 0x209   :  { %v2219_v29 = vstv %s10820_s14  ;;  %s10849_s26 = sld [smem:[#allocation20_spill]]  ;;  %s10857_s28 = sld [smem:[#allocation45_spill]]  ;;  %v2059_v5 = vmax.f32 %v2045_v10, 0.0  ;;  %v2194_v31 = vmul.f32 %v2193_v24, %v7395_v45  ;;  %v2195_v43 = vmul.f32 %v2193_v24, %v7398_v25 }
 0x20a   :  { %s2120_s1 = sadd.f32 %s10836_s25, %s10835_s18  ;;  %s10844_s18 = smul.f32 %s10822_s27, %s10780_s11  ;;  %10978 = vst [vmem:[#allocation106_spill] sm:$0xff] %v7405_v37  ;;  %10979 = vst [vmem:[#allocation107_spill] sm:$0xff] %v7408_v12  ;;  %v7442_v24 = vadd.f32 %v2058_v42, %v7257_v30  ;;  %v2200_v19 = vmul.f32 %v2198_v6, %v7408_v12  ;;  %v2212_v49 = vmul.f32 %v2211_v2, %v7381_v57 }
 0x20b   :  { %s10845_s25 = smul.f32 %s10823_s12, %s10787_s30  ;;  %s10850_s27 = sld [smem:[#allocation26_spill]]  ;;  %v7445_v17 = vadd.f32 %v2059_v5, %v7274_v16  ;;  %v2196_v30 = vadd.f32 %v2194_v31, %v2191_v21  ;;  %v2197_v27 = vadd.f32 %v2195_v43, %v2192_v46  ;;  %v2199_v16 = vmul.f32 %v2198_v6, %v7405_v37 }
 0x20c   :  { %s10851_s12 = sld [smem:[#allocation51_spill]]  ;;  %s10865_s24 = sld [smem:[#allocation46_spill]]  ;;  %10987 = vst [vmem:[#allocation108_spill] sm:$0xff] %v7442_v24  ;;  %v2213_v61 = vmul.f32 %v2211_v2, %v7384_v15  ;;  %v2215_v51 = vmul.f32 %v2214_v18, %v7395_v45  ;;  %v2216_v1 = vmul.f32 %v2214_v18, %v7398_v25  ;;  %v2204_v34 = vmul.f32 %v2203_v23, %v7442_v24 }
 0x20d   :  { %s2128_s23 = sadd.f32 %s10845_s25, %s10844_s18  ;;  %s10853_s25 = smul.f32 %s10831_s10, %s10780_s11  ;;  %v2201_v18 = vadd.f32 %v2199_v16, %v2196_v30  ;;  %v2202_v62 = vadd.f32 %v2200_v19, %v2197_v27  ;;  %v2205_v13 = vmul.f32 %v2203_v23, %v7445_v17  ;;  %v2220_v48 = vmul.f32 %v2219_v29, %v7405_v37 }
 0x20e   :  { %s10859_s10 = sld [smem:[#allocation59_spill]]  ;;  %s7096_s0 = sadd.f32 %s10840_s4, %s2116_s8  ;;  %v2217_v32 = vadd.f32 %v2215_v51, %v2212_v49  ;;  %v2218_v50 = vadd.f32 %v2216_v1, %v2213_v61  ;;  %v2221_v53 = vmul.f32 %v2219_v29, %v7408_v12 }
 0x20f   :  { %s2136_s17 = sadd.f32 %s2135_s19, %s10853_s25  ;;  %s10871_s20 = smul.f32 %s10857_s28, %s10832_s13  ;;  %v2206_v30 = vadd.f32 %v2204_v34, %v2201_v18  ;;  %v2207_v27 = vadd.f32 %v2205_v13, %v2202_v62 }
 0x210   :  { %10862 = sst [smem:[#allocation58_spill]] %s7096_s0  ;;  %s10880_s21 = sld [smem:[#allocation56_spill]]  ;;  %v2222_v51 = vadd.f32 %v2220_v48, %v2217_v32  ;;  %v2223_v1 = vadd.f32 %v2221_v53, %v2218_v50 }
 0x211   :  { %s10866_s2 = smul.f32 %s10849_s26, %s10850_s27  ;;  %s7118_s22 = sadd.f32 %s10871_s20, %s2128_s23 }
 0x212   :  { %s10872_s14 = sld [smem:[#allocation50_spill]]  ;;  %s10873_s27 = sld [smem:[#allocation19_spill]] }
 0x213   :  { %s7107_s8 = sadd.f32 %s10866_s2, %s2120_s1  ;;  %s10874_s2 = sld [smem:[#allocation43_spill]] }
 0x214   :  { %s10875_s1 = sld [smem:[#allocation25_spill]]  ;;  %s10876_s7 = smul.f32 %s10865_s24, %s10832_s13 }
 0x215   :  { %s10877_s23 = sld [smem:[#allocation40_spill]]  ;;  %s10878_s20 = sld [smem:[#allocation47_spill]] }
 0x216   :  { %s7129_s18 = sadd.f32 %s10876_s7, %s2136_s17  ;;  %s10881_s17 = sld [smem:[#allocation12_spill]] }
 0x217   :  { %s10885_s15 = sld [smem:[#allocation16_spill]]  ;;  %s10898_s7 = sld [smem:[#allocation100_spill]] }
 0x218   :  { %s10883_s30 = smul.f32 %s10872_s14, %s10780_s11  ;;  %s10897_s14 = sld [smem:[#allocation53_spill]] }
 0x219   :  { %s10884_s4 = smul.f32 %s10873_s27, %s10858_s3  ;;  %s10894_s27 = sld [smem:[#allocation29_spill]] }
 0x21a   :  { %s10890_s0 = smul.f32 %s10880_s21, %s10874_s2  ;;  %s10903_s9 = sld [smem:[#allocation44_spill]] }
 0x21b   :  { %s2144_s29 = sadd.f32 %s10884_s4, %s10883_s30  ;;  %s10887_s6 = smul.f32 %s10875_s1, %s10877_s23 }
 0x21c   :  { %s10888_s30 = sld [smem:[#allocation55_spill]]  ;;  %s2132_s16 = sadd.f32 %s10890_s0, %s7118_s22 }
 0x21d   :  { %s2124_s25 = sadd.f32 %s10887_s6, %s7107_s8  ;;  %s10891_s6 = sld [smem:[#allocation57_spill]]  ;;  %v2329_v52 = vstv %s10898_s7 }
 0x21e   :  { %s10892_s8 = sld [smem:[#allocation30_spill]]  ;;  %s10893_s23 = smul.f32 %s10885_s15, %s10874_s2 }
 0x21f   :  { %s10902_s1 = sld [smem:[#allocation15_spill]]  ;;  %s7197_s24 = sadd.f32 %s10894_s27, %s2132_s16 }
 0x220   :  { %s2140_s19 = sadd.f32 %s10893_s23, %s7129_s18  ;;  %s10900_s18 = sld [smem:[#allocation61_spill]] }
 0x221   :  { %10906 = sst [smem:[#allocation66_spill]] %s7197_s24  ;;  %s10908_s15 = sld [smem:[#allocation97_spill]] }
 0x222   :  { %s10896_s0 = smul.f32 %s10888_s30, %s10832_s13  ;;  %s7201_s30 = sadd.f32 %s10897_s14, %s2140_s19 }
 0x223   :  { %s7191_s23 = sadd.f32 %s10891_s6, %s2124_s25  ;;  %s10911_s13 = sld [smem:[#allocation14_spill]] }
 0x224   :  { %s2146_s26 = sadd.f32 %s10896_s0, %s2144_s29  ;;  %s10904_s29 = sld [smem:[#allocation89_spill]] }
 0x225   :  { %10901 = sst [smem:[#allocation32_spill]] %s7191_s23  ;;  %s10905_s0 = sld [smem:[#allocation93_spill]] }
 0x226   :  { %s10907_s23 = sld [smem:[#allocation13_spill]]  ;;  %10910 = sst [smem:[#allocation36_spill]] %s7201_s30 }
 0x227   :  { %s10912_s4 = sld [smem:[#allocation49_spill]]  ;;  %s2413_s16 = smul.f32 0.5, %s10900_s18  ;;  %v2345_v26 = vstv %s10908_s15 }
 0x228   :  { %s10913_s24 = sld [smem:[#allocation46_spill]]  ;;  %s10915_s25 = smul.f32 %s10902_s1, %s10874_s2 }
 0x229   :  { %s10916_s19 = sld [smem:[#allocation52_spill]]  ;;  %s10917_s30 = sld [smem:[#allocation23_spill]]  ;;  %v7254_v54 = vstv %s2413_s16 }
 0x22a   :  { %s2148_s22 = sadd.f32 %s10915_s25, %s2146_s26  ;;  %v2337_v60 = vstv %s10904_s29  ;;  %s10918_s5 = sld [smem:[#allocation50_spill]] }
 0x22b   :  { %v2340_v40 = vstv %s10905_s0  ;;  %s10919_s7 = sld [smem:[#allocation34_spill]]  ;;  %s10920_s18 = smul.f32 %s10851_s12, %s10780_s11 }
 0x22c   :  { %s10921_s1 = smul.f32 %s10859_s10, %s10858_s3  ;;  %s10925_s28 = sld [smem:[#allocation54_spill]] }
 0x22d   :  { %s10926_s0 = smul.f32 %s10911_s13, %s10878_s20  ;;  %s10928_s12 = sld [smem:[#allocation19_spill]] }
 0x22e   :  { %s2152_s2 = sadd.f32 %s10921_s1, %s10920_s18  ;;  %s10927_s11 = smul.f32 %s10912_s4, %s10881_s17 }
 0x22f   :  { %s10929_s1 = smul.f32 0.5, %s10892_s8  ;;  %s10930_s18 = sld [smem:[#allocation20_spill]] }
 0x230   :  { %s2160_s3 = sadd.f32 %s10927_s11, %s10926_s0  ;;  %s10931_s25 = sld [smem:[#allocation18_spill]] }
 0x231   :  { %v7237_v58 = vstv %s10929_s1  ;;  %s10932_s6 = smul.f32 %s10916_s19, %s10878_s20  ;;  %s10934_s4 = sld [smem:[#allocation16_spill]] }
 0x232   :  { %s10933_s13 = smul.f32 %s10917_s30, %s10881_s17  ;;  %s10938_s27 = sld [smem:[#allocation45_spill]] }
 0x233   :  { %s10935_s11 = smul.f32 0.5, %s10919_s7  ;;  %s10939_s30 = sld [smem:[#allocation55_spill]] }
 0x234   :  { %s2168_s15 = sadd.f32 %s10933_s13, %s10932_s6  ;;  %s2175_s16 = smul.f32 %s10928_s12, %s10881_s17 }
 0x235   :  { %v7252_v3 = vstv %s10935_s11  ;;  %s7269_s6 = sadd.f32 %s10925_s28, %s2148_s22  ;;  %s10941_s19 = sld [smem:[#allocation15_spill]] }
 0x236   :  { %s10942_s22 = smul.f32 %s10930_s18, %s10931_s25  ;;  %s10943_s26 = sld [smem:[#allocation51_spill]] }
 0x237   :  { %10940 = sst [smem:[#allocation33_spill]] %s7269_s6  ;;  %s10948_s12 = sld [smem:[#allocation59_spill]] }
 0x238   :  { %s2154_s13 = sadd.f32 %s10942_s22, %s2152_s2  ;;  %s10944_s14 = smul.f32 %s10938_s27, %s10903_s9 }
 0x239   :  { %s10946_s2 = sld [smem:[#allocation25_spill]]  ;;  %s10947_s22 = sld [smem:[#allocation43_spill]] }
 0x23a   :  { %s2162_s29 = sadd.f32 %s10944_s14, %s2160_s3  ;;  %s10950_s27 = smul.f32 %s10913_s24, %s10903_s9 }
 0x23b   :  { %s10953_s10 = sld [smem:[#allocation17_spill]]  ;;  %s10954_s8 = smul.f32 %s10918_s5, %s10878_s20 }
 0x23c   :  { %s2170_s14 = sadd.f32 %s10950_s27, %s2168_s15  ;;  %s10955_s15 = sld [smem:[#allocation63_spill]] }
 0x23d   :  { %s2176_s1 = sadd.f32 %s2175_s16, %s10954_s8  ;;  %s10958_s5 = sld [smem:[#allocation64_spill]] }
 0x23e   :  { %s10960_s16 = smul.f32 %s10880_s21, %s10907_s23  ;;  %s10964_s25 = sld [smem:[#allocation29_spill]] }
 0x23f   :  { %s10956_s24 = smul.f32 %s10946_s2, %s10947_s22  ;;  %s10961_s22 = sld [smem:[#allocation57_spill]] }
 0x240   :  { %s10963_s28 = smul.f32 %s10934_s4, %s10907_s23  ;;  %s10965_s21 = sld [smem:[#allocation32_spill]] }
 0x241   :  { %s2156_s27 = sadd.f32 %s10956_s24, %s2154_s13  ;;  %s2417_s11 = smul.f32 0.5, %s10953_s10 }
 0x242   :  { %s2164_s13 = sadd.f32 %s10960_s16, %s2162_s29  ;;  %s10962_s24 = sld [smem:[#allocation58_spill]] }
 0x243   :  { %s2172_s18 = sadd.f32 %s10963_s28, %s2170_s14  ;;  %s10966_s0 = smul.f32 %s10939_s30, %s10903_s9  ;;  %v7426_v44 = vstv %s2417_s11 }
 0x244   :  { %s2472_s3 = smul.f32 0.5, %s10958_s5  ;;  %s10967_s28 = sld [smem:[#allocation53_spill]] }
 0x245   :  { %s2178_s29 = sadd.f32 %s10966_s0, %s2176_s1  ;;  %s10968_s4 = sld [smem:[#allocation66_spill]] }
 0x246   :  { %s7373_s16 = sadd.f32 %s10961_s22, %s2156_s27  ;;  %s10971_s7 = sld [smem:[#allocation36_spill]]  ;;  %v7434_v39 = vstv %s2472_s3 }
 0x247   :  { %s7377_s30 = sadd.f32 %s10964_s25, %s2164_s13  ;;  %s10977_s13 = smul.f32 %s10941_s19, %s10907_s23 }
 0x248   :  { %10970 = sst [smem:[#allocation26_spill]] %s7373_s16  ;;  %s2633_s14 = smul.f32 0.5, %s7269_s6 }
 0x249   :  { %10972 = sst [smem:[#allocation11_spill]] %s7377_s30  ;;  %s10981_s19 = sld [smem:[#allocation20_spill]] }
 0x24a   :  { %s7387_s0 = sadd.f32 %s10967_s28, %s2172_s18  ;;  %s10980_s28 = sld [smem:[#allocation54_spill]]  ;;  %v7487_v59 = vstv %s2633_s14 }
 0x24b   :  { %s2578_s2 = smul.f32 0.5, %s10968_s4  ;;  %s2180_s18 = sadd.f32 %s10977_s13, %s2178_s29 }
 0x24c   :  { %10975 = sst [smem:[#allocation40_spill]] %s7387_s0  ;;  %s2637_s29 = smul.f32 0.5, %s7373_s16 }
 0x24d   :  { %s10983_s13 = smul.f32 0.5, %s10955_s15  ;;  %v7454_v0 = vstv %s2578_s2  ;;  %s10990_s3 = sld [smem:[#allocation30_spill]] }
 0x24e   :  { %s10985_s8 = smul.f32 0.5, %s10962_s24  ;;  %s10994_s5 = sld [smem:[#allocation61_spill]]  ;;  %v7489_v6 = vstv %s2637_s29 }
 0x24f   :  { %v7430_v55 = vstv %s10983_s13  ;;  %s2688_s27 = smul.f32 0.5, %s7377_s30  ;;  %s10993_s30 = sld [smem:[#allocation34_spill]] }
 0x250   :  { %v7438_v47 = vstv %s10985_s8  ;;  %s7448_s11 = sadd.f32 %s10980_s28, %s2180_s18  ;;  %s10989_s13 = smul.f32 0.5, %s10965_s21 }
 0x251   :  { %s2692_s8 = smul.f32 0.5, %s7387_s0  ;;  %s10995_s18 = sld [smem:[#allocation25_spill]]  ;;  %v7491_v33 = vstv %s2688_s27 }
 0x252   :  { %10988 = sst [smem:[#allocation47_spill]] %s7448_s11  ;;  %v7452_v41 = vstv %s10989_s13  ;;  %s10991_s16 = smul.f32 %s10943_s26, %s10878_s20 }
 0x253   :  { %s10992_s4 = smul.f32 %s10948_s12, %s10881_s17  ;;  %s10999_s12 = sld [smem:[#allocation27_spill]]  ;;  %v7496_v7 = vstv %s2692_s8 }
 0x254   :  { %s2185_s15 = smul.f32 %s10981_s19, %s10903_s9  ;;  %s11000_s26 = sld [smem:[#allocation72_spill]] }
 0x255   :  { %s2184_s24 = sadd.f32 %s10992_s4, %s10991_s16  ;;  %s10997_s20 = smul.f32 0.5, %s10971_s7 }
 0x256   :  { %s11001_s6 = sld [smem:[#allocation79_spill]]  ;;  %s2743_s2 = smul.f32 0.5, %s7448_s11 }
 0x257   :  { %v7485_v56 = vstv %s10997_s20  ;;  %s2186_s4 = sadd.f32 %s2185_s15, %s2184_s24  ;;  %s2187_s16 = smul.f32 %s10995_s18, %s10907_s23 }
 0x258   :  { %s11002_s25 = sld [smem:[#allocation69_spill]]  ;;  %s11004_s23 = sld [smem:[#allocation73_spill]]  ;;  %v7532_v43 = vstv %s2743_s2 }
 0x259   :  { %v11003_v35 = vstv %s10999_s12  ;;  %s11009_s15 = sld [smem:[#allocation76_spill]]  ;;  %s11011_s24 = sld [smem:[#allocation77_spill]] }
 0x25a   :  { %v2233_v11 = vmul.f32 %v11003_v35, %v7381_v57  ;;  %v11005_v8 = vmov %v11003_v35  ;;  %v11006_v23 = vstv %s11000_s26  ;;  %s11012_s28 = sld [smem:[#allocation86_spill]]  ;;  %s2188_s14 = sadd.f32 %s2187_s16, %s2186_s4 }
 0x25b   :  { %v2234_v9 = vmul.f32 %v11005_v8, %v7384_v15  ;;  %v2236_v63 = vmul.f32 %v11006_v23, %v7395_v45  ;;  %v11007_v10 = vmov %v11006_v23  ;;  %s11015_s19 = sld [smem:[#allocation90_spill]]  ;;  %s11017_s29 = sld [smem:[#allocation80_spill]] }
 0x25c   :  { %v2237_v21 = vmul.f32 %v11007_v10, %v7398_v25  ;;  %v11008_v46 = vstv %s11001_s6  ;;  %s11019_s1 = sld [smem:[#allocation94_spill]]  ;;  %s11025_s27 = sld [smem:[#allocation81_spill]] }
 0x25d   :  { %v2225_v42 = vmul.f32 %v11008_v46, %v7442_v24  ;;  %v11010_v29 = vmov %v11008_v46  ;;  %v2238_v62 = vadd.f32 %v2236_v63, %v2233_v11  ;;  %s11027_s13 = sld [smem:[#allocation87_spill]]  ;;  %s7565_s8 = sadd.f32 %s10961_s22, %s2188_s14 }
 0x25e   :  { %v2226_v5 = vmul.f32 %v11010_v29, %v7445_v17  ;;  %v11013_v16 = vstv %s11002_s25  ;;  %v11016_v35 = vstv %s11004_s23  ;;  %v2239_v34 = vadd.f32 %v2237_v21, %v2234_v9  ;;  %s11030_s18 = sld [smem:[#allocation91_spill]]  ;;  %s11035_s22 = sld [smem:[#allocation98_spill]] }
 0x25f   :  { %v2254_v19 = vmul.f32 %v11013_v16, %v7381_v57  ;;  %v11014_v49 = vmov %v11013_v16  ;;  %v2257_v8 = vmul.f32 %v11016_v35, %v7395_v45  ;;  %v11018_v23 = vmov %v11016_v35  ;;  %s11037_s9 = sld [smem:[#allocation95_spill]]  ;;  %s11042_s20 = sld [smem:[#allocation82_spill]] }
 0x260   :  { %v2255_v61 = vmul.f32 %v11014_v49, %v7384_v15  ;;  %v2258_v18 = vmul.f32 %v11018_v23, %v7398_v25  ;;  %v11020_v13 = vstv %s11009_s15  ;;  %v11022_v50 = vstv %s11011_s24  ;;  %s11044_s17 = sld [smem:[#allocation63_spill]]  ;;  %s2747_s12 = smul.f32 0.5, %s7565_s8 }
 0x261   :  { %v2241_v10 = vmul.f32 %v11020_v13, %v7405_v37  ;;  %v11021_v46 = vmov %v11020_v13  ;;  %v2262_v48 = vmul.f32 %v11022_v50, %v7405_v37  ;;  %v11023_v53 = vmov %v11022_v50  ;;  %s11049_s26 = sld [smem:[#allocation99_spill]]  ;;  %s11051_s2 = sld [smem:[#allocation84_spill]] }
 0x262   :  { %v2242_v32 = vmul.f32 %v11021_v46, %v7408_v12  ;;  %v2263_v29 = vmul.f32 %v11023_v53, %v7408_v12  ;;  %v11024_v16 = vstv %s11012_s28  ;;  %v2259_v63 = vadd.f32 %v2257_v8, %v2254_v19  ;;  %s11050_s6 = sld [smem:[#allocation83_spill]]  ;;  %s11054_s4 = sld [smem:[#allocation88_spill]] }
 0x263   :  { %v2275_v49 = vmul.f32 %v11024_v16, %v7381_v57  ;;  %v11026_v11 = vmov %v11024_v16  ;;  %v2260_v21 = vadd.f32 %v2258_v18, %v2255_v61  ;;  %v11028_v35 = vstv %s11015_s19  ;;  %s11055_s16 = sld [smem:[#allocation92_spill]]  ;;  %s11056_s25 = sld [smem:[#allocation85_spill]] }
 0x264   :  { %v2276_v9 = vmul.f32 %v11026_v11, %v7384_v15  ;;  %v2278_v23 = vmul.f32 %v11028_v35, %v7395_v45  ;;  %v11029_v13 = vmov %v11028_v35  ;;  %v11031_v50 = vstv %s11017_s29  ;;  %s11057_s23 = sld [smem:[#allocation102_spill]]  ;;  %s11060_s15 = sld [smem:[#allocation96_spill]] }
 0x265   :  { %v2279_v46 = vmul.f32 %v11029_v13, %v7398_v25  ;;  %v2246_v53 = vmul.f32 %v11031_v50, %v7442_v24  ;;  %v11032_v16 = vmov %v11031_v50  ;;  %v11033_v31 = vstv %s11019_s1  ;;  %s11075_s14 = sld [smem:[#allocation103_spill]]  ;;  %s11081_s1 = sld [smem:[#allocation101_spill]] }
 0x266   :  { %v2247_v11 = vmul.f32 %v11032_v16, %v7445_v17  ;;  %v2283_v38 = vmul.f32 %v11033_v31, %v7405_v37  ;;  %v11034_v19 = vmov %v11033_v31  ;;  %v2243_v8 = vadd.f32 %v2241_v10, %v2238_v62  ;;  %s7944_s24 = sld [smem:[#allocation6 + $0xe6]]  ;;  %s7946_s28 = sld [smem:[#allocation6 + $0xed]] }
 0x267   :  { %v2284_v61 = vmul.f32 %v11034_v19, %v7408_v12  ;;  %v2244_v18 = vadd.f32 %v2242_v32, %v2239_v34  ;;  %v2280_v35 = vadd.f32 %v2278_v23, %v2275_v49  ;;  %v2281_v13 = vadd.f32 %v2279_v46, %v2276_v9  ;;  %s7954_s19 = sld [smem:[#allocation6 + $0xf5]]  ;;  %s7959_s29 = sld [smem:[#allocation6 + $0xea]] }
 0x268   :  { %v11036_v4 = vstv %s11025_s27  ;;  %v11039_v22 = vstv %s11027_s13  ;;  %v2264_v14 = vadd.f32 %v2262_v48, %v2259_v63  ;;  %v2265_v62 = vadd.f32 %v2263_v29, %v2260_v21  ;;  %s11085_s27 = sld [smem:[#allocation104_spill]]  ;;  %s11086_s13 = sld [smem:[#allocation65_spill]] }
 0x269   :  { %v2267_v50 = vmul.f32 %v11036_v4, %v7442_v24  ;;  %v11038_v2 = vmov %v11036_v4  ;;  %v2296_v31 = vmul.f32 %v11039_v22, %v7381_v57  ;;  %v11040_v28 = vmov %v11039_v22  ;;  %s7978_s11 = sld [smem:[#allocation6 + $0xeb]]  ;;  %s7981_s0 = sld [smem:[#allocation6 + $0xef]] }
 0x26a   :  { %v2268_v16 = vmul.f32 %v11038_v2, %v7445_v17  ;;  %v2297_v19 = vmul.f32 %v11040_v28, %v7384_v15  ;;  %v11041_v34 = vstv %s11030_s18  ;;  %v2285_v49 = vadd.f32 %v2283_v38, %v2280_v35  ;;  %s11089_s18 = sld [smem:[#allocation64_spill]] }
 0x26b   :  { %v2299_v10 = vmul.f32 %v11041_v34, %v7395_v45  ;;  %v11043_v32 = vmov %v11041_v34  ;;  %v2286_v2 = vadd.f32 %v2284_v61, %v2281_v13  ;;  %v11045_v9 = vstv %s11035_s22  ;;  %s11090_s22 = sld [smem:[#allocation58_spill]] }
 0x26c   :  { %v2300_v4 = vmul.f32 %v11043_v32, %v7398_v25  ;;  %v2288_v22 = vmul.f32 %v11045_v9, %v7442_v24  ;;  %v11046_v23 = vmov %v11045_v9  ;;  %v11047_v63 = vstv %s11037_s9  ;;  %s11093_s9 = sld [smem:[#allocation66_spill]] }
 0x26d   :  { %v2289_v28 = vmul.f32 %v11046_v23, %v7445_v17  ;;  %v2301_v48 = vadd.f32 %v2299_v10, %v2296_v31  ;;  %v2304_v21 = vmul.f32 %v11047_v63, %v7405_v37  ;;  %v11048_v46 = vmov %v11047_v63  ;;  %11098 = sst [smem:[#allocation12_spill]] %s7954_s19  ;;  %s8029_s19 = sld [smem:[#allocation6 + $0x100]] }
 0x26e   :  { %v2302_v29 = vadd.f32 %v2300_v4, %v2297_v19  ;;  %v2305_v34 = vmul.f32 %v11048_v46, %v7408_v12  ;;  %v2227_v32 = vadd.f32 %v2225_v42, %v2222_v51  ;;  %v2228_v38 = vadd.f32 %v2226_v5, %v2223_v1 }
 0x26f   :  { %v2248_v61 = vadd.f32 %v2246_v53, %v2243_v8  ;;  %v2249_v35 = vadd.f32 %v2247_v11, %v2244_v18  ;;  %v11052_v13 = vstv %s11042_s20  ;;  %v7625_v4 = vstv %s2747_s12  ;;  %s7925_s20 = sld [smem:[#allocation6 + $0xe4]]  ;;  %s7927_s12 = sld [smem:[#allocation6 + $0xe5]] }
 0x270   :  { %v7618_v9 = vadd.f32 %v11052_v13, %v2206_v30  ;;  %v11053_v31 = vmov %v11052_v13  ;;  %v2269_v42 = vadd.f32 %v2267_v50, %v2264_v14  ;;  %v2270_v5 = vadd.f32 %v2268_v16, %v2265_v62 }
 0x271   :  { %v7622_v19 = vadd.f32 %v11053_v31, %v2207_v27  ;;  %v2290_v51 = vadd.f32 %v2288_v22, %v2285_v49  ;;  %v2291_v1 = vadd.f32 %v2289_v28, %v2286_v2  ;;  %v2306_v30 = vadd.f32 %v2304_v21, %v2301_v48 }
 0x272   :  { %v2307_v53 = vadd.f32 %v2305_v34, %v2302_v29  ;;  %v11058_v11 = vstv %s11049_s26  ;;  %v11061_v23 = vstv %s11050_s6  ;;  %v11064_v16 = vstv %s11051_s2  ;;  %s11094_s26 = sld [smem:[#allocation33_spill]]  ;;  %s7930_s6 = sld [smem:[#allocation6 + $0xe8]] }
 0x273   :  { %v2309_v27 = vmul.f32 %v11058_v11, %v7442_v24  ;;  %v11059_v8 = vmov %v11058_v11  ;;  %v7635_v63 = vadd.f32 %v11061_v23, %v2227_v32  ;;  %v11062_v14 = vmov %v11061_v23  ;;  %s7932_s2 = sld [smem:[#allocation6 + $0xec]] }
 0x274   :  { %v2310_v18 = vmul.f32 %v11059_v8, %v7445_v17  ;;  %v7639_v50 = vadd.f32 %v11062_v14, %v2228_v38  ;;  %v7643_v62 = vadd.f32 %v11064_v16, %v2248_v61  ;;  %v11065_v49 = vmov %v11064_v16 }
 0x275   :  { %v7647_v2 = vadd.f32 %v11065_v49, %v2249_v35  ;;  %v11066_v22 = vstv %s11054_s4  ;;  %v11068_v21 = vstv %s11055_s16  ;;  %v11070_v38 = vstv %s11056_s25  ;;  %s7936_s16 = sld [smem:[#allocation6 + $0xe9]]  ;;  %s7970_s25 = sld [smem:[#allocation6 + $0xf6]] }
 0x276   :  { %v2317_v28 = vmul.f32 %v11066_v22, %v7381_v57  ;;  %v11067_v48 = vmov %v11066_v22  ;;  %v2320_v46 = vmul.f32 %v11068_v21, %v7395_v45  ;;  %v11069_v34 = vmov %v11068_v21  ;;  %s7983_s4 = sld [smem:[#allocation6 + $0xf3]] }
 0x277   :  { %v2318_v29 = vmul.f32 %v11067_v48, %v7384_v15  ;;  %v2321_v32 = vmul.f32 %v11069_v34, %v7398_v25  ;;  %v7663_v13 = vadd.f32 %v11070_v38, %v2269_v42  ;;  %v11071_v61 = vmov %v11070_v38 }
 0x278   :  { %v7667_v31 = vadd.f32 %v11071_v61, %v2270_v5  ;;  %v11073_v35 = vstv %s11057_s23  ;;  %v2311_v14 = vadd.f32 %v2309_v27, %v2306_v30  ;;  %v7677_v16 = vadd.f32 %v2310_v18, %v2307_v53  ;;  %s7938_s23 = sld [smem:[#allocation6 + $0xf0]] }
 0x279   :  { %v7671_v11 = vadd.f32 %v11073_v35, %v2290_v51  ;;  %v11074_v8 = vmov %v11073_v35  ;;  %v11076_v49 = vstv %s11060_s15  ;;  %v7688_v5 = vmul.f32 %v2329_v52, %v7442_v24  ;;  %s7942_s15 = sld [smem:[#allocation6 + $0xf4]] }
 0x27a   :  { %v7675_v23 = vadd.f32 %v11074_v8, %v2291_v1  ;;  %v2325_v42 = vmul.f32 %v11076_v49, %v7405_v37  ;;  %v11078_v22 = vmov %v11076_v49  ;;  %v7693_v51 = vmul.f32 %v2329_v52, %v7445_v17 }
 0x27b   :  { %v2326_v48 = vmul.f32 %v11078_v22, %v7408_v12  ;;  %v2360_v1 = vmul.f32 %v7237_v58, %v7618_v9  ;;  %v2361_v30 = vmul.f32 %v7237_v58, %v7622_v19  ;;  %v2322_v53 = vadd.f32 %v2320_v46, %v2317_v28  ;;  %11099 = sst [smem:[#allocation44_spill]] %s7970_s25  ;;  %s8012_s25 = sld [smem:[#allocation6 + $0xfc]] }
 0x27c   :  { %v2323_v27 = vadd.f32 %v2321_v32, %v2318_v29  ;;  %v2364_v18 = vmul.f32 %v7252_v3, %v7635_v63  ;;  %v2365_v21 = vmul.f32 %v7252_v3, %v7639_v50  ;;  %v2338_v34 = vmul.f32 %v2337_v60, %v7381_v57 }
 0x27d   :  { %v2339_v52 = vmul.f32 %v2337_v60, %v7384_v15  ;;  %v2415_v38 = vmul.f32 %v7254_v54, %v7643_v62  ;;  %v2416_v58 = vmul.f32 %v7254_v54, %v7647_v2  ;;  %v11079_v28 = vstv %s11075_s14 }
 0x27e   :  { %v7715_v29 = vadd.f32 %v11079_v28, %v2311_v14  ;;  %v2341_v46 = vmul.f32 %v2340_v40, %v7395_v45  ;;  %v7720_v32 = vadd.f32 %v2364_v18, %v2360_v1  ;;  %v7722_v3 = vadd.f32 %v2365_v21, %v2361_v30  ;;  %11097 = sst [smem:[#allocation56_spill]] %s7938_s23  ;;  %s7994_s23 = sld [smem:[#allocation6 + $0xf8]] }
 0x27f   :  { %v2419_v61 = vmul.f32 %v7426_v44, %v7663_v13  ;;  %v2420_v60 = vmul.f32 %v7426_v44, %v7667_v31  ;;  %v2470_v35 = vmul.f32 %v7430_v55, %v7618_v9  ;;  %v2471_v54 = vmul.f32 %v7430_v55, %v7622_v19 }
 0x280   :  { %v7732_v8 = vadd.f32 %v2325_v42, %v2322_v53  ;;  %v2342_v14 = vmul.f32 %v2340_v40, %v7398_v25  ;;  %v2368_v49 = vmax.f32 %v7720_v32, %v7722_v3  ;;  %v2474_v22 = vmul.f32 %v7434_v39, %v7635_v63 }
 0x281   :  { %v7741_v44 = vadd.f32 %v2326_v48, %v2323_v27  ;;  %v7743_v1 = vadd.f32 %v2419_v61, %v2415_v38  ;;  %v7745_v30 = vadd.f32 %v2420_v60, %v2416_v58  ;;  %v2475_v55 = vmul.f32 %v7434_v39, %v7639_v50 }
 0x282   :  { %v2369_v42 = vrot.slane %v2368_v49, 4  ;;  %v7749_v53 = vadd.f32 %v2474_v22, %v2470_v35  ;;  %v2525_v40 = vmul.f32 %v7438_v47, %v7643_v62  ;;  %v2526_v18 = vmul.f32 %v7438_v47, %v7647_v2 }
 0x283   :  { %v2423_v48 = vmax.f32 %v7743_v1, %v7745_v30  ;;  %v7757_v27 = vadd.f32 %v2475_v55, %v2471_v54  ;;  %v2529_v21 = vmul.f32 %v7452_v41, %v7663_v13  ;;  %v2530_v39 = vmul.f32 %v7452_v41, %v7667_v31 }
 0x284   :  { %v7766_v38 = vmul.f32 %v2345_v26, %v7405_v37  ;;  %v7771_v58 = vmul.f32 %v2345_v26, %v7408_v12  ;;  %v2370_v47 = vmax.f32 %v2368_v49, %v2369_v42  ;;  %v2580_v28 = vmul.f32 %v7454_v0, %v7618_v9 }
 0x285   :  { %v2424_v61 = vrot.slane %v2423_v48, 4  ;;  %v2478_v60 = vmax.f32 %v7749_v53, %v7757_v27  ;;  %v7777_v35 = vadd.f32 %v2529_v21, %v2525_v40  ;;  %v7779_v54 = vadd.f32 %v2530_v39, %v2526_v18 }
 0x286   :  { %v2371_v41 = vrot.slane %v2370_v47, 2  ;;  %v2581_v22 = vmul.f32 %v7454_v0, %v7622_v19  ;;  %v2584_v26 = vmul.f32 %v7485_v56, %v7635_v63  ;;  %v2585_v49 = vmul.f32 %v7485_v56, %v7639_v50 }
 0x287   :  { %v7787_v55 = vadd.f32 %v2341_v46, %v2338_v34  ;;  %v2425_v42 = vmax.f32 %v2423_v48, %v2424_v61  ;;  %v2479_v10 = vrot.slane %v2478_v60, 4  ;;  %v2533_v40 = vmax.f32 %v7777_v35, %v7779_v54 }
 0x288   :  { %v7791_v21 = vadd.f32 %v2342_v14, %v2339_v52  ;;  %v2372_v18 = vmax.f32 %v2370_v47, %v2371_v41  ;;  %v7793_v39 = vadd.f32 %v2584_v26, %v2580_v28  ;;  %v7795_v0 = vadd.f32 %v2585_v49, %v2581_v22 }
 0x289   :  { %v2426_v36 = vrot.slane %v2425_v42, 2  ;;  %v2480_v20 = vmax.f32 %v2478_v60, %v2479_v10  ;;  %v2534_v12 = vrot.slane %v2533_v40, 4  ;;  %v2635_v56 = vmul.f32 %v7487_v59, %v7643_v62 }
 0x28a   :  { %v2373_v34 = vrot.slane %v2372_v18, 1  ;;  %v2588_v46 = vmax.f32 %v7793_v39, %v7795_v0  ;;  %v2636_v52 = vmul.f32 %v7487_v59, %v7647_v2  ;;  %v2639_v14 = vmul.f32 %v7489_v6, %v7663_v13 }
 0x28b   :  { %v2427_v48 = vmax.f32 %v2425_v42, %v2426_v36  ;;  %v2481_v47 = vrot.slane %v2480_v20, 2  ;;  %v2535_v28 = vmax.f32 %v2533_v40, %v2534_v12  ;;  %v2640_v10 = vmul.f32 %v7489_v6, %v7667_v31 }
 0x28c   :  { %v11082_v61 = vstv %s11081_s1  ;;  %v2374_v41 = vmax.f32 %v2372_v18, %v2373_v34  ;;  %v2589_v22 = vrot.slane %v2588_v46, 4  ;;  %v7812_v26 = vadd.f32 %v2639_v14, %v2635_v56  ;;  %s7961_s1 = sld [smem:[#allocation6 + $0xee]] }
 0x28d   :  { %v7810_v60 = vmul.f32 %v11082_v61, %v7442_v24  ;;  %v2428_v49 = vrot.slane %v2427_v48, 1  ;;  %v2482_v37 = vmax.f32 %v2480_v20, %v2481_v47  ;;  %v2536_v59 = vrot.slane %v2535_v28, 2 }
 0x28e   :  { %v7814_v25 = vadd.f32 %v2640_v10, %v2636_v52  ;;  %v11083_v36 = vmov %v11082_v61  ;;  %v2375_v12 = vsub.f32 %v7720_v32, %v2374_v41  ;;  %v2376_v6 = vsub.f32 %v7722_v3, %v2374_v41 }
 0x28f   :  { %v7819_v42 = vmul.f32 %v11083_v36, %v7445_v17  ;;  %v2590_v40 = vmax.f32 %v2588_v46, %v2589_v22  ;;  %v2429_v61 = vmax.f32 %v2427_v48, %v2428_v49  ;;  %v2483_v24 = vrot.slane %v2482_v37, 1 }
 0x290   :  { %v2537_v18 = vmax.f32 %v2535_v28, %v2536_v59  ;;  %v2643_v56 = vmax.f32 %v7812_v26, %v7814_v25  ;;  %v2377_v34 = vmul.f32 1.442695, %v2375_v12  ;;  %v2379_v20 = vmul.f32 1.442695, %v2376_v6 }
 0x291   :  { %v2591_v14 = vrot.slane %v2590_v40, 2  ;;  %v2690_v52 = vmul.f32 %v7491_v33, %v7618_v9  ;;  %v2430_v47 = vsub.f32 %v7743_v1, %v2429_v61  ;;  %v2431_v10 = vsub.f32 %v7745_v30, %v2429_v61 }
 0x292   :  { %v2484_v32 = vmax.f32 %v2482_v37, %v2483_v24  ;;  %v2538_v36 = vrot.slane %v2537_v18, 1  ;;  %4825 = vpow2.f32 %v2377_v34  ;;  %v2644_v46 = vrot.slane %v2643_v56, 4 }
 0x293   :  { %v2592_v3 = vmax.f32 %v2590_v40, %v2591_v14  ;;  %v2691_v48 = vmul.f32 %v7491_v33, %v7622_v19  ;;  %4827 = vpow2.f32 %v2379_v20  ;;  %v2432_v28 = vmul.f32 1.442695, %v2430_v47 }
 0x294   :  { %v2434_v41 = vmul.f32 1.442695, %v2431_v10  ;;  %v2485_v22 = vsub.f32 %v7749_v53, %v2484_v32  ;;  %v2486_v49 = vsub.f32 %v7757_v27, %v2484_v32  ;;  %v2539_v9 = vmax.f32 %v2537_v18, %v2538_v36 }
 0x295   :  { %v2593_v59 = vrot.slane %v2592_v3, 1  ;;  %v2645_v1 = vmax.f32 %v2643_v56, %v2644_v46  ;;  %4829 = vpow2.f32 %v2432_v28  ;;  %v2694_v37 = vmul.f32 %v7496_v7, %v7635_v63 }
 0x296   :  { %v2487_v30 = vmul.f32 1.442695, %v2485_v22  ;;  %v2695_v24 = vmul.f32 %v7496_v7, %v7639_v50  ;;  %4831 = vpow2.f32 %v2434_v41  ;;  %v2489_v33 = vmul.f32 1.442695, %v2486_v49 }
 0x297   :  { %v2540_v19 = vsub.f32 %v7777_v35, %v2539_v9  ;;  %v2541_v12 = vsub.f32 %v7779_v54, %v2539_v9  ;;  %v2594_v53 = vmax.f32 %v2592_v3, %v2593_v59  ;;  %v2646_v27 = vrot.slane %v2645_v1, 2 }
 0x298   :  { %4833 = vpow2.f32 %v2487_v30  ;;  %v7839_v6 = vadd.f32 %v2694_v37, %v2690_v52  ;;  %v7841_v18 = vadd.f32 %v2695_v24, %v2691_v48  ;;  %v2348_v63 = vadd.f32 %v7766_v38, %v7787_v55 }
 0x299   :  { %4835 = vpow2.f32 %v2489_v33  ;;  %v2542_v40 = vmul.f32 1.442695, %v2540_v19  ;;  %v2544_v61 = vmul.f32 1.442695, %v2541_v12  ;;  %v2595_v7 = vsub.f32 %v7793_v39, %v2594_v53 }
 0x29a   :  { %v2596_v50 = vsub.f32 %v7795_v0, %v2594_v53  ;;  %v2647_v35 = vmax.f32 %v2645_v1, %v2646_v27  ;;  %v2349_v54 = vadd.f32 %v7771_v58, %v7791_v21  ;;  %v2698_v56 = vmax.f32 %v7839_v6, %v7841_v18 }
 0x29b   :  { %4837 = vpow2.f32 %v2542_v40  ;;  %v2745_v34 = vmul.f32 %v7532_v43, %v7643_v62  ;;  %v2597_v20 = vmul.f32 1.442695, %v2595_v7  ;;  %v2746_v39 = vmul.f32 %v7532_v43, %v7647_v2 }
 0x29c   :  { %4839 = vpow2.f32 %v2544_v61  ;;  %v2599_v14 = vmul.f32 1.442695, %v2596_v50  ;;  %v2648_v52 = vrot.slane %v2647_v35, 1  ;;  %v7853_v38 = vpop.eup %4825  ;;  %v2699_v55 = vrot.slane %v2698_v56, 4 }
 0x29d   :  { %v2749_v58 = vmul.f32 %v7625_v4, %v7663_v13  ;;  %v2750_v21 = vmul.f32 %v7625_v4, %v7667_v31  ;;  %v7861_v0 = vpop.eup %4827  ;;  %v2332_v62 = vadd.f32 %v7688_v5, %v7732_v8  ;;  %v2333_v47 = vadd.f32 %v7693_v51, %v7741_v44 }
 0x29e   :  { %4841 = vpow2.f32 %v2597_v20  ;;  %v2649_v10 = vmax.f32 %v2647_v35, %v2648_v52  ;;  %v2381_v32 = vadd.f32 %v7861_v0, %v7853_v38  ;;  %v2700_v43 = vmax.f32 %v2698_v56, %v2699_v55 }
 0x29f   :  { %4843 = vpow2.f32 %v2599_v14  ;;  %v7869_v2 = vadd.f32 %v2749_v58, %v2745_v34  ;;  %v7871_v13 = vpop.eup %4829  ;;  %v11084_v4 = vstv %s11075_s14  ;;  %v7880_v8 = vadd.f32 %v2750_v21, %v2746_v39  ;;  %s7952_s14 = sld [smem:[#allocation6 + $0xf1]] }
 0x2a0   :  { %v7876_v31 = vadd.f32 %v11084_v4, %v7677_v16  ;;  %v2650_v5 = vsub.f32 %v7812_v26, %v2649_v10  ;;  %v2651_v51 = vsub.f32 %v7814_v25, %v2649_v10  ;;  %v7882_v44 = vpop.eup %4831  ;;  %v2353_v36 = vadd.f32 %v7810_v60, %v2348_v63 }
 0x2a1   :  { %v2354_v3 = vadd.f32 %v7819_v42, %v2349_v54  ;;  %v2382_v46 = vrot.slane %v2381_v32, 4  ;;  %v2701_v48 = vrot.slane %v2700_v43, 2  ;;  %v2436_v16 = vadd.f32 %v7882_v44, %v7871_v13 }
 0x2a2   :  { %v7886_v28 = vpop.eup %4833  ;;  %v2652_v41 = vmul.f32 1.442695, %v2650_v5  ;;  %v2654_v26 = vmul.f32 1.442695, %v2651_v51  ;;  %v2753_v25 = vmax.f32 %v7869_v2, %v7880_v8  ;;  %v11087_v49 = vstv %s11085_s27  ;;  %s7966_s27 = sld [smem:[#allocation6 + $0xf2]] }
 0x2a3   :  { %v7892_v22 = vpop.eup %4835  ;;  %v7896_v60 = vadd.f32 %v11087_v49, %v2332_v62  ;;  %v11088_v42 = vmov %v11087_v49  ;;  %v2383_v59 = vadd.f32 %v2382_v46, %v2381_v32  ;;  %v2702_v1 = vmax.f32 %v2700_v43, %v2701_v48 }
 0x2a4   :  { %v7900_v9 = vadd.f32 %v11088_v42, %v2333_v47  ;;  %v2437_v30 = vrot.slane %v2436_v16, 4  ;;  %v2491_v37 = vadd.f32 %v7892_v22, %v7886_v28  ;;  %4845 = vpow2.f32 %v2652_v41 }
 0x2a5   :  { %v2754_v24 = vrot.slane %v2753_v25, 4  ;;  %v7904_v33 = vpop.eup %4837  ;;  %v11091_v19 = vstv %s11086_s13  ;;  %v2384_v53 = vrot.slane %v2383_v59, 2  ;;  %4847 = vpow2.f32 %v2654_v26  ;;  %s7968_s13 = sld [smem:[#allocation6 + $0xe7]] }
 0x2a6   :  { %v7908_v12 = vadd.f32 %v11091_v19, %v2353_v36  ;;  %v2703_v27 = vrot.slane %v2702_v1, 1  ;;  %v7910_v40 = vpop.eup %4839  ;;  %v11092_v61 = vmov %v11091_v19  ;;  %v2438_v7 = vadd.f32 %v2437_v30, %v2436_v16 }
 0x2a7   :  { %v7914_v63 = vadd.f32 %v11092_v61, %v2354_v3  ;;  %v2492_v50 = vrot.slane %v2491_v37, 4  ;;  %v2755_v35 = vmax.f32 %v2753_v25, %v2754_v24  ;;  %v2385_v54 = vadd.f32 %v2384_v53, %v2383_v59 }
 0x2a8   :  { %v2521_v56 = vstv %s11089_s18  ;;  %v2546_v34 = vadd.f32 %v7910_v40, %v7904_v33  ;;  %v2565_v20 = vstv %s11090_s22  ;;  %v7920_v14 = vpop.eup %4841  ;;  %v2439_v52 = vrot.slane %v2438_v7, 2  ;;  %s8161_s18 = sld [smem:[#allocation6 + $0x102]]  ;;  %s11109_s22 = sld [smem:[#allocation26_spill]] }
 0x2a9   :  { %v2493_v55 = vadd.f32 %v2492_v50, %v2491_v37  ;;  %v2576_v39 = vstv %s10965_s21  ;;  %v2756_v58 = vrot.slane %v2755_v35, 2  ;;  %v7923_v21 = vpop.eup %4843  ;;  %v2386_v62 = vrot.slane %v2385_v54, 1  ;;  %s8143_s21 = sld [smem:[#allocation6 + $0xfe]] }
 0x2aa   :  { %v2547_v47 = vrot.slane %v2546_v34, 4  ;;  %v2620_v10 = vstv %s11093_s9  ;;  %v2704_v32 = vmax.f32 %v2702_v1, %v2703_v27  ;;  %v2440_v43 = vadd.f32 %v2439_v52, %v2438_v7  ;;  %s8169_s9 = sld [smem:[#allocation6 + $0x106]] }
 0x2ab   :  { %v2494_v4 = vrot.slane %v2493_v55, 2  ;;  %v2601_v5 = vadd.f32 %v7923_v21, %v7920_v14  ;;  %v2757_v51 = vmax.f32 %v2755_v35, %v2756_v58  ;;  %v2387_v36 = vadd.f32 %v2386_v62, %v2385_v54 }
 0x2ac   :  { %v2548_v3 = vadd.f32 %v2547_v47, %v2546_v34  ;;  %v2631_v46 = vstv %s10971_s7  ;;  %v2441_v16 = vrot.slane %v2440_v43, 1  ;;  %v2705_v19 = vsub.f32 %v7839_v6, %v2704_v32  ;;  %s8149_s7 = sld [smem:[#allocation6 + $0x109]] }
 0x2ad   :  { %v2495_v41 = vadd.f32 %v2494_v4, %v2493_v55  ;;  %v2602_v26 = vrot.slane %v2601_v5, 4  ;;  %v2758_v25 = vrot.slane %v2757_v51, 1  ;;  %4849 = vrcp.f32 %v2387_v36 }
 0x2ae   :  { %v2549_v49 = vrot.slane %v2548_v3, 2  ;;  %v7950_v1 = vpop.eup %4845  ;;  %v2442_v30 = vadd.f32 %v2441_v16, %v2440_v43  ;;  %v2706_v61 = vsub.f32 %v7841_v18, %v2704_v32  ;;  %v2707_v58 = vmul.f32 1.442695, %v2705_v19 }
 0x2af   :  { %v2496_v37 = vrot.slane %v2495_v41, 1  ;;  %v2603_v24 = vadd.f32 %v2602_v26, %v2601_v5  ;;  %v7957_v53 = vpop.eup %4847  ;;  %v2759_v54 = vmax.f32 %v2757_v51, %v2758_v25 }
 0x2b0   :  { %v2550_v27 = vadd.f32 %v2549_v49, %v2548_v3  ;;  %4851 = vrcp.f32 %v2442_v30  ;;  %v2656_v18 = vadd.f32 %v7957_v53, %v7950_v1  ;;  %v2709_v4 = vmul.f32 1.442695, %v2706_v61 }
 0x2b1   :  { %v2497_v35 = vadd.f32 %v2496_v37, %v2495_v41  ;;  %v2604_v6 = vrot.slane %v2603_v24, 2  ;;  %v2760_v51 = vsub.f32 %v7869_v2, %v2759_v54  ;;  %v2761_v26 = vsub.f32 %v7880_v8, %v2759_v54 }
 0x2b2   :  { %v2551_v34 = vrot.slane %v2550_v27, 1  ;;  %v2657_v41 = vrot.slane %v2656_v18, 4  ;;  %v2878_v37 = vstv %s8029_s19  ;;  %s8109_s19 = sld [smem:[#allocation6 + $0x105]] }
 0x2b3   :  { %4853 = vrcp.f32 %v2497_v35  ;;  %v2605_v43 = vadd.f32 %v2604_v6, %v2603_v24  ;;  %v2762_v8 = vmul.f32 1.442695, %v2760_v51 }
 0x2b4   :  { %v2552_v32 = vadd.f32 %v2551_v34, %v2550_v27  ;;  %v2658_v54 = vadd.f32 %v2657_v41, %v2656_v18  ;;  %v2764_v34 = vmul.f32 1.442695, %v2761_v26 }
 0x2b5   :  { %v2606_v2 = vrot.slane %v2605_v43, 1 }
 0x2b6   :  { %4855 = vrcp.f32 %v2552_v32 }
 0x2b7   :  { %4857 = vpow2.f32 %v2707_v58  ;;  %v4850_v24 = vpop.eup %4849  ;;  %v2607_v51 = vadd.f32 %v2606_v2, %v2605_v43  ;;  %v2870_v2 = vstv %s7994_s23  ;;  %s8087_s23 = sld [smem:[#allocation6 + $0xfd]] }
 0x2b8   :  { %4859 = vpow2.f32 %v2709_v4  ;;  %v2389_v61 = vmul.f32 %v4850_v24, %v7853_v38  ;;  %v2390_v35 = vmul.f32 %v4850_v24, %v7861_v0  ;;  %v8034_v52 = vmul.f32 %v2870_v2, %v7381_v57 }
 0x2b9   :  { %4861 = vpow2.f32 %v2762_v8 }
 0x2ba   :  { %v4852_v30 = vpop.eup %4851  ;;  %v2391_v36 = vmul.f32 %v2389_v61, %v7671_v11  ;;  %v2392_v4 = vmul.f32 %v2390_v35, %v7675_v23  ;;  %v2402_v49 = vmul.f32 %v2389_v61, %v7715_v29  ;;  %v2403_v38 = vmul.f32 %v2390_v35, %v7876_v31 }
 0x2bb   :  { %v2444_v5 = vmul.f32 %v4852_v30, %v7871_v13  ;;  %v2445_v0 = vmul.f32 %v4852_v30, %v7882_v44  ;;  %4863 = vrcp.f32 %v2607_v51  ;;  %v2659_v30 = vrot.slane %v2658_v54, 2 }
 0x2bc   :  { %v2393_v26 = vadd.f32 %v2392_v4, %v2391_v36  ;;  %v2404_v24 = vadd.f32 %v2403_v38, %v2402_v49  ;;  %4865 = vpow2.f32 %v2764_v34 }
 0x2bd   :  { %v4854_v41 = vpop.eup %4853  ;;  %v2446_v27 = vmul.f32 %v2444_v5, %v7896_v60  ;;  %v2447_v61 = vmul.f32 %v2445_v0, %v7900_v9  ;;  %v2457_v35 = vmul.f32 %v2444_v5, %v7908_v12  ;;  %v2458_v13 = vmul.f32 %v2445_v0, %v7914_v63 }
 0x2be   :  { %v2394_v25 = vrot.slane %v2393_v26, 4  ;;  %v2499_v44 = vmul.f32 %v4854_v41, %v7886_v28  ;;  %v2500_v43 = vmul.f32 %v4854_v41, %v7892_v22  ;;  %v2405_v6 = vrot.slane %v2404_v24, 4 }
 0x2bf   :  { %v2448_v49 = vadd.f32 %v2447_v61, %v2446_v27  ;;  %v2459_v28 = vadd.f32 %v2458_v13, %v2457_v35  ;;  %v2660_v61 = vadd.f32 %v2659_v30, %v2658_v54 }
 0x2c0   :  { %v4856_v36 = vpop.eup %4855  ;;  %v2395_v38 = vadd.f32 %v2394_v25, %v2393_v26  ;;  %v2501_v58 = vmul.f32 %v2499_v44, %v7671_v11  ;;  %v2502_v5 = vmul.f32 %v2500_v43, %v7675_v23  ;;  %v2512_v22 = vmul.f32 %v2499_v44, %v7715_v29 }
 0x2c1   :  { %v8021_v4 = vpop.eup %4857  ;;  %v2449_v47 = vrot.slane %v2448_v49, 4  ;;  %v2513_v8 = vmul.f32 %v2500_v43, %v7876_v31  ;;  %v2554_v25 = vmul.f32 %v4856_v36, %v7904_v33  ;;  %v2555_v26 = vmul.f32 %v4856_v36, %v7910_v40 }
 0x2c2   :  { %v8025_v0 = vpop.eup %4859  ;;  %v2396_v27 = vrot.slane %v2395_v38, 2  ;;  %v2503_v51 = vadd.f32 %v2502_v5, %v2501_v58  ;;  %v2406_v13 = vadd.f32 %v2405_v6, %v2404_v24  ;;  %v2460_v32 = vrot.slane %v2459_v28, 4 }
 0x2c3   :  { %v2514_v41 = vadd.f32 %v2513_v8, %v2512_v22  ;;  %v2556_v43 = vmul.f32 %v2554_v25, %v7896_v60  ;;  %v2450_v18 = vadd.f32 %v2449_v47, %v2448_v49  ;;  %v2557_v19 = vmul.f32 %v2555_v26, %v7900_v9  ;;  %v8045_v24 = vpop.eup %4861 }
 0x2c4   :  { %v2397_v35 = vadd.f32 %v2396_v27, %v2395_v38  ;;  %v2504_v44 = vrot.slane %v2503_v51, 4  ;;  %v2873_v58 = vstv %s8012_s25  ;;  %v2567_v34 = vmul.f32 %v2554_v25, %v7908_v12  ;;  %s8051_s25 = sld [smem:[#allocation6 + $0x104]] }
 0x2c5   :  { %v8041_v40 = vmul.f32 %v2870_v2, %v7384_v15  ;;  %v2515_v54 = vrot.slane %v2514_v41, 4  ;;  %v2558_v36 = vadd.f32 %v2557_v19, %v2556_v43  ;;  %v2661_v30 = vrot.slane %v2660_v61, 1  ;;  %v4864_v8 = vpop.eup %4863  ;;  %v11100_v43 = vld [vmem:[#allocation105_spill] sm:$0xff] }
 0x2c6   :  { %v2398_v5 = vrot.slane %v2397_v35, 1  ;;  %v2505_v33 = vadd.f32 %v2504_v44, %v2503_v51  ;;  %v2711_v6 = vadd.f32 %v8025_v0, %v8021_v4  ;;  %v2407_v47 = vrot.slane %v2406_v13, 2 }
 0x2c7   :  { %v2568_v38 = vmul.f32 %v2555_v26, %v7914_v63  ;;  %v2874_v22 = vmul.f32 %v2873_v58, %v7395_v45  ;;  %v2451_v51 = vrot.slane %v2450_v18, 2  ;;  %v2461_v2 = vadd.f32 %v2460_v32, %v2459_v28  ;;  %v8053_v26 = vpop.eup %4865 }
 0x2c8   :  { %v2506_v49 = vrot.slane %v2505_v33, 2  ;;  %v2399_v27 = vadd.f32 %v2398_v5, %v2397_v35  ;;  %v2559_v25 = vrot.slane %v2558_v36, 4  ;;  %v2875_v50 = vmul.f32 %v2873_v58, %v11100_v43 }
 0x2c9   :  { %v2569_v44 = vadd.f32 %v2568_v38, %v2567_v34  ;;  %v2516_v16 = vadd.f32 %v2515_v54, %v2514_v41  ;;  %v2662_v3 = vadd.f32 %v2661_v30, %v2660_v61  ;;  %v2712_v55 = vrot.slane %v2711_v6, 4 }
 0x2ca   :  { %v2507_v19 = vadd.f32 %v2506_v49, %v2505_v33  ;;  %v2560_v62 = vadd.f32 %v2559_v25, %v2558_v36  ;;  %v2609_v32 = vmul.f32 %v4864_v8, %v7920_v14  ;;  %v2610_v28 = vmul.f32 %v4864_v8, %v7923_v21 }
 0x2cb   :  { %v2570_v35 = vrot.slane %v2569_v44, 4  ;;  %v11101_v5 = vstv %s10990_s3  ;;  %v2408_v34 = vadd.f32 %v2407_v47, %v2406_v13  ;;  %v2452_v58 = vadd.f32 %v2451_v51, %v2450_v18  ;;  %s8075_s3 = sld [smem:[#allocation6 + $0xf7]] }
 0x2cc   :  { %v2508_v7 = vrot.slane %v2507_v19, 1  ;;  %v2401_v33 = vadd.f32 %v11101_v5, %v2399_v27  ;;  %v2462_v49 = vrot.slane %v2461_v2, 2  ;;  %v2611_v41 = vmul.f32 %v2609_v32, %v7671_v11 }
 0x2cd   :  { %v2571_v59 = vadd.f32 %v2570_v35, %v2569_v44  ;;  %v2612_v61 = vmul.f32 %v2610_v28, %v7675_v23  ;;  %v2517_v54 = vrot.slane %v2516_v16, 2  ;;  %v2561_v36 = vrot.slane %v2560_v62, 2 }
 0x2ce   :  { %v2509_v38 = vadd.f32 %v2508_v7, %v2507_v19  ;;  %v2622_v30 = vmul.f32 %v2609_v32, %v7715_v29  ;;  %v2623_v25 = vmul.f32 %v2610_v28, %v7876_v31  ;;  %v11102_v14 = vstv %s11044_s17  ;;  %s8077_s17 = sld [smem:[#allocation6 + $0xf9]] }
 0x2cf   :  { %v2572_v8 = vrot.slane %v2571_v59, 2  ;;  %v2613_v27 = vadd.f32 %v2612_v61, %v2611_v41  ;;  %4867 = vrcp.f32 %v2662_v3  ;;  %v2409_v18 = vrot.slane %v2408_v34, 1 }
 0x2d0   :  { %v2511_v21 = vadd.f32 %v11102_v14, %v2509_v38  ;;  %v2463_v13 = vadd.f32 %v2462_v49, %v2461_v2  ;;  %v2624_v7 = vadd.f32 %v2623_v25, %v2622_v30  ;;  %v2713_v47 = vadd.f32 %v2712_v55, %v2711_v6 }
 0x2d1   :  { %v2453_v51 = vrot.slane %v2452_v58, 1  ;;  %v2614_v19 = vrot.slane %v2613_v27, 4  ;;  %v2766_v44 = vadd.f32 %v8053_v26, %v8045_v24  ;;  %v2518_v32 = vadd.f32 %v2517_v54, %v2516_v16 }
 0x2d2   :  { %v8068_v35 = vsel %vm1159_vm0, %v2401_v33, %v2511_v21  ;;  %v2625_v28 = vrot.slane %v2624_v7, 4  ;;  %v2714_v5 = vrot.slane %v2713_v47, 2  ;;  %v2883_v42 = vstv %s8051_s25  ;;  %s11112_s25 = sld [smem:[#allocation11_spill]] }
 0x2d3   :  { %v2562_v38 = vadd.f32 %v2561_v36, %v2560_v62  ;;  %v2573_v14 = vadd.f32 %v2572_v8, %v2571_v59  ;;  %v2615_v41 = vadd.f32 %v2614_v19, %v2613_v27  ;;  %v2767_v3 = vrot.slane %v2766_v44, 4  ;;  %v11105_v19 = vld [vmem:[#allocation106_spill] sm:$0xff] }
 0x2d4   :  { %v2410_v61 = vadd.f32 %v2409_v18, %v2408_v34  ;;  %v2464_v2 = vrot.slane %v2463_v13, 1  ;;  %v2626_v55 = vadd.f32 %v2625_v28, %v2624_v7  ;;  %v2715_v6 = vadd.f32 %v2714_v5, %v2713_v47 }
 0x2d5   :  { %v2454_v49 = vadd.f32 %v2453_v51, %v2452_v58  ;;  %v2616_v30 = vrot.slane %v2615_v41, 2  ;;  %v2768_v25 = vadd.f32 %v2767_v3, %v2766_v44  ;;  %v2876_v48 = vadd.f32 %v2874_v22, %v8034_v52 }
 0x2d6   :  { %v2519_v33 = vrot.slane %v2518_v32, 1  ;;  %v2627_v16 = vrot.slane %v2626_v55, 2  ;;  %v2716_v54 = vrot.slane %v2715_v6, 1  ;;  %v2877_v59 = vadd.f32 %v2875_v50, %v8041_v40  ;;  %v11106_v40 = vld [vmem:[#allocation107_spill] sm:$0xff] }
 0x2d7   :  { %v2563_v62 = vrot.slane %v2562_v38, 1  ;;  %v2574_v36 = vrot.slane %v2573_v14, 1  ;;  %v2617_v34 = vadd.f32 %v2616_v30, %v2615_v41  ;;  %v2769_v21 = vrot.slane %v2768_v25, 2 }
 0x2d8   :  { %v11103_v8 = vstv %s10993_s30  ;;  %v2465_v18 = vadd.f32 %v2464_v2, %v2463_v13  ;;  %v2628_v58 = vadd.f32 %v2627_v16, %v2626_v55  ;;  %v2717_v7 = vadd.f32 %v2716_v54, %v2715_v6  ;;  %s8091_s30 = sld [smem:[#allocation6 + $0x108]] }
 0x2d9   :  { %v2412_v27 = vadd.f32 %v11103_v8, %v2410_v61  ;;  %v4868_v47 = vpop.eup %4867  ;;  %v11104_v52 = vstv %s10994_s5  ;;  %v2770_v51 = vadd.f32 %v2769_v21, %v2768_v25  ;;  %v2879_v50 = vmul.f32 %v2878_v37, %v11105_v19  ;;  %v11107_v25 = vld [vmem:[#allocation108_spill] sm:$0xff]  ;;  %s8103_s5 = sld [smem:[#allocation6 + $0x101]] }
 0x2da   :  { %v2456_v22 = vadd.f32 %v11104_v52, %v2454_v49  ;;  %v2880_v44 = vmul.f32 %v2878_v37, %v11106_v40  ;;  %v2618_v28 = vrot.slane %v2617_v34, 1  ;;  %v2664_v13 = vmul.f32 %v4868_v47, %v7950_v1 }
 0x2db   :  { %v2665_v5 = vmul.f32 %v4868_v47, %v7957_v53  ;;  %4869 = vrcp.f32 %v2717_v7  ;;  %v2520_v41 = vadd.f32 %v2519_v33, %v2518_v32  ;;  %v2564_v3 = vadd.f32 %v2563_v62, %v2562_v38 }
 0x2dc   :  { %v2575_v61 = vadd.f32 %v2574_v36, %v2573_v14  ;;  %v2771_v2 = vrot.slane %v2770_v51, 1  ;;  %v2629_v55 = vrot.slane %v2628_v58, 1  ;;  %v2666_v6 = vmul.f32 %v2664_v13, %v7896_v60 }
 0x2dd   :  { %v2667_v37 = vmul.f32 %v2665_v5, %v7900_v9  ;;  %v2677_v1 = vmul.f32 %v2664_v13, %v7908_v12  ;;  %v2678_v53 = vmul.f32 %v2665_v5, %v7914_v63  ;;  %v2881_v30 = vadd.f32 %v2879_v50, %v2876_v48 }
 0x2de   :  { %v2772_v49 = vadd.f32 %v2771_v2, %v2770_v51  ;;  %v2884_v32 = vmul.f32 %v2883_v42, %v11107_v25  ;;  %v2619_v38 = vadd.f32 %v2618_v28, %v2617_v34  ;;  %v2882_v14 = vadd.f32 %v2880_v44, %v2877_v59 }
 0x2df   :  { %v2668_v33 = vadd.f32 %v2667_v37, %v2666_v6  ;;  %v2885_v16 = vmul.f32 %v2883_v42, %v7445_v17  ;;  %v2522_v54 = vadd.f32 %v2521_v56, %v2520_v41  ;;  %v2566_v62 = vadd.f32 %v2565_v20, %v2564_v3 }
 0x2e0   :  { %v2679_v36 = vadd.f32 %v2678_v53, %v2677_v1  ;;  %4871 = vrcp.f32 %v2772_v49  ;;  %v11108_v48 = vstv %s10953_s10  ;;  %v2577_v34 = vadd.f32 %v2576_v39, %v2575_v61  ;;  %s8138_s10 = sld [smem:[#allocation6 + $0xfa]] }
 0x2e1   :  { %v2467_v21 = vadd.f32 %v11108_v48, %v2465_v18  ;;  %v2630_v8 = vadd.f32 %v2629_v55, %v2628_v58  ;;  %v2669_v59 = vrot.slane %v2668_v33, 4  ;;  %v2860_v7 = vstv %s8075_s3  ;;  %s8314_s3 = sld [smem:[#allocation6 + $0x113]] }
 0x2e2   :  { %v2680_v42 = vrot.slane %v2679_v36, 4  ;;  %v2886_v56 = vadd.f32 %v2884_v32, %v2881_v30  ;;  %v2891_v47 = vstv %s8077_s17  ;;  %v2621_v20 = vadd.f32 %v2620_v10, %v2619_v38  ;;  %s11113_s17 = sld [smem:[#allocation40_spill]] }
 0x2e3   :  { %v2670_v52 = vadd.f32 %v2669_v59, %v2668_v33  ;;  %v2887_v51 = vadd.f32 %v2885_v16, %v2882_v14  ;;  %v2894_v50 = vstv %s8087_s23  ;;  %v2801_v18 = vsel %vm1159_vm0, %v2412_v27, %v2522_v54  ;;  %s8206_s23 = sld [smem:[#allocation6 + $0xfb]] }
 0x2e4   :  { %v2681_v44 = vadd.f32 %v2680_v42, %v2679_v36  ;;  %v8118_v28 = vsel %vm1159_vm0, %v2456_v22, %v2566_v62  ;;  %v2888_v39 = vstv %s8091_s30  ;;  %v2632_v13 = vadd.f32 %v2631_v46, %v2630_v8  ;;  %s8217_s30 = sld [smem:[#allocation6 + $0xff]] }
 0x2e5   :  { %v4870_v58 = vpop.eup %4869  ;;  %v2671_v5 = vrot.slane %v2670_v52, 2  ;;  %v8124_v41 = vsel %vm1159_vm0, %v2467_v21, %v2577_v34  ;;  %v2892_v3 = vmul.f32 %v2891_v47, %v7381_v57  ;;  %v2895_v27 = vmul.f32 %v2894_v50, %v7395_v45 }
 0x2e6   :  { %v2682_v10 = vrot.slane %v2681_v44, 2  ;;  %v2719_v61 = vmul.f32 %v4870_v58, %v8021_v4  ;;  %v2720_v2 = vmul.f32 %v4870_v58, %v8025_v0  ;;  %v8132_v55 = vsel %vm1161_vm1, %v8068_v35, %v2621_v20 }
 0x2e7   :  { %v2672_v22 = vadd.f32 %v2671_v5, %v2670_v52  ;;  %v8134_v46 = vadd.f32 %v2888_v39, %v2886_v56  ;;  %v8136_v6 = vadd.f32 %v2888_v39, %v2887_v51  ;;  %v2893_v35 = vmul.f32 %v2891_v47, %v7384_v15 }
 0x2e8   :  { %v2683_v37 = vadd.f32 %v2682_v10, %v2681_v44  ;;  %v2721_v4 = vmul.f32 %v2719_v61, %v7671_v11  ;;  %v2722_v1 = vmul.f32 %v2720_v2, %v7675_v23  ;;  %v2732_v0 = vmul.f32 %v2719_v61, %v7715_v29 }
 0x2e9   :  { %v2733_v53 = vmul.f32 %v2720_v2, %v7876_v31  ;;  %v2896_v49 = vmul.f32 %v2894_v50, %v11100_v43  ;;  %v2899_v30 = vstv %s8103_s5  ;;  %v8152_v33 = vsel %vm1161_vm1, %v2801_v18, %v2632_v13  ;;  %s8309_s5 = sld [smem:[#allocation6 + $0x11a]] }
 0x2ea   :  { %v4872_v32 = vpop.eup %4871  ;;  %v2723_v38 = vadd.f32 %v2722_v1, %v2721_v4  ;;  %v2897_v11 = vadd.f32 %v2895_v27, %v2892_v3  ;;  %v2904_v23 = vstv %s8109_s19  ;;  %v2673_v14 = vrot.slane %v2672_v22, 1  ;;  %s8325_s19 = sld [smem:[#allocation6 + $0x117]] }
 0x2eb   :  { %v2734_v29 = vadd.f32 %v2733_v53, %v2732_v0  ;;  %v2774_v16 = vmul.f32 %v4872_v32, %v8045_v24  ;;  %v2775_v31 = vmul.f32 %v4872_v32, %v8053_v26  ;;  %v2684_v54 = vrot.slane %v2683_v37, 1 }
 0x2ec   :  { %v2724_v62 = vrot.slane %v2723_v38, 4  ;;  %v2900_v36 = vmul.f32 %v2899_v30, %v11105_v19  ;;  %v2901_v48 = vmul.f32 %v2899_v30, %v11106_v40  ;;  %v2898_v59 = vadd.f32 %v2896_v49, %v2893_v35 }
 0x2ed   :  { %v2735_v21 = vrot.slane %v2734_v29, 4  ;;  %v2776_v34 = vmul.f32 %v2774_v16, %v7896_v60  ;;  %v2777_v8 = vmul.f32 %v2775_v31, %v7900_v9  ;;  %v2787_v24 = vmul.f32 %v2774_v16, %v7908_v12 }
 0x2ee   :  { %v2725_v42 = vadd.f32 %v2724_v62, %v2723_v38  ;;  %v2788_v26 = vmul.f32 %v2775_v31, %v7914_v63  ;;  %v2905_v56 = vmul.f32 %v2904_v23, %v11107_v25  ;;  %v2674_v47 = vadd.f32 %v2673_v14, %v2672_v22 }
 0x2ef   :  { %v2736_v20 = vadd.f32 %v2735_v21, %v2734_v29  ;;  %v2778_v52 = vadd.f32 %v2777_v8, %v2776_v34  ;;  %v2906_v60 = vmul.f32 %v2904_v23, %v7445_v17  ;;  %v2685_v51 = vadd.f32 %v2684_v54, %v2683_v37 }
 0x2f0   :  { %v2726_v9 = vrot.slane %v2725_v42, 2  ;;  %v2789_v50 = vadd.f32 %v2788_v26, %v2787_v24  ;;  %v2912_v44 = vstv %s8138_s10  ;;  %v2902_v58 = vadd.f32 %v2900_v36, %v2897_v11  ;;  %s8327_s10 = sld [smem:[#allocation6 + $0x11b]] }
 0x2f1   :  { %v2737_v18 = vrot.slane %v2736_v20, 2  ;;  %v2779_v39 = vrot.slane %v2778_v52, 4  ;;  %v2915_v12 = vstv %s8143_s21  ;;  %v2903_v5 = vadd.f32 %v2901_v48, %v2898_v59  ;;  %s8334_s21 = sld [smem:[#allocation6 + $0x107]] }
 0x2f2   :  { %v2727_v63 = vadd.f32 %v2726_v9, %v2725_v42  ;;  %v2790_v13 = vrot.slane %v2789_v50, 4  ;;  %v2909_v3 = vstv %s8149_s7  ;;  %v11110_v10 = vstv %s11094_s26  ;;  %s11116_s26 = sld [smem:[#allocation47_spill]]  ;;  %s8340_s7 = sld [smem:[#allocation6 + $0x120]] }
 0x2f3   :  { %v2676_v61 = vadd.f32 %v11110_v10, %v2674_v47  ;;  %v2738_v2 = vadd.f32 %v2737_v18, %v2736_v20  ;;  %v2780_v27 = vadd.f32 %v2779_v39, %v2778_v52  ;;  %v2913_v22 = vmul.f32 %v2912_v44, %v7381_v57 }
 0x2f4   :  { %v11111_v37 = vstv %s11109_s22  ;;  %v2728_v1 = vrot.slane %v2727_v63, 1  ;;  %v2791_v0 = vadd.f32 %v2790_v13, %v2789_v50  ;;  %v2916_v53 = vmul.f32 %v2915_v12, %v7395_v45  ;;  %s8352_s22 = sld [smem:[#allocation6 + $0x128]] }
 0x2f5   :  { %v2687_v4 = vadd.f32 %v11111_v37, %v2685_v51  ;;  %v2739_v35 = vrot.slane %v2738_v2, 1  ;;  %v2781_v49 = vrot.slane %v2780_v27, 2  ;;  %v2914_v30 = vmul.f32 %v2912_v44, %v7384_v15 }
 0x2f6   :  { %v2917_v32 = vmul.f32 %v2915_v12, %v11100_v43  ;;  %v2729_v38 = vadd.f32 %v2728_v1, %v2727_v63  ;;  %v2792_v11 = vrot.slane %v2791_v0, 2  ;;  %v2907_v23 = vadd.f32 %v2905_v56, %v2902_v58 }
 0x2f7   :  { %v2920_v14 = vstv %s8161_s18  ;;  %v2740_v29 = vadd.f32 %v2739_v35, %v2738_v2  ;;  %v2782_v16 = vadd.f32 %v2781_v49, %v2780_v27  ;;  %v2805_v31 = vsel %vm1161_vm1, %v8118_v28, %v2676_v61  ;;  %s8347_s18 = sld [smem:[#allocation6 + $0x124]] }
 0x2f8   :  { %v2908_v54 = vadd.f32 %v2906_v60, %v2903_v5  ;;  %v11114_v62 = vstv %s11112_s25  ;;  %v2793_v48 = vadd.f32 %v2792_v11, %v2791_v0  ;;  %v2808_v21 = vsel %vm1161_vm1, %v8124_v41, %v2687_v4  ;;  %s8359_s25 = sld [smem:[#allocation6 + $0x11c]] }
 0x2f9   :  { %v2731_v36 = vadd.f32 %v11114_v62, %v2729_v38  ;;  %v2918_v34 = vadd.f32 %v2916_v53, %v2913_v22  ;;  %v11115_v8 = vstv %s11113_s17  ;;  %v2783_v42 = vrot.slane %v2782_v16, 1  ;;  %s8361_s17 = sld [smem:[#allocation6 + $0x121]] }
 0x2fa   :  { %v2742_v59 = vadd.f32 %v11115_v8, %v2740_v29  ;;  %v2919_v24 = vadd.f32 %v2917_v32, %v2914_v30  ;;  %v2921_v28 = vmul.f32 %v2920_v14, %v11105_v19  ;;  %v2794_v26 = vrot.slane %v2793_v48, 1 }
 0x2fb   :  { %v8192_v56 = vsel %vm1163_vm2, %v8132_v55, %v2731_v36  ;;  %v2922_v41 = vmul.f32 %v2920_v14, %v11106_v40  ;;  %v2925_v47 = vstv %s8169_s9  ;;  %v2784_v20 = vadd.f32 %v2783_v42, %v2782_v16  ;;  %s8354_s9 = sld [smem:[#allocation6 + $0x12c]] }
 0x2fc   :  { %v8198_v52 = vsel %vm1163_vm2, %v8152_v33, %v2742_v59  ;;  %v11117_v60 = vstv %s7925_s20  ;;  %v11118_v9 = vstv %s7927_s12  ;;  %v2795_v55 = vadd.f32 %v2794_v26, %v2793_v48  ;;  %s8230_s20 = sld [smem:[#allocation6 + $0x10a]]  ;;  %s11127_s12 = sld [smem:[#allocation56_spill]] }
 0x2fd   :  { %v2811_v51 = vmul.f32 %v11117_v60, %v8192_v56  ;;  %v2824_v50 = vmul.f32 %v11118_v9, %v8192_v56  ;;  %v11119_v44 = vstv %s7930_s6  ;;  %v11120_v39 = vstv %s7936_s16  ;;  %s8234_s6 = sld [smem:[#allocation6 + $0x103]]  ;;  %s8249_s16 = sld [smem:[#allocation6 + $0x114]] }
 0x2fe   :  { %v2813_v18 = vmul.f32 %v11119_v44, %v8198_v52  ;;  %v2826_v58 = vmul.f32 %v11120_v39, %v8198_v52  ;;  %v11121_v12 = vstv %s7944_s24  ;;  %v11122_v33 = vstv %s11116_s26  ;;  %s8263_s24 = sld [smem:[#allocation6 + $0x111]]  ;;  %s8366_s26 = sld [smem:[#allocation6 + $0x125]] }
 0x2ff   :  { %v2837_v63 = vmul.f32 %v11121_v12, %v8192_v56  ;;  %v2786_v13 = vadd.f32 %v11122_v33, %v2784_v20  ;;  %v11123_v5 = vstv %s7959_s29  ;;  %v11124_v61 = vstv %s7968_s13  ;;  %s8280_s29 = sld [smem:[#allocation6 + $0x119]]  ;;  %s8299_s13 = sld [smem:[#allocation6 + $0x116]] }
 0x300   :  { %v2839_v10 = vmul.f32 %v11123_v5, %v8198_v52  ;;  %v2850_v2 = vmul.f32 %v11124_v61, %v8192_v56  ;;  %v11125_v27 = vstv %s7978_s11  ;;  %v11126_v37 = vstv %s7565_s8  ;;  %s8238_s11 = sld [smem:[#allocation6 + $0x10c]]  ;;  %s8247_s8 = sld [smem:[#allocation6 + $0x110]] }
 0x301   :  { %v2852_v22 = vmul.f32 %v11125_v27, %v8198_v52  ;;  %v2797_v4 = vadd.f32 %v11126_v37, %v2795_v55  ;;  %v2814_v1 = vadd.f32 %v2813_v18, %v2811_v51  ;;  %v2827_v0 = vadd.f32 %v2826_v58, %v2824_v50 }
 0x302   :  { %v2923_v53 = vadd.f32 %v2921_v28, %v2918_v34  ;;  %v2806_v35 = vsel %vm1163_vm2, %v2805_v31, %v2786_v13  ;;  %v2840_v49 = vadd.f32 %v2839_v10, %v2837_v63  ;;  %v2926_v32 = vmul.f32 %v2925_v47, %v11107_v25 }
 0x303   :  { %v2853_v30 = vadd.f32 %v2852_v22, %v2850_v2  ;;  %v2809_v38 = vsel %vm1163_vm2, %v2808_v21, %v2797_v4  ;;  %v11128_v11 = vstv %s7932_s2  ;;  %v11129_v29 = vstv %s7946_s28  ;;  %s8259_s2 = sld [smem:[#allocation6 + $0x10d]]  ;;  %s8265_s28 = sld [smem:[#allocation6 + $0x118]] }
 0x304   :  { %v2816_v14 = vmul.f32 %v11128_v11, %v2806_v35  ;;  %v2829_v16 = vmul.f32 %v11129_v29, %v2806_v35  ;;  %v11130_v62 = vstv %s7961_s1  ;;  %v11131_v31 = vstv %s11127_s12  ;;  %s8288_s1 = sld [smem:[#allocation6 + $0x10e]]  ;;  %s8378_s12 = sld [smem:[#allocation6 + $0x122]] }
 0x305   :  { %v2842_v36 = vmul.f32 %v11130_v62, %v2806_v35  ;;  %v2819_v48 = vmul.f32 %v11131_v31, %v2809_v38  ;;  %v11132_v34 = vstv %s7952_s14  ;;  %v11133_v59 = vstv %s7966_s27  ;;  %s11136_s14 = sld [smem:[#allocation12_spill]]  ;;  %s8297_s27 = sld [smem:[#allocation6 + $0x112]] }
 0x306   :  { %v2832_v8 = vmul.f32 %v11132_v34, %v2809_v38  ;;  %v2845_v42 = vmul.f32 %v11133_v59, %v2809_v38  ;;  %v11134_v28 = vstv %s7981_s0  ;;  %v2817_v26 = vadd.f32 %v2816_v14, %v2814_v1  ;;  %s11137_s0 = sld [smem:[#allocation44_spill]] }
 0x307   :  { %v2855_v21 = vmul.f32 %v11134_v28, %v2806_v35  ;;  %v2830_v20 = vadd.f32 %v2829_v16, %v2827_v0  ;;  %v2843_v60 = vadd.f32 %v2842_v36, %v2840_v49  ;;  %v11135_v51 = vstv %s7983_s4  ;;  %s8278_s4 = sld [smem:[#allocation6 + $0x115]] }
 0x308   :  { %v2858_v9 = vmul.f32 %v11135_v51, %v2809_v38  ;;  %v8269_v55 = vadd.f32 %v2909_v3, %v2907_v23  ;;  %v8273_v44 = vadd.f32 %v2909_v3, %v2908_v54  ;;  %v8275_v18 = vadd.f32 %v2922_v41, %v2919_v24 }
 0x309   :  { %v2856_v50 = vadd.f32 %v2855_v21, %v2853_v30  ;;  %v2820_v39 = vadd.f32 %v2819_v48, %v2817_v26  ;;  %v2833_v58 = vadd.f32 %v2832_v8, %v2830_v20  ;;  %v2846_v12 = vadd.f32 %v2845_v42, %v2843_v60 }
 0x30a   :  { %v2933_v63 = vstv %s8206_s23  ;;  %v8283_v23 = vmul.f32 %v2925_v47, %v7445_v17  ;;  %v8285_v13 = vadd.f32 %v2926_v32, %v2923_v53  ;;  %v2936_v3 = vstv %s8217_s30  ;;  %s8368_s23 = sld [smem:[#allocation6 + $0x129]]  ;;  %s8374_s30 = sld [smem:[#allocation6 + $0x11d]] }
 0x30b   :  { %v2859_v33 = vadd.f32 %v2858_v9, %v2856_v50  ;;  %v11138_v54 = vstv %s7942_s15  ;;  %v11139_v41 = vstv %s11136_s14  ;;  %v2930_v2 = vstv %s8230_s20  ;;  %s8307_s15 = sld [smem:[#allocation6 + $0x10f]]  ;;  %s8625_s20 = sld [smem:[#allocation6 + $0x134]] }
 0x30c   :  { %v2822_v24 = vadd.f32 %v11138_v54, %v2820_v39  ;;  %v2835_v5 = vadd.f32 %v11139_v41, %v2833_v58  ;;  %v11140_v10 = vstv %s11137_s0  ;;  %v2934_v27 = vmul.f32 %v2933_v63, %v7381_v57  ;;  %s8423_s14 = sld [smem:[#allocation6 + $0x12f]]  ;;  %s8436_s0 = sld [smem:[#allocation6 + $0x11e]] }
 0x30d   :  { %v2848_v61 = vadd.f32 %v11140_v10, %v2846_v12  ;;  %v2861_v47 = vadd.f32 %v2860_v7, %v2859_v33  ;;  %v2935_v22 = vmul.f32 %v2933_v63, %v7384_v15  ;;  %v2941_v37 = vstv %s8234_s6  ;;  %s8421_s6 = sld [smem:[#allocation6 + $0x12b]] }
 0x30e   :  { %v2862_v4 = vmax.f32 %v2822_v24, 0.0  ;;  %v2864_v1 = vmax.f32 %v2835_v5, 0.0  ;;  %v2937_v53 = vmul.f32 %v2936_v3, %v7395_v45  ;;  %v2954_v30 = vstv %s8238_s11  ;;  %s8380_s11 = sld [smem:[#allocation6 + $0x12d]] }
 0x30f   :  { %v2866_v0 = vmax.f32 %v2848_v61, 0.0  ;;  %v2868_v49 = vmax.f32 %v2861_v47, 0.0  ;;  %v2956_v7 = vstv %s8247_s8  ;;  %v2959_v32 = vstv %s8249_s16  ;;  %s8385_s8 = sld [smem:[#allocation6 + $0x126]]  ;;  %s8390_s16 = sld [smem:[#allocation6 + $0x12a]] }
 0x310   :  { %v8317_v57 = vadd.f32 %v2862_v4, %v8192_v56  ;;  %v8320_v15 = vadd.f32 %v2864_v1, %v8198_v52  ;;  %v2938_v45 = vmul.f32 %v2936_v3, %v11100_v43  ;;  %v2962_v29 = vstv %s8265_s28  ;;  %s8408_s28 = sld [smem:[#allocation6 + $0x127]] }
 0x311   :  { %v8322_v11 = vadd.f32 %v2866_v0, %v2806_v35  ;;  %v8329_v14 = vadd.f32 %v2868_v49, %v2809_v38  ;;  %v2967_v16 = vstv %s8259_s2  ;;  %v2969_v62 = vstv %s8263_s24  ;;  %s8392_s2 = sld [smem:[#allocation6 + $0x12e]]  ;;  %s8406_s24 = sld [smem:[#allocation6 + $0x123]] }
 0x312   :  { %v2955_v56 = vmul.f32 %v2954_v30, %v8317_v57  ;;  %v2957_v52 = vmul.f32 %v2956_v7, %v8320_v15  ;;  %v2968_v43 = vmul.f32 %v2967_v16, %v8317_v57  ;;  %v8342_v38 = vadd.f32 %v2937_v53, %v2934_v27 }
 0x313   :  { %v2960_v35 = vmul.f32 %v2959_v32, %v8322_v11  ;;  %v2970_v36 = vmul.f32 %v2969_v62, %v8320_v15  ;;  %v2972_v31 = vstv %s8278_s4  ;;  %v2975_v48 = vstv %s8280_s29  ;;  %s8448_s4 = sld [smem:[#allocation6 + $0x130]]  ;;  %s8475_s29 = sld [smem:[#allocation6 + $0x131]] }
 0x314   :  { %v2958_v34 = vadd.f32 %v2957_v52, %v2955_v56  ;;  %v2963_v8 = vmul.f32 %v2962_v29, %v8329_v14  ;;  %v2973_v59 = vmul.f32 %v2972_v31, %v8322_v11  ;;  %v2976_v42 = vmul.f32 %v2975_v48, %v8329_v14 }
 0x315   :  { %v2971_v28 = vadd.f32 %v2970_v36, %v2968_v43  ;;  %v2980_v21 = vstv %s8288_s1  ;;  %v2982_v26 = vstv %s8297_s27  ;;  %v2985_v20 = vstv %s8299_s13  ;;  %s8497_s1 = sld [smem:[#allocation6 + $0x10b]]  ;;  %s8499_s27 = sld [smem:[#allocation6 + $0x11f]] }
 0x316   :  { %v2961_v60 = vadd.f32 %v2960_v35, %v2958_v34  ;;  %v2981_v51 = vmul.f32 %v2980_v21, %v8317_v57  ;;  %v2983_v9 = vmul.f32 %v2982_v26, %v8320_v15  ;;  %v2986_v50 = vmul.f32 %v2985_v20, %v8322_v11  ;;  %s8516_s13 = sld [smem:[#allocation6 + $0x132]] }
 0x317   :  { %v8370_v39 = vadd.f32 %v2938_v45, %v2935_v22  ;;  %v2974_v58 = vadd.f32 %v2973_v59, %v2971_v28  ;;  %v2988_v12 = vstv %s8309_s5  ;;  %v2993_v63 = vstv %s8307_s15  ;;  %s8520_s15 = sld [smem:[#allocation6 + $0x133]]  ;;  %s8629_s5 = sld [smem:[#allocation6 + $0x138]] }
 0x318   :  { %v2964_v33 = vadd.f32 %v2963_v8, %v2961_v60  ;;  %v2984_v3 = vadd.f32 %v2983_v9, %v2981_v51  ;;  %v2989_v54 = vmul.f32 %v2988_v12, %v8329_v14  ;;  %v2994_v24 = vmul.f32 %v2993_v63, %v8317_v57 }
 0x319   :  { %v2977_v41 = vadd.f32 %v2976_v42, %v2974_v58  ;;  %v2995_v5 = vstv %s8314_s3  ;;  %v2998_v10 = vstv %s8325_s19  ;;  %v3001_v61 = vstv %s8327_s10  ;;  %s8661_s3 = sld [smem:[#allocation6 + $0x135]]  ;;  %s8666_s19 = sld [smem:[#allocation6 + $0x139]] }
 0x31a   :  { %v2946_v47 = vstv %s8334_s21  ;;  %v2987_v27 = vadd.f32 %v2986_v50, %v2984_v3  ;;  %v2996_v22 = vmul.f32 %v2995_v5, %v8320_v15  ;;  %v2999_v4 = vmul.f32 %v2998_v10, %v8322_v11  ;;  %s8672_s10 = sld [smem:[#allocation6 + $0x136]]  ;;  %s8678_s21 = sld [smem:[#allocation6 + $0x13a]] }
 0x31b   :  { %v2942_v1 = vmul.f32 %v2941_v37, %v11105_v19  ;;  %v2943_v0 = vmul.f32 %v2941_v37, %v11106_v40  ;;  %v3002_v53 = vmul.f32 %v3001_v61, %v8329_v14  ;;  %v3006_v49 = vstv %s8340_s7  ;;  %s8680_s7 = sld [smem:[#allocation6 + $0x137]] }
 0x31c   :  { %v8402_v30 = vadd.f32 %v2989_v54, %v2987_v27  ;;  %v2997_v7 = vadd.f32 %v2996_v22, %v2994_v24  ;;  %v3007_v32 = vmul.f32 %v3006_v49, %v8317_v57  ;;  %v3008_v45 = vstv %s8347_s18  ;;  %s8682_s18 = sld [smem:[#allocation6 + $0x13b]] }
 0x31d   :  { %v8413_v19 = vmul.f32 %v2946_v47, %v11107_v25  ;;  %v3009_v40 = vmul.f32 %v3008_v45, %v8320_v15  ;;  %v3011_v37 = vstv %s8352_s22  ;;  %v3014_v29 = vstv %s8354_s9  ;;  %s8686_s22 = sld [smem:[#allocation6 + $0x13c]]  ;;  %s8688_s9 = sld [smem:[#allocation6 + $0x13d]] }
 0x31e   :  { %v2965_v16 = vstv %s8359_s25  ;;  %v3000_v62 = vadd.f32 %v2999_v4, %v2997_v7  ;;  %v3012_v56 = vmul.f32 %v3011_v37, %v8322_v11  ;;  %v3015_v52 = vmul.f32 %v3014_v29, %v8329_v14  ;;  %v11141_v7 = vld [vmem:[#allocation67_spill] sm:$0xff]  ;;  %s8693_s25 = sld [smem:[#allocation6 + $0x13e]] }
 0x31f   :  { %v3010_v35 = vadd.f32 %v3009_v40, %v3007_v32  ;;  %v3019_v25 = vstv %s8361_s17  ;;  %v3021_v43 = vstv %s8366_s26  ;;  %v3024_v36 = vstv %s8368_s23  ;;  %s8695_s17 = sld [smem:[#allocation6 + $0x13f]]  ;;  %s8700_s26 = sld [smem:[#allocation6 + $0x140]] }
 0x320   :  { %v8428_v31 = vadd.f32 %v3002_v53, %v3000_v62  ;;  %v3020_v48 = vmul.f32 %v3019_v25, %v8317_v57  ;;  %v3022_v34 = vmul.f32 %v3021_v43, %v8320_v15  ;;  %v3025_v8 = vmul.f32 %v3024_v36, %v8322_v11  ;;  %s8702_s23 = sld [smem:[#allocation6 + $0x141]] }
 0x321   :  { %v2978_v59 = vstv %s8374_s30  ;;  %v3013_v42 = vadd.f32 %v3012_v56, %v3010_v35  ;;  %v3027_v28 = vstv %s8380_s11  ;;  %v3032_v21 = vstv %s8378_s12  ;;  %s8705_s30 = sld [smem:[#allocation6 + $0x142]]  ;;  %s8707_s12 = sld [smem:[#allocation6 + $0x143]] }
 0x322   :  { %v2966_v26 = vadd.f32 %v2965_v16, %v2964_v33  ;;  %v3023_v20 = vadd.f32 %v3022_v34, %v3020_v48  ;;  %v3028_v60 = vmul.f32 %v3027_v28, %v8329_v14  ;;  %v3033_v51 = vmul.f32 %v3032_v21, %v8317_v57  ;;  %s8714_s11 = sld [smem:[#allocation6 + $0x144]] }
 0x323   :  { %v8440_v9 = vadd.f32 %v3015_v52, %v3013_v42  ;;  %v3034_v50 = vstv %s8385_s8  ;;  %v3037_v58 = vstv %s8390_s16  ;;  %v3040_v12 = vstv %s8392_s2  ;;  %11143 = sst [smem:[#allocation13_spill]] %s8686_s22  ;;  %s8716_s8 = sld [smem:[#allocation6 + $0x145]] }
 0x324   :  { %v2944_v63 = vadd.f32 %v2942_v1, %v8342_v38  ;;  %v3026_v3 = vadd.f32 %v3025_v8, %v3023_v20  ;;  %v3035_v54 = vmul.f32 %v3034_v50, %v8320_v15  ;;  %v3038_v33 = vmul.f32 %v3037_v58, %v8322_v11  ;;  %s8723_s16 = sld [smem:[#allocation6 + $0x146]]  ;;  %s8725_s2 = sld [smem:[#allocation6 + $0x147]] }
 0x325   :  { %v2979_v24 = vadd.f32 %v2978_v59, %v2977_v41  ;;  %v3041_v5 = vmul.f32 %v3040_v12, %v8329_v14  ;;  %v3045_v10 = vstv %s8406_s24  ;;  %v3047_v61 = vstv %s8408_s28  ;;  %11144 = sst [smem:[#allocation14_spill]] %s8695_s17  ;;  %s8735_s24 = sld [smem:[#allocation6 + $0x160]] }
 0x326   :  { %v8453_v27 = vadd.f32 %v3028_v60, %v3026_v3  ;;  %v3036_v22 = vadd.f32 %v3035_v54, %v3033_v51  ;;  %v3046_v4 = vmul.f32 %v3045_v10, %v8317_v57  ;;  %v3048_v38 = vmul.f32 %v3047_v61, %v8320_v15  ;;  %11145 = sst [smem:[#allocation49_spill]] %s8700_s26  ;;  %s8737_s28 = sld [smem:[#allocation6 + $0x161]] }
 0x327   :  { %v2945_v1 = vadd.f32 %v2943_v0, %v8370_v39  ;;  %v3050_v53 = vstv %s8421_s6  ;;  %v3053_v49 = vstv %s8423_s14  ;;  %v3065_v32 = vrot.slane %v2966_v26, %v11141_v7  ;;  %11146 = sst [smem:[#allocation46_spill]] %s8705_s30  ;;  %s8747_s6 = sld [smem:[#allocation6 + $0x162]] }
 0x328   :  { %v2948_v41 = vmul.f32 %v2946_v47, %v7445_v17  ;;  %v3039_v45 = vadd.f32 %v3038_v33, %v3036_v22  ;;  %v3049_v40 = vadd.f32 %v3048_v38, %v3046_v4  ;;  %v3051_v37 = vmul.f32 %v3050_v53, %v8322_v11  ;;  %11147 = sst [smem:[#allocation52_spill]] %s8707_s12  ;;  %s8749_s14 = sld [smem:[#allocation6 + $0x163]] }
 0x329   :  { %v3054_v29 = vmul.f32 %v3053_v49, %v8329_v14  ;;  %v3066_v16 = vcombine.high %v3065_v32, %v3065_v32  ;;  %v3073_v57 = vrot.slane %v3065_v32, %v11141_v7  ;;  %v3118_v15 = vrot.slane %v2979_v24, %v11141_v7  ;;  %v11142_v14 = vld [vmem:[#allocation68_spill] sm:$0xff]  ;;  %11148 = sst [smem:[#allocation23_spill]] %s8714_s11 }
 0x32a   :  { %v8470_v39 = vadd.f32 %v8283_v23, %v8275_v18  ;;  %v2991_v0 = vstv %s8436_s0  ;;  %v8473_v62 = vadd.f32 %v3041_v5, %v3039_v45  ;;  %v3052_v17 = vadd.f32 %v3051_v37, %v3049_v40  ;;  %11149 = sst [smem:[#allocation50_spill]] %s8716_s8  ;;  %s8758_s0 = sld [smem:[#allocation6 + $0x164]] }
 0x32b   :  { %v3080_v11 = vrot.slane %v3066_v16, %v11141_v7  ;;  %v3081_v47 = vcombine.high %v3073_v57, %v3073_v57  ;;  %v3086_v56 = vrot.slane %v3073_v57, %v11142_v14  ;;  %v3119_v52 = vcombine.high %v3118_v15, %v3118_v15  ;;  %11150 = sst [smem:[#allocation62_spill]] %s8723_s16 }
 0x32c   :  { %v8480_v35 = vadd.f32 %v8413_v19, %v2944_v63  ;;  %v8482_v25 = vadd.f32 %v2948_v41, %v2945_v1  ;;  %v8484_v43 = vadd.f32 %v3054_v29, %v3052_v17  ;;  %v3126_v18 = vrot.slane %v3118_v15, %v11141_v7  ;;  %11151 = sst [smem:[#allocation37_spill]] %s8725_s2 }
 0x32d   :  { %v3017_v23 = vstv %s8448_s4  ;;  %v3082_v36 = vcombine.high %v3080_v11, %v3080_v11  ;;  %v3090_v48 = vrot.slane %v3080_v11, %v11142_v14  ;;  %v3094_v34 = vrot.slane %v3081_v47, %v11142_v14  ;;  %11152 = sst [smem:[#allocation31_spill]] %s8735_s24  ;;  %s8760_s4 = sld [smem:[#allocation6 + $0x165]] }
 0x32e   :  { %v2992_v8 = vadd.f32 %v2991_v0, %v8402_v30  ;;  %v3103_v59 = vmul.f32 %v3086_v56, %v8134_v46  ;;  %v3133_v42 = vrot.slane %v3119_v52, %v11141_v7  ;;  %v3134_v19 = vcombine.high %v3126_v18, %v3126_v18  ;;  %11153 = sst [smem:[#allocation19_spill]] %s8737_s28 }
 0x32f   :  { %v3098_v28 = vrot.slane %v3082_v36, %v11142_v14  ;;  %v3104_v21 = vmul.f32 %v3086_v56, %v8136_v6  ;;  %v3105_v26 = vmul.f32 %v3090_v48, %v8134_v46  ;;  %v3106_v20 = vmul.f32 %v3090_v48, %v8136_v6  ;;  %11154 = sst [smem:[#allocation18_spill]] %s8747_s6 }
 0x330   :  { %v3107_v30 = vmul.f32 %v3094_v34, %v8134_v46  ;;  %v3135_v60 = vcombine.high %v3133_v42, %v3133_v42  ;;  %v3139_v51 = vrot.slane %v3126_v18, %v11142_v14  ;;  %v3143_v50 = vrot.slane %v3133_v42, %v11142_v14  ;;  %11155 = sst [smem:[#allocation16_spill]] %s8749_s14  ;;  %s8869_s14 = sld [smem:[#allocation6 + $0x179]] }
 0x331   :  { %v3108_v58 = vmul.f32 %v3094_v34, %v8136_v6  ;;  %v3109_v12 = vmul.f32 %v3098_v28, %v8134_v46  ;;  %v3110_v63 = vmul.f32 %v3098_v28, %v8136_v6  ;;  %v3147_v3 = vrot.slane %v3134_v19, %v11142_v14  ;;  %11156 = sst [smem:[#allocation41_spill]] %s8758_s0 }
 0x332   :  { %v3151_v54 = vrot.slane %v3135_v60, %v11142_v14  ;;  %v3156_v33 = vmul.f32 %v3139_v51, %v8269_v55  ;;  %v3157_v24 = vmul.f32 %v3139_v51, %v8273_v44  ;;  %v3158_v5 = vmul.f32 %v3143_v50, %v8269_v55 }
 0x333   :  { %v3030_v10 = vstv %s8475_s29  ;;  %v3159_v61 = vmul.f32 %v3143_v50, %v8273_v44  ;;  %v3160_v22 = vmul.f32 %v3147_v3, %v8269_v55  ;;  %v3161_v4 = vmul.f32 %v3147_v3, %v8273_v44  ;;  %11157 = sst [smem:[#allocation48_spill]] %s8760_s4  ;;  %s8769_s29 = sld [smem:[#allocation6 + $0x166]] }
 0x334   :  { %v3162_v38 = vmul.f32 %v3151_v54, %v8269_v55  ;;  %v3163_v1 = vmul.f32 %v3151_v54, %v8273_v44  ;;  %v3164_v53 = vadd.f32 %v3156_v33, %v3103_v59  ;;  %v3165_v49 = vadd.f32 %v3157_v24, %v3104_v21 }
 0x335   :  { %v3166_v32 = vadd.f32 %v3158_v5, %v3105_v26  ;;  %v3167_v41 = vadd.f32 %v3159_v61, %v3106_v20  ;;  %v3168_v45 = vadd.f32 %v3160_v22, %v3107_v30  ;;  %v3169_v40 = vadd.f32 %v3161_v4, %v3108_v58 }
 0x336   :  { %v3170_v37 = vadd.f32 %v3162_v38, %v3109_v12  ;;  %v3171_v29 = vadd.f32 %v3163_v1, %v3110_v63  ;;  %v3172_v16 = vmul.f32 0.5, %v3164_v53  ;;  %v3173_v57 = vmul.f32 0.5, %v3165_v49  ;;  %11175 = sst [smem:[#allocation39_spill]] %s8869_s14  ;;  %s8886_s14 = sld [smem:[#allocation6 + $0x148]] }
 0x337   :  { %v3174_v15 = vmul.f32 0.5, %v3166_v32  ;;  %v3175_v0 = vmul.f32 0.5, %v3167_v41  ;;  %v3176_v17 = vmul.f32 0.5, %v3168_v45  ;;  %v3177_v11 = vmul.f32 0.5, %v3169_v40 }
 0x338   :  { %v2951_v47 = vstv %s8497_s1  ;;  %v3004_v56 = vstv %s8499_s27  ;;  %v3178_v52 = vmul.f32 0.5, %v3170_v37  ;;  %v3179_v18 = vmul.f32 0.5, %v3171_v29  ;;  %s8771_s1 = sld [smem:[#allocation6 + $0x167]]  ;;  %s8785_s27 = sld [smem:[#allocation6 + $0x168]] }
 0x339   :  { %v3018_v36 = vadd.f32 %v3017_v23, %v8440_v9  ;;  %v3031_v48 = vadd.f32 %v3030_v10, %v8453_v27  ;;  %v3180_v34 = vmax.f32 %v3172_v16, %v3176_v17  ;;  %v3183_v59 = vmax.f32 %v3173_v57, %v3177_v11  ;;  %11158 = sst [smem:[#allocation45_spill]] %s8769_s29  ;;  %s8994_s29 = sld [smem:[#allocation6 + $0x158]] }
 0x33a   :  { %v8529_v42 = vadd.f32 %v2930_v2, %v8285_v13  ;;  %v3181_v19 = vmax.f32 %v3174_v15, %v3178_v52  ;;  %v3184_v28 = vmax.f32 %v3175_v0, %v3179_v18  ;;  %v8534_v21 = vadd.f32 %v2930_v2, %v8470_v39 }
 0x33b   :  { %v8537_v26 = vadd.f32 %v2951_v47, %v8480_v35  ;;  %v8540_v20 = vadd.f32 %v2951_v47, %v8482_v25  ;;  %v3355_v9 = vrot.slane %v2992_v8, %v11141_v7  ;;  %v3005_v27 = vadd.f32 %v3004_v56, %v8428_v31 }
 0x33c   :  { %v3043_v23 = vstv %s8516_s13  ;;  %v3182_v30 = vmax.f32 %v3180_v34, %v3181_v19  ;;  %v3185_v13 = vmax.f32 %v3183_v59, %v3184_v28  ;;  %v3056_v60 = vstv %s8520_s15  ;;  %s8787_s13 = sld [smem:[#allocation6 + $0x169]]  ;;  %s8798_s15 = sld [smem:[#allocation6 + $0x16a]] }
 0x33d   :  { %v3233_v51 = vrot.slane %v3018_v36, %v11141_v7  ;;  %v8548_v50 = vrot.slane %v3031_v48, %v11141_v7  ;;  %v3356_v2 = vcombine.high %v3355_v9, %v3355_v9  ;;  %v3408_v24 = vrot.slane %v3005_v27, %v11141_v7 }
 0x33e   :  { %v3186_v39 = vsub.f32 %v3172_v16, %v3182_v30  ;;  %v3187_v35 = vsub.f32 %v3173_v57, %v3185_v13  ;;  %v3188_v58 = vsub.f32 %v3174_v15, %v3182_v30  ;;  %v3189_v12 = vsub.f32 %v3175_v0, %v3185_v13  ;;  %11159 = sst [smem:[#allocation55_spill]] %s8771_s1  ;;  %s8867_s1 = sld [smem:[#allocation6 + $0x178]] }
 0x33f   :  { %v3190_v25 = vsub.f32 %v3176_v17, %v3182_v30  ;;  %v3191_v63 = vsub.f32 %v3177_v11, %v3185_v13  ;;  %v3192_v3 = vsub.f32 %v3178_v52, %v3182_v30  ;;  %v3193_v8 = vsub.f32 %v3179_v18, %v3185_v13  ;;  %11160 = sst [smem:[#allocation15_spill]] %s8785_s27 }
 0x340   :  { %v3194_v54 = vmul.f32 1.442695, %v3186_v39  ;;  %v3196_v31 = vmul.f32 1.442695, %v3187_v35  ;;  %v3198_v33 = vmul.f32 1.442695, %v3188_v58  ;;  %v8552_v5 = vadd.f32 %v3043_v23, %v8473_v62 }
 0x341   :  { %v8555_v10 = vadd.f32 %v3056_v60, %v8484_v43  ;;  %v3200_v61 = vmul.f32 1.442695, %v3189_v12  ;;  %v3234_v22 = vcombine.high %v3233_v51, %v3233_v51  ;;  %v3202_v4 = vmul.f32 1.442695, %v3190_v25 }
 0x342   :  { %4873 = vpow2.f32 %v3194_v54  ;;  %v3204_v38 = vmul.f32 1.442695, %v3191_v63  ;;  %v8558_v1 = vrot.slane %v3233_v51, %v11141_v7  ;;  %v3206_v53 = vmul.f32 1.442695, %v3192_v3  ;;  %11161 = sst [smem:[#allocation51_spill]] %s8787_s13 }
 0x343   :  { %4875 = vpow2.f32 %v3196_v31  ;;  %v3363_v49 = vrot.slane %v3355_v9, %v11141_v7  ;;  %v3370_v32 = vrot.slane %v3356_v2, %v11141_v7  ;;  %v3208_v62 = vmul.f32 1.442695, %v3193_v8  ;;  %11162 = sst [smem:[#allocation35_spill]] %s8798_s15  ;;  %s8942_s15 = sld [smem:[#allocation6 + $0x181]] }
 0x344   :  { %4877 = vpow2.f32 %v3198_v33  ;;  %v3409_v41 = vcombine.high %v3408_v24, %v3408_v24  ;;  %v3416_v43 = vrot.slane %v3408_v24, %v11141_v7  ;;  %v8565_v29 = vrot.slane %v3234_v22, %v11141_v7  ;;  %11174 = sst [smem:[#allocation53_spill]] %s8867_s1 }
 0x345   :  { %4879 = vpow2.f32 %v3200_v61  ;;  %v3371_v45 = vcombine.high %v3363_v49, %v3363_v49  ;;  %v3372_v40 = vcombine.high %v3370_v32, %v3370_v32  ;;  %v3376_v37 = vrot.slane %v3363_v49, %v11142_v14  ;;  %s8958_s1 = sld [smem:[#allocation6 + $0x182]] }
 0x346   :  { %4881 = vpow2.f32 %v3202_v4  ;;  %v3380_v16 = vrot.slane %v3370_v32, %v11142_v14  ;;  %v3423_v57 = vrot.slane %v3409_v41, %v11141_v7  ;;  %v3424_v17 = vcombine.high %v3416_v43, %v3416_v43 }
 0x347   :  { %4883 = vpow2.f32 %v3204_v38  ;;  %v3384_v15 = vrot.slane %v3371_v45, %v11142_v14  ;;  %v3388_v0 = vrot.slane %v3372_v40, %v11142_v14  ;;  %v3249_v11 = vcombine.high %v8558_v1, %v8558_v1 }
 0x348   :  { %4885 = vpow2.f32 %v3206_v53  ;;  %v3250_v47 = vcombine.high %v8565_v29, %v8565_v29  ;;  %v3393_v56 = vmul.f32 %v3376_v37, %v8529_v42  ;;  %v3394_v52 = vmul.f32 %v3376_v37, %v8534_v21 }
 0x349   :  { %4887 = vpow2.f32 %v3208_v62  ;;  %v3395_v18 = vmul.f32 %v3380_v16, %v8529_v42  ;;  %v3396_v36 = vmul.f32 %v3380_v16, %v8534_v21  ;;  %v3397_v48 = vmul.f32 %v3384_v15, %v8529_v42  ;;  %11188 = sst [smem:[#allocation20_spill]] %s8942_s15 }
 0x34a   :  { %v3425_v34 = vcombine.high %v3423_v57, %v3423_v57  ;;  %v3429_v59 = vrot.slane %v3416_v43, %v11142_v14  ;;  %v3433_v19 = vrot.slane %v3423_v57, %v11142_v14  ;;  %v3398_v28 = vmul.f32 %v3384_v15, %v8534_v21 }
 0x34b   :  { %v3399_v9 = vmul.f32 %v3388_v0, %v8529_v42  ;;  %v3400_v27 = vmul.f32 %v3388_v0, %v8534_v21  ;;  %v3437_v23 = vrot.slane %v3424_v17, %v11142_v14  ;;  %v3295_v35 = vcombine.high %v8548_v50, %v8548_v50  ;;  %11192 = sst [smem:[#allocation30_spill]] %s8958_s1 }
 0x34c   :  { %v8586_v30 = vpop.eup %4873  ;;  %v3441_v13 = vrot.slane %v3425_v34, %v11142_v14  ;;  %v3446_v60 = vmul.f32 %v3429_v59, %v8537_v26  ;;  %v3447_v51 = vmul.f32 %v3429_v59, %v8540_v20  ;;  %v3448_v2 = vmul.f32 %v3433_v19, %v8537_v26 }
 0x34d   :  { %v8592_v39 = vpop.eup %4875  ;;  %v3449_v58 = vmul.f32 %v3433_v19, %v8540_v20  ;;  %v3450_v12 = vmul.f32 %v3437_v23, %v8537_v26  ;;  %v3451_v25 = vmul.f32 %v3437_v23, %v8540_v20 }
 0x34e   :  { %v8599_v63 = vpop.eup %4877  ;;  %v3452_v3 = vmul.f32 %v3441_v13, %v8537_v26  ;;  %v3453_v8 = vmul.f32 %v3441_v13, %v8540_v20  ;;  %v3454_v54 = vadd.f32 %v3446_v60, %v3393_v56  ;;  %v3455_v31 = vadd.f32 %v3447_v51, %v3394_v52 }
 0x34f   :  { %v8603_v33 = vpop.eup %4879  ;;  %v3210_v24 = vadd.f32 %v8599_v63, %v8586_v30  ;;  %v3456_v61 = vadd.f32 %v3448_v2, %v3395_v18  ;;  %v3457_v22 = vadd.f32 %v3449_v58, %v3396_v36  ;;  %v3458_v4 = vadd.f32 %v3450_v12, %v3397_v48 }
 0x350   :  { %v8607_v38 = vpop.eup %4881  ;;  %v3213_v53 = vadd.f32 %v8603_v33, %v8592_v39  ;;  %v3459_v49 = vadd.f32 %v3451_v25, %v3398_v28  ;;  %v3460_v32 = vadd.f32 %v3452_v3, %v3399_v9  ;;  %v3461_v62 = vadd.f32 %v3453_v8, %v3400_v27 }
 0x351   :  { %v8611_v41 = vpop.eup %4883  ;;  %v3211_v43 = vadd.f32 %v8607_v38, %v3210_v24  ;;  %v3462_v45 = vmul.f32 0.5, %v3454_v54  ;;  %v3463_v40 = vmul.f32 0.5, %v3455_v31  ;;  %v3464_v37 = vmul.f32 0.5, %v3456_v61 }
 0x352   :  { %v8614_v16 = vpop.eup %4885  ;;  %v3214_v57 = vadd.f32 %v8611_v41, %v3213_v53  ;;  %v3465_v15 = vmul.f32 0.5, %v3457_v22  ;;  %v3466_v0 = vmul.f32 0.5, %v3458_v4  ;;  %v3467_v17 = vmul.f32 0.5, %v3459_v49 }
 0x353   :  { %v8617_v56 = vpop.eup %4887  ;;  %v3212_v52 = vadd.f32 %v8614_v16, %v3211_v43  ;;  %v3302_v18 = vrot.slane %v8548_v50, %v11141_v7  ;;  %v3468_v36 = vmul.f32 0.5, %v3460_v32  ;;  %v3469_v48 = vmul.f32 0.5, %v3461_v62 }
 0x354   :  { %v3215_v34 = vadd.f32 %v8617_v56, %v3214_v57  ;;  %v3470_v59 = vmax.f32 %v3462_v45, %v3466_v0  ;;  %v3473_v19 = vmax.f32 %v3463_v40, %v3467_v17  ;;  %v3523_v28 = vrot.slane %v8552_v5, %v11141_v7 }
 0x355   :  { %4889 = vrcp.f32 %v3212_v52  ;;  %v3254_v9 = vrot.slane %v8558_v1, %v11142_v14  ;;  %v3471_v27 = vmax.f32 %v3464_v37, %v3468_v36  ;;  %v3474_v23 = vmax.f32 %v3465_v15, %v3469_v48 }
 0x356   :  { %4891 = vrcp.f32 %v3215_v34  ;;  %v3258_v50 = vrot.slane %v8565_v29, %v11142_v14  ;;  %v3262_v13 = vrot.slane %v3249_v11, %v11142_v14  ;;  %v3309_v5 = vrot.slane %v3295_v35, %v11141_v7 }
 0x357   :  { %v3266_v60 = vrot.slane %v3250_v47, %v11142_v14  ;;  %v3472_v51 = vmax.f32 %v3470_v59, %v3471_v27  ;;  %v3475_v2 = vmax.f32 %v3473_v19, %v3474_v23  ;;  %v8644_v58 = vrot.slane %v8555_v10, %v11141_v7 }
 0x358   :  { %v3310_v12 = vcombine.high %v3302_v18, %v3302_v18  ;;  %v3311_v25 = vcombine.high %v3309_v5, %v3309_v5  ;;  %v3524_v3 = vcombine.high %v3523_v28, %v3523_v28  ;;  %v8647_v8 = vrot.slane %v3523_v28, %v11141_v7 }
 0x359   :  { %v3476_v1 = vsub.f32 %v3462_v45, %v3472_v51  ;;  %v3477_v11 = vsub.f32 %v3463_v40, %v3475_v2  ;;  %v3478_v35 = vsub.f32 %v3464_v37, %v3472_v51  ;;  %v3479_v54 = vsub.f32 %v3465_v15, %v3475_v2 }
 0x35a   :  { %v3480_v31 = vsub.f32 %v3466_v0, %v3472_v51  ;;  %v3481_v29 = vsub.f32 %v3467_v17, %v3475_v2  ;;  %v3482_v47 = vsub.f32 %v3468_v36, %v3472_v51  ;;  %v3483_v24 = vsub.f32 %v3469_v48, %v3475_v2 }
 0x35b   :  { %v3315_v61 = vrot.slane %v3302_v18, %v11142_v14  ;;  %v3484_v10 = vmul.f32 1.442695, %v3476_v1  ;;  %v3486_v22 = vmul.f32 1.442695, %v3477_v11  ;;  %v3488_v4 = vmul.f32 1.442695, %v3478_v35 }
 0x35c   :  { %v3319_v53 = vrot.slane %v3309_v5, %v11142_v14  ;;  %v3323_v49 = vrot.slane %v3310_v12, %v11142_v14  ;;  %v3327_v32 = vrot.slane %v3311_v25, %v11142_v14  ;;  %v8654_v62 = vrot.slane %v3524_v3, %v11141_v7 }
 0x35d   :  { %4893 = vpow2.f32 %v3484_v10  ;;  %v3539_v43 = vcombine.high %v8647_v8, %v8647_v8  ;;  %v3585_v45 = vcombine.high %v8644_v58, %v8644_v58  ;;  %v3638_v40 = vstv %s8625_s20  ;;  %s8800_s20 = sld [smem:[#allocation6 + $0x16b]] }
 0x35e   :  { %4895 = vpow2.f32 %v3486_v22  ;;  %v3490_v37 = vmul.f32 1.442695, %v3479_v54  ;;  %v3492_v57 = vmul.f32 1.442695, %v3480_v31  ;;  %v3641_v15 = vstv %s8629_s5  ;;  %s8809_s5 = sld [smem:[#allocation6 + $0x16c]] }
 0x35f   :  { %v4890_v0 = vpop.eup %4889  ;;  %4897 = vpow2.f32 %v3488_v4  ;;  %v3494_v17 = vmul.f32 1.442695, %v3481_v29  ;;  %v3496_v52 = vmul.f32 1.442695, %v3482_v47  ;;  %v8664_v18 = vmul.f32 1.442695, %v3483_v24 }
 0x360   :  { %v4892_v36 = vpop.eup %4891  ;;  %v3218_v48 = vmul.f32 %v4890_v0, %v8586_v30  ;;  %v3220_v34 = vmul.f32 %v4890_v0, %v8599_v63  ;;  %v3222_v59 = vmul.f32 %v4890_v0, %v8607_v38  ;;  %v3224_v19 = vmul.f32 %v4890_v0, %v8614_v16 }
 0x361   :  { %v3219_v28 = vmul.f32 %v4892_v36, %v8592_v39  ;;  %v3221_v27 = vmul.f32 %v4892_v36, %v8603_v33  ;;  %v3223_v23 = vmul.f32 %v4892_v36, %v8611_v41  ;;  %v3225_v5 = vmul.f32 %v4892_v36, %v8617_v56 }
 0x362   :  { %v3271_v51 = vmul.f32 %v3254_v9, %v3218_v48  ;;  %v3273_v2 = vmul.f32 %v3258_v50, %v3220_v34  ;;  %v3275_v12 = vmul.f32 %v3262_v13, %v3222_v59  ;;  %v3277_v30 = vmul.f32 %v3266_v60, %v3224_v19 }
 0x363   :  { %v3272_v63 = vmul.f32 %v3254_v9, %v3219_v28  ;;  %v3274_v38 = vmul.f32 %v3258_v50, %v3221_v27  ;;  %v3276_v25 = vmul.f32 %v3262_v13, %v3223_v23  ;;  %v3278_v16 = vmul.f32 %v3266_v60, %v3225_v5  ;;  %11163 = sst [smem:[#allocation43_spill]] %s8800_s20  ;;  %s8840_s20 = sld [smem:[#allocation6 + $0x173]] }
 0x364   :  { %v3279_v3 = vadd.f32 %v3273_v2, %v3271_v51  ;;  %v3332_v1 = vmul.f32 %v3315_v61, %v3218_v48  ;;  %v3333_v11 = vmul.f32 %v3315_v61, %v3219_v28  ;;  %v3334_v39 = vmul.f32 %v3319_v53, %v3220_v34  ;;  %11164 = sst [smem:[#allocation59_spill]] %s8809_s5 }
 0x365   :  { %v3282_v35 = vadd.f32 %v3274_v38, %v3272_v63  ;;  %v3335_v33 = vmul.f32 %v3319_v53, %v3221_v27  ;;  %v3336_v41 = vmul.f32 %v3323_v49, %v3222_v59  ;;  %v3337_v54 = vmul.f32 %v3323_v49, %v3223_v23 }
 0x366   :  { %v3280_v56 = vadd.f32 %v3279_v3, %v3275_v12  ;;  %v3338_v31 = vmul.f32 %v3327_v32, %v3224_v19  ;;  %v3339_v9 = vmul.f32 %v3327_v32, %v3225_v5  ;;  %v3340_v50 = vadd.f32 %v3334_v39, %v3332_v1 }
 0x367   :  { %v8684_v13 = vpop.eup %4893  ;;  %v3283_v60 = vadd.f32 %v3282_v35, %v3276_v25  ;;  %v3343_v29 = vadd.f32 %v3335_v33, %v3333_v11  ;;  %4899 = vpow2.f32 %v3490_v37  ;;  %v3659_v47 = vstv %s8661_s3  ;;  %s8811_s3 = sld [smem:[#allocation6 + $0x16d]] }
 0x368   :  { %v8691_v24 = vpop.eup %4895  ;;  %v3281_v61 = vadd.f32 %v3280_v56, %v3277_v30  ;;  %v3341_v10 = vadd.f32 %v3340_v50, %v3336_v41  ;;  %4901 = vpow2.f32 %v3492_v57  ;;  %v3662_v22 = vstv %s8666_s19  ;;  %s8818_s19 = sld [smem:[#allocation6 + $0x16e]] }
 0x369   :  { %v8698_v4 = vpop.eup %4897  ;;  %v3284_v53 = vadd.f32 %v3283_v60, %v3278_v16  ;;  %v3344_v49 = vadd.f32 %v3343_v29, %v3337_v54  ;;  %4903 = vpow2.f32 %v3494_v17  ;;  %v3680_v32 = vstv %s8672_s10  ;;  %s8820_s10 = sld [smem:[#allocation6 + $0x170]]  ;;  %11171 = sst [smem:[#allocation57_spill]] %s8840_s20 }
 0x36a   :  { %v8710_v37 = vadd.f32 %v3281_v61, %v8134_v46  ;;  %v3342_v57 = vadd.f32 %v3341_v10, %v3338_v31  ;;  %4905 = vpow2.f32 %v3496_v52  ;;  %v3500_v0 = vadd.f32 %v8698_v4, %v8684_v13  ;;  %s8858_s20 = sld [smem:[#allocation6 + $0x175]] }
 0x36b   :  { %v8719_v17 = vadd.f32 %v3284_v53, %v8136_v6  ;;  %v3345_v36 = vadd.f32 %v3344_v49, %v3339_v9  ;;  %4907 = vpow2.f32 %v8664_v18  ;;  %v3683_v48 = vstv %s8678_s21  ;;  %s8825_s21 = sld [smem:[#allocation6 + $0x16f]] }
 0x36c   :  { %v8728_v46 = vadd.f32 %v3342_v57, %v8269_v55  ;;  %v3639_v52 = vmul.f32 %v3638_v40, %v8710_v37  ;;  %v3660_v34 = vmul.f32 %v3659_v47, %v8710_v37  ;;  %v3681_v6 = vmul.f32 %v3680_v32, %v8710_v37 }
 0x36d   :  { %v8740_v18 = vadd.f32 %v3345_v36, %v8273_v44  ;;  %v3640_v59 = vmul.f32 %v3638_v40, %v8719_v17  ;;  %v3661_v55 = vmul.f32 %v3659_v47, %v8719_v17  ;;  %v3682_v19 = vmul.f32 %v3680_v32, %v8719_v17  ;;  %11165 = sst [smem:[#allocation24_spill]] %s8811_s3 }
 0x36e   :  { %v3540_v28 = vcombine.high %v8654_v62, %v8654_v62  ;;  %v3642_v27 = vmul.f32 %v3641_v15, %v8728_v46  ;;  %v3663_v44 = vmul.f32 %v3662_v22, %v8728_v46  ;;  %v3684_v23 = vmul.f32 %v3683_v48, %v8728_v46  ;;  %11166 = sst [smem:[#allocation28_spill]] %s8818_s19  ;;  %s8940_s19 = sld [smem:[#allocation6 + $0x17d]] }
 0x36f   :  { %v3592_v40 = vrot.slane %v8644_v58, %v11141_v7  ;;  %v3643_v5 = vmul.f32 %v3641_v15, %v8740_v18  ;;  %v3664_v51 = vmul.f32 %v3662_v22, %v8740_v18  ;;  %v3685_v2 = vmul.f32 %v3683_v48, %v8740_v18  ;;  %11167 = sst [smem:[#allocation38_spill]] %s8820_s10  ;;  %s8924_s10 = sld [smem:[#allocation6 + $0x151]] }
 0x370   :  { %v3599_v12 = vrot.slane %v3585_v45, %v11141_v7  ;;  %v8777_v30 = vadd.f32 %v3642_v27, %v3639_v52  ;;  %v8779_v63 = vadd.f32 %v3663_v44, %v3660_v34  ;;  %v8781_v38 = vadd.f32 %v3684_v23, %v3681_v6  ;;  %11173 = sst [smem:[#allocation32_spill]] %s8858_s20  ;;  %s8878_s20 = sld [smem:[#allocation6 + $0x17c]] }
 0x371   :  { %v8783_v15 = vpop.eup %4899  ;;  %v8789_v25 = vadd.f32 %v3643_v5, %v3640_v59  ;;  %v8791_v16 = vadd.f32 %v3664_v51, %v3661_v55  ;;  %v8793_v3 = vadd.f32 %v3685_v2, %v3682_v19  ;;  %v3701_v7 = vstv %s8680_s7  ;;  %11168 = sst [smem:[#allocation17_spill]] %s8825_s21  ;;  %s8827_s7 = sld [smem:[#allocation6 + $0x171]] }
 0x372   :  { %v8796_v58 = vpop.eup %4901  ;;  %v3503_v45 = vadd.f32 %v8783_v15, %v8691_v24  ;;  %v3702_v1 = vmul.f32 %v3701_v7, %v8710_v37  ;;  %v3703_v11 = vmul.f32 %v3701_v7, %v8719_v17  ;;  %v3704_v39 = vstv %s8682_s18  ;;  %s8838_s18 = sld [smem:[#allocation6 + $0x172]]  ;;  %s8856_s21 = sld [smem:[#allocation6 + $0x174]] }
 0x373   :  { %v8807_v35 = vpop.eup %4903  ;;  %v3501_v33 = vadd.f32 %v8796_v58, %v3500_v0  ;;  %v3705_v41 = vmul.f32 %v3704_v39, %v8728_v46  ;;  %v3706_v54 = vmul.f32 %v3704_v39, %v8740_v18  ;;  %v3600_v9 = vcombine.high %v3592_v40, %v3592_v40 }
 0x374   :  { %v8816_v56 = vpop.eup %4905  ;;  %v3504_v31 = vadd.f32 %v8807_v35, %v3503_v45  ;;  %v3601_v50 = vcombine.high %v3599_v12, %v3599_v12  ;;  %v8832_v47 = vrot.slane %v8647_v8, %v11142_v14  ;;  %v8845_v53 = vrot.slane %v8654_v62, %v11142_v14  ;;  %11187 = sst [smem:[#allocation54_spill]] %s8940_s19 }
 0x375   :  { %v8823_v60 = vpop.eup %4907  ;;  %v3502_v29 = vadd.f32 %v8816_v56, %v3501_v33  ;;  %v8834_v61 = vadd.f32 %v3705_v41, %v3702_v1  ;;  %v8836_v10 = vadd.f32 %v3706_v54, %v3703_v11  ;;  %v8851_v49 = vrot.slane %v3539_v43, %v11142_v14 }
 0x376   :  { %v3505_v22 = vadd.f32 %v8823_v60, %v3504_v31  ;;  %v8854_v32 = vrot.slane %v3540_v28, %v11142_v14  ;;  %v8861_v62 = vrot.slane %v3592_v40, %v11142_v14  ;;  %v8864_v8 = vrot.slane %v3599_v12, %v11142_v14  ;;  %11176 = sst [smem:[#allocation36_spill]] %s8878_s20  ;;  %s8974_s20 = sld [smem:[#allocation6 + $0x183]] }
 0x377   :  { %11169 = sst [smem:[#allocation22_spill]] %s8827_s7  ;;  %4909 = vrcp.f32 %v3502_v29  ;;  %v3646_v43 = vstv %s8686_s22  ;;  %v8872_v57 = vrot.slane %v3600_v9, %v11142_v14  ;;  %v8875_v0 = vrot.slane %v3601_v50, %v11142_v14  ;;  %s8880_s22 = sld [smem:[#allocation6 + $0x180]] }
 0x378   :  { %11170 = sst [smem:[#allocation42_spill]] %s8838_s18  ;;  %4911 = vrcp.f32 %v3505_v22  ;;  %v3651_v36 = vstv %s8700_s26  ;;  %v3656_v48 = vstv %s8714_s11  ;;  %v3667_v52 = vstv %s8688_s9  ;;  %s8892_s26 = sld [smem:[#allocation6 + $0x149]] }
 0x379   :  { %11172 = sst [smem:[#allocation29_spill]] %s8856_s21  ;;  %v3672_v34 = vstv %s8702_s23  ;;  %v3677_v6 = vstv %s8716_s8  ;;  %v3688_v14 = vstv %s8693_s25  ;;  %v3693_v59 = vstv %s8705_s30  ;;  %s8900_s8 = sld [smem:[#allocation6 + $0x14b]] }
 0x37a   :  { %v3698_v55 = vstv %s8723_s16  ;;  %v3709_v19 = vstv %s8695_s17  ;;  %v3714_v28 = vstv %s8707_s12  ;;  %v3719_v27 = vstv %s8725_s2  ;;  %s8902_s11 = sld [smem:[#allocation6 + $0x14c]]  ;;  %s8908_s17 = sld [smem:[#allocation6 + $0x14d]] }
 0x37b   :  { %v3770_v44 = vstv %s8735_s24  ;;  %v3773_v23 = vstv %s8758_s0  ;;  %v3778_v40 = vstv %s8785_s27  ;;  %v3783_v5 = vstv %s8809_s5  ;;  %s8910_s2 = sld [smem:[#allocation6 + $0x14e]]  ;;  %s8918_s5 = sld [smem:[#allocation6 + $0x150]] }
 0x37c   :  { %v3791_v2 = vstv %s8737_s28  ;;  %v3794_v12 = vstv %s8760_s4  ;;  %v3799_v7 = vstv %s8787_s13  ;;  %v3804_v45 = vstv %s8811_s3  ;;  %s8926_s4 = sld [smem:[#allocation6 + $0x152]]  ;;  %s8932_s13 = sld [smem:[#allocation6 + $0x153]] }
 0x37d   :  { %11177 = sst [smem:[#allocation60_spill]] %s8880_s22  ;;  %s8894_s22 = sld [smem:[#allocation6 + $0x14a]] }
 0x37e   :  { %s8934_s27 = sld [smem:[#allocation6 + $0x154]]  ;;  %s8948_s18 = sld [smem:[#allocation6 + $0x176]] }
 0x37f   :  { %11178 = sst [smem:[#allocation70_spill]] %s8900_s8  ;;  %s8916_s8 = sld [smem:[#allocation6 + $0x14f]] }
 0x380   :  { %s8950_s24 = sld [smem:[#allocation6 + $0x17a]]  ;;  %s8956_s30 = sld [smem:[#allocation6 + $0x17e]] }
 0x381   :  { %v4910_v41 = vpop.eup %4909  ;;  %s8964_s7 = sld [smem:[#allocation6 + $0x177]]  ;;  %s8966_s3 = sld [smem:[#allocation6 + $0x17b]] }
 0x382   :  { %v4912_v31 = vpop.eup %4911  ;;  %v3508_v50 = vmul.f32 %v4910_v41, %v8684_v13  ;;  %v3510_v22 = vmul.f32 %v4910_v41, %v8698_v4  ;;  %v3512_v51 = vmul.f32 %v4910_v41, %v8796_v58  ;;  %v3514_v1 = vmul.f32 %v4910_v41, %v8816_v56  ;;  %s8972_s28 = sld [smem:[#allocation6 + $0x17f]]  ;;  %11196 = sst [smem:[#allocation78_spill]] %s8974_s20 }
 0x383   :  { %v3509_v54 = vmul.f32 %v4912_v31, %v8691_v24  ;;  %v3511_v11 = vmul.f32 %v4912_v31, %v8783_v15  ;;  %v3513_v39 = vmul.f32 %v4912_v31, %v8807_v35  ;;  %v3515_v33 = vmul.f32 %v4912_v31, %v8823_v60  ;;  %s8980_s21 = sld [smem:[#allocation6 + $0x155]]  ;;  %s8982_s0 = sld [smem:[#allocation6 + $0x156]] }
 0x384   :  { %11189 = sst [smem:[#allocation74_spill]] %s8948_s18  ;;  %v3561_v13 = vmul.f32 %v8832_v47, %v3508_v50  ;;  %v3563_v4 = vmul.f32 %v8845_v53, %v3510_v22  ;;  %v3565_v58 = vmul.f32 %v8851_v49, %v3512_v51  ;;  %v3567_v56 = vmul.f32 %v8854_v32, %v3514_v1  ;;  %s8987_s12 = sld [smem:[#allocation6 + $0x157]] }
 0x385   :  { %v3562_v24 = vmul.f32 %v8832_v47, %v3509_v54  ;;  %v3564_v15 = vmul.f32 %v8845_v53, %v3511_v11  ;;  %v3566_v35 = vmul.f32 %v8851_v49, %v3513_v39  ;;  %v3568_v60 = vmul.f32 %v8854_v32, %v3515_v33  ;;  %s3739_s6 = smul.f32 %s8918_s5, %s8892_s26 }
 0x386   :  { %11190 = sst [smem:[#allocation21_spill]] %s8950_s24  ;;  %v3569_v41 = vadd.f32 %v3563_v4, %v3561_v13  ;;  %v3622_v31 = vmul.f32 %v8861_v62, %v3508_v50  ;;  %v3623_v29 = vmul.f32 %v8861_v62, %v3509_v54  ;;  %v3624_v9 = vmul.f32 %v8864_v8, %v3510_v22  ;;  %s11201_s16 = smul.f32 %s8902_s11, %s8886_s14 }
 0x387   :  { %11191 = sst [smem:[#allocation71_spill]] %s8956_s30  ;;  %v3572_v47 = vadd.f32 %v3564_v15, %v3562_v24  ;;  %v3625_v53 = vmul.f32 %v8864_v8, %v3511_v11  ;;  %v3626_v49 = vmul.f32 %v8872_v57, %v3512_v51  ;;  %v3627_v32 = vmul.f32 %v8872_v57, %v3513_v39  ;;  %s3763_s11 = smul.f32 %s8932_s13, %s8892_s26 }
 0x388   :  { %11193 = sst [smem:[#allocation34_spill]] %s8964_s7  ;;  %v3570_v62 = vadd.f32 %v3569_v41, %v3565_v58  ;;  %v3628_v54 = vmul.f32 %v8875_v0, %v3514_v1  ;;  %v3629_v50 = vmul.f32 %v8875_v0, %v3515_v33  ;;  %v3630_v22 = vadd.f32 %v3624_v9, %v3622_v31  ;;  %s11206_s9 = smul.f32 %s8908_s17, %s8886_s14 }
 0x389   :  { %11194 = sst [smem:[#allocation61_spill]] %s8966_s3  ;;  %v3573_v8 = vadd.f32 %v3572_v47, %v3566_v35  ;;  %v3633_v57 = vadd.f32 %v3625_v53, %v3623_v29  ;;  %v3883_v51 = vstv %s8940_s19  ;;  %v3888_v11 = vstv %s8942_s15  ;;  %s9018_s19 = sld [smem:[#allocation6 + $0x15c]] }
 0x38a   :  { %11195 = sst [smem:[#allocation25_spill]] %s8972_s28  ;;  %v3571_v1 = vadd.f32 %v3570_v62, %v3567_v56  ;;  %v3631_v0 = vadd.f32 %v3630_v22, %v3626_v49  ;;  %v3896_v39 = vstv %s8948_s18  ;;  %v3899_v33 = vstv %s8950_s24  ;;  %s9037_s18 = sld [smem:[#allocation6 + $0x15d]] }
 0x38b   :  { %11197 = sst [smem:[#allocation75_spill]] %s8982_s0  ;;  %s9006_s0 = sld [smem:[#allocation6 + $0x15a]]  ;;  %v3574_v9 = vadd.f32 %v3573_v8, %v3568_v60  ;;  %v3634_v29 = vadd.f32 %v3633_v57, %v3627_v32  ;;  %v3904_v13 = vstv %s8956_s30  ;;  %v3909_v4 = vstv %s8958_s1 }
 0x38c   :  { %11198 = sst [smem:[#allocation27_spill]] %s8987_s12  ;;  %s9000_s12 = sld [smem:[#allocation6 + $0x159]]  ;;  %v9021_v58 = vadd.f32 %v3571_v1, %v8529_v42  ;;  %v3632_v56 = vadd.f32 %v3631_v0, %v3628_v54  ;;  %v3917_v24 = vstv %s8964_s7  ;;  %v3920_v15 = vstv %s8966_s3 }
 0x38d   :  { %v9028_v35 = vadd.f32 %v3574_v9, %v8534_v21  ;;  %v3635_v60 = vadd.f32 %v3634_v29, %v3629_v50  ;;  %s3740_s1 = sadd.f32 %s3739_s6, %s11201_s16  ;;  %v3925_v42 = vstv %s8972_s28  ;;  %v3930_v41 = vstv %s8974_s20  ;;  %s9053_s16 = sld [smem:[#allocation6 + $0x15e]] }
 0x38e   :  { %v9040_v21 = vadd.f32 %v3632_v56, %v8537_v26  ;;  %v3647_v31 = vmul.f32 %v3646_v43, %v9021_v58  ;;  %v3668_v47 = vmul.f32 %v3667_v52, %v9021_v58  ;;  %v3689_v53 = vmul.f32 %v3688_v14, %v9021_v58  ;;  %s11204_s6 = sld [smem:[#allocation70_spill]]  ;;  %s11205_s15 = sld [smem:[#allocation75_spill]] }
 0x38f   :  { %v9056_v26 = vadd.f32 %v3635_v60, %v8540_v20  ;;  %v3648_v49 = vmul.f32 %v3646_v43, %v9028_v35  ;;  %v3669_v32 = vmul.f32 %v3667_v52, %v9028_v35  ;;  %v3690_v62 = vmul.f32 %v3688_v14, %v9028_v35  ;;  %s11207_s25 = smul.f32 %s8924_s10, %s8892_s26  ;;  %s11209_s20 = sld [smem:[#allocation27_spill]] }
 0x390   :  { %v3649_v54 = vadd.f32 %v3647_v31, %v8777_v30  ;;  %v3652_v20 = vmul.f32 %v3651_v36, %v9040_v21  ;;  %v3670_v43 = vadd.f32 %v3668_v47, %v8779_v63  ;;  %v3673_v52 = vmul.f32 %v3672_v34, %v9040_v21  ;;  %s3749_s5 = smul.f32 %s8980_s21, %s8894_s22  ;;  %s11277_s13 = sld [smem:[#allocation42_spill]] }
 0x391   :  { %s3748_s30 = sadd.f32 %s11207_s25, %s11206_s9  ;;  %v3650_v30 = vadd.f32 %v3648_v49, %v8789_v25  ;;  %v3653_v14 = vmul.f32 %v3651_v36, %v9056_v26  ;;  %v3671_v63 = vadd.f32 %v3669_v32, %v8791_v16  ;;  %v3674_v50 = vmul.f32 %v3672_v34, %v9056_v26  ;;  %s11211_s17 = smul.f32 %s8934_s27, %s8894_s22 }
 0x392   :  { %11199 = sst [smem:[#allocation72_spill]] %s9000_s12  ;;  %v3654_v25 = vadd.f32 %v3652_v20, %v3649_v54  ;;  %v3675_v22 = vadd.f32 %v3673_v52, %v3670_v43  ;;  %v3691_v36 = vadd.f32 %v3689_v53, %v8781_v38  ;;  %v3692_v8 = vadd.f32 %v3690_v62, %v8793_v3  ;;  %s11215_s3 = smul.f32 %s8910_s2, %s8886_s14 }
 0x393   :  { %s9012_s12 = sld [smem:[#allocation6 + $0x15b]]  ;;  %11203 = sst [smem:[#allocation79_spill]] %s9053_s16  ;;  %v3655_v16 = vadd.f32 %v3653_v14, %v3650_v30  ;;  %v3676_v34 = vadd.f32 %v3674_v50, %v3671_v63  ;;  %v3694_v57 = vmul.f32 %v3693_v59, %v9040_v21  ;;  %v3695_v1 = vmul.f32 %v3693_v59, %v9056_v26 }
 0x394   :  { %s3742_s9 = sadd.f32 %s11211_s17, %s3740_s1  ;;  %s3743_s25 = smul.f32 %s8994_s29, %s11204_s6  ;;  %v3657_v38 = vadd.f32 %v3656_v48, %v3654_v25  ;;  %v3678_v3 = vadd.f32 %v3677_v6, %v3675_v22  ;;  %v3710_v0 = vmul.f32 %v3709_v19, %v9021_v58  ;;  %v3711_v9 = vmul.f32 %v3709_v19, %v9028_v35 }
 0x395   :  { %s11214_s24 = sld [smem:[#allocation72_spill]]  ;;  %s11216_s7 = smul.f32 %s8926_s4, %s8892_s26  ;;  %v3658_v59 = vadd.f32 %v3656_v48, %v3655_v16  ;;  %v3679_v29 = vadd.f32 %v3677_v6, %v3676_v34  ;;  %v3696_v56 = vadd.f32 %v3694_v57, %v3691_v36  ;;  %v3697_v60 = vadd.f32 %v3695_v1, %v3692_v8 }
 0x396   :  { %s3757_s16 = smul.f32 %s11205_s15, %s8894_s22  ;;  %s3750_s2 = sadd.f32 %s3749_s5, %s3748_s30  ;;  %v3712_v31 = vadd.f32 %v3710_v0, %v8834_v61  ;;  %v3713_v47 = vadd.f32 %v3711_v9, %v8836_v10  ;;  %v3715_v19 = vmul.f32 %v3714_v28, %v9040_v21  ;;  %v3716_v53 = vmul.f32 %v3714_v28, %v9056_v26 }
 0x397   :  { %s3756_s23 = sadd.f32 %s11216_s7, %s11215_s3  ;;  %s11217_s29 = smul.f32 %s8916_s8, %s8886_s14  ;;  %v3699_v48 = vadd.f32 %v3698_v55, %v3696_v56  ;;  %v3700_v6 = vadd.f32 %v3698_v55, %v3697_v60  ;;  %v3722_v49 = vmax.f32 %v3657_v38, 0.0  ;;  %v3723_v32 = vmax.f32 %v3658_v59, 0.0 }
 0x398   :  { %s3765_s17 = smul.f32 %s11209_s20, %s8894_s22  ;;  %s9131_s14 = sld [smem:[#allocation6 + $0x15f]]  ;;  %v3717_v61 = vadd.f32 %v3715_v19, %v3712_v31  ;;  %v3718_v10 = vadd.f32 %v3716_v53, %v3713_v47  ;;  %v3726_v62 = vmax.f32 %v3678_v3, 0.0  ;;  %v3727_v54 = vmax.f32 %v3679_v29, 0.0 }
 0x399   :  { %s3764_s1 = sadd.f32 %s3763_s11, %s11217_s29  ;;  %s3759_s28 = smul.f32 %s9006_s0, %s11204_s6  ;;  %v9154_v28 = vadd.f32 %v3722_v49, %v8710_v37  ;;  %v9157_v20 = vadd.f32 %v3723_v32, %v8719_v17  ;;  %v3730_v55 = vmax.f32 %v3699_v48, 0.0  ;;  %v3731_v43 = vmax.f32 %v3700_v6, 0.0 }
 0x39a   :  { %s3744_s22 = sadd.f32 %s3743_s25, %s3742_s9  ;;  %s3767_s3 = smul.f32 %s9012_s12, %s11204_s6  ;;  %v3720_v52 = vadd.f32 %v3719_v27, %v3717_v61  ;;  %v3721_v30 = vadd.f32 %v3719_v27, %v3718_v10  ;;  %v9167_v37 = vadd.f32 %v3726_v62, %v8728_v46  ;;  %v9170_v17 = vadd.f32 %v3727_v54, %v8740_v18 }
 0x39b   :  { %s3751_s8 = smul.f32 %s11214_s24, %s11204_s6  ;;  %s3758_s30 = sadd.f32 %s3757_s16, %s3756_s23  ;;  %v9173_v14 = vadd.f32 %v3730_v55, %v9021_v58  ;;  %v9176_v63 = vadd.f32 %v3731_v43, %v9028_v35  ;;  %v3771_v27 = vmul.f32 %v3770_v44, %v9154_v28  ;;  %v3772_v46 = vmul.f32 %v3770_v44, %v9157_v20 }
 0x39c   :  { %s3766_s20 = sadd.f32 %s3765_s17, %s3764_s1  ;;  %v3734_v50 = vmax.f32 %v3720_v52, 0.0  ;;  %v3735_v18 = vmax.f32 %v3721_v30, 0.0  ;;  %v3774_v58 = vmul.f32 %v3773_v23, %v9167_v37  ;;  %v3775_v35 = vmul.f32 %v3773_v23, %v9170_v17  ;;  %s11230_s23 = sld [smem:[#allocation18_spill]] }
 0x39d   :  { %s3752_s5 = sadd.f32 %s3751_s8, %s3750_s2  ;;  %v3779_v25 = vmul.f32 %v3778_v40, %v9173_v14  ;;  %v3780_v44 = vmul.f32 %v3778_v40, %v9176_v63  ;;  %v3792_v22 = vmul.f32 %v3791_v2, %v9154_v28  ;;  %v3793_v36 = vmul.f32 %v3791_v2, %v9157_v20  ;;  %s11231_s1 = sld [smem:[#allocation45_spill]] }
 0x39e   :  { %s9160_s11 = sadd.f32 %s9018_s19, %s3744_s22  ;;  %s11225_s19 = sld [smem:[#allocation79_spill]]  ;;  %v9206_v8 = vadd.f32 %v3734_v50, %v9040_v21  ;;  %v9209_v23 = vadd.f32 %v3735_v18, %v9056_v26  ;;  %v3776_v16 = vadd.f32 %v3774_v58, %v3771_v27  ;;  %v3777_v40 = vadd.f32 %v3775_v35, %v3772_v46 }
 0x39f   :  { %s3760_s6 = sadd.f32 %s3759_s28, %s3758_s30  ;;  %v3795_v34 = vmul.f32 %v3794_v12, %v9167_v37  ;;  %v3796_v2 = vmul.f32 %v3794_v12, %v9170_v17  ;;  %v3800_v21 = vmul.f32 %v3799_v7, %v9173_v14  ;;  %v3801_v26 = vmul.f32 %v3799_v7, %v9176_v63  ;;  %s11232_s27 = sld [smem:[#allocation35_spill]] }
 0x3a0   :  { %s3768_s15 = sadd.f32 %s3767_s3, %s3766_s20  ;;  %s3938_s29 = smul.f32 0.5, %s9160_s11  ;;  %v3781_v57 = vadd.f32 %v3779_v25, %v3776_v16  ;;  %v3782_v1 = vadd.f32 %v3780_v44, %v3777_v40  ;;  %v3784_v38 = vmul.f32 %v3783_v5, %v9206_v8  ;;  %v3785_v12 = vmul.f32 %v3783_v5, %v9209_v23 }
 0x3a1   :  { %s9185_s9 = sadd.f32 %s9037_s18, %s3752_s5  ;;  %v3797_v3 = vadd.f32 %v3795_v34, %v3792_v22  ;;  %v3798_v0 = vadd.f32 %v3796_v2, %v3793_v36  ;;  %v3805_v7 = vmul.f32 %v3804_v45, %v9206_v8  ;;  %v3806_v9 = vmul.f32 %v3804_v45, %v9209_v23  ;;  %s11235_s26 = sld [smem:[#allocation28_spill]] }
 0x3a2   :  { %s9215_s24 = sadd.f32 %s9131_s14, %s3768_s15  ;;  %v3786_v59 = vadd.f32 %v3784_v38, %v3781_v57  ;;  %v3787_v29 = vadd.f32 %v3785_v12, %v3782_v1  ;;  %v11233_v56 = vstv %s11230_s23  ;;  %s11236_s8 = sld [smem:[#allocation16_spill]]  ;;  %v9263_v62 = vstv %s3938_s29 }
 0x3a3   :  { %s3942_s17 = smul.f32 0.5, %s9185_s9  ;;  %v3813_v60 = vmul.f32 %v11233_v56, %v9154_v28  ;;  %v11234_v31 = vmov %v11233_v56  ;;  %v3802_v47 = vadd.f32 %v3800_v21, %v3797_v3  ;;  %v3803_v19 = vadd.f32 %v3801_v26, %v3798_v0  ;;  %s11241_s22 = sld [smem:[#allocation55_spill]] }
 0x3a4   :  { %s9212_s18 = sadd.f32 %s11225_s19, %s3760_s6  ;;  %v3814_v5 = vmul.f32 %v11234_v31, %v9157_v20  ;;  %v11237_v53 = vstv %s11231_s1  ;;  %s3997_s14 = smul.f32 0.5, %s9215_s24 }
 0x3a5   :  { %v3816_v48 = vmul.f32 %v11237_v53, %v9167_v37  ;;  %v11238_v45 = vmov %v11237_v53  ;;  %v11239_v49 = vstv %s11232_s27  ;;  %s11242_s30 = sld [smem:[#allocation43_spill]]  ;;  %v9265_v54 = vstv %s3942_s17  ;;  %s11243_s28 = sld [smem:[#allocation17_spill]] }
 0x3a6   :  { %s3993_s2 = smul.f32 0.5, %s9212_s18  ;;  %v3817_v6 = vmul.f32 %v11238_v45, %v9170_v17  ;;  %v3821_v32 = vmul.f32 %v11239_v49, %v9173_v14  ;;  %v11240_v61 = vmov %v11239_v49  ;;  %v3807_v55 = vadd.f32 %v3805_v7, %v3802_v47  ;;  %s11248_s4 = sld [smem:[#allocation29_spill]] }
 0x3a7   :  { %v3822_v10 = vmul.f32 %v11240_v61, %v9176_v63  ;;  %v3808_v43 = vadd.f32 %v3806_v9, %v3803_v19  ;;  %v3818_v52 = vadd.f32 %v3816_v48, %v3813_v60  ;;  %v11244_v27 = vstv %s11235_s26  ;;  %s11249_s20 = sld [smem:[#allocation38_spill]]  ;;  %s11250_s3 = sld [smem:[#allocation53_spill]] }
 0x3a8   :  { %v3819_v30 = vadd.f32 %v3817_v6, %v3814_v5  ;;  %v3826_v46 = vmul.f32 %v11244_v27, %v9206_v8  ;;  %v11245_v50 = vmov %v11244_v27  ;;  %v11246_v58 = vstv %s11236_s8  ;;  %s11255_s7 = sld [smem:[#allocation36_spill]]  ;;  %s11261_s0 = sld [smem:[#allocation32_spill]] }
 0x3a9   :  { %v3827_v18 = vmul.f32 %v11245_v50, %v9209_v23  ;;  %v3834_v35 = vmul.f32 %v11246_v58, %v9154_v28  ;;  %v11247_v25 = vmov %v11246_v58  ;;  %v3823_v22 = vadd.f32 %v3821_v32, %v3818_v52  ;;  %s11258_s5 = sld [smem:[#allocation60_spill]]  ;;  %s11266_s12 = sld [smem:[#allocation39_spill]] }
 0x3aa   :  { %v3835_v44 = vmul.f32 %v11247_v25, %v9157_v20  ;;  %v3824_v36 = vadd.f32 %v3822_v10, %v3819_v30  ;;  %v9279_v16 = vstv %s3993_s2  ;;  %v9281_v40 = vstv %s3997_s14  ;;  %s11267_s16 = sld [smem:[#allocation22_spill]]  ;;  %s11288_s29 = sld [smem:[#allocation57_spill]] }
 0x3ab   :  { %v11251_v34 = vstv %s11241_s22  ;;  %v11253_v57 = vstv %s11242_s30  ;;  %v3828_v3 = vadd.f32 %v3826_v46, %v3823_v22  ;;  %v11256_v7 = vstv %s11243_s28  ;;  %s9449_s26 = sld [smem:[#allocation6 + $0x184]]  ;;  %s9451_s2 = sld [smem:[#allocation6 + $0x185]] }
 0x3ac   :  { %v3837_v2 = vmul.f32 %v11251_v34, %v9167_v37  ;;  %v11252_v21 = vmov %v11251_v34  ;;  %v3842_v1 = vmul.f32 %v11253_v57, %v9173_v14  ;;  %v11254_v38 = vmov %v11253_v57  ;;  %s9453_s8 = sld [smem:[#allocation6 + $0x186]]  ;;  %s9455_s14 = sld [smem:[#allocation6 + $0x187]] }
 0x3ad   :  { %v3838_v26 = vmul.f32 %v11252_v21, %v9170_v17  ;;  %v3843_v12 = vmul.f32 %v11254_v38, %v9176_v63  ;;  %v3829_v0 = vadd.f32 %v3827_v18, %v3824_v36  ;;  %v3847_v9 = vmul.f32 %v11256_v7, %v9206_v8  ;;  %s9457_s22 = sld [smem:[#allocation6 + $0x188]]  ;;  %s9459_s30 = sld [smem:[#allocation6 + $0x189]] }
 0x3ae   :  { %v11257_v56 = vmov %v11256_v7  ;;  %v3839_v31 = vadd.f32 %v3837_v2, %v3834_v35  ;;  %v11259_v47 = vstv %s11248_s4  ;;  %v11262_v45 = vstv %s11249_s20  ;;  %s9461_s28 = sld [smem:[#allocation6 + $0x18a]]  ;;  %s9463_s4 = sld [smem:[#allocation6 + $0x18b]] }
 0x3af   :  { %v3848_v60 = vmul.f32 %v11257_v56, %v9209_v23  ;;  %v3840_v5 = vadd.f32 %v3838_v26, %v3835_v44  ;;  %v3855_v19 = vmul.f32 %v11259_v47, %v9154_v28  ;;  %v11260_v53 = vmov %v11259_v47  ;;  %s9465_s20 = sld [smem:[#allocation6 + $0x18c]]  ;;  %s9479_s6 = sld [smem:[#allocation6 + $0x198]] }
 0x3b0   :  { %v3856_v48 = vmul.f32 %v11260_v53, %v9157_v20  ;;  %v3789_v6 = vadd.f32 %v11262_v45, %v3786_v59  ;;  %v11263_v49 = vmov %v11262_v45  ;;  %v11264_v61 = vstv %s11250_s3  ;;  %s9467_s3 = sld [smem:[#allocation6 + $0x190]]  ;;  %s9481_s19 = sld [smem:[#allocation6 + $0x195]] }
 0x3b1   :  { %v3790_v32 = vadd.f32 %v11263_v49, %v3787_v29  ;;  %v3858_v10 = vmul.f32 %v11264_v61, %v9167_v37  ;;  %v11265_v52 = vmov %v11264_v61  ;;  %v3844_v27 = vadd.f32 %v3842_v1, %v3839_v31  ;;  %s9483_s15 = sld [smem:[#allocation6 + $0x199]]  ;;  %s9487_s10 = sld [smem:[#allocation6 + $0x196]] }
 0x3b2   :  { %v3859_v30 = vmul.f32 %v11265_v52, %v9170_v17  ;;  %v3845_v46 = vadd.f32 %v3843_v12, %v3840_v5  ;;  %v11268_v50 = vstv %s11255_s7  ;;  %v11271_v25 = vstv %s11258_s5  ;;  %s9469_s7 = sld [smem:[#allocation6 + $0x18d]]  ;;  %s9471_s5 = sld [smem:[#allocation6 + $0x191]] }
 0x3b3   :  { %v3863_v18 = vmul.f32 %v11268_v50, %v9173_v14  ;;  %v11269_v58 = vmov %v11268_v50  ;;  %v3860_v29 = vadd.f32 %v3858_v10, %v3855_v19  ;;  %v3868_v44 = vmul.f32 %v11271_v25, %v9206_v8  ;;  %s9489_s21 = sld [smem:[#allocation6 + $0x193]]  ;;  %s9491_s25 = sld [smem:[#allocation6 + $0x19a]] }
 0x3b4   :  { %v3864_v59 = vmul.f32 %v11269_v58, %v9176_v63  ;;  %v3861_v35 = vadd.f32 %v3859_v30, %v3856_v48  ;;  %v11272_v22 = vmov %v11271_v25  ;;  %v3849_v34 = vadd.f32 %v3847_v9, %v3844_v27  ;;  %11294 = sst [smem:[#allocation69_spill]] %s9463_s4  ;;  %s9501_s23 = sld [smem:[#allocation6 + $0x197]] }
 0x3b5   :  { %v3869_v36 = vmul.f32 %v11272_v22, %v9209_v23  ;;  %v3850_v2 = vadd.f32 %v3848_v60, %v3845_v46  ;;  %v11274_v21 = vstv %s11261_s0  ;;  %v3865_v38 = vadd.f32 %v3863_v18, %v3860_v29  ;;  %s9473_s0 = sld [smem:[#allocation6 + $0x18e]]  ;;  %11300 = sst [smem:[#allocation80_spill]] %s9479_s6 }
 0x3b6   :  { %v3876_v26 = vmul.f32 %v11274_v21, %v9154_v28  ;;  %v11275_v57 = vmov %v11274_v21  ;;  %v3866_v12 = vadd.f32 %v3864_v59, %v3861_v35  ;;  %v11278_v7 = vstv %s11266_s12  ;;  %11295 = sst [smem:[#allocation73_spill]] %s9467_s3  ;;  %s9475_s12 = sld [smem:[#allocation6 + $0x18f]] }
 0x3b7   :  { %v3877_v1 = vmul.f32 %v11275_v57, %v9157_v20  ;;  %v3879_v56 = vmul.f32 %v11278_v7, %v9167_v37  ;;  %v11279_v9 = vmov %v11278_v7  ;;  %v11280_v60 = vstv %s11267_s16  ;;  %s9477_s16 = sld [smem:[#allocation6 + $0x194]]  ;;  %11301 = sst [smem:[#allocation94_spill]] %s9481_s19 }
 0x3b8   :  { %v3880_v31 = vmul.f32 %v11279_v9, %v9170_v17  ;;  %v3810_v5 = vadd.f32 %v11280_v60, %v3807_v55  ;;  %v11281_v47 = vmov %v11280_v60  ;;  %v3884_v53 = vmul.f32 %v3883_v51, %v9173_v14  ;;  %11296 = sst [smem:[#allocation76_spill]] %s9471_s5  ;;  %s9509_s1 = sld [smem:[#allocation6 + $0x19c]] }
 0x3b9   :  { %v3811_v19 = vadd.f32 %v11281_v47, %v3808_v43  ;;  %v3885_v48 = vmul.f32 %v3883_v51, %v9176_v63  ;;  %v9351_v45 = vadd.f32 %v3868_v44, %v3865_v38  ;;  %v9353_v49 = vadd.f32 %v3869_v36, %v3866_v12  ;;  %11302 = sst [smem:[#allocation81_spill]] %s9483_s15  ;;  %s9511_s27 = sld [smem:[#allocation6 + $0x1a6]] }
 0x3ba   :  { %v3881_v61 = vadd.f32 %v3879_v56, %v3876_v26  ;;  %v3882_v10 = vadd.f32 %v3880_v31, %v3877_v1  ;;  %v3889_v55 = vmul.f32 %v3888_v11, %v9206_v8  ;;  %v3890_v43 = vmul.f32 %v3888_v11, %v9209_v23  ;;  %11304 = sst [smem:[#allocation91_spill]] %s9487_s10  ;;  %s9521_s17 = sld [smem:[#allocation6 + $0x1b0]] }
 0x3bb   :  { %v3897_v52 = vmul.f32 %v3896_v39, %v9154_v28  ;;  %v3898_v51 = vmul.f32 %v3896_v39, %v9157_v20  ;;  %v11286_v30 = vstv %s11277_s13  ;;  %v3900_v11 = vmul.f32 %v3899_v33, %v9167_v37  ;;  %11297 = sst [smem:[#allocation77_spill]] %s9473_s0  ;;  %s9485_s13 = sld [smem:[#allocation6 + $0x192]] }
 0x3bc   :  { %v3831_v27 = vadd.f32 %v11286_v30, %v3828_v3  ;;  %v11287_v46 = vmov %v11286_v30  ;;  %v3886_v18 = vadd.f32 %v3884_v53, %v3881_v61  ;;  %v3887_v58 = vadd.f32 %v3885_v48, %v3882_v10  ;;  %11298 = sst [smem:[#allocation86_spill]] %s9475_s12 }
 0x3bd   :  { %v3832_v50 = vadd.f32 %v11287_v46, %v3829_v0  ;;  %v3901_v59 = vmul.f32 %v3899_v33, %v9170_v17  ;;  %v3905_v39 = vmul.f32 %v3904_v13, %v9173_v14  ;;  %v3906_v3 = vmul.f32 %v3904_v13, %v9176_v63  ;;  %11299 = sst [smem:[#allocation90_spill]] %s9477_s16 }
 0x3be   :  { %v9383_v0 = vadd.f32 %v3889_v55, %v3886_v18  ;;  %v9385_v29 = vadd.f32 %v3890_v43, %v3887_v58  ;;  %v3910_v35 = vmul.f32 %v3909_v4, %v9206_v8  ;;  %v3911_v25 = vmul.f32 %v3909_v4, %v9209_v23  ;;  %11305 = sst [smem:[#allocation98_spill]] %s9489_s21 }
 0x3bf   :  { %v3902_v33 = vadd.f32 %v3900_v11, %v3897_v52  ;;  %v3903_v44 = vadd.f32 %v3901_v59, %v3898_v51  ;;  %v3918_v22 = vmul.f32 %v3917_v24, %v9154_v28  ;;  %v3919_v13 = vmul.f32 %v3917_v24, %v9157_v20  ;;  %11306 = sst [smem:[#allocation95_spill]] %s9491_s25 }
 0x3c0   :  { %v11292_v36 = vstv %s11288_s29  ;;  %v3921_v1 = vmul.f32 %v3920_v15, %v9167_v37  ;;  %v3922_v38 = vmul.f32 %v3920_v15, %v9170_v17  ;;  %v3926_v7 = vmul.f32 %v3925_v42, %v9173_v14  ;;  %11307 = sst [smem:[#allocation82_spill]] %s9501_s23  ;;  %s9503_s29 = sld [smem:[#allocation6 + $0x19b]] }
 0x3c1   :  { %v3852_v21 = vadd.f32 %v11292_v36, %v3849_v34  ;;  %v11293_v26 = vmov %v11292_v36  ;;  %v3907_v4 = vadd.f32 %v3905_v39, %v3902_v33  ;;  %v3908_v12 = vadd.f32 %v3906_v3, %v3903_v44  ;;  %11303 = sst [smem:[#allocation87_spill]] %s9485_s13 }
 0x3c2   :  { %v3853_v57 = vadd.f32 %v11293_v26, %v3850_v2  ;;  %v3927_v28 = vmul.f32 %v3925_v42, %v9176_v63  ;;  %v3923_v56 = vadd.f32 %v3921_v1, %v3918_v22  ;;  %v3924_v24 = vadd.f32 %v3922_v38, %v3919_v13  ;;  %11309 = sst [smem:[#allocation99_spill]] %s9509_s1 }
 0x3c3   :  { %v3931_v20 = vmul.f32 %v3930_v41, %v9206_v8  ;;  %v3932_v34 = vmul.f32 %v3930_v41, %v9209_v23  ;;  %v9421_v37 = vadd.f32 %v3910_v35, %v3907_v4  ;;  %v9423_v2 = vadd.f32 %v3911_v25, %v3908_v12  ;;  %11310 = sst [smem:[#allocation83_spill]] %s9511_s27 }
 0x3c4   :  { %v3940_v15 = vmul.f32 %v9263_v62, %v3789_v6  ;;  %v3941_v17 = vmul.f32 %v9263_v62, %v3790_v32  ;;  %v3928_v14 = vadd.f32 %v3926_v7, %v3923_v56  ;;  %v3929_v9 = vadd.f32 %v3927_v28, %v3924_v24  ;;  %11311 = sst [smem:[#allocation84_spill]] %s9521_s17 }
 0x3c5   :  { %v3944_v42 = vmul.f32 %v9265_v54, %v3810_v5  ;;  %v3945_v63 = vmul.f32 %v9265_v54, %v3811_v19  ;;  %v3995_v31 = vmul.f32 %v9279_v16, %v3831_v27  ;;  %v3996_v8 = vmul.f32 %v9279_v16, %v3832_v50 }
 0x3c6   :  { %v9431_v60 = vadd.f32 %v3931_v20, %v3928_v14  ;;  %v9433_v41 = vadd.f32 %v3932_v34, %v3929_v9  ;;  %v3999_v6 = vmul.f32 %v9281_v40, %v3852_v21  ;;  %v4000_v62 = vmul.f32 %v9281_v40, %v3853_v57  ;;  %11308 = sst [smem:[#allocation63_spill]] %s9503_s29 }
 0x3c7   :  { %v3946_v23 = vadd.f32 %v3944_v42, %v3940_v15  ;;  %v3947_v47 = vadd.f32 %v3945_v63, %v3941_v17  ;;  %v3872_v20 = vstv %s9449_s26  ;;  %v3893_v34 = vstv %s9451_s2  ;;  %s9523_s26 = sld [smem:[#allocation6 + $0x1ba]]  ;;  %s9529_s2 = sld [smem:[#allocation6 + $0x19d]] }
 0x3c8   :  { %v4001_v53 = vadd.f32 %v3999_v6, %v3995_v31  ;;  %v4002_v48 = vadd.f32 %v4000_v62, %v3996_v8  ;;  %v3914_v15 = vstv %s9453_s8  ;;  %v3935_v17 = vstv %s9455_s14  ;;  %s9531_s8 = sld [smem:[#allocation6 + $0x1c4]]  ;;  %s9537_s14 = sld [smem:[#allocation6 + $0x1a7]] }
 0x3c9   :  { %v3948_v32 = vmax.f32 %v3946_v23, %v3947_v47  ;;  %v3980_v14 = vstv %s9160_s11  ;;  %v3991_v9 = vstv %s9185_s9  ;;  %v4035_v42 = vstv %s9212_s18  ;;  %s9645_s11 = sld [smem:[#allocation6 + $0x1ad]]  ;;  %s9647_s9 = sld [smem:[#allocation6 + $0x1ca]] }
 0x3ca   :  { %v4003_v61 = vmax.f32 %v4001_v53, %v4002_v48  ;;  %v4048_v63 = vstv %s9457_s22  ;;  %v4046_v31 = vstv %s9215_s24  ;;  %v4050_v8 = vstv %s9465_s20  ;;  %s9677_s20 = sld [smem:[#allocation6 + $0x1c1]]  ;;  %s9687_s18 = sld [smem:[#allocation6 + $0x1ae]] }
 0x3cb   :  { %v3949_v5 = vrot.slane %v3948_v32, 4  ;;  %v3873_v6 = vadd.f32 %v3872_v20, %v9351_v45  ;;  %v3874_v62 = vadd.f32 %v3872_v20, %v9353_v49  ;;  %v3936_v45 = vadd.f32 %v3935_v17, %v9431_v60 }
 0x3cc   :  { %v4004_v19 = vrot.slane %v4003_v61, 4  ;;  %v3937_v49 = vadd.f32 %v3935_v17, %v9433_v41 }
 0x3cd   :  { %v3950_v54 = vmax.f32 %v3948_v32, %v3949_v5  ;;  %v4063_v32 = vstv %s9469_s7  ;;  %v3895_v5 = vadd.f32 %v3893_v34, %v9385_v29  ;;  %11312 = sst [smem:[#allocation88_spill]] %s9523_s26  ;;  %v4069_v29 = vstv %s9481_s19  ;;  %s9555_s19 = sld [smem:[#allocation6 + $0x1a8]] }
 0x3ce   :  { %v4005_v55 = vmax.f32 %v4003_v61, %v4004_v19  ;;  %v3915_v61 = vadd.f32 %v3914_v15, %v9421_v37  ;;  %v4056_v19 = vstv %s9477_s16  ;;  %11313 = sst [smem:[#allocation92_spill]] %s9529_s2  ;;  %v4072_v37 = vstv %s9483_s15  ;;  %s9547_s16 = sld [smem:[#allocation6 + $0x1c5]] }
 0x3cf   :  { %v3951_v10 = vrot.slane %v3950_v54, 2  ;;  %11314 = sst [smem:[#allocation85_spill]] %s9531_s8  ;;  %s9553_s15 = sld [smem:[#allocation6 + $0x19e]]  ;;  %v4123_v20 = vstv %s9537_s14 }
 0x3d0   :  { %v4006_v43 = vrot.slane %v4005_v55, 2  ;;  %11315 = sst [smem:[#allocation102_spill]] %s9537_s14  ;;  %s9721_s7 = sld [smem:[#allocation6 + $0x1c3]] }
 0x3d1   :  { %v3952_v16 = vmax.f32 %v3950_v54, %v3951_v10  ;;  %v3916_v54 = vadd.f32 %v3914_v15, %v9423_v2  ;;  %v4059_v10 = vstv %s9479_s6  ;;  %v4074_v2 = vstv %s9461_s28  ;;  %s9545_s6 = sld [smem:[#allocation6 + $0x1bb]]  ;;  %s9607_s14 = sld [smem:[#allocation6 + $0x1c9]] }
 0x3d2   :  { %v4007_v51 = vmax.f32 %v4005_v55, %v4006_v43  ;;  %v4076_v55 = vstv %s9473_s0  ;;  %v4082_v43 = vstv %s9487_s10  ;;  %s9557_s10 = sld [smem:[#allocation6 + $0x1b2]]  ;;  %s9589_s0 = sld [smem:[#allocation6 + $0x1be]] }
 0x3d3   :  { %v3953_v52 = vrot.slane %v3952_v16, 1  ;;  %11334 = sst [smem:[#allocation47_spill]] %s9647_s9  ;;  %s9689_s28 = sld [smem:[#allocation6 + $0x1b8]] }
 0x3d4   :  { %v4008_v27 = vrot.slane %v4007_v51, 1  ;;  %11317 = sst [smem:[#allocation100_spill]] %s9547_s16 }
 0x3d5   :  { %v3954_v30 = vmax.f32 %v3952_v16, %v3953_v52  ;;  %v4079_v16 = vstv %s9485_s13  ;;  %v4085_v52 = vstv %s9491_s25  ;;  %s9559_s13 = sld [smem:[#allocation6 + $0x1bc]]  ;;  %s9565_s25 = sld [smem:[#allocation6 + $0x19f]] }
 0x3d6   :  { %v4009_v18 = vmax.f32 %v4007_v51, %v4008_v27  ;;  %v4087_v51 = vstv %s9463_s4  ;;  %v4092_v27 = vstv %s9489_s21  ;;  %s9567_s21 = sld [smem:[#allocation6 + $0x1c6]]  ;;  %s9587_s4 = sld [smem:[#allocation6 + $0x1b4]] }
 0x3d7   :  { %v3955_v46 = vsub.f32 %v3946_v23, %v3954_v30  ;;  %v3956_v50 = vsub.f32 %v3947_v47, %v3954_v30  ;;  %v4053_v23 = vstv %s9467_s3  ;;  %v4061_v47 = vstv %s9459_s30  ;;  %s9571_s3 = sld [smem:[#allocation6 + $0x1a9]]  ;;  %11331 = sst [smem:[#allocation40_spill]] %s9607_s14 }
 0x3d8   :  { %v4010_v11 = vsub.f32 %v4001_v53, %v4009_v18  ;;  %v4011_v59 = vsub.f32 %v4002_v48, %v4009_v18  ;;  %v4066_v53 = vstv %s9471_s5  ;;  %v3894_v48 = vadd.f32 %v3893_v34, %v9383_v0  ;;  %s9539_s5 = sld [smem:[#allocation6 + $0x1b1]]  ;;  %11325 = sst [smem:[#allocation64_spill]] %s9589_s0 }
 0x3d9   :  { %v3957_v58 = vmul.f32 1.442695, %v3955_v46  ;;  %v3959_v40 = vmul.f32 1.442695, %v3956_v50  ;;  %v4089_v30 = vstv %s9475_s12  ;;  %s9573_s12 = sld [smem:[#allocation6 + $0x1b3]]  ;;  %s9719_s30 = sld [smem:[#allocation6 + $0x1b9]] }
 0x3da   :  { %v4012_v39 = vmul.f32 1.442695, %v4010_v11  ;;  %v4014_v3 = vmul.f32 1.442695, %v4011_v59 }
 0x3db   :  { %4913 = vpow2.f32 %v3957_v58 }
 0x3dc   :  { %4915 = vpow2.f32 %v3959_v40  ;;  %11318 = sst [smem:[#allocation89_spill]] %s9567_s21 }
 0x3dd   :  { %4917 = vpow2.f32 %v4012_v39  ;;  %v4095_v39 = vstv %s9501_s23  ;;  %s9577_s23 = sld [smem:[#allocation6 + $0x1c7]]  ;;  %11324 = sst [smem:[#allocation65_spill]] %s9587_s4 }
 0x3de   :  { %4919 = vpow2.f32 %v4014_v3  ;;  %11316 = sst [smem:[#allocation96_spill]] %s9539_s5  ;;  %v4098_v3 = vstv %s9503_s29  ;;  %s9575_s29 = sld [smem:[#allocation6 + $0x1bd]]  ;;  %v4126_v34 = vstv %s9539_s5 }
 0x3df   :  { %11319 = sst [smem:[#allocation103_spill]] %s9573_s12  ;;  %s9605_s5 = sld [smem:[#allocation6 + $0x1bf]] }
 0x3e3   :  { %11321 = sst [smem:[#allocation97_spill]] %s9577_s23 }
 0x3e4   :  { %11320 = sst [smem:[#allocation93_spill]] %s9575_s29 }
 0x3e5   :  { %v9437_v35 = vpop.eup %4913  ;;  %11330 = sst [smem:[#allocation11_spill]] %s9605_s5 }
 0x3e6   :  { %v9439_v25 = vpop.eup %4915 }
 0x3e7   :  { %v3961_v33 = vadd.f32 %v9439_v25, %v9437_v35  ;;  %v9443_v44 = vpop.eup %4917 }
 0x3e8   :  { %v9445_v22 = vpop.eup %4919 }
 0x3e9   :  { %v3962_v13 = vrot.slane %v3961_v33, 4  ;;  %v4016_v36 = vadd.f32 %v9445_v22, %v9443_v44 }
 0x3eb   :  { %v3963_v21 = vadd.f32 %v3962_v13, %v3961_v33  ;;  %v4017_v26 = vrot.slane %v4016_v36, 4  ;;  %v4108_v33 = vstv %s9509_s1  ;;  %v4110_v13 = vstv %s9511_s27  ;;  %s9581_s27 = sld [smem:[#allocation6 + $0x1a0]]  ;;  %s9583_s1 = sld [smem:[#allocation6 + $0x1aa]] }
 0x3ed   :  { %v3964_v57 = vrot.slane %v3963_v21, 2  ;;  %v4018_v1 = vadd.f32 %v4017_v26, %v4016_v36 }
 0x3ef   :  { %v3965_v38 = vadd.f32 %v3964_v57, %v3963_v21  ;;  %v4019_v4 = vrot.slane %v4018_v1, 2 }
 0x3f1   :  { %v3966_v12 = vrot.slane %v3965_v38, 1  ;;  %v4020_v7 = vadd.f32 %v4019_v4, %v4018_v1  ;;  %v4113_v1 = vstv %s9521_s17  ;;  %11322 = sst [smem:[#allocation101_spill]] %s9581_s27 }
 0x3f2   :  { %11323 = sst [smem:[#allocation104_spill]] %s9583_s1  ;;  %s9595_s17 = sld [smem:[#allocation6 + $0x1c8]] }
 0x3f3   :  { %v3967_v28 = vadd.f32 %v3966_v12, %v3965_v38  ;;  %v4021_v56 = vrot.slane %v4020_v7, 1  ;;  %v4116_v38 = vstv %s9523_s26  ;;  %s9593_s26 = sld [smem:[#allocation6 + $0x1a1]] }
 0x3f5   :  { %4921 = vrcp.f32 %v3967_v28  ;;  %v4022_v24 = vadd.f32 %v4021_v56, %v4020_v7  ;;  %v4119_v7 = vstv %s9531_s8  ;;  %v4121_v28 = vstv %s9529_s2  ;;  %s9599_s8 = sld [smem:[#allocation6 + $0x1ab]]  ;;  %s9601_s2 = sld [smem:[#allocation6 + $0x1b5]] }
 0x3f7   :  { %4923 = vrcp.f32 %v4022_v24 }
 0x3f8   :  { %11327 = sst [smem:[#allocation66_spill]] %s9595_s17 }
 0x3f9   :  { %11326 = sst [smem:[#allocation58_spill]] %s9593_s26 }
 0x3fb   :  { %11328 = sst [smem:[#allocation33_spill]] %s9599_s8 }
 0x3fc   :  { %11329 = sst [smem:[#allocation26_spill]] %s9601_s2 }
 0x3ff   :  { %v4922_v0 = vpop.eup %4921 }
 0x400   :  { %v3969_v60 = vmul.f32 %v4922_v0, %v9437_v35  ;;  %v3970_v41 = vmul.f32 %v4922_v0, %v9439_v25  ;;  %v4139_v0 = vstv %s9557_s10 }
 0x401   :  { %v4924_v46 = vpop.eup %4923 }
 0x402   :  { %v3971_v50 = vmul.f32 %v3969_v60, %v3873_v6  ;;  %v3972_v18 = vmul.f32 %v3970_v41, %v3874_v62  ;;  %v3982_v58 = vmul.f32 %v3969_v60, %v3894_v48  ;;  %v3983_v40 = vmul.f32 %v3970_v41, %v3895_v5 }
 0x403   :  { %v4024_v11 = vmul.f32 %v4924_v46, %v9443_v44  ;;  %v4025_v59 = vmul.f32 %v4924_v46, %v9445_v22  ;;  %v4129_v6 = vstv %s9545_s6  ;;  %v4132_v62 = vstv %s9547_s16  ;;  %s9627_s16 = sld [smem:[#allocation6 + $0x1b6]] }
 0x404   :  { %v3973_v35 = vadd.f32 %v3972_v18, %v3971_v50  ;;  %v3984_v25 = vadd.f32 %v3983_v40, %v3982_v58  ;;  %v4142_v60 = vstv %s9559_s13  ;;  %v4145_v50 = vstv %s9567_s21  ;;  %s9621_s21 = sld [smem:[#allocation6 + $0x1a2]] }
 0x405   :  { %v4026_v44 = vmul.f32 %v4024_v11, %v3915_v61  ;;  %v4027_v22 = vmul.f32 %v4025_v59, %v3916_v54  ;;  %v4037_v36 = vmul.f32 %v4024_v11, %v3936_v45  ;;  %v4038_v21 = vmul.f32 %v4025_v59, %v3937_v49 }
 0x406   :  { %v3974_v26 = vrot.slane %v3973_v35, 4  ;;  %v3985_v57 = vrot.slane %v3984_v25, 4  ;;  %v4134_v61 = vstv %s9553_s15  ;;  %v4136_v54 = vstv %s9555_s19 }
 0x407   :  { %v4028_v4 = vadd.f32 %v4027_v22, %v4026_v44  ;;  %v4039_v12 = vadd.f32 %v4038_v21, %v4037_v36  ;;  %v4147_v18 = vstv %s9565_s25  ;;  %v4149_v11 = vstv %s9571_s3 }
 0x408   :  { %v3975_v56 = vadd.f32 %v3974_v26, %v3973_v35  ;;  %v3986_v24 = vadd.f32 %v3985_v57, %v3984_v25  ;;  %v4152_v59 = vstv %s9573_s12  ;;  %v4155_v44 = vstv %s9575_s29  ;;  %s9679_s29 = sld [smem:[#allocation6 + $0x1cb]] }
 0x409   :  { %v4029_v15 = vrot.slane %v4028_v4, 4  ;;  %v4040_v17 = vrot.slane %v4039_v12, 4  ;;  %v4158_v22 = vstv %s9577_s23  ;;  %v4160_v26 = vstv %s9581_s27  ;;  %s9625_s23 = sld [smem:[#allocation6 + $0x1ac]]  ;;  %s9663_s27 = sld [smem:[#allocation6 + $0x1b7]] }
 0x40a   :  { %v3976_v48 = vrot.slane %v3975_v56, 2  ;;  %v3987_v5 = vrot.slane %v3986_v24, 2  ;;  %v4162_v57 = vstv %s9583_s1  ;;  %s9710_s1 = sld [smem:[#allocation6 + $0x1a5]] }
 0x40b   :  { %v4030_v45 = vadd.f32 %v4029_v15, %v4028_v4  ;;  %v4041_v49 = vadd.f32 %v4040_v17, %v4039_v12 }
 0x40c   :  { %v3977_v41 = vadd.f32 %v3976_v48, %v3975_v56  ;;  %v3988_v46 = vadd.f32 %v3987_v5, %v3986_v24  ;;  %v4165_v56 = vstv %s9587_s4  ;;  %v4168_v24 = vstv %s9589_s0  ;;  %s9701_s4 = sld [smem:[#allocation6 + $0x1c2]] }
 0x40d   :  { %v4031_v58 = vrot.slane %v4030_v45, 2  ;;  %v4042_v40 = vrot.slane %v4041_v49, 2  ;;  %v4171_v48 = vstv %s9595_s17  ;;  %v4173_v5 = vstv %s9593_s26  ;;  %s9639_s17 = sld [smem:[#allocation6 + $0x1a3]]  ;;  %s9641_s26 = sld [smem:[#allocation6 + $0x1c0]] }
 0x40e   :  { %v3978_v35 = vrot.slane %v3977_v41, 1  ;;  %v3989_v25 = vrot.slane %v3988_v46, 1  ;;  %11343 = sst [smem:[#allocation12_spill]] %s9679_s29 }
 0x40f   :  { %v4032_v36 = vadd.f32 %v4031_v58, %v4030_v45  ;;  %v4043_v21 = vadd.f32 %v4042_v40, %v4041_v49  ;;  %11339 = sst [smem:[#allocation56_spill]] %s9663_s27 }
 0x410   :  { %v3979_v4 = vadd.f32 %v3978_v35, %v3977_v41  ;;  %v3990_v12 = vadd.f32 %v3989_v25, %v3988_v46  ;;  %v4175_v41 = vstv %s9599_s8  ;;  %v4178_v46 = vstv %s9601_s2  ;;  %s9703_s8 = sld [smem:[#allocation6 + $0x1cc]]  ;;  %s9712_s2 = sld [smem:[#allocation6 + $0x1af]] }
 0x411   :  { %v4033_v15 = vrot.slane %v4032_v36, 1  ;;  %v4044_v17 = vrot.slane %v4043_v21, 1  ;;  %v4181_v35 = vstv %s9605_s5  ;;  %v4184_v25 = vstv %s9607_s14  ;;  %s9661_s5 = sld [smem:[#allocation6 + $0x1a4]] }
 0x412   :  { %v9631_v45 = vadd.f32 %v3980_v14, %v3979_v4  ;;  %v9635_v49 = vadd.f32 %v3991_v9, %v3990_v12 }
 0x413   :  { %v4034_v58 = vadd.f32 %v4033_v15, %v4032_v36  ;;  %v4045_v40 = vadd.f32 %v4044_v17, %v4043_v21 }
 0x414   :  { %v4049_v14 = vmul.f32 %v4048_v63, %v9631_v45  ;;  %v4051_v9 = vmul.f32 %v4050_v8, %v9635_v49  ;;  %v4062_v4 = vmul.f32 %v4061_v47, %v9631_v45  ;;  %v4064_v36 = vmul.f32 %v4063_v32, %v9635_v49 }
 0x415   :  { %v4036_v21 = vadd.f32 %v4035_v42, %v4034_v58  ;;  %v9669_v63 = vadd.f32 %v4046_v31, %v4045_v40  ;;  %v4075_v8 = vmul.f32 %v4074_v2, %v9631_v45  ;;  %v4077_v47 = vmul.f32 %v4076_v55, %v9635_v49 }
 0x416   :  { %v4052_v32 = vadd.f32 %v4051_v9, %v4049_v14  ;;  %v4065_v12 = vadd.f32 %v4064_v36, %v4062_v4  ;;  %v4088_v42 = vmul.f32 %v4087_v51, %v9631_v45  ;;  %v4090_v31 = vmul.f32 %v4089_v30, %v9635_v49  ;;  %11346 = sst [smem:[#allocation44_spill]] %s9703_s8 }
 0x417   :  { %v4054_v2 = vmul.f32 %v4053_v23, %v4036_v21  ;;  %v4057_v55 = vmul.f32 %v4056_v19, %v9669_v63  ;;  %v4067_v15 = vmul.f32 %v4066_v53, %v4036_v21  ;;  %v4070_v17 = vmul.f32 %v4069_v29, %v9669_v63 }
 0x418   :  { %v4078_v51 = vadd.f32 %v4077_v47, %v4075_v8  ;;  %v4080_v30 = vmul.f32 %v4079_v16, %v4036_v21  ;;  %v4083_v23 = vmul.f32 %v4082_v43, %v9669_v63  ;;  %v4091_v58 = vadd.f32 %v4090_v31, %v4088_v42 }
 0x419   :  { %v4055_v53 = vadd.f32 %v4054_v2, %v4052_v32  ;;  %v4068_v19 = vadd.f32 %v4067_v15, %v4065_v12  ;;  %v4093_v29 = vmul.f32 %v4092_v27, %v4036_v21  ;;  %v4096_v16 = vmul.f32 %v4095_v39, %v9669_v63 }
 0x41a   :  { %v4081_v43 = vadd.f32 %v4080_v30, %v4078_v51  ;;  %v4186_v40 = vstv %s9621_s21  ;;  %v4188_v14 = vstv %s9625_s23  ;;  %v4191_v9 = vstv %s9627_s16  ;;  %s9859_s23 = sld [smem:[#allocation6 + $0x1cd]] }
 0x41b   :  { %v4058_v4 = vadd.f32 %v4057_v55, %v4055_v53  ;;  %v4071_v27 = vadd.f32 %v4070_v17, %v4068_v19  ;;  %v4094_v36 = vadd.f32 %v4093_v29, %v4091_v58  ;;  %v4194_v8 = vstv %s9641_s26  ;;  %s4994_s26 = smov [#allocation7]  }
 0x41c   :  { %v4084_v39 = vadd.f32 %v4083_v23, %v4081_v43  ;;  %v4197_v47 = vstv %s9647_s9  ;;  %v4199_v32 = vstv %s9639_s17  ;;  %v4201_v12 = vstv %s9645_s11  ;;  %s4257_s11 = sshll.u32 %s4994_s26, 4  ;;  %s4258_s11 = int_to_ptr.vmem [resolvable:$true] %s4257_s11 }
 0x41d   :  { %v4060_v42 = vadd.f32 %v4059_v10, %v4058_v4  ;;  %v4073_v31 = vadd.f32 %v4072_v37, %v4071_v27  ;;  %v4097_v2 = vadd.f32 %v4096_v16, %v4094_v36  ;;  %v4204_v15 = vstv %s9663_s27  ;;  %p4966_p12 = scmp.lt.s32.totalorder %s4258_s11, %s4258_s11 }
 0x41e   :  { %v4086_v55 = vadd.f32 %v4085_v52, %v4084_v39  ;;  %v4207_v17 = vstv %s9677_s20  ;;  %v4210_v51 = vstv %s9679_s29  ;;  %v4212_v30 = vstv %s9661_s5  ;;  %s4961_s20 = scalar_lea.vmem %s4258_s11, 256 }
 0x41f   :  { %v4099_v23 = vadd.f32 %v4098_v3, %v4097_v2  ;;  %v4100_v58 = vmax.f32 %v4060_v42, 0.0  ;;  %v4102_v53 = vmax.f32 %v4073_v31, 0.0  ;;  %v4214_v10 = vstv %s9687_s18  ;;  %p4962_p11 = scmp.ne.s32.totalorder %s4258_s11, %s4961_s20  ;;  %p4967_p13 = scmp.lt.s32.totalorder %s4961_s20, %s4961_s20 }
 0x420   :  { %v4104_v37 = vmax.f32 %v4086_v55, 0.0  ;;  %v4217_v19 = vstv %s9689_s28  ;;  %v4220_v29 = vstv %s9701_s4  ;;  %v4223_v52 = vstv %s9703_s8 }
 0x421   :  { %v9747_v16 = vadd.f32 %v4100_v58, %v9631_v45  ;;  %v9750_v43 = vadd.f32 %v4102_v53, %v9635_v49  ;;  %v4106_v3 = vmax.f32 %v4099_v23, 0.0  ;;  %v4225_v4 = vstv %s9710_s1  ;;  %p4968_p0 = por %p4967_p13, %p4966_p12 }
 0x422   :  { %v9753_v27 = vadd.f32 %v4104_v37, %v4036_v21  ;;  %v4227_v36 = vstv %s9712_s2  ;;  %v4230_v39 = vstv %s9719_s30  ;;  %v4233_v42 = vstv %s9721_s7 }
 0x423   :  { %v9759_v31 = vadd.f32 %v4106_v3, %v9669_v63  ;;  %v4109_v45 = vmul.f32 %v4108_v33, %v9747_v16  ;;  %v4111_v49 = vmul.f32 %v4110_v13, %v9750_v43  ;;  %v4122_v21 = vmul.f32 %v4121_v28, %v9747_v16  ;;  %p4969_p1 = pnand %p4968_p0, %p4962_p11 }
 0x424   :  { %v4114_v2 = vmul.f32 %v4113_v1, %v9753_v27  ;;  %v4124_v55 = vmul.f32 %v4123_v20, %v9750_v43  ;;  %v4127_v63 = vmul.f32 %v4126_v34, %v9753_v27  ;;  %v4135_v33 = vmul.f32 %v4134_v61, %v9747_v16 }
 0x425   :  { %v4112_v13 = vadd.f32 %v4111_v49, %v4109_v45  ;;  %v4117_v28 = vmul.f32 %v4116_v38, %v9759_v31  ;;  %v4130_v23 = vmul.f32 %v4129_v6, %v9759_v31  ;;  %v4137_v1 = vmul.f32 %v4136_v54, %v9750_v43 }
 0x426   :  { %v4125_v20 = vadd.f32 %v4124_v55, %v4122_v21  ;;  %v4140_v34 = vmul.f32 %v4139_v0, %v9753_v27  ;;  %v4143_v58 = vmul.f32 %v4142_v60, %v9759_v31  ;;  %v4148_v61 = vmul.f32 %v4147_v18, %v9747_v16 }
 0x427   :  { %v4115_v38 = vadd.f32 %v4114_v2, %v4112_v13  ;;  %v4138_v53 = vadd.f32 %v4137_v1, %v4135_v33  ;;  %v4150_v6 = vmul.f32 %v4149_v11, %v9750_v43  ;;  %v4153_v54 = vmul.f32 %v4152_v59, %v9753_v27 }
 0x428   :  { %v4128_v37 = vadd.f32 %v4127_v63, %v4125_v20  ;;  %v4156_v0 = vmul.f32 %v4155_v44, %v9759_v31  ;;  %v4161_v60 = vmul.f32 %v4160_v26, %v9747_v16  ;;  %v4163_v18 = vmul.f32 %v4162_v57, %v9750_v43 }
 0x429   :  { %v4118_v3 = vadd.f32 %v4117_v28, %v4115_v38  ;;  %v4141_v45 = vadd.f32 %v4140_v34, %v4138_v53  ;;  %v4151_v11 = vadd.f32 %v4150_v6, %v4148_v61  ;;  %v4166_v59 = vmul.f32 %v4165_v56, %v9753_v27 }
 0x42a   :  { %v4131_v49 = vadd.f32 %v4130_v23, %v4128_v37  ;;  %v4164_v21 = vadd.f32 %v4163_v18, %v4161_v60  ;;  %v4169_v44 = vmul.f32 %v4168_v24, %v9759_v31  ;;  %v4174_v26 = vmul.f32 %v4173_v5, %v9747_v16 }
 0x42b   :  { %v4120_v57 = vadd.f32 %v4119_v7, %v4118_v3  ;;  %v4144_v2 = vadd.f32 %v4143_v58, %v4141_v45  ;;  %v4154_v55 = vadd.f32 %v4153_v54, %v4151_v11  ;;  %v4176_v56 = vmul.f32 %v4175_v41, %v9750_v43 }
 0x42c   :  { %v4133_v63 = vadd.f32 %v4132_v62, %v4131_v49  ;;  %v4167_v33 = vadd.f32 %v4166_v59, %v4164_v21  ;;  %v4179_v24 = vmul.f32 %v4178_v46, %v9753_v27  ;;  %v4182_v5 = vmul.f32 %v4181_v35, %v9759_v31 }
 0x42d   :  { %v4146_v7 = vadd.f32 %v4145_v50, %v4144_v2  ;;  %v4157_v13 = vadd.f32 %v4156_v0, %v4154_v55  ;;  %v4177_v28 = vadd.f32 %v4176_v56, %v4174_v26  ;;  %v4187_v62 = vmul.f32 %v4186_v40, %v9747_v16 }
 0x42e   :  { %v4170_v41 = vadd.f32 %v4169_v44, %v4167_v33  ;;  %v4189_v46 = vmul.f32 %v4188_v14, %v9750_v43  ;;  %v4192_v35 = vmul.f32 %v4191_v9, %v9753_v27  ;;  %v4195_v50 = vmul.f32 %v4194_v8, %v9759_v31 }
 0x42f   :  { %v4159_v23 = vadd.f32 %v4158_v22, %v4157_v13  ;;  %v4180_v1 = vadd.f32 %v4179_v24, %v4177_v28  ;;  %v4200_v40 = vmul.f32 %v4199_v32, %v9747_v16  ;;  %v4202_v20 = vmul.f32 %v4201_v12, %v9750_v43 }
 0x430   :  { %v4172_v14 = vadd.f32 %v4171_v48, %v4170_v41  ;;  %v4190_v9 = vadd.f32 %v4189_v46, %v4187_v62  ;;  %v4205_v8 = vmul.f32 %v4204_v15, %v9753_v27  ;;  %v4208_v22 = vmul.f32 %v4207_v17, %v9759_v31 }
 0x431   :  { %v4183_v34 = vadd.f32 %v4182_v5, %v4180_v1  ;;  %v4203_v58 = vadd.f32 %v4202_v20, %v4200_v40  ;;  %v4213_v32 = vmul.f32 %v4212_v30, %v9747_v16  ;;  %v4215_v12 = vmul.f32 %v4214_v10, %v9750_v43 }
 0x432   :  { %v4193_v61 = vadd.f32 %v4192_v35, %v4190_v9  ;;  %v4218_v48 = vmul.f32 %v4217_v19, %v9753_v27  ;;  %v4221_v15 = vmul.f32 %v4220_v29, %v9759_v31  ;;  %v4226_v38 = vmul.f32 %v4225_v4, %v9747_v16 }
 0x433   :  { %v4185_v17 = vadd.f32 %v4184_v25, %v4183_v34  ;;  %v4206_v53 = vadd.f32 %v4205_v8, %v4203_v58  ;;  %v4216_v6 = vadd.f32 %v4215_v12, %v4213_v32  ;;  %v4228_v30 = vmul.f32 %v4227_v36, %v9750_v43 }
 0x434   :  { %v4196_v10 = vadd.f32 %v4195_v50, %v4193_v61  ;;  %v4231_v54 = vmul.f32 %v4230_v39, %v9753_v27  ;;  %v4234_v19 = vmul.f32 %v4233_v42, %v9759_v31  ;;  %v4238_v29 = vsel %vm1159_vm0, %v4120_v57, %v4133_v63 }
 0x435   :  { %v4209_v16 = vadd.f32 %v4208_v22, %v4206_v53  ;;  %v4219_v4 = vadd.f32 %v4218_v48, %v4216_v6  ;;  %v4229_v25 = vadd.f32 %v4228_v30, %v4226_v38  ;;  %v4239_v37 = vsel %vm1161_vm1, %v4238_v29, %v4146_v7 }
 0x436   :  { %v4198_v0 = vadd.f32 %v4197_v47, %v4196_v10  ;;  %v4240_v43 = vsel %vm1163_vm2, %v4239_v37, %v4159_v23  ;;  %v4236_v31 = vstv %s9859_s23 }
 0x437   :  { %v4211_v36 = vadd.f32 %v4210_v51, %v4209_v16  ;;  %v4222_v27 = vadd.f32 %v4221_v15, %v4219_v4  ;;  %v4232_v39 = vadd.f32 %v4231_v54, %v4229_v25  ;;  %v4242_v42 = vsel %vm4241_vm3, %v4240_v43, %v4172_v14 }
 0x438   :  { %v4244_v60 = vsel %vm4243_vm4, %v4242_v42, %v4185_v17 }
 0x439   :  { %v4224_v18 = vadd.f32 %v4223_v52, %v4222_v27  ;;  %v4235_v3 = vadd.f32 %v4234_v19, %v4232_v39  ;;  %v4246_v45 = vsel %vm4245_vm5, %v4244_v60, %v4198_v0 }
 0x43a   :  { %v4248_v47 = vsel %vm4247_vm6, %v4246_v45, %v4211_v36 }
 0x43b   :  { %v4237_v11 = vadd.f32 %v4236_v31, %v4235_v3  ;;  %4250 = vst [vmem:[#allocation7] sm:$0xff] %v4248_v47 }
 0x43d   :  { %v4249_v59 = vsel %vm1159_vm0, %v4224_v18, %v4237_v11 }
 0x43e   :  { %4251 = vst [vmem:[#allocation7 + $0x8] sm:$0x3] %v4249_v59 }
 0x43f   :  { %4972 = shalt.err (!%p4969_p1)
}
 0x440   :  { %s11378_s4 = sld [smem:[#allocation109_spill]] }
 0x446   :  { %s4973_s1 = scalar_lea.hbm %s11378_s4, 256 }
 0x447   :  { %p4974_p2 = scmp.ne.s32.totalorder %s11378_s4, %s4973_s1  ;;  %p4977_p3 = scmp.lt.u32.totalorder %s4973_s1, %s11378_s4 }
 0x449   :  { %p4979_p4 = pnand %p4977_p3, %p4974_p2 }
 0x44b   :  { %4982 = shalt.err (!%p4979_p4)
}
 0x44c   :  { %s11379_s24 = smov 8   ;;  %s11380_s0 = smov 128  }
 0x44d   :  { %4263 = dma.vmem_to_hbm [thread:$0]  %s4258_s11, 256, %s11378_s4, [#allocation4], %s11380_s0, %s11380_s0, %s11379_s24  }
 0x44e   :  { %4987 = dma.done.wait [#allocation4], 256  }
 0x44f   :  { %4988 = vsyncadd [#allocation4], 4294967040 }
 0x450   :  { %4267 = vsyncpa [#allocation3], 1 }
 0x451   :  { %4268 = vsyncpa [#allocation4], 1 }
 0x452   :  { %4269 = vsyncpa [#allocation5], 1 }

</bundles_post_ra>
